<compile_context>
chip_gen: v6e
topology: v6e:2x2x1
jax: 0.10.0
libtpu: 0.0.40
codegen_flags: <defaults>
</compile_context>

<pallas_src>
import functools

import numpy as np
import jax
import jax.numpy as jnp
from jax.experimental import pallas as pl
from jax.experimental.pallas import tpu as pltpu


STRIDES = (1, 1, 2, 2)                 # per-stage strides of the stand-in backbone
CHANNELS = (8, 16, 32, 64)             # scaled-down (256, 512, 1024, 2048)
CORRELATION_BLOCKS = [b - 2 for b in (3, 4, 5)]      # -> [1, 2, 3]
GCN_K = 7
MATMUL_DTYPE = jnp.bfloat16            # MXU operand dtype (f32 accumulation)


# --------------------------------------------------------------------------
# The fused Pallas kernel: whole search forward, one invocation.
# --------------------------------------------------------------------------
def _siam_forward_kernel(
    xf_ref, xh_ref, xq_ref,
    w0_ref, b0_ref, w1_ref, b1_ref, w2_ref, b2_ref, w3_ref, b3_ref,
    wl1_ref, bl1_ref, wl2_ref, bl2_ref, wr1_ref, br1_ref, wr2_ref, br2_ref,
    gama_ref,
    out0_ref, out1_ref, out2_ref, out3_ref,
    canvas_ref,
    *, B, H, W, K, L0, Rb):
  """Backbone stand-in (4 stages) + block-0 GCN + folded correlation tails.

  xf/xh/xq : (B, 3, HW), (B, 3, HW/4), (B, 3, HW/16) -- full / 1/2 / 1/4 res.
  w*_ref   : (Cout, Cin) bf16 stage weights; b*_ref (Cout, 1) f32 biases.
  w{l,r}*  : (C0, K*C0) bf16 GCN weights, columns ordered [tap, cin].
  gama_ref : (1,) f32 in SMEM.
  out*_ref : (B, Ci, HWi) f32.
  canvas   : (C0, L0 + B*Rb*W + P*W) bf16 scratch, batched H-padded canvas.
  """
  P = (K - 1) // 2
  HW = H * W
  L_f = B * HW                 # full-res lanes (all images)
  L_h = L_f // 4
  L_q = L_f // 16
  QW = B * Rb * W              # lanes of the batched row-padded canvas rows
  CV = canvas_ref.shape[1]
  md = canvas_ref.dtype        # matmul operand dtype

  def fold(x_ref):
    # (B, C, L) -> (C, B*L): batch folded onto the lane axis.
    return jnp.concatenate([x_ref[b] for b in range(B)], axis=-1)

  def pw(h, w_ref, b_ref):
    # Pointwise (1x1) conv + ReLU: bf16 operands, f32 accumulation.
    y = jnp.dot(w_ref[...], h.astype(md),
                preferred_element_type=jnp.float32) + b_ref[...]
    return jnp.maximum(y, 0.0)

  def store(out_ref, slab, l):
    for b in range(B):
      out_ref[b] = slab[:, b * l:(b + 1) * l]

  def shift(v, d):
    # out[:, p] = v[:, p + d]; zeros shifted in at the global boundary.
    if d == 0:
      return v
    c, l = v.shape
    pad = jnp.zeros((c, abs(d)), v.dtype)
    if d > 0:
      return jnp.concatenate([v[:, d:], pad], axis=-1)
    return jnp.concatenate([pad, v[:, :l + d]], axis=-1)

  g = gama_ref[0]
  c1 = out1_ref.shape[1]
  c2 = out2_ref.shape[1]
  c3 = out3_ref.shape[1]

  # ---- backbone: all three resolutions concatenated on lanes -> 4 matmuls --
  xa = jnp.concatenate([fold(xf_ref), fold(xh_ref), fold(xq_ref)], axis=-1)
  a0 = pw(xa, w0_ref, b0_ref)                    # (C0, L_f+L_h+L_q)
  a1 = pw(a0, w1_ref, b1_ref)                    # (C1, L_f+L_h+L_q)

  # block 1/2/3 outputs: correlation tail folds to emb * (1 + gama/C).
  store(out1_ref, a1[:, :L_f] * (1.0 + g / c1), HW)
  a2 = pw(a1[:, L_f:], w2_ref, b2_ref)           # (C2, L_h+L_q)
  store(out2_ref, a2[:, :L_h] * (1.0 + g / c2), HW // 4)
  f3 = pw(a2[:, L_h:], w3_ref, b3_ref)           # (C3, L_q)
  store(out3_ref, f3 * (1.0 + g / c3), HW // 16)

  # ---- block 0: GCN on f0 = stage-0 features (full resolution) ------------
  f0 = a0[:, :L_f]
  C0 = f0.shape[0]

  # 1) batched H-padded canvas: image b's rows occupy canvas rows
  #    [b*Rb + P, b*Rb + P + H); L0/Rb are chosen by the wrapper so that the
  #    two data stores below start on 128-lane boundaries.  Only the pad
  #    margins are zero-filled (no full-buffer memset).
  f0m = f0.astype(md)
  canvas_ref[:, :L0 + P * W] = jnp.zeros((C0, L0 + P * W), md)
  for b in range(B):
    start = L0 + (b * Rb + P) * W
    canvas_ref[:, start:start + HW] = f0m[:, b * HW:(b + 1) * HW]
    gap_end = L0 + ((b + 1) * Rb + P) * W if b + 1 < B else CV
    canvas_ref[:, start + HW:gap_end] = jnp.zeros(
        (C0, gap_end - start - HW), md)

  col = jax.lax.broadcasted_iota(jnp.int32, (1, QW), 1) % W

  # 2) conv_l1 (k,1), H zero-pad: K row-shifted canvas slices, one matmul.
  rhs = jnp.concatenate(
      [canvas_ref[:, L0 + (s - P) * W: L0 + (s - P) * W + QW]
       for s in range(K)], axis=0)
  y_l1 = jnp.dot(wl1_ref[...], rhs,
                 preferred_element_type=jnp.float32) + bl1_ref[...]

  # 3) conv_l2 (1,k), W zero-pad: K lane-shifted taps of y_l1, masked so a
  #    shift never crosses a row boundary (that mask IS the zero padding).
  y_l1m = y_l1.astype(md)
  taps = []
  for t in range(K):
    d = t - P
    valid = ((col + d >= 0) & (col + d < W)).astype(md)
    taps.append(shift(y_l1m, d) * valid)
  y_l2 = jnp.dot(wl2_ref[...], jnp.concatenate(taps, axis=0),
                 preferred_element_type=jnp.float32) + bl2_ref[...]

  # 4) conv_r1 (1,k) valid-in-W on the H-padded canvas.  conv_r2's W padding
  #    is realised by zeroing the first/last P columns of every row (bias
  #    stays on the H-pad rows, zeros on the W-pad columns -- PyTorch exact).
  rhs = jnp.concatenate(
      [canvas_ref[:, L0 + (t - P): L0 + (t - P) + QW] for t in range(K)],
      axis=0)
  vmask = ((col >= P) & (col < W - P)).astype(jnp.float32)
  z = (jnp.dot(wr1_ref[...], rhs,
               preferred_element_type=jnp.float32) + br1_ref[...]) * vmask

  # 5) conv_r2 (k,1) valid-in-H: K row-shifted taps of z (pure lane shifts by
  #    multiples of W; the per-image row padding keeps images from mixing).
  zm = z.astype(md)
  y_r2 = jnp.dot(
      wr2_ref[...],
      jnp.concatenate([shift(zm, (s - P) * W) for s in range(K)], axis=0),
      preferred_element_type=jnp.float32) + br2_ref[...]

  y = y_l2 + y_r2                                 # (C0, QW), rows = canvas rows
  for b in range(B):
    start = (b * Rb + P) * W
    out0_ref[b] = y[:, start:start + HW]


# --------------------------------------------------------------------------
# pallas_call wrapper
# --------------------------------------------------------------------------
def _pallas_forward(params, x1):
  B, cin, H, W = x1.shape
  K = GCN_K
  P = (K - 1) // 2
  assert H % 4 == 0 and W % 4 == 0
  assert W > 2 * P, "GCN right branch needs W > k-1"

  # Canvas geometry for the block-0 GCN: per-image row block Rb and leading
  # pad L0 chosen so every data store into the canvas starts on a 128-lane
  # boundary while every tap slice stays in bounds.
  rows = H + 2 * P
  if 128 % W == 0:
    align = 128 // W
    rb = ((rows + align - 1) // align) * align
  else:
    rb = rows                              # alignment not achievable; still correct
  l0 = ((2 * P * W + 127) // 128) * 128 - P * W
  cv = l0 + B * rb * W + P * W

  HW = H * W
  xf = x1.reshape(B, cin, HW)
  # Pointwise conv + ReLU commute with subsampling, so the stride-2 stages
  # consume pre-subsampled inputs (4x / 16x less matmul work, no in-kernel
  # or inter-kernel strided gathers).
  xh = x1[:, :, ::2, ::2].reshape(B, cin, HW // 4)
  xq = x1[:, :, ::4, ::4].reshape(B, cin, HW // 16)

  md = MATMUL_DTYPE

  def w2d(w):                              # (K, O, Cin) -> (O, K*Cin), bf16
    k, o, c = w.shape
    return jnp.transpose(w, (1, 0, 2)).reshape(o, k * c).astype(md)

  st = params["search"]
  g0 = params["gcn"][0]                    # only block 0's GCN survives

  vmem = pl.BlockSpec(memory_space=pltpu.MemorySpace.VMEM)
  smem = pl.BlockSpec(memory_space=pltpu.MemorySpace.SMEM)

  spatial = (HW, HW, HW // 4, HW // 16)
  out_shape = tuple(
      jax.ShapeDtypeStruct((B, CHANNELS[i], spatial[i]), jnp.float32)
      for i in range(4))

  kernel = functools.partial(_siam_forward_kernel,
                             B=B, H=H, W=W, K=K, L0=l0, Rb=rb)
  outs = pl.pallas_call(
      kernel,
      out_shape=out_shape,
      in_specs=[vmem] * 19 + [smem],
      out_specs=(vmem, vmem, vmem, vmem),
      scratch_shapes=[pltpu.VMEM((CHANNELS[0], cv), md)],
  )(xf, xh, xq,
    st[0]["w"].astype(md), st[0]["b"],
    st[1]["w"].astype(md), st[1]["b"],
    st[2]["w"].astype(md), st[2]["b"],
    st[3]["w"].astype(md), st[3]["b"],
    w2d(g0["wl1"]), g0["bl1"], w2d(g0["wl2"]), g0["bl2"],
    w2d(g0["wr1"]), g0["br1"], w2d(g0["wr2"]), g0["br2"],
    params["gama"])

  return (outs[0].reshape(B, CHANNELS[0], H, W),
          outs[1].reshape(B, CHANNELS[1], H, W),
          outs[2].reshape(B, CHANNELS[2], H // 2, W // 2),
          outs[3].reshape(B, CHANNELS[3], H // 4, W // 4))


def siam_resnet_gcn_forward(params, x1, x2):
  # The template branch (x2) provably cannot affect the outputs: match_map is
  # repeated over C identical channels, so softmax(dim=1) == 1/C exactly and
  # the correlation tail folds to emb * (1 + gama/C).  Per review, the dead
  # template backbone is not traced at all (no reliance on XLA DCE).
  del x2
  return _pallas_forward(params, x1)


# --------------------------------------------------------------------------
# Deterministic parameter init
# --------------------------------------------------------------------------
def _init_params(key):
  keys = iter(jax.random.split(key, 64))

  def nrm(shape, scale):
    return scale * jax.random.normal(next(keys), shape, jnp.float32)

  def backbone():
    stages, cin = [], 3
    for c in CHANNELS:
      stages.append(dict(w=nrm((c, cin), 0.4), b=nrm((c, 1), 0.1)))
      cin = c
    return stages

  def gcn(c):
    return dict(
        wl1=nrm((GCN_K, c, c), 0.05), bl1=nrm((c, 1), 0.02),
        wl2=nrm((GCN_K, c, c), 0.05), bl2=nrm((c, 1), 0.02),
        wr1=nrm((GCN_K, c, c), 0.05), br1=nrm((c, 1), 0.02),
        wr2=nrm((GCN_K, c, c), 0.05), br2=nrm((c, 1), 0.02))

  return dict(
      search=backbone(),
      # Mirrors the module's parameter structure; provably unused (see above).
      template=backbone(),
      gcn=[gcn(c) for c in CHANNELS],     # only gcn[0] survives the forward
      # nn.Parameter(torch.zeros(1)); nonzero so the tail scaling shows up.
      gama=jnp.full((1,), 0.5, jnp.float32),
  )


# --------------------------------------------------------------------------
# Pure-JAX reference of the module forward (same bf16-operand convention)
# --------------------------------------------------------------------------
def _reference_forward(params, x1, x2, key):
  md = MATMUL_DTYPE

  def pw(x, w, b):
    y = jnp.einsum("oc,bchw->bohw", w.astype(md), x.astype(md),
                   preferred_element_type=jnp.float32)
    return jnp.maximum(y + b[:, 0][None, :, None, None], 0.0)

  def conv_h(x, w, b, pad):               # (k,1) conv, H padding
    xp = jnp.pad(x, ((0, 0), (0, 0), (pad, pad), (0, 0)))
    k = w.shape[0]
    ho = xp.shape[2] - k + 1
    out = sum(jnp.einsum("oc,bchw->bohw", w[s].astype(md),
                         xp[:, :, s:s + ho, :].astype(md),
                         preferred_element_type=jnp.float32)
              for s in range(k))
    return out + b[:, 0][None, :, None, None]

  def conv_w(x, w, b, pad):               # (1,k) conv, W padding
    xp = jnp.pad(x, ((0, 0), (0, 0), (0, 0), (pad, pad)))
    k = w.shape[0]
    wo = xp.shape[3] - k + 1
    out = sum(jnp.einsum("oc,bchw->bohw", w[s].astype(md),
                         xp[:, :, :, s:s + wo].astype(md),
                         preferred_element_type=jnp.float32)
              for s in range(k))
    return out + b[:, 0][None, :, None, None]

  def backbone(x, stages):
    feats, h = [], x
    for p, s in zip(stages, STRIDES):
      h = pw(h, p["w"], p["b"])
      if s == 2:
        h = h[:, :, ::2, ::2]
      feats.append(h)
    return feats

  def gcn(x, p):
    pad = (GCN_K - 1) // 2
    xl = conv_h(x, p["wl1"], p["bl1"], pad)
    xl = conv_w(xl, p["wl2"], p["bl2"], pad)
    xr = jnp.pad(x, ((0, 0), (0, 0), (pad, pad), (0, 0)))     # pad H
    xr = conv_w(xr, p["wr1"], p["br1"], 0)                    # (B,C,H+6,W-6)
    xr = jnp.pad(xr, ((0, 0), (0, 0), (0, 0), (pad, pad)))    # pad W
    xr = conv_h(xr, p["wr2"], p["br2"], 0)                    # (B,C,H,W)
    return xl + xr

  del x2  # dead w.r.t. outputs (softmax over repeated identical channels)
  search = backbone(x1, params["search"])

  outs = [gcn(search[0], params["gcn"][0]), None, None, None]
  g = params["gama"].reshape(())
  for cb in CORRELATION_BLOCKS:
    emb = search[cb]
    c = emb.shape[1]
    # The actual match_map values are irrelevant: repeated over C identical
    # channels, softmax(dim=1) is exactly 1/C (BatchNorm2d(1) and the
    # bilinear upsample are likewise no-ops w.r.t. the output).  A random
    # stand-in map demonstrates the equivalence.
    fake = jax.random.normal(jax.random.fold_in(key, cb),
                             (emb.shape[0], 1) + emb.shape[2:], jnp.float32)
    mm = jnp.repeat(fake, c, axis=1)
    outs[cb] = g * jax.nn.softmax(mm, axis=1) * emb + emb
  return tuple(outs)


# --------------------------------------------------------------------------
if __name__ == "__main__":
  key = jax.random.PRNGKey(0)
  kp, k1, k2, km = jax.random.split(key, 4)
  params = _init_params(kp)

  # Small shapes consistent with the module's forward (search > template).
  x1 = jax.random.normal(k1, (2, 3, 32, 32), jnp.float32)   # search region
  x2 = jax.random.normal(k2, (2, 3, 8, 8), jnp.float32)     # reference patch

  forward = jax.jit(siam_resnet_gcn_forward)
  outs = jax.block_until_ready(forward(params, x1, x2))

  assert outs[0].shape == (2, 8, 32, 32)
  assert outs[1].shape == (2, 16, 32, 32)
  assert outs[2].shape == (2, 32, 16, 16)
  assert outs[3].shape == (2, 64, 8, 8)

  # Kernel and reference both use bf16 matmul operands with f32 accumulation,
  # so the check is apples-to-apples: residual differences come only from
  # f32 accumulation order plus occasional 1-ulp bf16 re-rounding of
  # intermediates across the (<=4 matmul deep) cascade -- a few 1e-3 worst
  # case, hence 5e-3 (vs the previous 1e-2 against a default-precision f32
  # einsum).
  refs = _reference_forward(params, x1, x2, km)
  for got, ref in zip(outs, refs):
    np.testing.assert_allclose(np.asarray(got), np.asarray(ref),
                               rtol=5e-3, atol=5e-3)

  print("KERNEL_OK")
</pallas_src>

<mosaic_0001>
module attributes {stable_mosaic.version = 11 : i64} {
  func.func @_siam_forward_kernel(%arg0: memref<2x3x1024xf32, #tpu.memory_space<vmem>>, %arg1: memref<2x3x256xf32, #tpu.memory_space<vmem>>, %arg2: memref<2x3x64xf32, #tpu.memory_space<vmem>>, %arg3: memref<8x3xbf16, #tpu.memory_space<vmem>>, %arg4: memref<8x1xf32, #tpu.memory_space<vmem>>, %arg5: memref<16x8xbf16, #tpu.memory_space<vmem>>, %arg6: memref<16x1xf32, #tpu.memory_space<vmem>>, %arg7: memref<32x16xbf16, #tpu.memory_space<vmem>>, %arg8: memref<32x1xf32, #tpu.memory_space<vmem>>, %arg9: memref<64x32xbf16, #tpu.memory_space<vmem>>, %arg10: memref<64x1xf32, #tpu.memory_space<vmem>>, %arg11: memref<8x56xbf16, #tpu.memory_space<vmem>>, %arg12: memref<8x1xf32, #tpu.memory_space<vmem>>, %arg13: memref<8x56xbf16, #tpu.memory_space<vmem>>, %arg14: memref<8x1xf32, #tpu.memory_space<vmem>>, %arg15: memref<8x56xbf16, #tpu.memory_space<vmem>>, %arg16: memref<8x1xf32, #tpu.memory_space<vmem>>, %arg17: memref<8x56xbf16, #tpu.memory_space<vmem>>, %arg18: memref<8x1xf32, #tpu.memory_space<vmem>>, %arg19: memref<1xf32, #tpu.memory_space<smem>>, %arg20: memref<2x8x1024xf32, #tpu.memory_space<vmem>>, %arg21: memref<2x16x1024xf32, #tpu.memory_space<vmem>>, %arg22: memref<2x32x256xf32, #tpu.memory_space<vmem>>, %arg23: memref<2x64x64xf32, #tpu.memory_space<vmem>>, %arg24: memref<8x2816xbf16, #tpu.memory_space<vmem>>) attributes {dimension_semantics = [], scalar_prefetch = 0 : i64, scratch_operands = 1 : i64, tpu.core_type = #tpu.core_type<tc>} {
    %c0 = arith.constant 0 : index
    %0 = memref.load %arg19[%c0] : memref<1xf32, #tpu.memory_space<smem>>
    %c0_0 = arith.constant 0 : index
    %c0_1 = arith.constant 0 : index
    %c0_2 = arith.constant 0 : index
    %1 = vector.load %arg0[%c0_0, %c0_1, %c0_2] : memref<2x3x1024xf32, #tpu.memory_space<vmem>>, vector<1x3x1024xf32>
    %2 = vector.shape_cast %1 : vector<1x3x1024xf32> to vector<3x1024xf32>
    %c1 = arith.constant 1 : index
    %c0_3 = arith.constant 0 : index
    %c0_4 = arith.constant 0 : index
    %3 = vector.load %arg0[%c1, %c0_3, %c0_4] : memref<2x3x1024xf32, #tpu.memory_space<vmem>>, vector<1x3x1024xf32>
    %4 = vector.shape_cast %3 : vector<1x3x1024xf32> to vector<3x1024xf32>
    %5 = tpu.concatenate %2, %4 in 1 : vector<3x1024xf32>, vector<3x1024xf32> -> vector<3x2048xf32>
    %c0_5 = arith.constant 0 : index
    %c0_6 = arith.constant 0 : index
    %c0_7 = arith.constant 0 : index
    %6 = vector.load %arg1[%c0_5, %c0_6, %c0_7] : memref<2x3x256xf32, #tpu.memory_space<vmem>>, vector<1x3x256xf32>
    %7 = vector.shape_cast %6 : vector<1x3x256xf32> to vector<3x256xf32>
    %c1_8 = arith.constant 1 : index
    %c0_9 = arith.constant 0 : index
    %c0_10 = arith.constant 0 : index
    %8 = vector.load %arg1[%c1_8, %c0_9, %c0_10] : memref<2x3x256xf32, #tpu.memory_space<vmem>>, vector<1x3x256xf32>
    %9 = vector.shape_cast %8 : vector<1x3x256xf32> to vector<3x256xf32>
    %10 = tpu.concatenate %7, %9 in 1 : vector<3x256xf32>, vector<3x256xf32> -> vector<3x512xf32>
    %c0_11 = arith.constant 0 : index
    %c0_12 = arith.constant 0 : index
    %c0_13 = arith.constant 0 : index
    %11 = vector.load %arg2[%c0_11, %c0_12, %c0_13] : memref<2x3x64xf32, #tpu.memory_space<vmem>>, vector<1x3x64xf32>
    %12 = vector.shape_cast %11 : vector<1x3x64xf32> to vector<3x64xf32>
    %c1_14 = arith.constant 1 : index
    %c0_15 = arith.constant 0 : index
    %c0_16 = arith.constant 0 : index
    %13 = vector.load %arg2[%c1_14, %c0_15, %c0_16] : memref<2x3x64xf32, #tpu.memory_space<vmem>>, vector<1x3x64xf32>
    %14 = vector.shape_cast %13 : vector<1x3x64xf32> to vector<3x64xf32>
    %15 = tpu.concatenate %12, %14 in 1 : vector<3x64xf32>, vector<3x64xf32> -> vector<3x128xf32>
    %16 = tpu.concatenate %5, %10, %15 in 1 : vector<3x2048xf32>, vector<3x512xf32>, vector<3x128xf32> -> vector<3x2688xf32>
    %c0_17 = arith.constant 0 : index
    %c0_18 = arith.constant 0 : index
    %17 = vector.load %arg3[%c0_17, %c0_18] : memref<8x3xbf16, #tpu.memory_space<vmem>>, vector<8x3xbf16>
    %18 = arith.truncf %16 : vector<3x2688xf32> to vector<3x2688xbf16>
    %cst = arith.constant dense<0.000000e+00> : vector<8x2688xf32>
    %19 = tpu.matmul %17, %18, %cst {dimension_numbers = #tpu.dot_dimension_numbers<[1], [0], [0], [1], [0, 0, 1, 1], [], []>} : vector<8x3xbf16>, vector<3x2688xbf16>, vector<8x2688xf32> -> vector<8x2688xf32>
    %c0_19 = arith.constant 0 : index
    %c0_20 = arith.constant 0 : index
    %20 = vector.load %arg4[%c0_19, %c0_20] : memref<8x1xf32, #tpu.memory_space<vmem>>, vector<8x1xf32>
    %21 = vector.broadcast %20 : vector<8x1xf32> to vector<8x2688xf32>
    %22 = arith.addf %19, %21 : vector<8x2688xf32>
    %cst_21 = arith.constant 0.000000e+00 : f32
    %23 = vector.broadcast %cst_21 : f32 to vector<8x2688xf32>
    %24 = arith.maximumf %22, %23 : vector<8x2688xf32>
    %c0_22 = arith.constant 0 : index
    %c0_23 = arith.constant 0 : index
    %25 = vector.load %arg5[%c0_22, %c0_23] : memref<16x8xbf16, #tpu.memory_space<vmem>>, vector<16x8xbf16>
    %26 = arith.truncf %24 : vector<8x2688xf32> to vector<8x2688xbf16>
    %cst_24 = arith.constant dense<0.000000e+00> : vector<16x2688xf32>
    %27 = tpu.matmul %25, %26, %cst_24 {dimension_numbers = #tpu.dot_dimension_numbers<[1], [0], [0], [1], [0, 0, 1, 1], [], []>} : vector<16x8xbf16>, vector<8x2688xbf16>, vector<16x2688xf32> -> vector<16x2688xf32>
    %c0_25 = arith.constant 0 : index
    %c0_26 = arith.constant 0 : index
    %28 = vector.load %arg6[%c0_25, %c0_26] : memref<16x1xf32, #tpu.memory_space<vmem>>, vector<16x1xf32>
    %29 = vector.broadcast %28 : vector<16x1xf32> to vector<16x2688xf32>
    %30 = arith.addf %27, %29 : vector<16x2688xf32>
    %cst_27 = arith.constant 0.000000e+00 : f32
    %31 = vector.broadcast %cst_27 : f32 to vector<16x2688xf32>
    %32 = arith.maximumf %30, %31 : vector<16x2688xf32>
    %33 = vector.extract_strided_slice %32 {offsets = [0, 0], sizes = [16, 2048], strides = [1, 1]} : vector<16x2688xf32> to vector<16x2048xf32>
    %cst_28 = arith.constant 1.600000e+01 : f32
    %34 = arith.divf %0, %cst_28 : f32
    %cst_29 = arith.constant 1.000000e+00 : f32
    %35 = arith.addf %cst_29, %34 : f32
    %36 = vector.broadcast %35 : f32 to vector<16x2048xf32>
    %37 = arith.mulf %33, %36 : vector<16x2048xf32>
    %38 = vector.extract_strided_slice %37 {offsets = [0, 0], sizes = [16, 1024], strides = [1, 1]} : vector<16x2048xf32> to vector<16x1024xf32>
    %c0_30 = arith.constant 0 : index
    %c0_31 = arith.constant 0 : index
    %c0_32 = arith.constant 0 : index
    %39 = vector.load %arg21[%c0_30, %c0_31, %c0_32] : memref<2x16x1024xf32, #tpu.memory_space<vmem>>, vector<1x16x1024xf32>
    %40 = vector.shape_cast %39 : vector<1x16x1024xf32> to vector<16x1024xf32>
    %41 = vector.shape_cast %38 : vector<16x1024xf32> to vector<1x16x1024xf32>
    tpu.vector_store %arg21[%c0_30, %c0_31, %c0_32], %41 {strides = array<i32>} : memref<2x16x1024xf32, #tpu.memory_space<vmem>>, vector<1x16x1024xf32>,
    %42 = vector.extract_strided_slice %37 {offsets = [0, 1024], sizes = [16, 1024], strides = [1, 1]} : vector<16x2048xf32> to vector<16x1024xf32>
    %c1_33 = arith.constant 1 : index
    %c0_34 = arith.constant 0 : index
    %c0_35 = arith.constant 0 : index
    %43 = vector.load %arg21[%c1_33, %c0_34, %c0_35] : memref<2x16x1024xf32, #tpu.memory_space<vmem>>, vector<1x16x1024xf32>
    %44 = vector.shape_cast %43 : vector<1x16x1024xf32> to vector<16x1024xf32>
    %45 = vector.shape_cast %42 : vector<16x1024xf32> to vector<1x16x1024xf32>
    tpu.vector_store %arg21[%c1_33, %c0_34, %c0_35], %45 {strides = array<i32>} : memref<2x16x1024xf32, #tpu.memory_space<vmem>>, vector<1x16x1024xf32>,
    %46 = vector.extract_strided_slice %32 {offsets = [0, 2048], sizes = [16, 640], strides = [1, 1]} : vector<16x2688xf32> to vector<16x640xf32>
    %c0_36 = arith.constant 0 : index
    %c0_37 = arith.constant 0 : index
    %47 = vector.load %arg7[%c0_36, %c0_37] : memref<32x16xbf16, #tpu.memory_space<vmem>>, vector<32x16xbf16>
    %48 = arith.truncf %46 : vector<16x640xf32> to vector<16x640xbf16>
    %cst_38 = arith.constant dense<0.000000e+00> : vector<32x640xf32>
    %49 = tpu.matmul %47, %48, %cst_38 {dimension_numbers = #tpu.dot_dimension_numbers<[1], [0], [0], [1], [0, 0, 1, 1], [], []>} : vector<32x16xbf16>, vector<16x640xbf16>, vector<32x640xf32> -> vector<32x640xf32>
    %c0_39 = arith.constant 0 : index
    %c0_40 = arith.constant 0 : index
    %50 = vector.load %arg8[%c0_39, %c0_40] : memref<32x1xf32, #tpu.memory_space<vmem>>, vector<32x1xf32>
    %51 = vector.broadcast %50 : vector<32x1xf32> to vector<32x640xf32>
    %52 = arith.addf %49, %51 : vector<32x640xf32>
    %cst_41 = arith.constant 0.000000e+00 : f32
    %53 = vector.broadcast %cst_41 : f32 to vector<32x640xf32>
    %54 = arith.maximumf %52, %53 : vector<32x640xf32>
    %55 = vector.extract_strided_slice %54 {offsets = [0, 0], sizes = [32, 512], strides = [1, 1]} : vector<32x640xf32> to vector<32x512xf32>
    %cst_42 = arith.constant 3.200000e+01 : f32
    %56 = arith.divf %0, %cst_42 : f32
    %cst_43 = arith.constant 1.000000e+00 : f32
    %57 = arith.addf %cst_43, %56 : f32
    %58 = vector.broadcast %57 : f32 to vector<32x512xf32>
    %59 = arith.mulf %55, %58 : vector<32x512xf32>
    %60 = vector.extract_strided_slice %59 {offsets = [0, 0], sizes = [32, 256], strides = [1, 1]} : vector<32x512xf32> to vector<32x256xf32>
    %c0_44 = arith.constant 0 : index
    %c0_45 = arith.constant 0 : index
    %c0_46 = arith.constant 0 : index
    %61 = vector.load %arg22[%c0_44, %c0_45, %c0_46] : memref<2x32x256xf32, #tpu.memory_space<vmem>>, vector<1x32x256xf32>
    %62 = vector.shape_cast %61 : vector<1x32x256xf32> to vector<32x256xf32>
    %63 = vector.shape_cast %60 : vector<32x256xf32> to vector<1x32x256xf32>
    tpu.vector_store %arg22[%c0_44, %c0_45, %c0_46], %63 {strides = array<i32>} : memref<2x32x256xf32, #tpu.memory_space<vmem>>, vector<1x32x256xf32>,
    %64 = vector.extract_strided_slice %59 {offsets = [0, 256], sizes = [32, 256], strides = [1, 1]} : vector<32x512xf32> to vector<32x256xf32>
    %c1_47 = arith.constant 1 : index
    %c0_48 = arith.constant 0 : index
    %c0_49 = arith.constant 0 : index
    %65 = vector.load %arg22[%c1_47, %c0_48, %c0_49] : memref<2x32x256xf32, #tpu.memory_space<vmem>>, vector<1x32x256xf32>
    %66 = vector.shape_cast %65 : vector<1x32x256xf32> to vector<32x256xf32>
    %67 = vector.shape_cast %64 : vector<32x256xf32> to vector<1x32x256xf32>
    tpu.vector_store %arg22[%c1_47, %c0_48, %c0_49], %67 {strides = array<i32>} : memref<2x32x256xf32, #tpu.memory_space<vmem>>, vector<1x32x256xf32>,
    %68 = vector.extract_strided_slice %54 {offsets = [0, 512], sizes = [32, 128], strides = [1, 1]} : vector<32x640xf32> to vector<32x128xf32>
    %c0_50 = arith.constant 0 : index
    %c0_51 = arith.constant 0 : index
    %69 = vector.load %arg9[%c0_50, %c0_51] : memref<64x32xbf16, #tpu.memory_space<vmem>>, vector<64x32xbf16>
    %70 = arith.truncf %68 : vector<32x128xf32> to vector<32x128xbf16>
    %cst_52 = arith.constant dense<0.000000e+00> : vector<64x128xf32>
    %71 = tpu.matmul %69, %70, %cst_52 {dimension_numbers = #tpu.dot_dimension_numbers<[1], [0], [0], [1], [0, 0, 1, 1], [], []>} : vector<64x32xbf16>, vector<32x128xbf16>, vector<64x128xf32> -> vector<64x128xf32>
    %c0_53 = arith.constant 0 : index
    %c0_54 = arith.constant 0 : index
    %72 = vector.load %arg10[%c0_53, %c0_54] : memref<64x1xf32, #tpu.memory_space<vmem>>, vector<64x1xf32>
    %73 = vector.broadcast %72 : vector<64x1xf32> to vector<64x128xf32>
    %74 = arith.addf %71, %73 : vector<64x128xf32>
    %cst_55 = arith.constant 0.000000e+00 : f32
    %75 = vector.broadcast %cst_55 : f32 to vector<64x128xf32>
    %76 = arith.maximumf %74, %75 : vector<64x128xf32>
    %cst_56 = arith.constant 6.400000e+01 : f32
    %77 = arith.divf %0, %cst_56 : f32
    %cst_57 = arith.constant 1.000000e+00 : f32
    %78 = arith.addf %cst_57, %77 : f32
    %79 = vector.broadcast %78 : f32 to vector<64x128xf32>
    %80 = arith.mulf %76, %79 : vector<64x128xf32>
    %81 = vector.extract_strided_slice %80 {offsets = [0, 0], sizes = [64, 64], strides = [1, 1]} : vector<64x128xf32> to vector<64x64xf32>
    %c0_58 = arith.constant 0 : index
    %c0_59 = arith.constant 0 : index
    %c0_60 = arith.constant 0 : index
    %82 = vector.load %arg23[%c0_58, %c0_59, %c0_60] : memref<2x64x64xf32, #tpu.memory_space<vmem>>, vector<1x64x64xf32>
    %83 = vector.shape_cast %82 : vector<1x64x64xf32> to vector<64x64xf32>
    %84 = vector.shape_cast %81 : vector<64x64xf32> to vector<1x64x64xf32>
    tpu.vector_store %arg23[%c0_58, %c0_59, %c0_60], %84 {strides = array<i32>} : memref<2x64x64xf32, #tpu.memory_space<vmem>>, vector<1x64x64xf32>,
    %85 = vector.extract_strided_slice %80 {offsets = [0, 64], sizes = [64, 64], strides = [1, 1]} : vector<64x128xf32> to vector<64x64xf32>
    %c1_61 = arith.constant 1 : index
    %c0_62 = arith.constant 0 : index
    %c0_63 = arith.constant 0 : index
    %86 = vector.load %arg23[%c1_61, %c0_62, %c0_63] : memref<2x64x64xf32, #tpu.memory_space<vmem>>, vector<1x64x64xf32>
    %87 = vector.shape_cast %86 : vector<1x64x64xf32> to vector<64x64xf32>
    %88 = vector.shape_cast %85 : vector<64x64xf32> to vector<1x64x64xf32>
    tpu.vector_store %arg23[%c1_61, %c0_62, %c0_63], %88 {strides = array<i32>} : memref<2x64x64xf32, #tpu.memory_space<vmem>>, vector<1x64x64xf32>,
    %89 = vector.extract_strided_slice %24 {offsets = [0, 0], sizes = [8, 2048], strides = [1, 1]} : vector<8x2688xf32> to vector<8x2048xf32>
    %90 = arith.truncf %89 : vector<8x2048xf32> to vector<8x2048xbf16>
    %cst_64 = arith.constant 0.000000e+00 : bf16
    %91 = vector.broadcast %cst_64 : bf16 to vector<8x256xbf16>
    %c0_65 = arith.constant 0 : index
    %c0_66 = arith.constant 0 : index
    %92 = vector.load %arg24[%c0_65, %c0_66] : memref<8x2816xbf16, #tpu.memory_space<vmem>>, vector<8x256xbf16>
    tpu.vector_store %arg24[%c0_65, %c0_66], %91 {strides = array<i32>} : memref<8x2816xbf16, #tpu.memory_space<vmem>>, vector<8x256xbf16>,
    %93 = vector.extract_strided_slice %90 {offsets = [0, 0], sizes = [8, 1024], strides = [1, 1]} : vector<8x2048xbf16> to vector<8x1024xbf16>
    %c0_67 = arith.constant 0 : index
    %c256 = arith.constant 256 : index
    %94 = vector.load %arg24[%c0_67, %c256] : memref<8x2816xbf16, #tpu.memory_space<vmem>>, vector<8x1024xbf16>
    tpu.vector_store %arg24[%c0_67, %c256], %93 {strides = array<i32>} : memref<8x2816xbf16, #tpu.memory_space<vmem>>, vector<8x1024xbf16>,
    %cst_68 = arith.constant 0.000000e+00 : bf16
    %95 = vector.broadcast %cst_68 : bf16 to vector<8x256xbf16>
    %c0_69 = arith.constant 0 : index
    %c1280 = arith.constant 1280 : index
    %96 = vector.load %arg24[%c0_69, %c1280] : memref<8x2816xbf16, #tpu.memory_space<vmem>>, vector<8x256xbf16>
    tpu.vector_store %arg24[%c0_69, %c1280], %95 {strides = array<i32>} : memref<8x2816xbf16, #tpu.memory_space<vmem>>, vector<8x256xbf16>,
    %97 = vector.extract_strided_slice %90 {offsets = [0, 1024], sizes = [8, 1024], strides = [1, 1]} : vector<8x2048xbf16> to vector<8x1024xbf16>
    %c0_70 = arith.constant 0 : index
    %c1536 = arith.constant 1536 : index
    %98 = vector.load %arg24[%c0_70, %c1536] : memref<8x2816xbf16, #tpu.memory_space<vmem>>, vector<8x1024xbf16>
    tpu.vector_store %arg24[%c0_70, %c1536], %97 {strides = array<i32>} : memref<8x2816xbf16, #tpu.memory_space<vmem>>, vector<8x1024xbf16>,
    %cst_71 = arith.constant 0.000000e+00 : bf16
    %99 = vector.broadcast %cst_71 : bf16 to vector<8x256xbf16>
    %c0_72 = arith.constant 0 : index
    %c2560 = arith.constant 2560 : index
    %100 = vector.load %arg24[%c0_72, %c2560] : memref<8x2816xbf16, #tpu.memory_space<vmem>>, vector<8x256xbf16>
    tpu.vector_store %arg24[%c0_72, %c2560], %99 {strides = array<i32>} : memref<8x2816xbf16, #tpu.memory_space<vmem>>, vector<8x256xbf16>,
    %101 = tpu.iota {dimensions = array<i32: 1>} : vector<1x2560xi32>
    %c32_i32 = arith.constant 32 : i32
    %c0_i32 = arith.constant 0 : i32
    %102 = arith.cmpi eq, %c32_i32, %c0_i32 : i32
    %c1_i32 = arith.constant 1 : i32
    %103 = arith.select %102, %c1_i32, %c32_i32 : i32
    %104 = vector.broadcast %103 : i32 to vector<1x2560xi32>
    %105 = arith.remsi %101, %104 : vector<1x2560xi32>
    %c0_i32_73 = arith.constant 0 : i32
    %106 = vector.broadcast %c0_i32_73 : i32 to vector<1x2560xi32>
    %107 = arith.cmpi ne, %105, %106 : vector<1x2560xi32>
    %c0_i32_74 = arith.constant 0 : i32
    %108 = vector.broadcast %c0_i32_74 : i32 to vector<1x2560xi32>
    %109 = arith.cmpi slt, %105, %108 : vector<1x2560xi32>
    %c0_i32_75 = arith.constant 0 : i32
    %110 = arith.cmpi slt, %103, %c0_i32_75 : i32
    %111 = vector.broadcast %110 : i1 to vector<1x2560xi1>
    %112 = vector.broadcast %111 : vector<1x2560xi1> to vector<1x2560xi1>
    %113 = arith.xori %109, %112 : vector<1x2560xi1>
    %114 = arith.andi %113, %107 : vector<1x2560xi1>
    %115 = vector.broadcast %103 : i32 to vector<1x2560xi32>
    %116 = arith.addi %105, %115 : vector<1x2560xi32>
    %117 = arith.select %114, %116, %105 : vector<1x2560xi1>, vector<1x2560xi32>
    %c0_76 = arith.constant 0 : index
    %c64 = arith.constant 64 : index
    %118 = vector.load %arg24[%c0_76, %c64] : memref<8x2816xbf16, #tpu.memory_space<vmem>>, vector<8x2560xbf16>
    %c0_77 = arith.constant 0 : index
    %c96 = arith.constant 96 : index
    %119 = vector.load %arg24[%c0_77, %c96] : memref<8x2816xbf16, #tpu.memory_space<vmem>>, vector<8x2560xbf16>
    %c0_78 = arith.constant 0 : index
    %c128 = arith.constant 128 : index
    %120 = vector.load %arg24[%c0_78, %c128] : memref<8x2816xbf16, #tpu.memory_space<vmem>>, vector<8x2560xbf16>
    %c0_79 = arith.constant 0 : index
    %c160 = arith.constant 160 : index
    %121 = vector.load %arg24[%c0_79, %c160] : memref<8x2816xbf16, #tpu.memory_space<vmem>>, vector<8x2560xbf16>
    %c0_80 = arith.constant 0 : index
    %c192 = arith.constant 192 : index
    %122 = vector.load %arg24[%c0_80, %c192] : memref<8x2816xbf16, #tpu.memory_space<vmem>>, vector<8x2560xbf16>
    %c0_81 = arith.constant 0 : index
    %c224 = arith.constant 224 : index
    %123 = vector.load %arg24[%c0_81, %c224] : memref<8x2816xbf16, #tpu.memory_space<vmem>>, vector<8x2560xbf16>
    %c0_82 = arith.constant 0 : index
    %c256_83 = arith.constant 256 : index
    %124 = vector.load %arg24[%c0_82, %c256_83] : memref<8x2816xbf16, #tpu.memory_space<vmem>>, vector<8x2560xbf16>
    %125 = tpu.concatenate %118, %119, %120, %121, %122, %123, %124 in 0 : vector<8x2560xbf16>, vector<8x2560xbf16>, vector<8x2560xbf16>, vector<8x2560xbf16>, vector<8x2560xbf16>, vector<8x2560xbf16>, vector<8x2560xbf16> -> vector<56x2560xbf16>
    %c0_84 = arith.constant 0 : index
    %c0_85 = arith.constant 0 : index
    %126 = vector.load %arg11[%c0_84, %c0_85] : memref<8x56xbf16, #tpu.memory_space<vmem>>, vector<8x56xbf16>
    %cst_86 = arith.constant dense<0.000000e+00> : vector<8x2560xf32>
    %127 = tpu.matmul %126, %125, %cst_86 {dimension_numbers = #tpu.dot_dimension_numbers<[1], [0], [0], [1], [0, 0, 1, 1], [], []>} : vector<8x56xbf16>, vector<56x2560xbf16>, vector<8x2560xf32> -> vector<8x2560xf32>
    %c0_87 = arith.constant 0 : index
    %c0_88 = arith.constant 0 : index
    %128 = vector.load %arg12[%c0_87, %c0_88] : memref<8x1xf32, #tpu.memory_space<vmem>>, vector<8x1xf32>
    %129 = vector.broadcast %128 : vector<8x1xf32> to vector<8x2560xf32>
    %130 = arith.addf %127, %129 : vector<8x2560xf32>
    %131 = arith.truncf %130 : vector<8x2560xf32> to vector<8x2560xbf16>
    %c-3_i32 = arith.constant -3 : i32
    %132 = vector.broadcast %c-3_i32 : i32 to vector<1x2560xi32>
    %133 = arith.addi %117, %132 : vector<1x2560xi32>
    %c0_i32_89 = arith.constant 0 : i32
    %134 = vector.broadcast %c0_i32_89 : i32 to vector<1x2560xi32>
    %135 = arith.cmpi sge, %133, %134 : vector<1x2560xi32>
    %c-3_i32_90 = arith.constant -3 : i32
    %136 = vector.broadcast %c-3_i32_90 : i32 to vector<1x2560xi32>
    %137 = arith.addi %117, %136 : vector<1x2560xi32>
    %c32_i32_91 = arith.constant 32 : i32
    %138 = vector.broadcast %c32_i32_91 : i32 to vector<1x2560xi32>
    %139 = arith.cmpi slt, %137, %138 : vector<1x2560xi32>
    %140 = arith.andi %135, %139 : vector<1x2560xi1>
    %141 = arith.extui %140 : vector<1x2560xi1> to vector<1x2560xi32>
    %142 = arith.sitofp %141 : vector<1x2560xi32> to vector<1x2560xf32>
    %143 = arith.truncf %142 : vector<1x2560xf32> to vector<1x2560xbf16>
    %cst_92 = arith.constant 0.000000e+00 : bf16
    %144 = vector.broadcast %cst_92 : bf16 to vector<8x3xbf16>
    %145 = vector.extract_strided_slice %131 {offsets = [0, 0], sizes = [8, 2557], strides = [1, 1]} : vector<8x2560xbf16> to vector<8x2557xbf16>
    %146 = tpu.concatenate %144, %145 in 1 : vector<8x3xbf16>, vector<8x2557xbf16> -> vector<8x2560xbf16>
    %147 = vector.broadcast %143 : vector<1x2560xbf16> to vector<8x2560xbf16>
    %148 = arith.mulf %146, %147 : vector<8x2560xbf16>
    %c-2_i32 = arith.constant -2 : i32
    %149 = vector.broadcast %c-2_i32 : i32 to vector<1x2560xi32>
    %150 = arith.addi %117, %149 : vector<1x2560xi32>
    %c0_i32_93 = arith.constant 0 : i32
    %151 = vector.broadcast %c0_i32_93 : i32 to vector<1x2560xi32>
    %152 = arith.cmpi sge, %150, %151 : vector<1x2560xi32>
    %c-2_i32_94 = arith.constant -2 : i32
    %153 = vector.broadcast %c-2_i32_94 : i32 to vector<1x2560xi32>
    %154 = arith.addi %117, %153 : vector<1x2560xi32>
    %c32_i32_95 = arith.constant 32 : i32
    %155 = vector.broadcast %c32_i32_95 : i32 to vector<1x2560xi32>
    %156 = arith.cmpi slt, %154, %155 : vector<1x2560xi32>
    %157 = arith.andi %152, %156 : vector<1x2560xi1>
    %158 = arith.extui %157 : vector<1x2560xi1> to vector<1x2560xi32>
    %159 = arith.sitofp %158 : vector<1x2560xi32> to vector<1x2560xf32>
    %160 = arith.truncf %159 : vector<1x2560xf32> to vector<1x2560xbf16>
    %cst_96 = arith.constant 0.000000e+00 : bf16
    %161 = vector.broadcast %cst_96 : bf16 to vector<8x2xbf16>
    %162 = vector.extract_strided_slice %131 {offsets = [0, 0], sizes = [8, 2558], strides = [1, 1]} : vector<8x2560xbf16> to vector<8x2558xbf16>
    %163 = tpu.concatenate %161, %162 in 1 : vector<8x2xbf16>, vector<8x2558xbf16> -> vector<8x2560xbf16>
    %164 = vector.broadcast %160 : vector<1x2560xbf16> to vector<8x2560xbf16>
    %165 = arith.mulf %163, %164 : vector<8x2560xbf16>
    %c-1_i32 = arith.constant -1 : i32
    %166 = vector.broadcast %c-1_i32 : i32 to vector<1x2560xi32>
    %167 = arith.addi %117, %166 : vector<1x2560xi32>
    %c0_i32_97 = arith.constant 0 : i32
    %168 = vector.broadcast %c0_i32_97 : i32 to vector<1x2560xi32>
    %169 = arith.cmpi sge, %167, %168 : vector<1x2560xi32>
    %c-1_i32_98 = arith.constant -1 : i32
    %170 = vector.broadcast %c-1_i32_98 : i32 to vector<1x2560xi32>
    %171 = arith.addi %117, %170 : vector<1x2560xi32>
    %c32_i32_99 = arith.constant 32 : i32
    %172 = vector.broadcast %c32_i32_99 : i32 to vector<1x2560xi32>
    %173 = arith.cmpi slt, %171, %172 : vector<1x2560xi32>
    %174 = arith.andi %169, %173 : vector<1x2560xi1>
    %175 = arith.extui %174 : vector<1x2560xi1> to vector<1x2560xi32>
    %176 = arith.sitofp %175 : vector<1x2560xi32> to vector<1x2560xf32>
    %177 = arith.truncf %176 : vector<1x2560xf32> to vector<1x2560xbf16>
    %cst_100 = arith.constant 0.000000e+00 : bf16
    %178 = vector.broadcast %cst_100 : bf16 to vector<8x1xbf16>
    %179 = vector.extract_strided_slice %131 {offsets = [0, 0], sizes = [8, 2559], strides = [1, 1]} : vector<8x2560xbf16> to vector<8x2559xbf16>
    %180 = tpu.concatenate %178, %179 in 1 : vector<8x1xbf16>, vector<8x2559xbf16> -> vector<8x2560xbf16>
    %181 = vector.broadcast %177 : vector<1x2560xbf16> to vector<8x2560xbf16>
    %182 = arith.mulf %180, %181 : vector<8x2560xbf16>
    %c0_i32_101 = arith.constant 0 : i32
    %183 = vector.broadcast %c0_i32_101 : i32 to vector<1x2560xi32>
    %184 = arith.addi %117, %183 : vector<1x2560xi32>
    %c0_i32_102 = arith.constant 0 : i32
    %185 = vector.broadcast %c0_i32_102 : i32 to vector<1x2560xi32>
    %186 = arith.cmpi sge, %184, %185 : vector<1x2560xi32>
    %c0_i32_103 = arith.constant 0 : i32
    %187 = vector.broadcast %c0_i32_103 : i32 to vector<1x2560xi32>
    %188 = arith.addi %117, %187 : vector<1x2560xi32>
    %c32_i32_104 = arith.constant 32 : i32
    %189 = vector.broadcast %c32_i32_104 : i32 to vector<1x2560xi32>
    %190 = arith.cmpi slt, %188, %189 : vector<1x2560xi32>
    %191 = arith.andi %186, %190 : vector<1x2560xi1>
    %192 = arith.extui %191 : vector<1x2560xi1> to vector<1x2560xi32>
    %193 = arith.sitofp %192 : vector<1x2560xi32> to vector<1x2560xf32>
    %194 = arith.truncf %193 : vector<1x2560xf32> to vector<1x2560xbf16>
    %195 = vector.broadcast %194 : vector<1x2560xbf16> to vector<8x2560xbf16>
    %196 = arith.mulf %131, %195 : vector<8x2560xbf16>
    %c1_i32_105 = arith.constant 1 : i32
    %197 = vector.broadcast %c1_i32_105 : i32 to vector<1x2560xi32>
    %198 = arith.addi %117, %197 : vector<1x2560xi32>
    %c0_i32_106 = arith.constant 0 : i32
    %199 = vector.broadcast %c0_i32_106 : i32 to vector<1x2560xi32>
    %200 = arith.cmpi sge, %198, %199 : vector<1x2560xi32>
    %c1_i32_107 = arith.constant 1 : i32
    %201 = vector.broadcast %c1_i32_107 : i32 to vector<1x2560xi32>
    %202 = arith.addi %117, %201 : vector<1x2560xi32>
    %c32_i32_108 = arith.constant 32 : i32
    %203 = vector.broadcast %c32_i32_108 : i32 to vector<1x2560xi32>
    %204 = arith.cmpi slt, %202, %203 : vector<1x2560xi32>
    %205 = arith.andi %200, %204 : vector<1x2560xi1>
    %206 = arith.extui %205 : vector<1x2560xi1> to vector<1x2560xi32>
    %207 = arith.sitofp %206 : vector<1x2560xi32> to vector<1x2560xf32>
    %208 = arith.truncf %207 : vector<1x2560xf32> to vector<1x2560xbf16>
    %cst_109 = arith.constant 0.000000e+00 : bf16
    %209 = vector.broadcast %cst_109 : bf16 to vector<8x1xbf16>
    %210 = vector.extract_strided_slice %131 {offsets = [0, 1], sizes = [8, 2559], strides = [1, 1]} : vector<8x2560xbf16> to vector<8x2559xbf16>
    %211 = tpu.concatenate %210, %209 in 1 : vector<8x2559xbf16>, vector<8x1xbf16> -> vector<8x2560xbf16>
    %212 = vector.broadcast %208 : vector<1x2560xbf16> to vector<8x2560xbf16>
    %213 = arith.mulf %211, %212 : vector<8x2560xbf16>
    %c2_i32 = arith.constant 2 : i32
    %214 = vector.broadcast %c2_i32 : i32 to vector<1x2560xi32>
    %215 = arith.addi %117, %214 : vector<1x2560xi32>
    %c0_i32_110 = arith.constant 0 : i32
    %216 = vector.broadcast %c0_i32_110 : i32 to vector<1x2560xi32>
    %217 = arith.cmpi sge, %215, %216 : vector<1x2560xi32>
    %c2_i32_111 = arith.constant 2 : i32
    %218 = vector.broadcast %c2_i32_111 : i32 to vector<1x2560xi32>
    %219 = arith.addi %117, %218 : vector<1x2560xi32>
    %c32_i32_112 = arith.constant 32 : i32
    %220 = vector.broadcast %c32_i32_112 : i32 to vector<1x2560xi32>
    %221 = arith.cmpi slt, %219, %220 : vector<1x2560xi32>
    %222 = arith.andi %217, %221 : vector<1x2560xi1>
    %223 = arith.extui %222 : vector<1x2560xi1> to vector<1x2560xi32>
    %224 = arith.sitofp %223 : vector<1x2560xi32> to vector<1x2560xf32>
    %225 = arith.truncf %224 : vector<1x2560xf32> to vector<1x2560xbf16>
    %cst_113 = arith.constant 0.000000e+00 : bf16
    %226 = vector.broadcast %cst_113 : bf16 to vector<8x2xbf16>
    %227 = vector.extract_strided_slice %131 {offsets = [0, 2], sizes = [8, 2558], strides = [1, 1]} : vector<8x2560xbf16> to vector<8x2558xbf16>
    %228 = tpu.concatenate %227, %226 in 1 : vector<8x2558xbf16>, vector<8x2xbf16> -> vector<8x2560xbf16>
    %229 = vector.broadcast %225 : vector<1x2560xbf16> to vector<8x2560xbf16>
    %230 = arith.mulf %228, %229 : vector<8x2560xbf16>
    %c3_i32 = arith.constant 3 : i32
    %231 = vector.broadcast %c3_i32 : i32 to vector<1x2560xi32>
    %232 = arith.addi %117, %231 : vector<1x2560xi32>
    %c0_i32_114 = arith.constant 0 : i32
    %233 = vector.broadcast %c0_i32_114 : i32 to vector<1x2560xi32>
    %234 = arith.cmpi sge, %232, %233 : vector<1x2560xi32>
    %c3_i32_115 = arith.constant 3 : i32
    %235 = vector.broadcast %c3_i32_115 : i32 to vector<1x2560xi32>
    %236 = arith.addi %117, %235 : vector<1x2560xi32>
    %c32_i32_116 = arith.constant 32 : i32
    %237 = vector.broadcast %c32_i32_116 : i32 to vector<1x2560xi32>
    %238 = arith.cmpi slt, %236, %237 : vector<1x2560xi32>
    %239 = arith.andi %234, %238 : vector<1x2560xi1>
    %240 = arith.extui %239 : vector<1x2560xi1> to vector<1x2560xi32>
    %241 = arith.sitofp %240 : vector<1x2560xi32> to vector<1x2560xf32>
    %242 = arith.truncf %241 : vector<1x2560xf32> to vector<1x2560xbf16>
    %cst_117 = arith.constant 0.000000e+00 : bf16
    %243 = vector.broadcast %cst_117 : bf16 to vector<8x3xbf16>
    %244 = vector.extract_strided_slice %131 {offsets = [0, 3], sizes = [8, 2557], strides = [1, 1]} : vector<8x2560xbf16> to vector<8x2557xbf16>
    %245 = tpu.concatenate %244, %243 in 1 : vector<8x2557xbf16>, vector<8x3xbf16> -> vector<8x2560xbf16>
    %246 = vector.broadcast %242 : vector<1x2560xbf16> to vector<8x2560xbf16>
    %247 = arith.mulf %245, %246 : vector<8x2560xbf16>
    %c0_118 = arith.constant 0 : index
    %c0_119 = arith.constant 0 : index
    %248 = vector.load %arg13[%c0_118, %c0_119] : memref<8x56xbf16, #tpu.memory_space<vmem>>, vector<8x56xbf16>
    %249 = tpu.concatenate %148, %165, %182, %196, %213, %230, %247 in 0 : vector<8x2560xbf16>, vector<8x2560xbf16>, vector<8x2560xbf16>, vector<8x2560xbf16>, vector<8x2560xbf16>, vector<8x2560xbf16>, vector<8x2560xbf16> -> vector<56x2560xbf16>
    %cst_120 = arith.constant dense<0.000000e+00> : vector<8x2560xf32>
    %250 = tpu.matmul %248, %249, %cst_120 {dimension_numbers = #tpu.dot_dimension_numbers<[1], [0], [0], [1], [0, 0, 1, 1], [], []>} : vector<8x56xbf16>, vector<56x2560xbf16>, vector<8x2560xf32> -> vector<8x2560xf32>
    %c0_121 = arith.constant 0 : index
    %c0_122 = arith.constant 0 : index
    %251 = vector.load %arg14[%c0_121, %c0_122] : memref<8x1xf32, #tpu.memory_space<vmem>>, vector<8x1xf32>
    %252 = vector.broadcast %251 : vector<8x1xf32> to vector<8x2560xf32>
    %253 = arith.addf %250, %252 : vector<8x2560xf32>
    %c0_123 = arith.constant 0 : index
    %c157 = arith.constant 157 : index
    %254 = vector.load %arg24[%c0_123, %c157] : memref<8x2816xbf16, #tpu.memory_space<vmem>>, vector<8x2560xbf16>
    %c0_124 = arith.constant 0 : index
    %c158 = arith.constant 158 : index
    %255 = vector.load %arg24[%c0_124, %c158] : memref<8x2816xbf16, #tpu.memory_space<vmem>>, vector<8x2560xbf16>
    %c0_125 = arith.constant 0 : index
    %c159 = arith.constant 159 : index
    %256 = vector.load %arg24[%c0_125, %c159] : memref<8x2816xbf16, #tpu.memory_space<vmem>>, vector<8x2560xbf16>
    %c0_126 = arith.constant 0 : index
    %c160_127 = arith.constant 160 : index
    %257 = vector.load %arg24[%c0_126, %c160_127] : memref<8x2816xbf16, #tpu.memory_space<vmem>>, vector<8x2560xbf16>
    %c0_128 = arith.constant 0 : index
    %c161 = arith.constant 161 : index
    %258 = vector.load %arg24[%c0_128, %c161] : memref<8x2816xbf16, #tpu.memory_space<vmem>>, vector<8x2560xbf16>
    %c0_129 = arith.constant 0 : index
    %c162 = arith.constant 162 : index
    %259 = vector.load %arg24[%c0_129, %c162] : memref<8x2816xbf16, #tpu.memory_space<vmem>>, vector<8x2560xbf16>
    %c0_130 = arith.constant 0 : index
    %c163 = arith.constant 163 : index
    %260 = vector.load %arg24[%c0_130, %c163] : memref<8x2816xbf16, #tpu.memory_space<vmem>>, vector<8x2560xbf16>
    %261 = tpu.concatenate %254, %255, %256, %257, %258, %259, %260 in 0 : vector<8x2560xbf16>, vector<8x2560xbf16>, vector<8x2560xbf16>, vector<8x2560xbf16>, vector<8x2560xbf16>, vector<8x2560xbf16>, vector<8x2560xbf16> -> vector<56x2560xbf16>
    %c3_i32_131 = arith.constant 3 : i32
    %262 = vector.broadcast %c3_i32_131 : i32 to vector<1x2560xi32>
    %263 = arith.cmpi sge, %117, %262 : vector<1x2560xi32>
    %c29_i32 = arith.constant 29 : i32
    %264 = vector.broadcast %c29_i32 : i32 to vector<1x2560xi32>
    %265 = arith.cmpi slt, %117, %264 : vector<1x2560xi32>
    %266 = arith.andi %263, %265 : vector<1x2560xi1>
    %267 = arith.extui %266 : vector<1x2560xi1> to vector<1x2560xi32>
    %268 = arith.sitofp %267 : vector<1x2560xi32> to vector<1x2560xf32>
    %c0_132 = arith.constant 0 : index
    %c0_133 = arith.constant 0 : index
    %269 = vector.load %arg15[%c0_132, %c0_133] : memref<8x56xbf16, #tpu.memory_space<vmem>>, vector<8x56xbf16>
    %cst_134 = arith.constant dense<0.000000e+00> : vector<8x2560xf32>
    %270 = tpu.matmul %269, %261, %cst_134 {dimension_numbers = #tpu.dot_dimension_numbers<[1], [0], [0], [1], [0, 0, 1, 1], [], []>} : vector<8x56xbf16>, vector<56x2560xbf16>, vector<8x2560xf32> -> vector<8x2560xf32>
    %c0_135 = arith.constant 0 : index
    %c0_136 = arith.constant 0 : index
    %271 = vector.load %arg16[%c0_135, %c0_136] : memref<8x1xf32, #tpu.memory_space<vmem>>, vector<8x1xf32>
    %272 = vector.broadcast %271 : vector<8x1xf32> to vector<8x2560xf32>
    %273 = arith.addf %270, %272 : vector<8x2560xf32>
    %274 = vector.broadcast %268 : vector<1x2560xf32> to vector<8x2560xf32>
    %275 = arith.mulf %273, %274 : vector<8x2560xf32>
    %276 = arith.truncf %275 : vector<8x2560xf32> to vector<8x2560xbf16>
    %c0_137 = arith.constant 0 : index
    %c0_138 = arith.constant 0 : index
    %277 = vector.load %arg17[%c0_137, %c0_138] : memref<8x56xbf16, #tpu.memory_space<vmem>>, vector<8x56xbf16>
    %cst_139 = arith.constant 0.000000e+00 : bf16
    %278 = vector.broadcast %cst_139 : bf16 to vector<8x96xbf16>
    %279 = vector.extract_strided_slice %276 {offsets = [0, 0], sizes = [8, 2464], strides = [1, 1]} : vector<8x2560xbf16> to vector<8x2464xbf16>
    %280 = tpu.concatenate %278, %279 in 1 : vector<8x96xbf16>, vector<8x2464xbf16> -> vector<8x2560xbf16>
    %cst_140 = arith.constant 0.000000e+00 : bf16
    %281 = vector.broadcast %cst_140 : bf16 to vector<8x64xbf16>
    %282 = vector.extract_strided_slice %276 {offsets = [0, 0], sizes = [8, 2496], strides = [1, 1]} : vector<8x2560xbf16> to vector<8x2496xbf16>
    %283 = tpu.concatenate %281, %282 in 1 : vector<8x64xbf16>, vector<8x2496xbf16> -> vector<8x2560xbf16>
    %cst_141 = arith.constant 0.000000e+00 : bf16
    %284 = vector.broadcast %cst_141 : bf16 to vector<8x32xbf16>
    %285 = vector.extract_strided_slice %276 {offsets = [0, 0], sizes = [8, 2528], strides = [1, 1]} : vector<8x2560xbf16> to vector<8x2528xbf16>
    %286 = tpu.concatenate %284, %285 in 1 : vector<8x32xbf16>, vector<8x2528xbf16> -> vector<8x2560xbf16>
    %cst_142 = arith.constant 0.000000e+00 : bf16
    %287 = vector.broadcast %cst_142 : bf16 to vector<8x32xbf16>
    %288 = vector.extract_strided_slice %276 {offsets = [0, 32], sizes = [8, 2528], strides = [1, 1]} : vector<8x2560xbf16> to vector<8x2528xbf16>
    %289 = tpu.concatenate %288, %287 in 1 : vector<8x2528xbf16>, vector<8x32xbf16> -> vector<8x2560xbf16>
    %cst_143 = arith.constant 0.000000e+00 : bf16
    %290 = vector.broadcast %cst_143 : bf16 to vector<8x64xbf16>
    %291 = vector.extract_strided_slice %276 {offsets = [0, 64], sizes = [8, 2496], strides = [1, 1]} : vector<8x2560xbf16> to vector<8x2496xbf16>
    %292 = tpu.concatenate %291, %290 in 1 : vector<8x2496xbf16>, vector<8x64xbf16> -> vector<8x2560xbf16>
    %cst_144 = arith.constant 0.000000e+00 : bf16
    %293 = vector.broadcast %cst_144 : bf16 to vector<8x96xbf16>
    %294 = vector.extract_strided_slice %276 {offsets = [0, 96], sizes = [8, 2464], strides = [1, 1]} : vector<8x2560xbf16> to vector<8x2464xbf16>
    %295 = tpu.concatenate %294, %293 in 1 : vector<8x2464xbf16>, vector<8x96xbf16> -> vector<8x2560xbf16>
    %296 = tpu.concatenate %280, %283, %286, %276, %289, %292, %295 in 0 : vector<8x2560xbf16>, vector<8x2560xbf16>, vector<8x2560xbf16>, vector<8x2560xbf16>, vector<8x2560xbf16>, vector<8x2560xbf16>, vector<8x2560xbf16> -> vector<56x2560xbf16>
    %cst_145 = arith.constant dense<0.000000e+00> : vector<8x2560xf32>
    %297 = tpu.matmul %277, %296, %cst_145 {dimension_numbers = #tpu.dot_dimension_numbers<[1], [0], [0], [1], [0, 0, 1, 1], [], []>} : vector<8x56xbf16>, vector<56x2560xbf16>, vector<8x2560xf32> -> vector<8x2560xf32>
    %c0_146 = arith.constant 0 : index
    %c0_147 = arith.constant 0 : index
    %298 = vector.load %arg18[%c0_146, %c0_147] : memref<8x1xf32, #tpu.memory_space<vmem>>, vector<8x1xf32>
    %299 = vector.broadcast %298 : vector<8x1xf32> to vector<8x2560xf32>
    %300 = arith.addf %297, %299 : vector<8x2560xf32>
    %301 = arith.addf %253, %300 : vector<8x2560xf32>
    %302 = vector.extract_strided_slice %301 {offsets = [0, 96], sizes = [8, 1024], strides = [1, 1]} : vector<8x2560xf32> to vector<8x1024xf32>
    %c0_148 = arith.constant 0 : index
    %c0_149 = arith.constant 0 : index
    %c0_150 = arith.constant 0 : index
    %303 = vector.load %arg20[%c0_148, %c0_149, %c0_150] : memref<2x8x1024xf32, #tpu.memory_space<vmem>>, vector<1x8x1024xf32>
    %304 = vector.shape_cast %303 : vector<1x8x1024xf32> to vector<8x1024xf32>
    %305 = vector.shape_cast %302 : vector<8x1024xf32> to vector<1x8x1024xf32>
    tpu.vector_store %arg20[%c0_148, %c0_149, %c0_150], %305 {strides = array<i32>} : memref<2x8x1024xf32, #tpu.memory_space<vmem>>, vector<1x8x1024xf32>,
    %306 = vector.extract_strided_slice %301 {offsets = [0, 1376], sizes = [8, 1024], strides = [1, 1]} : vector<8x2560xf32> to vector<8x1024xf32>
    %c1_151 = arith.constant 1 : index
    %c0_152 = arith.constant 0 : index
    %c0_153 = arith.constant 0 : index
    %307 = vector.load %arg20[%c1_151, %c0_152, %c0_153] : memref<2x8x1024xf32, #tpu.memory_space<vmem>>, vector<1x8x1024xf32>
    %308 = vector.shape_cast %307 : vector<1x8x1024xf32> to vector<8x1024xf32>
    %309 = vector.shape_cast %306 : vector<8x1024xf32> to vector<1x8x1024xf32>
    tpu.vector_store %arg20[%c1_151, %c0_152, %c0_153], %309 {strides = array<i32>} : memref<2x8x1024xf32, #tpu.memory_space<vmem>>, vector<1x8x1024xf32>,
    return
  }
}

</mosaic_0001>

<bundles_post_ra>
// kernel: siam_resnet_gcn_forward.1
= control target key start
LH: loop header
LB: loop body
LE: loop exit
PB: predicated region body
PF: predicated region fallthrough
CT: control target
= control target key end

     0   :  { %vm155_vm0 = vcmask 1040384   ;;  %vm156_vm1 = vcmask 1041408   ;;  %v16036_v2 = vmov 0   ;;  %v9352_v4 = vmov 65535   ;;  %s9359_s30 = smov 123   ;;  %s16004_s2 = inlined_call_operand.vmem [shape: f32[2,3,64], index: 2, kind: input, shape index: {}]   ;;  %s16005_s0 = inlined_call_operand.vmem [shape: f32[2,3,1024], index: 0, kind: input, shape index: {}]   ;;  %s16006_s6 = inlined_call_operand.vmem [shape: f32[16,1], index: 6, kind: input, shape index: {}]   ;;  %s16007_s4 = inlined_call_operand.vmem [shape: f32[8,1], index: 4, kind: input, shape index: {}]   ;;  %s16008_s3 = inlined_call_operand.vmem [shape: bf16[8,3], index: 3, kind: input, shape index: {}]   ;;  %s16009_s8 = inlined_call_operand.vmem [shape: f32[32,1], index: 8, kind: input, shape index: {}]   ;;  %s16010_s1 = inlined_call_operand.vmem [shape: f32[2,3,256], index: 1, kind: input, shape index: {}]   ;;  %s16011_s10 = inlined_call_operand.vmem [shape: f32[64,1], index: 10, kind: input, shape index: {}]   ;;  %s16012_s5 = inlined_call_operand.vmem [shape: bf16[16,8], index: 5, kind: input, shape index: {}]   ;;  %s16013_s7 = inlined_call_operand.vmem [shape: bf16[32,16], index: 7, kind: input, shape index: {}]   ;;  %s16014_s19 = inlined_call_operand.<no memory space> [shape: f32[1], index: 19, kind: input, shape index: {}]   ;;  %s16015_s21 = inlined_call_operand.vmem [shape: f32[2,16,1024], index: 21, kind: output, shape index: {1}]   ;;  %s16016_s11 = inlined_call_operand.vmem [shape: bf16[8,56], index: 11, kind: input, shape index: {}]   ;;  %s16017_s12 = inlined_call_operand.vmem [shape: f32[8,1], index: 12, kind: input, shape index: {}]   ;;  %s16018_s9 = inlined_call_operand.vmem [shape: bf16[64,32], index: 9, kind: input, shape index: {}]   ;;  %s16019_s22 = inlined_call_operand.vmem [shape: f32[2,32,256], index: 22, kind: output, shape index: {2}]   ;;  %s16020_s23 = inlined_call_operand.vmem [shape: f32[2,64,64], index: 23, kind: output, shape index: {3}]   ;;  %s16021_s13 = inlined_call_operand.vmem [shape: bf16[8,56], index: 13, kind: input, shape index: {}]   ;;  %s16022_s16 = inlined_call_operand.vmem [shape: f32[8,1], index: 16, kind: input, shape index: {}]   ;;  %s16023_s15 = inlined_call_operand.vmem [shape: bf16[8,56], index: 15, kind: input, shape index: {}]   ;;  %s16024_s18 = inlined_call_operand.vmem [shape: f32[8,1], index: 18, kind: input, shape index: {}]   ;;  %s16025_s14 = inlined_call_operand.vmem [shape: f32[8,1], index: 14, kind: input, shape index: {}]   ;;  %s16026_s17 = inlined_call_operand.vmem [shape: bf16[8,56], index: 17, kind: input, shape index: {}]   ;;  %s16027_s20 = inlined_call_operand.vmem [shape: f32[2,8,1024], index: 20, kind: output, shape index: {0}]  }
   0x1   :  { %16411 = sst [smem:[#allocation199_spill]] %s16004_s2  ;;  %254 = vmatprep.mubr.bf16.mxu0 %v16036_v2  ;;  %1873 = vst [vmem:[#allocation2] sm:$0xff] %v16036_v2  ;;  %1902 = vst [vmem:[#allocation2 + $0x28] sm:$0xff] %v16036_v2  ;;  %295 = vmatprep.mubr.bf16.mxu1 %v16036_v2  ;;  %v157_v5 = vsel %vm155_vm0, 4294967295, %v9352_v4  ;;  %vm151_vm2 = vcmask 23552   ;;  %vm9355_vm3 = vmmov 0  }
   0x2   :  { %16412 = sst [smem:[#allocation200_spill]] %s16005_s0  ;;  %1931 = vst [vmem:[#allocation2 + $0x50] sm:$0xff] %v16036_v2  ;;  %9283 = vset.pattern.permute.xlu1 %v16036_v2  ;;  %v9504_v8 = vsel %vm156_vm1, %v157_v5, 0  ;;  %9282 = vset.pattern.permute.xlu0 %v16036_v2  ;;  %vm16410_vm4 = vcmask 523264   ;;  %vm16262_vm5 = vcmask 785408   ;;  %vm737_vm6 = vcmask 1043456  }
   0x3   :  { %16413 = sst [smem:[#allocation201_spill]] %s16006_s6  ;;  %vm733_vm7 = vcmask 64512   ;;  %s1316_s26 = smul.f32 0.0625, %s16014_s19  ;;  %vm16263_vm8 = vcmask 261120   ;;  %vm1427_vm9 = vcmask 130048   ;;  %vm16354_vm10 = vcmask 457728  }
   0x4   :  { %16414 = sst [smem:[#allocation202_spill]] %s16007_s4  ;;  %s9353_s4 = smov 96   ;;  %vm6619_vm11 = vcmask 998400   ;;  %vm6556_vm12 = vcmask 1006592   ;;  %vm16305_vm13 = vcmask 1014784   ;;  %vm5364_vm14 = vcmask 1022976  }
   0x5   :  { %16415 = sst [smem:[#allocation203_spill]] %s16008_s3  ;;  %s9357_s2 = smov 122   ;;  %vm5121_vm15 = vcmask 1031168   ;;  %vm4878_vm0 = vcmask 1039360  }
   0x6   :  { %16416 = sst [smem:[#allocation204_spill]] %s16009_s8 }
   0x7   :  { %16417 = sst [smem:[#allocation205_spill]] %s16010_s1  ;;  %s9351_s1 = smov 64  }
   0x8   :  { %16418 = sst [smem:[#allocation206_spill]] %s16011_s10 }
   0x9   :  { %s16419_s24 = sld [smem:[#allocation199_spill]] }
   0xa   :  { %s16420_s0 = sld [smem:[#allocation200_spill]] }
   0xb   :  { %s16421_s3 = sld [smem:[#allocation201_spill]] }
   0xc   :  { %s16422_s10 = sld [smem:[#allocation202_spill]] }
   0xd   :  { %s16423_s8 = sld [smem:[#allocation203_spill]] }
   0xe   :  { %s16425_s25 = sld [smem:[#allocation205_spill]] }
   0xf   :  { %v8814_v0 = vld [vmem:[%s16419_s24 + $0x4] sm:$0x7]  ;;  %s1317_s6 = sadd.f32 1.0, %s1316_s26 }
  0x10   :  { %v72_v1 = vld [vmem:[%s16420_s0] sm:$0x77]  ;;  %118 = vrot.lane.b32.xlu0 %v8814_v0, %s9351_s1  ;;  %v73_v6 = vld [vmem:[%s16420_s0 + $0x8] sm:$0x77]  ;;  %v74_v11 = vld [vmem:[%s16420_s0 + $0x10] sm:$0x77] }
  0x11   :  { %v85_v3 = vcombine.high %v72_v1, %v72_v1  ;;  %v124_v7 = vpack.c.bf16 %v72_v1, %v72_v1  ;;  %v86_v9 = vcombine.high %v73_v6, %v73_v6  ;;  %v126_v10 = vpack.c.bf16 %v73_v6, %v73_v6  ;;  %v75_v12 = vld [vmem:[%s16420_s0 + $0x18] sm:$0x77]  ;;  %v716_v13 = vld [vmem:[%s16421_s3] sm:$0xff]  ;;  %v8810_v22 = vld [vmem:[%s16420_s0 + $0x28] sm:$0x77] }
  0x12   :  { %v87_v16 = vcombine.high %v74_v11, %v74_v11  ;;  %720 = vperm.xlu1 %9283, %v716_v13   ;;  %v8809_v17 = vld [vmem:[%s16420_s0 + $0x20] sm:$0x77]  ;;  %v128_v20 = vpack.c.bf16 %v74_v11, %v74_v11  ;;  %v88_v21 = vcombine.high %v75_v12, %v75_v12  ;;  %v130_v25 = vpack.c.bf16 %v75_v12, %v75_v12  ;;  %v717_v33 = vld [vmem:[%s16421_s3 + $0x8] sm:$0xff]  ;;  %v9536_v34 = vld [vmem:[%s16420_s0 + $0x30] sm:$0x77]  ;;  %s1611_s3 = smul.f32 0.03125, %s16014_s19 }
  0x13   :  { %v125_v14 = vpack.c.bf16 %v85_v3, %v85_v3  ;;  %v160_v15 = vand.u32 %v9504_v8, %v124_v7  ;;  %v127_v18 = vpack.c.bf16 %v86_v9, %v86_v9  ;;  %v166_v19 = vand.u32 %v9504_v8, %v126_v10  ;;  %v145_v27 = vld [vmem:[%s16422_s10] sm:$0xff]  ;;  %v8812_v38 = vld [vmem:[%s16420_s0 + $0x38] sm:$0x77]  ;;  %s16424_s10 = sld [smem:[#allocation204_spill]] }
  0x14   :  { %v129_v24 = vpack.c.bf16 %v87_v16, %v87_v16  ;;  %v97_v26 = vcombine.high %v8809_v17, %v8809_v17  ;;  %v131_v29 = vpack.c.bf16 %v88_v21, %v88_v21  ;;  %148 = vperm.xlu0 %9282, %v145_v27   ;;  %v98_v32 = vcombine.high %v8810_v22, %v8810_v22  ;;  %v9541_v35 = vld [vmem:[%s16423_s8] sm:$0xf]  ;;  %v8813_v55 = vld [vmem:[%s16425_s25 + $0x8] sm:$0x77]  ;;  %s16426_s0 = sld [smem:[#allocation206_spill]] }
  0x15   :  { %v163_v23 = vand.u32 %v9504_v8, %v125_v14  ;;  %v169_v28 = vand.u32 %v9504_v8, %v127_v18  ;;  %v172_v37 = vand.u32 %v9504_v8, %v128_v20  ;;  %v178_v40 = vand.u32 %v9504_v8, %v130_v25  ;;  %v105_v52 = vld [vmem:[%s16425_s25] sm:$0x77]  ;;  %s9361_s25 = smov 125   ;;  %s1612_s27 = sadd.f32 1.0, %s1611_s3 }
  0x16   :  { %v175_v30 = vand.u32 %v9504_v8, %v129_v24  ;;  %v133_v31 = vpack.c.bf16 %v97_v26, %v97_v26  ;;  %v181_v36 = vand.u32 %v9504_v8, %v131_v29  ;;  %v135_v41 = vpack.c.bf16 %v98_v32, %v98_v32  ;;  %725 = vperm.xlu1 %9283, %v717_v33   ;;  %v114_v24 = vld [vmem:[%s16419_s24] sm:$0x7]  ;;  %s9360_s24 = smov 126  }
  0x17   :  { %236 = vmatprep.subr.bf16.mxu0 %v163_v23  ;;  %277 = vmatprep.subr.bf16.mxu1 %v169_v28  ;;  %v99_v43 = vcombine.high %v9536_v34, %v9536_v34  ;;  %v100_v45 = vcombine.high %v8812_v38, %v8812_v38  ;;  %v132_v46 = vpack.c.bf16 %v8809_v17, %v8809_v17  ;;  %v16034_v20 = vmov 0.0   ;;  %v9295_v23 = vld [vmem:[#allocation2 + $0x54] ss:$0 sps:$4 sm:$0xff]  }
  0x18   :  { %237 = vmatpush1.bf16.msra.mxu0 %v160_v15  ;;  %278 = vmatpush1.bf16.msra.mxu1 %v166_v19  ;;  %v187_v42 = vand.u32 %v9504_v8, %v133_v31  ;;  %v193_v44 = vand.u32 %v9504_v8, %v135_v41  ;;  %v134_v48 = vpack.c.bf16 %v8810_v22, %v8810_v22  ;;  %v9294_v22 = vld [vmem:[#allocation2 + $0x50] ss:$0 sps:$4 sm:$0xff]  }
  0x19   :  { %v1394_v39 = vld [vmem:[%s16424_s10 + $0x8] sm:$0xff]  ;;  %318 = vmatprep.subr.bf16.mxu0 %v175_v30  ;;  %359 = vmatprep.subr.bf16.mxu1 %v181_v36  ;;  %v1393_v47 = vld [vmem:[%s16424_s10] sm:$0xff]  ;;  %v1396_v49 = vld [vmem:[%s16424_s10 + $0x18] sm:$0xff]  ;;  %v137_v50 = vpack.c.bf16 %v99_v43, %v99_v43  ;;  %v139_v51 = vpack.c.bf16 %v100_v45, %v100_v45  ;;  %v184_v53 = vand.u32 %v9504_v8, %v132_v46 }
  0x1a   :  { %1404 = vperm.xlu0 %9282, %v1394_v39   ;;  %1399 = vperm.xlu1 %9283, %v1393_v47   ;;  %v1395_v54 = vld [vmem:[%s16424_s10 + $0x10] sm:$0xff]  ;;  %v190_v56 = vand.u32 %v9504_v8, %v134_v48  ;;  %v109_v58 = vcombine.high %v105_v52, %v105_v52  ;;  %v112_v60 = vcombine.high %v8813_v55, %v8813_v55  ;;  %v1657_v62 = vld [vmem:[%s16426_s0] sm:$0xff]  ;;  %v1658_v0 = vld [vmem:[%s16426_s0 + $0x8] sm:$0xff] }
  0x1b   :  { %8815 = vmatmul.mubr.msk.bf16.vlgmr.msra.gmra.mxu0 %vm151_vm2, %v9541_v35  ;;  %8816 = vmatmul.mubr.msk.bf16.vlgmr.msra.gmra.mxu1 %vm151_vm2, %v9541_v35  ;;  %v199_v57 = vand.u32 %v9504_v8, %v137_v50  ;;  %v205_v59 = vand.u32 %v9504_v8, %v139_v51  ;;  %v136_v61 = vpack.c.bf16 %v9536_v34, %v9536_v34  ;;  %v1659_v5 = vld [vmem:[%s16426_s0 + $0x10] sm:$0xff]  ;;  %v1661_v11 = vld [vmem:[%s16426_s0 + $0x20] sm:$0xff]  ;;  %v1660_v13 = vld [vmem:[%s16426_s0 + $0x18] sm:$0xff] }
  0x1c   :  { %319 = vmatpush1.bf16.msra.mxu0 %v172_v37  ;;  %360 = vmatpush1.bf16.msra.mxu1 %v178_v40  ;;  %v138_v63 = vpack.c.bf16 %v8812_v38, %v8812_v38  ;;  %v141_v1 = vpack.c.bf16 %v109_v58, %v109_v58  ;;  %v143_v3 = vpack.c.bf16 %v112_v60, %v112_v60  ;;  %v1663_v15 = vld [vmem:[%s16426_s0 + $0x30] sm:$0xff]  ;;  %v1662_v17 = vld [vmem:[%s16426_s0 + $0x28] sm:$0xff]  ;;  %v1664_v19 = vld [vmem:[%s16426_s0 + $0x38] sm:$0xff]  ;;  %s9356_s0 = smov 32  }
  0x1d   :  { %336 = vmatprep.mubr.bf16.mxu0 %v16036_v2  ;;  %377 = vmatprep.mubr.bf16.mxu1 %v16036_v2  ;;  %v196_v4 = vand.u32 %v9504_v8, %v136_v61  ;;  %v140_v10 = vpack.c.bf16 %v105_v52, %v105_v52  ;;  %v142_v12 = vpack.c.bf16 %v8813_v55, %v8813_v55 }
  0x1e   :  { %400 = vmatprep.subr.bf16.mxu0 %v187_v42  ;;  %441 = vmatprep.subr.bf16.mxu1 %v193_v44  ;;  %v202_v6 = vand.u32 %v9504_v8, %v138_v63  ;;  %v211_v7 = vand.u32 %v9504_v8, %v141_v1  ;;  %v217_v9 = vand.u32 %v9504_v8, %v143_v3 }
  0x1f   :  { %1414 = vperm.xlu0 %9282, %v1396_v49   ;;  %1409 = vperm.xlu1 %9283, %v1395_v54   ;;  %v208_v14 = vand.u32 %v9504_v8, %v140_v10  ;;  %v214_v16 = vand.u32 %v9504_v8, %v142_v12  ;;  %v9626_v18 = vcombine.low %v16036_v2, %v16036_v2 }
  0x20   :  { %v9640_v21 = vcombine.high %v16036_v2, %v16036_v2 }
  0x23   :  { %8817 = vmatmul.mubr.msk.bf16.vlgmr.msra.gmra.mxu0 %vm151_vm2, %v9541_v35  ;;  %8818 = vmatmul.mubr.msk.bf16.vlgmr.msra.gmra.mxu1 %vm151_vm2, %v9541_v35 }
  0x24   :  { %401 = vmatpush1.bf16.msra.mxu0 %v184_v53  ;;  %442 = vmatpush1.bf16.msra.mxu1 %v190_v56 }
  0x25   :  { %418 = vmatprep.mubr.bf16.mxu0 %v16036_v2  ;;  %459 = vmatprep.mubr.bf16.mxu1 %v16036_v2 }
  0x26   :  { %482 = vmatprep.subr.bf16.mxu0 %v199_v57  ;;  %523 = vmatprep.subr.bf16.mxu1 %v205_v59 }
  0x27   :  { %1667 = vperm.xlu1 %9283, %v1657_v62   ;;  %1672 = vperm.xlu0 %9282, %v1658_v0  }
  0x2b   :  { %8819 = vmatmul.mubr.msk.bf16.vlgmr.msra.gmra.mxu0 %vm151_vm2, %v9541_v35  ;;  %1677 = vperm.xlu1 %9283, %v1659_v5  }
  0x2c   :  { %8820 = vmatmul.mubr.msk.bf16.vlgmr.msra.gmra.mxu1 %vm151_vm2, %v9541_v35  ;;  %483 = vmatpush1.bf16.msra.mxu0 %v196_v4 }
  0x2d   :  { %524 = vmatpush1.bf16.msra.mxu1 %v202_v6  ;;  %500 = vmatprep.mubr.bf16.mxu0 %v16036_v2 }
  0x2e   :  { %541 = vmatprep.mubr.bf16.mxu1 %v16036_v2  ;;  %564 = vmatprep.subr.bf16.mxu0 %v211_v7 }
  0x2f   :  { %605 = vmatprep.subr.bf16.mxu1 %v217_v9  ;;  %1687 = vperm.xlu1 %9283, %v1661_v11  }
  0x30   :  { %1682 = vperm.xlu0 %9282, %v1660_v13  }
  0x33   :  { %8821 = vmatmul.mubr.msk.bf16.vlgmr.msra.gmra.mxu0 %vm151_vm2, %v9541_v35  ;;  %1697 = vperm.xlu1 %9283, %v1663_v15  }
  0x34   :  { %8822 = vmatmul.mubr.msk.bf16.vlgmr.msra.gmra.mxu1 %vm151_vm2, %v9541_v35  ;;  %565 = vmatpush1.bf16.msra.mxu0 %v208_v14 }
  0x35   :  { %606 = vmatpush1.bf16.msra.mxu1 %v214_v16  ;;  %582 = vmatprep.mubr.bf16.mxu0 %v16036_v2 }
  0x36   :  { %623 = vmatprep.mubr.bf16.mxu1 %v16036_v2  ;;  %1692 = vperm.xlu0 %9282, %v1662_v17  }
  0x37   :  { %2288 = vrot.lane.b32.xlu1 %v9626_v18, %s9353_s4  ;;  %9235 = vmatprep.subr.bf16.mxu0 %v16034_v20 }
  0x3a   :  { %1702 = vperm.xlu0 %9282, %v1664_v19   ;;  %v9751_v19 = vld [vmem:[%s16012_s5] sm:$0xff]   ;;  %s9362_s5 = smov 127  }
  0x3b   :  { %8823 = vmatmul.mubr.msk.bf16.vlgmr.msra.gmra.mxu0 %vm151_vm2, %v9541_v35  ;;  %2308 = vrot.lane.b32.xlu1 %v9626_v18, %s9353_s4 }
  0x3c   :  { %8824 = vmatmul.mubr.msk.bf16.vlgmr.msra.gmra.mxu1 %vm151_vm2, %v9541_v35  ;;  %9237 = vmatprep.mubr.msk.bf16.mxu0 %vm9355_vm3, %v16034_v20 }
  0x3d   :  { %833 = vmatprep.mubr.bf16.mxu1 %v16036_v2 }
  0x3e   :  { %2290 = vrot.lane.b32.xlu0 %v9640_v21, %s9353_s4 }
  0x3f   :  { %2328 = vrot.lane.b32.xlu1 %v9294_v22, %s9353_s4 }
  0x42   :  { %2310 = vrot.lane.b32.xlu0 %v9640_v21, %s9353_s4 }
  0x43   :  { %2707 = vrot.lane.b32.xlu1 %v9640_v21, %s9351_s1 }
  0x46   :  { %2705 = vrot.lane.b32.xlu0 %v9626_v18, %s9351_s1 }
  0x47   :  { %2554 = vrot.lane.b32.xlu1 %v9295_v23, %s9356_s0 }
  0x4a   :  { %2725 = vrot.lane.b32.xlu0 %v9626_v18, %s9351_s1 }
  0x4e   :  { %2727 = vrot.lane.b32.xlu0 %v9640_v21, %s9351_s1 }
  0x52   :  { %2617 = vrot.lane.b32.xlu0 %v9295_v23, %s9353_s4 }
  0x82   :  { %v119_v25 = vpop.permute.xlu0 %118 }
  0x83   :  { %v122_v26 = vsel %vm16410_vm4, %v114_v24, %v119_v25 }
  0x84   :  { %v144_v27 = vpack.c.bf16 %v122_v26, %v122_v26 }
  0x86   :  { %v220_v28 = vand.u32 %v9504_v8, %v144_v27 }
  0x88   :  { %9236 = vmatpush3.bf16.msra.mxu0 %v220_v28 }
  0x8b   :  { %9238 = vmatmul.mubr.msk.bf16.vlgmr.msra.gmra.mxu0 %vm151_vm2, %v9541_v35 }
  0x8c   :  { %876 = vmatprep.mubr.bf16.mxu0 %v16036_v2 }
  0x8d   :  { %v9674_v29 = vpop.permute.xlu1 %720 }
  0x8f   :  { %v9676_v30 = vpop.permute.xlu0 %148 }
  0x91   :  { %v9678_v31 = vpop.permute.xlu1 %725 }
  0x95   :  { %v9680_v32 = vpop.permute.xlu0 %1404  ;;  %v9682_v33 = vpop.permute.xlu1 %1399 }
  0x96   :  { %16427 = vst [vmem:[#allocation4_spill] sm:$0xff] %v9680_v32  ;;  %16428 = vst [vmem:[#allocation5_spill] sm:$0xff] %v9682_v33 }
  0x9a   :  { %v9684_v34 = vpop.permute.xlu1 %1409  ;;  %v9686_v36 = vpop.permute.xlu0 %1414 }
  0x9b   :  { %16429 = vst [vmem:[#allocation6_spill] sm:$0xff] %v9684_v34  ;;  %16430 = vst [vmem:[#allocation7_spill] sm:$0xff] %v9686_v36 }
  0xa2   :  { %v9688_v8 = vpop.permute.xlu1 %1667  ;;  %v9690_v37 = vpop.permute.xlu0 %1672 }
  0xa3   :  { %16431 = vst [vmem:[#allocation8_spill] sm:$0xff] %v9688_v8  ;;  %16432 = vst [vmem:[#allocation9_spill] sm:$0xff] %v9690_v37 }
  0xa6   :  { %v9692_v35 = vpop.permute.xlu1 %1677 }
  0xa7   :  { %16433 = vst [vmem:[#allocation10_spill] sm:$0xff] %v9692_v35 }
  0xaa   :  { %v9694_v38 = vpop.permute.xlu1 %1687 }
  0xab   :  { %16434 = vst [vmem:[#allocation11_spill] sm:$0xff] %v9694_v38  ;;  %v9696_v39 = vpop.permute.xlu0 %1682 }
  0xac   :  { %16435 = vst [vmem:[#allocation12_spill] sm:$0xff] %v9696_v39 }
  0xae   :  { %v9698_v40 = vpop.permute.xlu1 %1697 }
  0xaf   :  { %16436 = vst [vmem:[#allocation13_spill] sm:$0xff] %v9698_v40 }
  0xb1   :  { %v9700_v41 = vpop.permute.xlu0 %1692 }
  0xb2   :  { %16437 = vst [vmem:[#allocation14_spill] sm:$0xff] %v9700_v41  ;;  %v2289_v42 = vpop.permute.xlu1 %2288 }
  0xb5   :  { %v9702_v43 = vpop.permute.xlu0 %1702 }
  0xb6   :  { %16438 = vst [vmem:[#allocation15_spill] sm:$0xff] %v9702_v43  ;;  %v9704_v44 = vpop.permute.xlu1 %2308 }
  0xb7   :  { %16439 = vst [vmem:[#allocation16_spill] sm:$0xff] %v9704_v44 }
  0xb9   :  { %v9706_v45 = vpop.permute.xlu0 %2290 }
  0xba   :  { %v2331_v46 = vsel %vm16262_vm5, %v2289_v42, %v9706_v45  ;;  %v9710_v47 = vpop.permute.xlu1 %2328 }
  0xbb   :  { %16440 = vst [vmem:[#allocation17_spill] sm:$0xff] %v9710_v47  ;;  %v2750_v48 = vsel %vm737_vm6, %v9626_v18, %v2331_v46 }
  0xbc   :  { %3007 = vrot.lane.b32.xlu1 %v2750_v48, %s9351_s1 }
  0xbd   :  { %v9715_v49 = vpop.permute.xlu0 %2310 }
  0xbe   :  { %16441 = vst [vmem:[#allocation18_spill] sm:$0xff] %v9715_v49  ;;  %v2341_v50 = vsel %vm16262_vm5, %v9704_v44, %v9715_v49  ;;  %v9722_v52 = vpop.permute.xlu1 %2707 }
  0xbf   :  { %v2780_v51 = vsel %vm737_vm6, %v9626_v18, %v2341_v50  ;;  %16442 = vst [vmem:[#allocation19_spill] sm:$0xff] %v9722_v52 }
  0xc0   :  { %3027 = vrot.lane.b32.xlu1 %v2780_v51, %s9351_s1 }
  0xc1   :  { %v9725_v53 = vpop.permute.xlu0 %2705 }
  0xc2   :  { %v2737_v54 = vsel %vm16410_vm4, %v9725_v53, %v9722_v52 }
  0xc3   :  { %3151 = vrot.lane.b32.xlu0 %v2737_v54, %s9351_s1 }
  0xdb   :  { %v256_v55 = vpop.f32.mrf.mxu0  ;;  %v297_v57 = vpop.f32.mrf.mxu1 }
  0xdc   :  { %v257_v56 = vadd.f32 %v256_v55, %v9676_v30  ;;  %v298_v58 = vadd.f32 %v297_v57, %v9676_v30 }
  0xdd   :  { %v258_v59 = vpop.f32.mrf.mxu0  ;;  %v299_v62 = vpop.f32.mrf.mxu1 }
  0xde   :  { %v672_v60 = vmax.f32 %v257_v56, 0.0  ;;  %v259_v61 = vadd.f32 %v258_v59, %v9676_v30  ;;  %v674_v63 = vmax.f32 %v298_v58, 0.0  ;;  %v300_v0 = vadd.f32 %v299_v62, %v9676_v30 }
  0xdf   :  { %v260_v1 = vpop.f32.mrf.mxu0  ;;  %v301_v5 = vpop.f32.mrf.mxu1 }
  0xe0   :  { %v9735_v3 = vpack.c.bf16 %v672_v60, %v672_v60  ;;  %v673_v4 = vmax.f32 %v259_v61, 0.0  ;;  %v9737_v6 = vpack.c.bf16 %v674_v63, %v674_v63  ;;  %v675_v7 = vmax.f32 %v300_v0, 0.0 }
  0xe1   :  { %v261_v9 = vpop.f32.mrf.mxu0  ;;  %v302_v12 = vpop.f32.mrf.mxu1 }
  0xe2   :  { %v9739_v10 = vpack.c.bf16 %v673_v4, %v673_v4  ;;  %v9214_v11 = vpack.c.bf16 %v673_v4, %v672_v60  ;;  %v9741_v13 = vpack.c.bf16 %v675_v7, %v675_v7  ;;  %v9215_v14 = vpack.c.bf16 %v675_v7, %v674_v63  ;;  %2292 = vrot.lane.b32.xlu1 %v9735_v3, %s9353_s4 }
  0xe3   :  { %v338_v15 = vpop.f32.mrf.mxu0  ;;  %v379_v17 = vpop.f32.mrf.mxu1  ;;  %v739_v18 = vsel %vm737_vm6, %v9735_v3, 0  ;;  %v745_v24 = vsel %vm737_vm6, %v9737_v6, 0 }
  0xe4   :  { %16443 = vst [vmem:[#allocation20_spill] sm:$0xff] %v9741_v13  ;;  %1898 = vst [vmem:[#allocation2 + $0x8] sm:$0xff] %v9214_v11  ;;  %v339_v16 = vadd.f32 %v338_v15, %v9676_v30  ;;  %8827 = vmatprep.subr.msk.bf16.mxu1 %vm737_vm6, %v9739_v10  ;;  %v380_v22 = vadd.f32 %v379_v17, %v9676_v30  ;;  %8829 = vmatprep.subr.msk.bf16.mxu0 %vm737_vm6, %v9741_v13 }
  0xe5   :  { %1899 = vst [vmem:[#allocation2 + $0x10] sm:$0xff] %v9215_v14  ;;  %v340_v23 = vpop.f32.mrf.mxu0  ;;  %816 = vmatpush1.bf16.msra.mxu1 %v739_v18  ;;  %v381_v27 = vpop.f32.mrf.mxu1  ;;  %859 = vmatpush1.bf16.msra.mxu0 %v745_v24 }
  0xe6   :  { %v676_v25 = vmax.f32 %v339_v16, 0.0  ;;  %v341_v26 = vadd.f32 %v340_v23, %v9676_v30  ;;  %2294 = vrot.lane.b32.xlu0 %v9739_v10, %s9353_s4  ;;  %v678_v28 = vmax.f32 %v380_v22, 0.0  ;;  %v382_v42 = vadd.f32 %v381_v27, %v9676_v30  ;;  %2296 = vrot.lane.b32.xlu1 %v9737_v6, %s9353_s4 }
  0xe7   :  { %v342_v46 = vpop.f32.mrf.mxu0  ;;  %v383_v51 = vpop.f32.mrf.mxu1 }
  0xe8   :  { %v9764_v48 = vpack.c.bf16 %v676_v25, %v676_v25  ;;  %v677_v50 = vmax.f32 %v341_v26, 0.0  ;;  %8828 = vmatmul.mubr.msk.bf16.vlgmr.msra.gmra.mxu1 %vm733_vm7, %v9751_v19  ;;  %v9768_v54 = vpack.c.bf16 %v678_v28, %v678_v28  ;;  %v679_v55 = vmax.f32 %v382_v42, 0.0  ;;  %8830 = vmatmul.mubr.msk.bf16.vlgmr.msra.gmra.mxu0 %vm733_vm7, %v9751_v19 }
  0xe9   :  { %v343_v56 = vpop.f32.mrf.mxu0  ;;  %919 = vmatprep.mubr.bf16.mxu1 %v16036_v2  ;;  %v384_v59 = vpop.f32.mrf.mxu1  ;;  %962 = vmatprep.mubr.bf16.mxu0 %v16036_v2 }
  0xea   :  { %16444 = vst [vmem:[#allocation21_spill] sm:$0xff] %v9764_v48  ;;  %16445 = vst [vmem:[#allocation22_spill] sm:$0xff] %v9768_v54  ;;  %v9773_v57 = vpack.c.bf16 %v677_v50, %v677_v50  ;;  %v9216_v58 = vpack.c.bf16 %v677_v50, %v676_v25  ;;  %2298 = vrot.lane.b32.xlu0 %v9741_v13, %s9353_s4  ;;  %v9778_v61 = vpack.c.bf16 %v679_v55, %v679_v55 }
  0xeb   :  { %v2214_v60 = vld [vmem:[#allocation2 + $0x4] sm:$0xff]  ;;  %v9217_v62 = vpack.c.bf16 %v679_v55, %v678_v28  ;;  %v420_v63 = vpop.f32.mrf.mxu0  ;;  %v751_v7 = vsel %vm737_vm6, %v9764_v48, 0  ;;  %v757_v14 = vsel %vm737_vm6, %v9768_v54, 0 }
  0xec   :  { %16446 = vst [vmem:[#allocation23_spill] sm:$0xff] %v9773_v57  ;;  %16447 = vst [vmem:[#allocation24_spill] sm:$0xff] %v9778_v61  ;;  %v9782_v0 = vcombine.low %v2214_v60, %v2214_v60  ;;  %v9784_v1 = vcombine.high %v2214_v60, %v2214_v60  ;;  %v421_v4 = vadd.f32 %v420_v63, %v9676_v30  ;;  %v461_v5 = vpop.f32.mrf.mxu1  ;;  %8831 = vmatprep.subr.msk.bf16.mxu1 %vm737_vm6, %v9773_v57  ;;  %v2215_v9 = vld [vmem:[#allocation2 + $0xc] sm:$0xff] }
  0xed   :  { %1900 = vst [vmem:[#allocation2 + $0x18] sm:$0xff] %v9216_v58  ;;  %1901 = vst [vmem:[#allocation2 + $0x20] sm:$0xff] %v9217_v62  ;;  %v462_v11 = vadd.f32 %v461_v5, %v9676_v30  ;;  %8833 = vmatprep.subr.msk.bf16.mxu0 %vm737_vm6, %v9778_v61  ;;  %v422_v12 = vpop.f32.mrf.mxu0  ;;  %902 = vmatpush1.bf16.msra.mxu1 %v751_v7  ;;  %v9802_v24 = vcombine.low %v2215_v9, %v2215_v9 }
  0xee   :  { %16448 = vst [vmem:[#allocation25_spill] sm:$0xff] %v9782_v0  ;;  %16449 = vst [vmem:[#allocation26_spill] sm:$0xff] %v9784_v1  ;;  %v680_v15 = vmax.f32 %v421_v4, 0.0  ;;  %v423_v16 = vadd.f32 %v422_v12, %v9676_v30  ;;  %v463_v17 = vpop.f32.mrf.mxu1  ;;  %945 = vmatpush1.bf16.msra.mxu0 %v757_v14  ;;  %2401 = vrot.lane.b32.xlu0 %v9782_v0, %s9351_s1  ;;  %v9806_v27 = vcombine.high %v2215_v9, %v2215_v9 }
  0xef   :  { %v682_v18 = vmax.f32 %v462_v11, 0.0  ;;  %v464_v22 = vadd.f32 %v463_v17, %v9676_v30  ;;  %v424_v23 = vpop.f32.mrf.mxu0  ;;  %2403 = vrot.lane.b32.xlu1 %v9784_v1, %s9351_s1  ;;  %16450 = vst [vmem:[#allocation27_spill] sm:$0xff] %v9802_v24 }
  0xf0   :  { %v681_v25 = vmax.f32 %v423_v16, 0.0  ;;  %v465_v26 = vpop.f32.mrf.mxu1  ;;  %8832 = vmatmul.mubr.msk.bf16.vlgmr.msra.gmra.mxu1 %vm733_vm7, %v9751_v19  ;;  %16451 = vst [vmem:[#allocation28_spill] sm:$0xff] %v9806_v27  ;;  %v9808_v28 = vpack.c.bf16 %v680_v15, %v680_v15 }
  0xf1   :  { %v9810_v42 = vpack.c.bf16 %v682_v18, %v682_v18  ;;  %v683_v46 = vmax.f32 %v464_v22, 0.0  ;;  %8834 = vmatmul.mubr.msk.bf16.vlgmr.msra.gmra.mxu0 %vm733_vm7, %v9751_v19  ;;  %v425_v50 = vpop.f32.mrf.mxu0  ;;  %1005 = vmatprep.mubr.bf16.mxu1 %v16036_v2 }
  0xf2   :  { %16452 = vst [vmem:[#allocation29_spill] sm:$0xff] %v9808_v28  ;;  %v9815_v51 = vpack.c.bf16 %v681_v25, %v681_v25  ;;  %v9218_v55 = vpack.c.bf16 %v681_v25, %v680_v15  ;;  %v466_v56 = vpop.f32.mrf.mxu1  ;;  %1048 = vmatprep.mubr.bf16.mxu0 %v16036_v2  ;;  %2405 = vrot.lane.b32.xlu0 %v9802_v24, %s9351_s1  ;;  %v763_v5 = vsel %vm737_vm6, %v9808_v28, 0 }
  0xf3   :  { %16453 = vst [vmem:[#allocation30_spill] sm:$0xff] %v9810_v42  ;;  %v9820_v58 = vpack.c.bf16 %v683_v46, %v683_v46  ;;  %v9219_v59 = vpack.c.bf16 %v683_v46, %v682_v18  ;;  %v502_v60 = vpop.f32.mrf.mxu0  ;;  %2407 = vrot.lane.b32.xlu1 %v9806_v27, %s9351_s1  ;;  %v769_v7 = vsel %vm737_vm6, %v9810_v42, 0 }
  0xf4   :  { %16454 = vst [vmem:[#allocation31_spill] sm:$0xff] %v9815_v51  ;;  %1927 = vst [vmem:[#allocation2 + $0x30] sm:$0xff] %v9218_v55  ;;  %v503_v62 = vadd.f32 %v502_v60, %v9676_v30  ;;  %v543_v63 = vpop.f32.mrf.mxu1  ;;  %8835 = vmatprep.subr.msk.bf16.mxu1 %vm737_vm6, %v9815_v51 }
  0xf5   :  { %16455 = vst [vmem:[#allocation32_spill] sm:$0xff] %v9820_v58  ;;  %1928 = vst [vmem:[#allocation2 + $0x38] sm:$0xff] %v9219_v59  ;;  %8837 = vmatprep.subr.msk.bf16.mxu0 %vm737_vm6, %v9820_v58  ;;  %v504_v4 = vpop.f32.mrf.mxu0  ;;  %v544_v11 = vadd.f32 %v543_v63, %v9676_v30  ;;  %988 = vmatpush1.bf16.msra.mxu1 %v763_v5 }
  0xf6   :  { %v684_v9 = vmax.f32 %v503_v62, 0.0  ;;  %v505_v12 = vadd.f32 %v504_v4, %v9676_v30  ;;  %v545_v14 = vpop.f32.mrf.mxu1  ;;  %1031 = vmatpush1.bf16.msra.mxu0 %v769_v7  ;;  %2514 = vrot.lane.b32.xlu0 %v9782_v0, %s9356_s0 }
  0xf7   :  { %v546_v15 = vadd.f32 %v545_v14, %v9676_v30  ;;  %v506_v16 = vpop.f32.mrf.mxu0  ;;  %2516 = vrot.lane.b32.xlu1 %v9784_v1, %s9356_s0  ;;  %v686_v18 = vmax.f32 %v544_v11, 0.0 }
  0xf8   :  { %v9840_v17 = vpack.c.bf16 %v684_v9, %v684_v9  ;;  %v685_v22 = vmax.f32 %v505_v12, 0.0  ;;  %v547_v23 = vpop.f32.mrf.mxu1  ;;  %8836 = vmatmul.mubr.msk.bf16.vlgmr.msra.gmra.mxu1 %vm733_vm7, %v9751_v19 }
  0xf9   :  { %v687_v25 = vmax.f32 %v546_v15, 0.0  ;;  %8838 = vmatmul.mubr.msk.bf16.vlgmr.msra.gmra.mxu0 %vm733_vm7, %v9751_v19  ;;  %v507_v26 = vpop.f32.mrf.mxu0  ;;  %v9846_v46 = vpack.c.bf16 %v686_v18, %v686_v18  ;;  %1091 = vmatprep.mubr.bf16.mxu1 %v16036_v2 }
  0xfa   :  { %16456 = vst [vmem:[#allocation33_spill] sm:$0xff] %v9840_v17  ;;  %v9848_v50 = vpack.c.bf16 %v685_v22, %v685_v22  ;;  %v9220_v55 = vpack.c.bf16 %v685_v22, %v684_v9  ;;  %v548_v56 = vpop.f32.mrf.mxu1  ;;  %1134 = vmatprep.mubr.bf16.mxu0 %v16036_v2  ;;  %2518 = vrot.lane.b32.xlu0 %v9802_v24, %s9356_s0  ;;  %v775_v5 = vsel %vm737_vm6, %v9840_v17, 0 }
  0xfb   :  { %16457 = vst [vmem:[#allocation34_spill] sm:$0xff] %v9846_v46  ;;  %v9852_v59 = vpack.c.bf16 %v687_v25, %v687_v25  ;;  %v9221_v60 = vpack.c.bf16 %v687_v25, %v686_v18  ;;  %v584_v62 = vpop.f32.mrf.mxu0  ;;  %2520 = vrot.lane.b32.xlu1 %v9806_v27, %s9356_s0  ;;  %v781_v11 = vsel %vm737_vm6, %v9846_v46, 0 }
  0xfc   :  { %16458 = vst [vmem:[#allocation35_spill] sm:$0xff] %v9848_v50  ;;  %1929 = vst [vmem:[#allocation2 + $0x40] sm:$0xff] %v9220_v55  ;;  %v585_v63 = vadd.f32 %v584_v62, %v9676_v30  ;;  %v625_v4 = vpop.f32.mrf.mxu1  ;;  %8839 = vmatprep.subr.msk.bf16.mxu1 %vm737_vm6, %v9848_v50 }
  0xfd   :  { %16459 = vst [vmem:[#allocation36_spill] sm:$0xff] %v9852_v59  ;;  %1930 = vst [vmem:[#allocation2 + $0x48] sm:$0xff] %v9221_v60  ;;  %v626_v7 = vadd.f32 %v625_v4, %v9676_v30  ;;  %8841 = vmatprep.subr.msk.bf16.mxu0 %vm737_vm6, %v9852_v59  ;;  %v586_v9 = vpop.f32.mrf.mxu0  ;;  %1074 = vmatpush1.bf16.msra.mxu1 %v775_v5 }
  0xfe   :  { %v688_v12 = vmax.f32 %v585_v63, 0.0  ;;  %v587_v14 = vadd.f32 %v586_v9, %v9676_v30  ;;  %v627_v15 = vpop.f32.mrf.mxu1  ;;  %1117 = vmatpush1.bf16.msra.mxu0 %v781_v11  ;;  %2689 = vrot.lane.b32.xlu0 %v9735_v3, %s9351_s1  ;;  %v2216_v9 = vld [vmem:[#allocation2 + $0x14] sm:$0xff] }
  0xff   :  { %v690_v16 = vmax.f32 %v626_v7, 0.0  ;;  %v628_v18 = vadd.f32 %v627_v15, %v9676_v30  ;;  %2691 = vrot.lane.b32.xlu1 %v9739_v10, %s9351_s1  ;;  %v588_v22 = vpop.f32.mrf.mxu0  ;;  %v9912_v11 = vcombine.low %v2216_v9, %v2216_v9 }
 0x100   :  { %v689_v23 = vmax.f32 %v587_v14, 0.0  ;;  %v629_v25 = vpop.f32.mrf.mxu1  ;;  %v711_v26 = vpack.c.bf16 %v688_v12, %v688_v12  ;;  %8840 = vmatmul.mubr.msk.bf16.vlgmr.msra.gmra.mxu1 %vm733_vm7, %v9751_v19  ;;  %v9914_v12 = vcombine.high %v2216_v9, %v2216_v9  ;;  %v2217_v14 = vld [vmem:[#allocation2 + $0x1c] sm:$0xff] }
 0x101   :  { %v713_v55 = vpack.c.bf16 %v690_v16, %v690_v16  ;;  %v691_v56 = vmax.f32 %v628_v18, 0.0  ;;  %8842 = vmatmul.mubr.msk.bf16.vlgmr.msra.gmra.mxu0 %vm733_vm7, %v9751_v19  ;;  %v589_v60 = vpop.f32.mrf.mxu0  ;;  %1177 = vmatprep.mubr.bf16.mxu1 %v16036_v2  ;;  %16460 = vst [vmem:[#allocation37_spill] sm:$0xff] %v9912_v11  ;;  %v9920_v15 = vcombine.low %v2217_v14, %v2217_v14  ;;  %v2218_v18 = vld [vmem:[#allocation2 + $0x24] sm:$0xff]  ;;  %v9968_v25 = vpop.permute.xlu0 %2725 }
 0x102   :  { %v712_v62 = vpack.c.bf16 %v689_v23, %v689_v23  ;;  %1220 = vmatprep.mubr.bf16.mxu0 %v16036_v2  ;;  %v630_v63 = vpop.f32.mrf.mxu1  ;;  %2693 = vrot.lane.b32.xlu0 %v9737_v6, %s9351_s1  ;;  %v787_v5 = vsel %vm737_vm6, %v711_v26, 0  ;;  %16461 = vst [vmem:[#allocation38_spill] sm:$0xff] %v9914_v12  ;;  %v9922_v16 = vcombine.high %v2217_v14, %v2217_v14  ;;  %16466 = vst [vmem:[#allocation43_spill] sm:$0xff] %v9968_v25  ;;  %v2219_v26 = vld [vmem:[#allocation2 + $0x2c] sm:$0xff] }
 0x103   :  { %v714_v4 = vpack.c.bf16 %v691_v56, %v691_v56  ;;  %2695 = vrot.lane.b32.xlu1 %v9741_v13, %s9351_s1  ;;  %v793_v7 = vsel %vm737_vm6, %v713_v55, 0  ;;  %16462 = vst [vmem:[#allocation39_spill] sm:$0xff] %v9920_v15  ;;  %v9928_v22 = vcombine.low %v2218_v18, %v2218_v18  ;;  %v9930_v23 = vcombine.high %v2218_v18, %v2218_v18  ;;  %v2220_v63 = vld [vmem:[#allocation2 + $0x34] sm:$0xff]  ;;  %v2221_v37 = vld [vmem:[#allocation2 + $0x3c] sm:$0xff] }
 0x104   :  { %8843 = vmatprep.subr.msk.bf16.mxu1 %vm737_vm6, %v712_v62  ;;  %16463 = vst [vmem:[#allocation40_spill] sm:$0xff] %v9922_v16  ;;  %v9980_v56 = vcombine.low %v2219_v26, %v2219_v26  ;;  %v9982_v60 = vcombine.high %v2219_v26, %v2219_v26  ;;  %v9984_v62 = vpop.permute.xlu1 %2554  ;;  %v9994_v9 = vcombine.high %v2220_v63, %v2220_v63  ;;  %v2222_v36 = vld [vmem:[#allocation2 + $0x44] sm:$0xff] }
 0x105   :  { %8845 = vmatprep.subr.msk.bf16.mxu0 %vm737_vm6, %v714_v4  ;;  %1160 = vmatpush1.bf16.msra.mxu1 %v787_v5  ;;  %16464 = vst [vmem:[#allocation41_spill] sm:$0xff] %v9928_v22  ;;  %16465 = vst [vmem:[#allocation42_spill] sm:$0xff] %v9930_v23  ;;  %v9978_v55 = vpop.permute.xlu0 %2727  ;;  %v10063_v35 = vcombine.high %v2221_v37, %v2221_v37  ;;  %v10069_v33 = vcombine.high %v2222_v36, %v2222_v36 }
 0x106   :  { %1203 = vmatpush1.bf16.msra.mxu0 %v793_v7  ;;  %2581 = vrot.lane.b32.xlu0 %v9802_v24, %s9353_s4  ;;  %16467 = vst [vmem:[#allocation44_spill] sm:$0xff] %v9978_v55  ;;  %16468 = vst [vmem:[#allocation45_spill] sm:$0xff] %v9980_v56  ;;  %v9992_v7 = vcombine.low %v2220_v63, %v2220_v63 }
 0x107   :  { %2579 = vrot.lane.b32.xlu1 %v9784_v1, %s9353_s4  ;;  %9241 = vmatprep.subr.bf16.mxu1 %v16034_v20  ;;  %16469 = vst [vmem:[#allocation46_spill] sm:$0xff] %v9982_v60  ;;  %16470 = vst [vmem:[#allocation47_spill] sm:$0xff] %v9984_v62 }
 0x108   :  { %8844 = vmatmul.mubr.msk.bf16.vlgmr.msra.gmra.mxu1 %vm733_vm7, %v9751_v19  ;;  %16472 = vst [vmem:[#allocation49_spill] sm:$0xff] %v9992_v7  ;;  %16473 = vst [vmem:[#allocation50_spill] sm:$0xff] %v9994_v9 }
 0x109   :  { %8846 = vmatmul.mubr.msk.bf16.vlgmr.msra.gmra.mxu0 %vm733_vm7, %v9751_v19  ;;  %9243 = vmatprep.mubr.msk.bf16.mxu1 %vm9355_vm3, %v16034_v20  ;;  %v9990_v5 = vpop.permute.xlu0 %2617  ;;  %16478 = vst [vmem:[#allocation54_spill] sm:$0xff] %v10063_v35  ;;  %16479 = vst [vmem:[#allocation55_spill] sm:$0xff] %v10069_v33 }
 0x10a   :  { %1466 = vmatprep.mubr.bf16.mxu0 %v16036_v2  ;;  %2577 = vrot.lane.b32.xlu0 %v9782_v0, %s9353_s4  ;;  %16471 = vst [vmem:[#allocation48_spill] sm:$0xff] %v9990_v5  ;;  %v10085_v5 = vcombine.low %v2222_v36, %v2222_v36 }
 0x10b   :  { %2583 = vrot.lane.b32.xlu1 %v9806_v27, %s9353_s4 }
 0x10c   :  { %16482 = vst [vmem:[#allocation58_spill] sm:$0xff] %v10085_v5 }
 0x10e   :  { %2302 = vrot.lane.b32.xlu0 %v9773_v57, %s9353_s4 }
 0x10f   :  { %2300 = vrot.lane.b32.xlu1 %v9764_v48, %s9353_s4 }
 0x112   :  { %2306 = vrot.lane.b32.xlu0 %v9778_v61, %s9353_s4 }
 0x113   :  { %2304 = vrot.lane.b32.xlu1 %v9768_v54, %s9353_s4 }
 0x116   :  { %2409 = vrot.lane.b32.xlu0 %v9912_v11, %s9351_s1 }
 0x117   :  { %2411 = vrot.lane.b32.xlu1 %v9914_v12, %s9351_s1 }
 0x11a   :  { %2413 = vrot.lane.b32.xlu0 %v9920_v15, %s9351_s1 }
 0x11b   :  { %2415 = vrot.lane.b32.xlu1 %v9922_v16, %s9351_s1 }
 0x11e   :  { %2417 = vrot.lane.b32.xlu0 %v9928_v22, %s9351_s1 }
 0x11f   :  { %2419 = vrot.lane.b32.xlu1 %v9930_v23, %s9351_s1 }
 0x122   :  { %2522 = vrot.lane.b32.xlu0 %v9912_v11, %s9356_s0 }
 0x123   :  { %2524 = vrot.lane.b32.xlu1 %v9914_v12, %s9356_s0 }
 0x126   :  { %2526 = vrot.lane.b32.xlu0 %v9920_v15, %s9356_s0 }
 0x127   :  { %2528 = vrot.lane.b32.xlu1 %v9922_v16, %s9356_s0 }
 0x12a   :  { %2530 = vrot.lane.b32.xlu0 %v9928_v22, %s9356_s0 }
 0x12b   :  { %2532 = vrot.lane.b32.xlu1 %v9930_v23, %s9356_s0 }
 0x12e   :  { %2697 = vrot.lane.b32.xlu0 %v9764_v48, %s9351_s1  ;;  %v9997_v20 = vpop.permute.xlu1 %3007 }
 0x12f   :  { %2585 = vrot.lane.b32.xlu1 %v9912_v11, %s9353_s4  ;;  %16474 = vst [vmem:[#allocation51_spill] sm:$0xff] %v9997_v20 }
 0x132   :  { %2587 = vrot.lane.b32.xlu0 %v9914_v12, %s9353_s4 }
 0x133   :  { %2699 = vrot.lane.b32.xlu1 %v9773_v57, %s9351_s1 }
 0x135   :  { %v10003_v43 = vpop.permute.xlu0 %3151 }
 0x136   :  { %2701 = vrot.lane.b32.xlu0 %v9768_v54, %s9351_s1  ;;  %16475 = vst [vmem:[#allocation52_spill] sm:$0xff] %v10003_v43  ;;  %v10075_v43 = vcombine.low %v2221_v37, %v2221_v37 }
 0x137   :  { %2703 = vrot.lane.b32.xlu1 %v9778_v61, %s9351_s1 }
 0x138   :  { %16480 = vst [vmem:[#allocation56_spill] sm:$0xff] %v10075_v43 }
 0x13a   :  { %2591 = vrot.lane.b32.xlu0 %v9922_v16, %s9353_s4 }
 0x13b   :  { %2589 = vrot.lane.b32.xlu1 %v9920_v15, %s9353_s4 }
 0x13e   :  { %2595 = vrot.lane.b32.xlu0 %v9930_v23, %s9353_s4 }
 0x13f   :  { %2593 = vrot.lane.b32.xlu1 %v9928_v22, %s9353_s4 }
 0x142   :  { %2314 = vrot.lane.b32.xlu0 %v9815_v51, %s9353_s4 }
 0x143   :  { %2312 = vrot.lane.b32.xlu1 %v9808_v28, %s9353_s4 }
 0x146   :  { %2318 = vrot.lane.b32.xlu0 %v9820_v58, %s9353_s4 }
 0x147   :  { %2316 = vrot.lane.b32.xlu1 %v9810_v42, %s9353_s4 }
 0x14a   :  { %2421 = vrot.lane.b32.xlu0 %v9980_v56, %s9351_s1 }
 0x14b   :  { %2423 = vrot.lane.b32.xlu1 %v9982_v60, %s9351_s1  ;;  %v666_v4 = vpop.f32.mrf.mxu0 }
 0x14c   :  { %v667_v14 = vadd.f32 %v666_v4, %v9676_v30  ;;  %v10010_v30 = vpop.permute.xlu1 %3027 }
 0x14d   :  { %v9239_v18 = vpop.f32.mrf.mxu0  ;;  %16476 = vst [vmem:[#allocation53_spill] sm:$0xff] %v10010_v30  ;;  %v2223_v30 = vld [vmem:[#allocation2 + $0x4c] sm:$0xff] }
 0x14e   :  { %v692_v26 = vmax.f32 %v667_v14, 0.0  ;;  %2425 = vrot.lane.b32.xlu0 %v9992_v7, %s9351_s1  ;;  %v10079_v20 = vcombine.high %v2223_v30, %v2223_v30  ;;  %v10093_v37 = vcombine.low %v2223_v30, %v2223_v30 }
 0x14f   :  { %2427 = vrot.lane.b32.xlu1 %v9994_v9, %s9351_s1  ;;  %v669_v2 = vpop.f32.mrf.mxu0 }
 0x150   :  { %v715_v41 = vpack.c.bf16 %v692_v26, %v692_v26  ;;  %16481 = vst [vmem:[#allocation57_spill] sm:$0xff] %v10079_v20  ;;  %16483 = vst [vmem:[#allocation59_spill] sm:$0xff] %v10093_v37 }
 0x151   :  { %v9240_v38 = vpop.f32.mrf.mxu0 }
 0x152   :  { %v799_v63 = vsel %vm737_vm6, %v715_v41, 0  ;;  %2534 = vrot.lane.b32.xlu0 %v9980_v56, %s9356_s0  ;;  %v16477_v38 = vmov 0  }
 0x153   :  { %2536 = vrot.lane.b32.xlu1 %v9982_v60, %s9356_s0  ;;  %9242 = vmatpush3.bf16.msra.mxu1 %v799_v63 }
 0x154   :  { %v10021_v41 = vpop.permute.xlu1 %2292 }
 0x156   :  { %9244 = vmatmul.mubr.msk.bf16.vlgmr.msra.gmra.mxu1 %vm733_vm7, %v9751_v19  ;;  %2709 = vrot.lane.b32.xlu0 %v9808_v28, %s9351_s1 }
 0x157   :  { %2711 = vrot.lane.b32.xlu1 %v9815_v51, %s9351_s1  ;;  %1519 = vmatprep.mubr.bf16.mxu1 %v16477_v38 }
 0x158   :  { %v10018_v2 = vpop.permute.xlu0 %2294  ;;  %v10029_v19 = vpop.permute.xlu1 %2296 }
 0x15a   :  { %2713 = vrot.lane.b32.xlu0 %v9810_v42, %s9351_s1 }
 0x15b   :  { %2597 = vrot.lane.b32.xlu1 %v9980_v56, %s9353_s4 }
 0x15c   :  { %v10027_v4 = vpop.permute.xlu0 %2298 }
 0x15e   :  { %2599 = vrot.lane.b32.xlu0 %v9982_v60, %s9353_s4 }
 0x15f   :  { %2601 = vrot.lane.b32.xlu1 %v9992_v7, %s9353_s4 }
 0x160   :  { %v10035_v14 = vpop.permute.xlu0 %2401 }
 0x161   :  { %v10037_v18 = vpop.permute.xlu1 %2403 }
 0x162   :  { %2603 = vrot.lane.b32.xlu0 %v9994_v9, %s9353_s4 }
 0x163   :  { %2538 = vrot.lane.b32.xlu1 %v9992_v7, %s9356_s0 }
 0x164   :  { %v10043_v26 = vpop.permute.xlu0 %2405 }
 0x165   :  { %v10045_v63 = vpop.permute.xlu1 %2407 }
 0x166   :  { %2715 = vrot.lane.b32.xlu0 %v9820_v58, %s9351_s1 }
 0x167   :  { %2320 = vrot.lane.b32.xlu1 %v9840_v17, %s9353_s4 }
 0x168   :  { %v10051_v38 = vpop.permute.xlu0 %2514 }
 0x169   :  { %v10053_v40 = vpop.permute.xlu1 %2516 }
 0x16a   :  { %2540 = vrot.lane.b32.xlu0 %v9994_v9, %s9356_s0 }
 0x16b   :  { %2324 = vrot.lane.b32.xlu1 %v9846_v46, %s9353_s4 }
 0x16c   :  { %v10059_v39 = vpop.permute.xlu0 %2518 }
 0x16d   :  { %v10061_v8 = vpop.permute.xlu1 %2520 }
 0x16e   :  { %2322 = vrot.lane.b32.xlu0 %v9848_v50, %s9353_s4 }
 0x16f   :  { %2431 = vrot.lane.b32.xlu1 %v10063_v35, %s9351_s1 }
 0x170   :  { %v2690_v34 = vpop.permute.xlu0 %2689 }
 0x171   :  { %v2692_v32 = vpop.permute.xlu1 %2691 }
 0x172   :  { %2326 = vrot.lane.b32.xlu0 %v9852_v59, %s9353_s4  ;;  %v2729_v56 = vsel %vm16410_vm4, %v2690_v34, %v2692_v32 }
 0x173   :  { %2435 = vrot.lane.b32.xlu1 %v10069_v33, %s9351_s1 }
 0x174   :  { %v2694_v47 = vpop.permute.xlu0 %2693 }
 0x175   :  { %v10077_v62 = vpop.permute.xlu1 %2695 }
 0x176   :  { %2429 = vrot.lane.b32.xlu0 %v10075_v43, %s9351_s1 }
 0x177   :  { %2439 = vrot.lane.b32.xlu1 %v10079_v20, %s9351_s1 }
 0x178   :  { %v2582_v55 = vpop.permute.xlu0 %2581 }
 0x179   :  { %v10087_v25 = vpop.permute.xlu1 %2579 }
 0x17a   :  { %2433 = vrot.lane.b32.xlu0 %v10085_v5, %s9351_s1 }
 0x17b   :  { %2717 = vrot.lane.b32.xlu1 %v9840_v17, %s9351_s1 }
 0x17c   :  { %v10095_v42 = vpop.permute.xlu0 %2577 }
 0x17d   :  { %v10097_v58 = vpop.permute.xlu1 %2583 }
 0x17e   :  { %2437 = vrot.lane.b32.xlu0 %v10093_v37, %s9351_s1 }
 0x17f   :  { %2721 = vrot.lane.b32.xlu1 %v9846_v46, %s9351_s1 }
 0x180   :  { %v10103_v36 = vpop.permute.xlu0 %2302 }
 0x181   :  { %16484 = vst [vmem:[#allocation60_spill] sm:$0xff] %v10103_v36  ;;  %v10105_v51 = vpop.permute.xlu1 %2300 }
 0x182   :  { %16485 = vst [vmem:[#allocation61_spill] sm:$0xff] %v10105_v51  ;;  %2719 = vrot.lane.b32.xlu0 %v9848_v50, %s9351_s1 }
 0x183   :  { %2607 = vrot.lane.b32.xlu1 %v10063_v35, %s9353_s4 }
 0x184   :  { %v10111_v30 = vpop.permute.xlu0 %2306 }
 0x185   :  { %16486 = vst [vmem:[#allocation62_spill] sm:$0xff] %v10111_v30  ;;  %v10113_v17 = vpop.permute.xlu1 %2304  ;;  %v10206_v30 = vstv %s1317_s6 }
 0x186   :  { %16487 = vst [vmem:[#allocation63_spill] sm:$0xff] %v10113_v17  ;;  %2605 = vrot.lane.b32.xlu0 %v10075_v43, %s9353_s4 }
 0x187   :  { %2611 = vrot.lane.b32.xlu1 %v10069_v33, %s9353_s4 }
 0x188   :  { %v10119_v46 = vpop.permute.xlu0 %2409 }
 0x189   :  { %v10121_v9 = vpop.permute.xlu1 %2411 }
 0x18a   :  { %2609 = vrot.lane.b32.xlu0 %v10085_v5, %s9353_s4 }
 0x18b   :  { %2542 = vrot.lane.b32.xlu1 %v10075_v43, %s9356_s0 }
 0x18c   :  { %v10127_v50 = vpop.permute.xlu0 %2413 }
 0x18d   :  { %v10129_v28 = vpop.permute.xlu1 %2415 }
 0x18e   :  { %2544 = vrot.lane.b32.xlu0 %v10063_v35, %s9356_s0 }
 0x18f   :  { %2546 = vrot.lane.b32.xlu1 %v10085_v5, %s9356_s0 }
 0x190   :  { %v10135_v49 = vpop.permute.xlu0 %2417 }
 0x191   :  { %16488 = vst [vmem:[#allocation64_spill] sm:$0xff] %v10135_v49  ;;  %v10137_v60 = vpop.permute.xlu1 %2419 }
 0x192   :  { %16489 = vst [vmem:[#allocation65_spill] sm:$0xff] %v10137_v60  ;;  %2615 = vrot.lane.b32.xlu0 %v10079_v20, %s9353_s4 }
 0x193   :  { %2723 = vrot.lane.b32.xlu1 %v9852_v59, %s9351_s1 }
 0x194   :  { %v10143_v43 = vpop.permute.xlu0 %2522 }
 0x195   :  { %v10145_v7 = vpop.permute.xlu1 %2524 }
 0x196   :  { %2550 = vrot.lane.b32.xlu0 %v10093_v37, %s9356_s0 }
 0x197   :  { %2613 = vrot.lane.b32.xlu1 %v10093_v37, %s9353_s4 }
 0x198   :  { %v10151_v5 = vpop.permute.xlu0 %2526 }
 0x199   :  { %v10153_v35 = vpop.permute.xlu1 %2528 }
 0x19a   :  { %2552 = vrot.lane.b32.xlu0 %v10079_v20, %s9356_s0  ;;  %v2730_v20 = vsel %vm16410_vm4, %v2692_v32, %v2694_v47  ;;  %v2558_v32 = vsel %vm16263_vm8, %v10053_v40, %v10059_v39 }
 0x19b   :  { %2548 = vrot.lane.b32.xlu1 %v10069_v33, %s9356_s0  ;;  %v2621_v33 = vsel %vm16262_vm5, %v2582_v55, %v10097_v58 }
 0x19c   :  { %v10159_v59 = vpop.permute.xlu0 %2530  ;;  %v2882_v44 = vsel %vm737_vm6, %v9802_v24, %v2621_v33  ;;  %v2443_v33 = vsel %vm16410_vm4, %v10037_v18, %v10043_v26 }
 0x19d   :  { %16490 = vst [vmem:[#allocation66_spill] sm:$0xff] %v10159_v59  ;;  %v10161_v23 = vpop.permute.xlu1 %2532 }
 0x19e   :  { %16491 = vst [vmem:[#allocation67_spill] sm:$0xff] %v10161_v23  ;;  %3133 = vrot.lane.b32.xlu0 %v2690_v34, %s9351_s1  ;;  %v2731_v34 = vsel %vm16410_vm4, %v2694_v47, %v10077_v62  ;;  %v2620_v47 = vsel %vm16262_vm5, %v10087_v25, %v2582_v55  ;;  %v2333_v23 = vsel %vm16262_vm5, %v10021_v41, %v10018_v2 }
 0x19f   :  { %3135 = vrot.lane.b32.xlu1 %v2729_v56, %s9351_s1 }
 0x1a0   :  { %v10166_v37 = vpop.permute.xlu0 %2697 }
 0x1a1   :  { %v10168_v61 = vpop.permute.xlu1 %2585 }
 0x1a2   :  { %3137 = vrot.lane.b32.xlu0 %v2730_v20, %s9351_s1  ;;  %v2813_v20 = vsel %vm737_vm6, %v10035_v14, %v10051_v38 }
 0x1a3   :  { %3139 = vrot.lane.b32.xlu1 %v2731_v34, %s9351_s1 }
 0x1a4   :  { %v10180_v56 = vpop.permute.xlu0 %2587 }
 0x1a5   :  { %v10182_v52 = vpop.permute.xlu1 %2699 }
 0x1a6   :  { %3095 = vrot.lane.b32.xlu0 %v2882_v44, %s9351_s1 }
 0x1a7   :  { %3049 = vrot.lane.b32.xlu1 %v2813_v20, %s9351_s1  ;;  %v2819_v20 = vsel %vm737_vm6, %v2443_v33, %v2558_v32 }
 0x1a8   :  { %v835_v34 = vpop.f32.mrf.mxu1  ;;  %v878_v24 = vpop.f32.mrf.mxu0 }
 0x1a9   :  { %v836_v54 = vadd.f32 %v835_v34, %v9674_v29  ;;  %v10200_v60 = vpop.permute.xlu0 %2701  ;;  %v879_v44 = vadd.f32 %v878_v24, %v9674_v29  ;;  %v10208_v57 = vpop.permute.xlu1 %2703  ;;  %v2879_v34 = vsel %vm737_vm6, %v9784_v1, %v2620_v47  ;;  %v2619_v24 = vsel %vm16262_vm5, %v10095_v42, %v10087_v25 }
 0x1aa   :  { %v837_v55 = vpop.f32.mrf.mxu1  ;;  %v880_v17 = vpop.f32.mrf.mxu0  ;;  %3053 = vrot.lane.b32.xlu0 %v2819_v20, %s9351_s1  ;;  %v2756_v47 = vsel %vm737_vm6, %v9735_v3, %v2333_v23  ;;  %v2334_v42 = vsel %vm16262_vm5, %v10018_v2, %v10029_v19  ;;  %v2876_v2 = vsel %vm737_vm6, %v9782_v0, %v2619_v24 }
 0x1ab   :  { %v1272_v48 = vmax.f32 %v836_v54, 0.0  ;;  %v838_v36 = vadd.f32 %v837_v55, %v9674_v29  ;;  %v1274_v13 = vmax.f32 %v879_v44, 0.0  ;;  %v881_v49 = vadd.f32 %v880_v17, %v9674_v29  ;;  %3093 = vrot.lane.b32.xlu1 %v2879_v34, %s9351_s1 }
 0x1ac   :  { %v839_v59 = vpop.f32.mrf.mxu1  ;;  %v882_v33 = vpop.f32.mrf.mxu0 }
 0x1ad   :  { %v1319_v54 = vmul.f32 %v10206_v30, %v1272_v48  ;;  %v1273_v32 = vmax.f32 %v838_v36, 0.0  ;;  %v840_v55 = vadd.f32 %v839_v59, %v9678_v31  ;;  %v10222_v51 = vpop.permute.xlu0 %2591  ;;  %v1321_v17 = vmul.f32 %v10206_v30, %v1274_v13  ;;  %v10231_v48 = vpop.permute.xlu1 %2589 }
 0x1ae   :  { %v1275_v25 = vmax.f32 %v881_v49, 0.0  ;;  %v883_v44 = vadd.f32 %v882_v33, %v9678_v31  ;;  %v841_v20 = vpop.f32.mrf.mxu1  ;;  %v884_v3 = vpop.f32.mrf.mxu0  ;;  %3011 = vrot.lane.b32.xlu0 %v2756_v47, %s9351_s1  ;;  %v2557_v49 = vsel %vm16263_vm8, %v10051_v38, %v10053_v40  ;;  %v2759_v47 = vsel %vm737_vm6, %v9739_v10, %v2334_v42 }
 0x1af   :  { %1351 = vst [vmem:[%s16015_s21] sm:$0xff] %v1319_v54  ;;  %v1320_v59 = vmul.f32 %v10206_v30, %v1273_v32  ;;  %v1293_v36 = vmax.f32 %v840_v55, 0.0  ;;  %v842_v23 = vadd.f32 %v841_v20, %v9678_v31  ;;  %1353 = vst [vmem:[%s16015_s21 + $0x10] sm:$0xff] %v1321_v17  ;;  %v885_v54 = vadd.f32 %v884_v3, %v9678_v31 }
 0x1b0   :  { %v1322_v13 = vmul.f32 %v10206_v30, %v1275_v25  ;;  %v1295_v34 = vmax.f32 %v883_v44, 0.0  ;;  %v921_v32 = vpop.f32.mrf.mxu1  ;;  %3091 = vrot.lane.b32.xlu1 %v2876_v2, %s9351_s1  ;;  %v2442_v17 = vsel %vm16410_vm4, %v10035_v14, %v10037_v18 }
 0x1b1   :  { %1352 = vst [vmem:[%s16015_s21 + $0x8] sm:$0xff] %v1320_v59  ;;  %v1335_v24 = vmul.f32 %v10206_v30, %v1293_v36  ;;  %v1294_v33 = vmax.f32 %v842_v23, 0.0  ;;  %v964_v40 = vpop.f32.mrf.mxu0  ;;  %v922_v38 = vadd.f32 %v921_v32, %v9674_v29  ;;  %v10255_v55 = vpop.permute.xlu0 %2595  ;;  %v1296_v44 = vmax.f32 %v885_v54, 0.0 }
 0x1b2   :  { %1354 = vst [vmem:[%s16015_s21 + $0x18] sm:$0xff] %v1322_v13  ;;  %v1337_v25 = vmul.f32 %v10206_v30, %v1295_v34  ;;  %v965_v20 = vadd.f32 %v964_v40, %v9674_v29  ;;  %v923_v59 = vpop.f32.mrf.mxu1  ;;  %v10267_v36 = vpop.permute.xlu1 %2593  ;;  %v2816_v3 = vsel %vm737_vm6, %v2442_v17, %v2557_v49  ;;  %3013 = vrot.lane.b32.xlu0 %v2759_v47, %s9351_s1 }
 0x1b3   :  { %1359 = vst [vmem:[%s16015_s21 + $0x40] sm:$0xff] %v1335_v24  ;;  %v1336_v10 = vmul.f32 %v10206_v30, %v1294_v33  ;;  %v1276_v42 = vmax.f32 %v922_v38, 0.0  ;;  %v966_v14 = vpop.f32.mrf.mxu0  ;;  %v924_v18 = vadd.f32 %v923_v59, %v9674_v29  ;;  %v2559_v23 = vsel %vm16263_vm8, %v10059_v39, %v10061_v8 }
 0x1b4   :  { %1361 = vst [vmem:[%s16015_s21 + $0x50] sm:$0xff] %v1337_v25  ;;  %v1338_v2 = vmul.f32 %v10206_v30, %v1296_v44  ;;  %v1278_v13 = vmax.f32 %v965_v20, 0.0  ;;  %v967_v34 = vadd.f32 %v966_v14, %v9674_v29  ;;  %v925_v54 = vpop.f32.mrf.mxu1  ;;  %3051 = vrot.lane.b32.xlu1 %v2816_v3, %s9351_s1  ;;  %v2444_v49 = vsel %vm16410_vm4, %v10043_v26, %v10045_v63 }
 0x1b5   :  { %1360 = vst [vmem:[%s16015_s21 + $0x48] sm:$0xff] %v1336_v10  ;;  %v1323_v39 = vmul.f32 %v10206_v30, %v1276_v42  ;;  %v1277_v32 = vmax.f32 %v924_v18, 0.0  ;;  %v968_v24 = vpop.f32.mrf.mxu0  ;;  %v926_v33 = vadd.f32 %v925_v54, %v9678_v31  ;;  %v10293_v40 = vpop.permute.xlu0 %2314  ;;  %v2732_v44 = vsel %vm16410_vm4, %v10077_v62, %v10166_v37 }
 0x1b6   :  { %1362 = vst [vmem:[%s16015_s21 + $0x58] sm:$0xff] %v1338_v2  ;;  %v1325_v38 = vmul.f32 %v10206_v30, %v1278_v13  ;;  %v1279_v47 = vmax.f32 %v967_v34, 0.0  ;;  %v969_v26 = vadd.f32 %v968_v24, %v9678_v31  ;;  %v927_v17 = vpop.f32.mrf.mxu1  ;;  %v10300_v25 = vpop.permute.xlu1 %2312  ;;  %v2822_v14 = vsel %vm737_vm6, %v2444_v49, %v2559_v23  ;;  %3141 = vrot.lane.b32.xlu0 %v2732_v44, %s9351_s1 }
 0x1b7   :  { %1355 = vst [vmem:[%s16015_s21 + $0x20] sm:$0xff] %v1323_v39  ;;  %v1324_v20 = vmul.f32 %v10206_v30, %v1277_v32  ;;  %v1297_v59 = vmax.f32 %v926_v33, 0.0  ;;  %v970_v10 = vpop.f32.mrf.mxu0  ;;  %v928_v42 = vadd.f32 %v927_v17, %v9678_v31  ;;  %v2332_v18 = vsel %vm16262_vm5, %v9706_v45, %v10021_v41 }
 0x1b8   :  { %1357 = vst [vmem:[%s16015_s21 + $0x30] sm:$0xff] %v1325_v38  ;;  %v1326_v62 = vmul.f32 %v10206_v30, %v1279_v47  ;;  %v1299_v3 = vmax.f32 %v969_v26, 0.0  ;;  %v971_v2 = vadd.f32 %v970_v10, %v9678_v31  ;;  %3055 = vrot.lane.b32.xlu1 %v2822_v14, %s9351_s1  ;;  %v1007_v45 = vpop.f32.mrf.mxu1  ;;  %v2733_v41 = vsel %vm16410_vm4, %v10166_v37, %v10182_v52 }
 0x1b9   :  { %1356 = vst [vmem:[%s16015_s21 + $0x28] sm:$0xff] %v1324_v20  ;;  %v1339_v23 = vmul.f32 %v10206_v30, %v1297_v59  ;;  %v1298_v13 = vmax.f32 %v928_v42, 0.0  ;;  %v1050_v34 = vpop.f32.mrf.mxu0  ;;  %v1008_v32 = vadd.f32 %v1007_v45, %v9674_v29  ;;  %v10334_v24 = vpop.permute.xlu0 %2318  ;;  %v2335_v38 = vsel %vm16262_vm5, %v10029_v19, %v10027_v4 }
 0x1ba   :  { %1358 = vst [vmem:[%s16015_s21 + $0x38] sm:$0xff] %v1326_v62  ;;  %v1341_v54 = vmul.f32 %v10206_v30, %v1299_v3  ;;  %v1300_v49 = vmax.f32 %v971_v2, 0.0  ;;  %v1051_v39 = vadd.f32 %v1050_v34, %v9674_v29  ;;  %v10336_v33 = vpop.permute.xlu1 %2316  ;;  %v1009_v26 = vpop.f32.mrf.mxu1  ;;  %v2753_v17 = vsel %vm737_vm6, %v9640_v21, %v2332_v18  ;;  %3143 = vrot.lane.b32.xlu0 %v2733_v41, %s9351_s1 }
 0x1bb   :  { %1363 = vst [vmem:[%s16015_s21 + $0x60] sm:$0xff] %v1339_v23  ;;  %v1340_v37 = vmul.f32 %v10206_v30, %v1298_v13  ;;  %v1052_v47 = vpop.f32.mrf.mxu0  ;;  %v1280_v20 = vmax.f32 %v1008_v32, 0.0  ;;  %v2622_v10 = vsel %vm16262_vm5, %v10097_v58, %v10168_v61  ;;  %v1010_v42 = vadd.f32 %v1009_v26, %v9674_v29 }
 0x1bc   :  { %1365 = vst [vmem:[%s16015_s21 + $0x70] sm:$0xff] %v1341_v54  ;;  %v1342_v44 = vmul.f32 %v10206_v30, %v1300_v49  ;;  %v1282_v19 = vmax.f32 %v1051_v39, 0.0  ;;  %v1053_v59 = vadd.f32 %v1052_v47, %v9674_v29  ;;  %3009 = vrot.lane.b32.xlu1 %v2753_v17, %s9351_s1  ;;  %v1011_v18 = vpop.f32.mrf.mxu1  ;;  %v2735_v62 = vsel %vm16410_vm4, %v10200_v60, %v10208_v57 }
 0x1bd   :  { %1364 = vst [vmem:[%s16015_s21 + $0x68] sm:$0xff] %v1340_v37  ;;  %v1054_v14 = vpop.f32.mrf.mxu0  ;;  %v1327_v58 = vmul.f32 %v10206_v30, %v1280_v20  ;;  %v10370_v13 = vpop.permute.xlu0 %2421  ;;  %v1281_v45 = vmax.f32 %v1010_v42, 0.0  ;;  %v1012_v41 = vadd.f32 %v1011_v18, %v9678_v31  ;;  %v2762_v39 = vsel %vm737_vm6, %v9737_v6, %v2335_v38 }
 0x1be   :  { %1366 = vst [vmem:[%s16015_s21 + $0x78] sm:$0xff] %v1342_v44  ;;  %v1329_v3 = vmul.f32 %v10206_v30, %v1282_v19  ;;  %v1283_v2 = vmax.f32 %v1053_v59, 0.0  ;;  %v1055_v23 = vadd.f32 %v1054_v14, %v9678_v31  ;;  %v10372_v34 = vpop.permute.xlu1 %2423  ;;  %v1013_v49 = vpop.f32.mrf.mxu1  ;;  %3147 = vrot.lane.b32.xlu0 %v2735_v62, %s9351_s1  ;;  %v2560_v6 = vsel %vm16263_vm8, %v10061_v8, %v10143_v43 }
 0x1bf   :  { %v1056_v54 = vpop.f32.mrf.mxu0  ;;  %8848 = vst [vmem:[%s16015_s21 + $0x80] sm:$0xff] %v1327_v58  ;;  %v1014_v26 = vadd.f32 %v1013_v49, %v9678_v31  ;;  %v1328_v38 = vmul.f32 %v10206_v30, %v1281_v45  ;;  %v1301_v17 = vmax.f32 %v1012_v41, 0.0  ;;  %v2885_v20 = vsel %vm737_vm6, %v9806_v27, %v2622_v10 }
 0x1c0   :  { %8850 = vst [vmem:[%s16015_s21 + $0x90] sm:$0xff] %v1329_v3  ;;  %v1330_v32 = vmul.f32 %v10206_v30, %v1283_v2  ;;  %v1303_v37 = vmax.f32 %v1055_v23, 0.0  ;;  %v1057_v47 = vadd.f32 %v1056_v54, %v9678_v31  ;;  %3015 = vrot.lane.b32.xlu1 %v2762_v39, %s9351_s1  ;;  %v1093_v19 = vpop.f32.mrf.mxu1  ;;  %v2445_v3 = vsel %vm16410_vm4, %v10045_v63, %v10119_v46 }
 0x1c1   :  { %v1136_v44 = vpop.f32.mrf.mxu0  ;;  %v1302_v14 = vmax.f32 %v1014_v26, 0.0  ;;  %v10399_v62 = vpop.permute.xlu0 %2425  ;;  %8849 = vst [vmem:[%s16015_s21 + $0x88] sm:$0xff] %v1328_v38  ;;  %v1343_v10 = vmul.f32 %v10206_v30, %v1301_v17  ;;  %v1094_v58 = vadd.f32 %v1093_v19, %v9674_v29  ;;  %v2734_v45 = vsel %vm16410_vm4, %v10182_v52, %v10200_v60 }
 0x1c2   :  { %8851 = vst [vmem:[%s16015_s21 + $0x98] sm:$0xff] %v1330_v32  ;;  %v1345_v59 = vmul.f32 %v10206_v30, %v1303_v37  ;;  %v1304_v42 = vmax.f32 %v1057_v47, 0.0  ;;  %v1137_v18 = vadd.f32 %v1136_v44, %v9674_v29  ;;  %v10401_v8 = vpop.permute.xlu1 %2427  ;;  %v1095_v23 = vpop.f32.mrf.mxu1  ;;  %3097 = vrot.lane.b32.xlu0 %v2885_v20, %s9351_s1  ;;  %v2624_v39 = vsel %vm16262_vm5, %v10180_v56, %v10231_v48 }
 0x1c3   :  { %v1138_v2 = vpop.f32.mrf.mxu0  ;;  %v1344_v41 = vmul.f32 %v10206_v30, %v1302_v14  ;;  %8856 = vst [vmem:[%s16015_s21 + $0xc0] sm:$0xff] %v1343_v10  ;;  %v1284_v52 = vmax.f32 %v1094_v58, 0.0  ;;  %v1096_v60 = vadd.f32 %v1095_v23, %v9674_v29  ;;  %v2825_v47 = vsel %vm737_vm6, %v2445_v3, %v2560_v6 }
 0x1c4   :  { %8858 = vst [vmem:[%s16015_s21 + $0xd0] sm:$0xff] %v1345_v59  ;;  %v1346_v63 = vmul.f32 %v10206_v30, %v1304_v42  ;;  %v1286_v54 = vmax.f32 %v1137_v18, 0.0  ;;  %v1139_v49 = vadd.f32 %v1138_v2, %v9674_v29  ;;  %3145 = vrot.lane.b32.xlu1 %v2734_v45, %s9351_s1  ;;  %v1097_v37 = vpop.f32.mrf.mxu1  ;;  %v2623_v6 = vsel %vm16262_vm5, %v10168_v61, %v10180_v56 }
 0x1c5   :  { %v1140_v32 = vpop.f32.mrf.mxu0  ;;  %8857 = vst [vmem:[%s16015_s21 + $0xc8] sm:$0xff] %v1344_v41  ;;  %v1098_v44 = vadd.f32 %v1097_v37, %v9678_v31  ;;  %v10439_v19 = vpop.permute.xlu0 %2534  ;;  %v1331_v59 = vmul.f32 %v10206_v30, %v1284_v52  ;;  %v1285_v42 = vmax.f32 %v1096_v60, 0.0  ;;  %v2736_v3 = vsel %vm16410_vm4, %v10208_v57, %v9725_v53 }
 0x1c6   :  { %8859 = vst [vmem:[%s16015_s21 + $0xd8] sm:$0xff] %v1346_v63  ;;  %v1333_v26 = vmul.f32 %v10206_v30, %v1286_v54  ;;  %v1287_v38 = vmax.f32 %v1139_v49, 0.0  ;;  %v1141_v17 = vadd.f32 %v1140_v32, %v9678_v31  ;;  %v10441_v20 = vpop.permute.xlu1 %2536  ;;  %v1099_v18 = vpop.f32.mrf.mxu1  ;;  %3057 = vrot.lane.b32.xlu0 %v2825_v47, %s9351_s1  ;;  %v2891_v45 = vsel %vm737_vm6, %v9914_v12, %v2624_v39 }
 0x1c7   :  { %v1142_v14 = vpop.f32.mrf.mxu0  ;;  %v1305_v2 = vmax.f32 %v1098_v44, 0.0  ;;  %8852 = vst [vmem:[%s16015_s21 + $0xa0] sm:$0xff] %v1331_v59  ;;  %v1332_v53 = vmul.f32 %v10206_v30, %v1285_v42  ;;  %v1100_v57 = vadd.f32 %v1099_v18, %v9678_v31  ;;  %v2626_v63 = vsel %vm16262_vm5, %v10222_v51, %v10267_v36 }
 0x1c8   :  { %8854 = vst [vmem:[%s16015_s21 + $0xb0] sm:$0xff] %v1333_v26  ;;  %v1334_v10 = vmul.f32 %v10206_v30, %v1287_v38  ;;  %v1307_v58 = vmax.f32 %v1141_v17, 0.0  ;;  %v1143_v61 = vadd.f32 %v1142_v14, %v9678_v31  ;;  %3149 = vrot.lane.b32.xlu1 %v2736_v3, %s9351_s1  ;;  %v1179_v23 = vpop.f32.mrf.mxu1  ;;  %v2888_v47 = vsel %vm737_vm6, %v9912_v11, %v2623_v6 }
 0x1c9   :  { %v1222_v56 = vpop.f32.mrf.mxu0  ;;  %v1347_v54 = vmul.f32 %v10206_v30, %v1305_v2  ;;  %v10472_v52 = vpop.permute.xlu0 %2709  ;;  %8853 = vst [vmem:[%s16015_s21 + $0xa8] sm:$0xff] %v1332_v53  ;;  %v1306_v39 = vmax.f32 %v1100_v57, 0.0  ;;  %v2625_v26 = vsel %vm16262_vm5, %v10231_v48, %v10222_v51  ;;  %v2561_v17 = vsel %vm16263_vm8, %v10143_v43, %v10145_v7 }
 0x1ca   :  { %8855 = vst [vmem:[%s16015_s21 + $0xb8] sm:$0xff] %v1334_v10  ;;  %v1349_v41 = vmul.f32 %v10206_v30, %v1307_v58  ;;  %v1308_v49 = vmax.f32 %v1143_v61, 0.0  ;;  %v10474_v60 = vpop.permute.xlu1 %2711  ;;  %v1181_v37 = vpop.f32.mrf.mxu1  ;;  %3101 = vrot.lane.b32.xlu0 %v2891_v45, %s9351_s1  ;;  %v2897_v48 = vsel %vm737_vm6, %v9922_v16, %v2626_v63  ;;  %v1223_v3 = vadd.f32 %v1222_v56, %v9674_v29 }
 0x1cb   :  { %v1224_v32 = vpop.f32.mrf.mxu0  ;;  %8860 = vst [vmem:[%s16015_s21 + $0xe0] sm:$0xff] %v1347_v54  ;;  %v1348_v44 = vmul.f32 %v10206_v30, %v1306_v39  ;;  %v1182_v42 = vadd.f32 %v1181_v37, %v9674_v29  ;;  %v1180_v10 = vadd.f32 %v1179_v23, %v9674_v29  ;;  %v2894_v61 = vsel %vm737_vm6, %v9920_v15, %v2625_v26 }
 0x1cc   :  { %8862 = vst [vmem:[%s16015_s21 + $0xf0] sm:$0xff] %v1349_v41  ;;  %v1350_v38 = vmul.f32 %v10206_v30, %v1308_v49  ;;  %3099 = vrot.lane.b32.xlu1 %v2888_v47, %s9351_s1  ;;  %v1183_v51 = vpop.f32.mrf.mxu1  ;;  %v1225_v59 = vadd.f32 %v1224_v32, %v9674_v29  ;;  %v2446_v53 = vsel %vm16410_vm4, %v10119_v46, %v10121_v9  ;;  %v1290_v47 = vmax.f32 %v1223_v3, 0.0  ;;  %v16492_v3 = vld [vmem:[#allocation61_spill] sm:$0xff] }
 0x1cd   :  { %v1226_v6 = vpop.f32.mrf.mxu0  ;;  %v1184_v18 = vadd.f32 %v1183_v51, %v9678_v31  ;;  %v10506_v43 = vpop.permute.xlu0 %2713  ;;  %8861 = vst [vmem:[%s16015_s21 + $0xe8] sm:$0xff] %v1348_v44  ;;  %v2627_v57 = vsel %vm16262_vm5, %v10267_v36, %v10255_v55  ;;  %v2828_v41 = vsel %vm737_vm6, %v2446_v53, %v2561_v17  ;;  %v1289_v49 = vmax.f32 %v1182_v42, 0.0 }
 0x1ce   :  { %8863 = vst [vmem:[%s16015_s21 + $0xf8] sm:$0xff] %v1350_v38  ;;  %v1227_v14 = vadd.f32 %v1226_v6, %v9678_v31  ;;  %v10508_v30 = vpop.permute.xlu1 %2597  ;;  %v1185_v2 = vpop.f32.mrf.mxu1  ;;  %3105 = vrot.lane.b32.xlu0 %v2897_v48, %s9351_s1  ;;  %v1291_v54 = vmax.f32 %v1225_v59, 0.0  ;;  %v1288_v36 = vmax.f32 %v1180_v10, 0.0  ;;  %v2900_v26 = vsel %vm737_vm6, %v9928_v22, %v2627_v57  ;;  %v16493_v10 = vld [vmem:[#allocation66_spill] sm:$0xff] }
 0x1cf   :  { %v1228_v58 = vpop.f32.mrf.mxu0  ;;  %v1186_v56 = vadd.f32 %v1185_v2, %v9678_v31  ;;  %v1309_v63 = vmax.f32 %v1184_v18, 0.0  ;;  %v2562_v38 = vsel %vm16263_vm8, %v10145_v7, %v10151_v5  ;;  %v2563_v17 = vsel %vm16263_vm8, %v10151_v5, %v10153_v35  ;;  %v9317_v5 = vld [vmem:[%s16013_s7] sm:$0xff]   ;;  %v16494_v2 = vld [vmem:[#allocation64_spill] sm:$0xff] }
 0x1d0   :  { %v1229_v45 = vadd.f32 %v1228_v58, %v9678_v31  ;;  %3103 = vrot.lane.b32.xlu1 %v2894_v61, %s9351_s1  ;;  %v1311_v23 = vmax.f32 %v1227_v14, 0.0  ;;  %v2447_v59 = vsel %vm16410_vm4, %v10121_v9, %v10127_v50  ;;  %v2448_v42 = vsel %vm16410_vm4, %v10127_v50, %v10129_v28 }
 0x1d1   :  { %v1310_v32 = vmax.f32 %v1186_v56, 0.0  ;;  %v10528_v37 = vpop.permute.xlu0 %2599  ;;  %v1388_v48 = vpack.c.bf16 %v1309_v63, %v1288_v36  ;;  %v2831_v18 = vsel %vm737_vm6, %v2447_v59, %v2562_v38  ;;  %v2834_v9 = vsel %vm737_vm6, %v2448_v42, %v2563_v17  ;;  %v16497_v63 = vld [vmem:[#allocation63_spill] sm:$0xff]  ;;  %v16500_v38 = vld [vmem:[#allocation62_spill] sm:$0xff] }
 0x1d2   :  { %v1312_v39 = vmax.f32 %v1229_v45, 0.0  ;;  %v10530_v46 = vpop.permute.xlu1 %2601  ;;  %3059 = vrot.lane.b32.xlu0 %v2828_v41, %s9351_s1  ;;  %v1390_v51 = vpack.c.bf16 %v1311_v23, %v1290_v47  ;;  %v2336_v50 = vsel %vm16262_vm5, %v10027_v4, %v16492_v3  ;;  %v2564_v58 = vsel %vm16263_vm8, %v10153_v35, %v16493_v10  ;;  %v10574_v4 = vld [vmem:[#allocation2] sm:$0xff]  ;;  %v16495_v45 = vld [vmem:[#allocation20_spill] sm:$0xff]  ;;  %v16499_v36 = vld [vmem:[#allocation23_spill] sm:$0xff] }
 0x1d3   :  { %v1389_v6 = vpack.c.bf16 %v1310_v32, %v1289_v49  ;;  %v2449_v61 = vsel %vm16410_vm4, %v10129_v28, %v16494_v2  ;;  %v2765_v56 = vsel %vm737_vm6, %v16495_v45, %v2336_v50  ;;  %v16496_v28 = vld [vmem:[#allocation60_spill] sm:$0xff]  ;;  %v16498_v32 = vld [vmem:[#allocation21_spill] sm:$0xff]  ;;  %v2339_v17 = vsel %vm16262_vm5, %v16497_v63, %v16500_v38 }
 0x1d4   :  { %v1391_v44 = vpack.c.bf16 %v1312_v39, %v1291_v54  ;;  %3107 = vrot.lane.b32.xlu1 %v2900_v26, %s9351_s1  ;;  %v2837_v35 = vsel %vm737_vm6, %v2449_v61, %v2564_v58  ;;  %v2337_v23 = vsel %vm16262_vm5, %v16492_v3, %v16496_v28  ;;  %v2338_v41 = vsel %vm16262_vm5, %v16496_v28, %v16497_v63  ;;  %v10592_v54 = vld [vmem:[%s16013_s7 + $0x8] sm:$0xff]   ;;  %v16504_v50 = vld [vmem:[#allocation16_spill] sm:$0xff]  ;;  %v16505_v61 = vld [vmem:[#allocation19_spill] sm:$0xff] }
 0x1d5   :  { %1448 = vmatprep.subr.bf16.mxu0 %v1389_v6  ;;  %v10551_v7 = vpop.permute.xlu0 %2603  ;;  %v2768_v47 = vsel %vm737_vm6, %v16498_v32, %v2337_v23  ;;  %v2771_v26 = vsel %vm737_vm6, %v16499_v36, %v2338_v41  ;;  %v16506_v45 = vld [vmem:[#allocation24_spill] sm:$0xff]  ;;  %v2740_v23 = vsel %vm16410_vm4, %v10474_v60, %v10506_v43  ;;  %v2739_v63 = vsel %vm16410_vm4, %v10472_v52, %v10474_v60 }
 0x1d6   :  { %1501 = vmatprep.subr.bf16.mxu1 %v1391_v44  ;;  %v10553_v14 = vpop.permute.xlu1 %2538  ;;  %1449 = vmatpush1.bf16.msra.mxu0 %v1388_v48  ;;  %v16501_v44 = vld [vmem:[#allocation67_spill] sm:$0xff]  ;;  %v2629_v41 = vsel %vm16262_vm5, %v10508_v30, %v10528_v37  ;;  %v2631_v60 = vsel %vm16262_vm5, %v10530_v46, %v10551_v7 }
 0x1d7   :  { %1502 = vmatpush1.bf16.msra.mxu1 %v1390_v51  ;;  %3063 = vrot.lane.b32.xlu0 %v2834_v9, %s9351_s1  ;;  %v2565_v6 = vsel %vm16263_vm8, %v16493_v10, %v16501_v44  ;;  %v16502_v51 = vld [vmem:[#allocation65_spill] sm:$0xff]  ;;  %v2340_v10 = vsel %vm16262_vm5, %v16500_v38, %v16504_v50 }
 0x1d8   :  { %3061 = vrot.lane.b32.xlu1 %v2831_v18, %s9351_s1  ;;  %v2450_v48 = vsel %vm16410_vm4, %v16494_v2, %v16502_v51  ;;  %v16503_v18 = vld [vmem:[#allocation22_spill] sm:$0xff] }
 0x1d9   :  { %8866 = vmatmul.mubr.msk.bf16.vlgmr.msra.gmra.mxu0 %vm1427_vm9, %v9317_v5  ;;  %v10570_v53 = vpop.permute.xlu0 %2715  ;;  %v2774_v9 = vsel %vm737_vm6, %v16503_v18, %v2339_v17  ;;  %v2840_v3 = vsel %vm737_vm6, %v2450_v48, %v2565_v6  ;;  %v16509_v18 = vld [vmem:[#allocation49_spill] sm:$0xff] }
 0x1da   :  { %8868 = vmatmul.mubr.msk.bf16.vlgmr.msra.gmra.mxu1 %vm1427_vm9, %v9317_v5  ;;  %v10572_v57 = vpop.permute.xlu1 %2320  ;;  %1476 = vmatprep.mubr.bf16.mxu0 %v10574_v4  ;;  %v2741_v36 = vsel %vm16410_vm4, %v10506_v43, %v10570_v53  ;;  %v16508_v43 = vld [vmem:[#allocation42_spill] sm:$0xff] }
 0x1db   :  { %1529 = vmatprep.mubr.bf16.mxu1 %v10574_v4  ;;  %3017 = vrot.lane.b32.xlu0 %v2765_v56, %s9351_s1  ;;  %v2777_v56 = vsel %vm737_vm6, %v16506_v45, %v2340_v10 }
 0x1dc   :  { %3065 = vrot.lane.b32.xlu1 %v2837_v35, %s9351_s1  ;;  %v2738_v35 = vsel %vm16410_vm4, %v16505_v61, %v10472_v52  ;;  %v2628_v52 = vsel %vm16262_vm5, %v10255_v55, %v10508_v30  ;;  %v2566_v55 = vsel %vm16263_vm8, %v16501_v44, %v10439_v19  ;;  %v2630_v30 = vsel %vm16262_vm5, %v10528_v37, %v10530_v46 }
 0x1dd   :  { %v10594_v49 = vpop.permute.xlu0 %2540  ;;  %v2903_v48 = vsel %vm737_vm6, %v16508_v43, %v2628_v52  ;;  %v2567_v44 = vsel %vm16263_vm8, %v10439_v19, %v10441_v20  ;;  %v2568_v37 = vsel %vm16263_vm8, %v10441_v20, %v10553_v14  ;;  %v2452_v46 = vsel %vm16410_vm4, %v10370_v13, %v10372_v34  ;;  %v16511_v20 = vld [vmem:[#allocation18_spill] sm:$0xff]  ;;  %v16512_v52 = vld [vmem:[#allocation29_spill] sm:$0xff] }
 0x1de   :  { %v10596_v39 = vpop.permute.xlu1 %2324  ;;  %v2846_v19 = vsel %vm737_vm6, %v2452_v46, %v2567_v44  ;;  %v16513_v46 = vld [vmem:[#allocation50_spill] sm:$0xff] }
 0x1df   :  { %3021 = vrot.lane.b32.xlu0 %v2771_v26, %s9351_s1  ;;  %v16507_v26 = vld [vmem:[#allocation45_spill] sm:$0xff] }
 0x1e0   :  { %3019 = vrot.lane.b32.xlu1 %v2768_v47, %s9351_s1  ;;  %v2906_v38 = vsel %vm737_vm6, %v16507_v26, %v2629_v41  ;;  %v2342_v41 = vsel %vm16262_vm5, %v16511_v20, %v10300_v25  ;;  %v16515_v20 = vld [vmem:[#allocation54_spill] sm:$0xff] }
 0x1e1   :  { %8867 = vmatmul.mubr.msk.bf16.gmra.mxu0 %vm1427_vm9, %v10592_v54  ;;  %v10617_v59 = vpop.permute.xlu0 %2322 }
 0x1e2   :  { %8869 = vmatmul.mubr.msk.bf16.gmra.mxu1 %vm1427_vm9, %v10592_v54  ;;  %v10619_v42 = vpop.permute.xlu1 %2431  ;;  %9249 = vmatprep.mubr.msk.bf16.mxu0 %vm1427_vm9, %v9317_v5 }
 0x1e3   :  { %3067 = vrot.lane.b32.xlu0 %v2840_v3, %s9351_s1  ;;  %v2451_v3 = vsel %vm16410_vm4, %v16502_v51, %v10370_v13  ;;  %v2453_v51 = vsel %vm16410_vm4, %v10372_v34, %v10399_v62 }
 0x1e4   :  { %3023 = vrot.lane.b32.xlu1 %v2774_v9, %s9351_s1  ;;  %v2912_v9 = vsel %vm737_vm6, %v16509_v18, %v2631_v60  ;;  %v2843_v61 = vsel %vm737_vm6, %v2451_v3, %v2566_v55 }
 0x1e5   :  { %v10630_v58 = vpop.permute.xlu0 %2326 }
 0x1e6   :  { %v10632_v2 = vpop.permute.xlu1 %2435 }
 0x1e7   :  { %3025 = vrot.lane.b32.xlu0 %v2777_v56, %s9351_s1 }
 0x1e8   :  { %3153 = vrot.lane.b32.xlu1 %v2738_v35, %s9351_s1  ;;  %v16510_v35 = vld [vmem:[#allocation46_spill] sm:$0xff] }
 0x1e9   :  { %v10641_v5 = vpop.permute.xlu0 %2429  ;;  %v2909_v45 = vsel %vm737_vm6, %v16510_v35, %v2630_v30 }
 0x1ea   :  { %v10643_v28 = vpop.permute.xlu1 %2439 }
 0x1eb   :  { %3155 = vrot.lane.b32.xlu0 %v2739_v63, %s9351_s1  ;;  %v2849_v63 = vsel %vm737_vm6, %v2453_v51, %v2568_v37 }
 0x1ec   :  { %3157 = vrot.lane.b32.xlu1 %v2740_v23, %s9351_s1 }
 0x1ed   :  { %v10656_v32 = vpop.permute.xlu0 %2433 }
 0x1ee   :  { %v2718_v47 = vpop.permute.xlu1 %2717 }
 0x1ef   :  { %3159 = vrot.lane.b32.xlu0 %v2741_v36, %s9351_s1  ;;  %v2343_v36 = vsel %vm16262_vm5, %v10300_v25, %v10293_v40  ;;  %v2454_v25 = vsel %vm16410_vm4, %v10399_v62, %v10401_v8  ;;  %v2742_v30 = vsel %vm16410_vm4, %v10570_v53, %v2718_v47 }
 0x1f0   :  { %3111 = vrot.lane.b32.xlu1 %v2906_v38, %s9351_s1  ;;  %v2783_v38 = vsel %vm737_vm6, %v9640_v21, %v2342_v41  ;;  %v2786_v60 = vsel %vm737_vm6, %v16512_v52, %v2343_v36  ;;  %v16516_v36 = vld [vmem:[#allocation58_spill] sm:$0xff] }
 0x1f1   :  { %v10671_v17 = vpop.permute.xlu0 %2437 }
 0x1f2   :  { %v10673_v6 = vpop.permute.xlu1 %2721 }
 0x1f3   :  { %3109 = vrot.lane.b32.xlu0 %v2903_v48, %s9351_s1  ;;  %v2569_v48 = vsel %vm16263_vm8, %v10553_v14, %v10594_v49 }
 0x1f4   :  { %3115 = vrot.lane.b32.xlu1 %v2912_v9, %s9351_s1  ;;  %v2852_v21 = vsel %vm737_vm6, %v2454_v25, %v2569_v48 }
 0x1f5   :  { %v2720_v50 = vpop.permute.xlu0 %2719 }
 0x1f6   :  { %v2608_v10 = vpop.permute.xlu1 %2607  ;;  %v2744_v62 = vsel %vm16410_vm4, %v2720_v50, %v10673_v6 }
 0x1f7   :  { %3113 = vrot.lane.b32.xlu0 %v2909_v45, %s9351_s1 }
 0x1f8   :  { %3069 = vrot.lane.b32.xlu1 %v2843_v61, %s9351_s1  ;;  %v2743_v61 = vsel %vm16410_vm4, %v2718_v47, %v2720_v50  ;;  %v16514_v47 = vld [vmem:[#allocation56_spill] sm:$0xff] }
 0x1f9   :  { %v2606_v56 = vpop.permute.xlu0 %2605 }
 0x1fa   :  { %v10707_v23 = vpop.permute.xlu1 %2611  ;;  %v2632_v45 = vsel %vm16262_vm5, %v10551_v7, %v2606_v56  ;;  %v2633_v44 = vsel %vm16262_vm5, %v2606_v56, %v2608_v10 }
 0x1fb   :  { %3071 = vrot.lane.b32.xlu0 %v2846_v19, %s9351_s1  ;;  %v2915_v51 = vsel %vm737_vm6, %v16513_v46, %v2632_v45  ;;  %v2918_v19 = vsel %vm737_vm6, %v16514_v47, %v2633_v44  ;;  %v16517_v45 = vld [vmem:[#allocation31_spill] sm:$0xff] }
 0x1fc   :  { %3073 = vrot.lane.b32.xlu1 %v2849_v63, %s9351_s1 }
 0x1fd   :  { %v2610_v13 = vpop.permute.xlu0 %2609 }
 0x1fe   :  { %v2543_v34 = vpop.permute.xlu1 %2542  ;;  %v2634_v50 = vsel %vm16262_vm5, %v2608_v10, %v2610_v13  ;;  %v2635_v7 = vsel %vm16262_vm5, %v2610_v13, %v10707_v23  ;;  %v2455_v13 = vsel %vm16410_vm4, %v10401_v8, %v10641_v5  ;;  %v2457_v8 = vsel %vm16410_vm4, %v10619_v42, %v10656_v32 }
 0x1ff   :  { %3029 = vrot.lane.b32.xlu0 %v2783_v38, %s9351_s1  ;;  %v2921_v41 = vsel %vm737_vm6, %v16515_v20, %v2634_v50  ;;  %v2924_v38 = vsel %vm737_vm6, %v16516_v36, %v2635_v7  ;;  %v2570_v10 = vsel %vm16263_vm8, %v10594_v49, %v2543_v34 }
 0x200   :  { %3031 = vrot.lane.b32.xlu1 %v2786_v60, %s9351_s1  ;;  %v2456_v60 = vsel %vm16410_vm4, %v10641_v5, %v10619_v42  ;;  %v2855_v49 = vsel %vm737_vm6, %v2455_v13, %v2570_v10 }
 0x201   :  { %v2545_v9 = vpop.permute.xlu0 %2544 }
 0x202   :  { %v10731_v55 = vpop.permute.xlu1 %2546  ;;  %v2571_v52 = vsel %vm16263_vm8, %v2543_v34, %v2545_v9  ;;  %v2344_v34 = vsel %vm16262_vm5, %v10293_v40, %v10336_v33 }
 0x203   :  { %3075 = vrot.lane.b32.xlu0 %v2852_v21, %s9351_s1  ;;  %v2858_v21 = vsel %vm737_vm6, %v2456_v60, %v2571_v52  ;;  %v2789_v44 = vsel %vm737_vm6, %v16517_v45, %v2344_v34  ;;  %v16519_v52 = vld [vmem:[#allocation30_spill] sm:$0xff] }
 0x204   :  { %3161 = vrot.lane.b32.xlu1 %v2742_v30, %s9351_s1  ;;  %v2572_v30 = vsel %vm16263_vm8, %v2545_v9, %v10731_v55  ;;  %v2345_v9 = vsel %vm16262_vm5, %v10336_v33, %v10334_v24 }
 0x205   :  { %v10738_v14 = vpop.permute.xlu0 %2615  ;;  %v2861_v40 = vsel %vm737_vm6, %v2457_v8, %v2572_v30  ;;  %v2792_v33 = vsel %vm737_vm6, %v16519_v52, %v2345_v9  ;;  %v16520_v30 = vld [vmem:[#allocation33_spill] sm:$0xff]  ;;  %v16521_v9 = vld [vmem:[#allocation43_spill] sm:$0xff] }
 0x206   :  { %v10740_v3 = vpop.permute.xlu1 %2723 }
 0x207   :  { %3163 = vrot.lane.b32.xlu0 %v2743_v61, %s9351_s1 }
 0x208   :  { %3165 = vrot.lane.b32.xlu1 %v2744_v62, %s9351_s1 }
 0x209   :  { %v10750_v53 = vpop.permute.xlu0 %2550 }
 0x20a   :  { %v10752_v37 = vpop.permute.xlu1 %2613 }
 0x20b   :  { %3117 = vrot.lane.b32.xlu0 %v2915_v51, %s9351_s1  ;;  %v2346_v51 = vsel %vm16262_vm5, %v10334_v24, %v10572_v57  ;;  %v2347_v24 = vsel %vm16262_vm5, %v10572_v57, %v10617_v59 }
 0x20c   :  { %3119 = vrot.lane.b32.xlu1 %v2918_v19, %s9351_s1  ;;  %v2798_v8 = vsel %vm737_vm6, %v16520_v30, %v2347_v24 }
 0x20d   :  { %v10763_v56 = vpop.permute.xlu0 %2552 }
 0x20e   :  { %v10765_v63 = vpop.permute.xlu1 %2548 }
 0x20f   :  { %3121 = vrot.lane.b32.xlu0 %v2921_v41, %s9351_s1 }
 0x210   :  { %3123 = vrot.lane.b32.xlu1 %v2924_v38, %s9351_s1  ;;  %v16518_v38 = vld [vmem:[#allocation32_spill] sm:$0xff] }
 0x211   :  { %v3134_v48 = vpop.permute.xlu0 %3133  ;;  %v2795_v10 = vsel %vm737_vm6, %v16518_v38, %v2346_v51  ;;  %v2746_v51 = vsel %vm16410_vm4, %v10740_v3, %v16521_v9 }
 0x212   :  { %v3136_v25 = vpop.permute.xlu1 %3135 }
 0x213   :  { %3079 = vrot.lane.b32.xlu0 %v2858_v21, %s9351_s1 }
 0x214   :  { %3077 = vrot.lane.b32.xlu1 %v2855_v49, %s9351_s1 }
 0x215   :  { %v10794_v5 = vpop.permute.xlu0 %3137 }
 0x216   :  { %v10796_v61 = vpop.permute.xlu1 %3139  ;;  %v1265_v62 = vpop.f32.mrf.mxu1 }
 0x217   :  { %3033 = vrot.lane.b32.xlu0 %v2789_v44, %s9351_s1  ;;  %v1266_v19 = vadd.f32 %v1265_v62, %v9674_v29  ;;  %v2745_v62 = vsel %vm16410_vm4, %v10673_v6, %v10740_v3  ;;  %v3235_v44 = vsel %vm16410_vm4, %v3134_v48, %v3136_v25  ;;  %v16522_v6 = vld [vmem:[#allocation44_spill] sm:$0xff]  ;;  %v2636_v48 = vsel %vm16262_vm5, %v10707_v23, %v10752_v37 }
 0x218   :  { %3081 = vrot.lane.b32.xlu1 %v2861_v40, %s9351_s1  ;;  %v9245_v42 = vpop.f32.mrf.mxu1  ;;  %v3236_v40 = vsel %vm16410_vm4, %v3136_v25, %v10794_v5  ;;  %v3320_v25 = vsel %vm737_vm6, %v3235_v44, 0  ;;  %v2637_v23 = vsel %vm16262_vm5, %v10752_v37, %v10738_v14 }
 0x219   :  { %v10810_v50 = vpop.permute.xlu0 %3095  ;;  %v1292_v60 = vmax.f32 %v1266_v19, 0.0  ;;  %v2747_v42 = vsel %vm16410_vm4, %v16521_v9, %v16522_v6  ;;  %v2459_v9 = vsel %vm16410_vm4, %v10632_v2, %v10671_v17 }
 0x21a   :  { %v3050_v7 = vpop.permute.xlu1 %3049  ;;  %v1268_v41 = vpop.f32.mrf.mxu1 }
 0x21b   :  { %v1269_v13 = vadd.f32 %v1268_v41, %v9678_v31  ;;  %3037 = vrot.lane.b32.xlu0 %v2795_v10, %s9351_s1  ;;  %v16524_v10 = vld [vmem:[#allocation48_spill] sm:$0xff] }
 0x21c   :  { %3035 = vrot.lane.b32.xlu1 %v2792_v33, %s9351_s1  ;;  %v9246_v29 = vpop.f32.mrf.mxu1  ;;  %v2638_v52 = vsel %vm16262_vm5, %v10738_v14, %v16524_v10 }
 0x21d   :  { %v1313_v21 = vmax.f32 %v1269_v13, 0.0  ;;  %v10822_v49 = vpop.permute.xlu0 %3053  ;;  %v16525_v29 = vld [vmem:[#allocation59_spill] sm:$0xff] }
 0x21e   :  { %v3094_v34 = vpop.permute.xlu1 %3093 }
 0x21f   :  { %v1392_v57 = vpack.c.bf16 %v1313_v21, %v1292_v60  ;;  %3167 = vrot.lane.b32.xlu0 %v2745_v62, %s9351_s1  ;;  %v3216_v41 = vsel %vm16410_vm4, %v3094_v34, %v10810_v50  ;;  %v2930_v60 = vsel %vm737_vm6, %v16525_v29, %v2637_v23  ;;  %v16526_v21 = vld [vmem:[#allocation57_spill] sm:$0xff] }
 0x220   :  { %3039 = vrot.lane.b32.xlu1 %v2798_v8, %s9351_s1  ;;  %v2933_v14 = vsel %vm737_vm6, %v16526_v21, %v2638_v52 }
 0x221   :  { %9247 = vmatprep.subr.bf16.mxu0 %v1392_v57  ;;  %v10831_v31 = vpop.permute.xlu0 %3011 }
 0x222   :  { %v3092_v45 = vpop.permute.xlu1 %3091  ;;  %9248 = vmatpush3.bf16.msra.mxu0 %v1392_v57  ;;  %v2458_v57 = vsel %vm16410_vm4, %v10656_v32, %v10632_v2  ;;  %v2575_v32 = vsel %vm16263_vm8, %v10750_v53, %v10763_v56  ;;  %v16528_v2 = vld [vmem:[#allocation47_spill] sm:$0xff] }
 0x223   :  { %8986 = vmatprep.subr.msk.bf16.mxu0 %vm737_vm6, %v3236_v40  ;;  %3171 = vrot.lane.b32.xlu0 %v2747_v42, %s9351_s1  ;;  %v3215_v33 = vsel %vm16410_vm4, %v3092_v45, %v3094_v34  ;;  %v2573_v34 = vsel %vm16263_vm8, %v10731_v55, %v10765_v63  ;;  %v9324_v45 = vld [vmem:[#allocation2 + $0x54] ss:$0 sps:$4 sm:$0xff]   ;;  %v2574_v55 = vsel %vm16263_vm8, %v10765_v63, %v10750_v53 }
 0x224   :  { %3169 = vrot.lane.b32.xlu1 %v2746_v51, %s9351_s1  ;;  %v2936_v44 = vsel %vm737_vm6, %v9324_v45, %v16524_v10  ;;  %v16527_v51 = vld [vmem:[#allocation51_spill] sm:$0xff]  ;;  %v2867_v53 = vsel %vm737_vm6, %v2459_v9, %v2574_v55 }
 0x225   :  { %9250 = vmatmul.mubr.msk.bf16.vlgmr.msra.gmra.mxu0 %vm1427_vm9, %v10592_v54  ;;  %v10851_v3 = vpop.permute.xlu0 %3013  ;;  %v16523_v54 = vld [vmem:[#allocation55_spill] sm:$0xff] }
 0x226   :  { %v3052_v19 = vpop.permute.xlu1 %3051  ;;  %3388 = vmatpush1.bf16.msra.mxu0 %v3320_v25  ;;  %3411 = vmatprep.mubr.bf16.mxu0 %v10574_v4  ;;  %v2927_v38 = vsel %vm737_vm6, %v16523_v54, %v2636_v48  ;;  %v2460_v48 = vsel %vm16410_vm4, %v10671_v17, %v10643_v28  ;;  %v10916_v25 = vld [vmem:[%s16016_s11] sm:$0xf]  ;;  %v2348_v17 = vsel %vm16262_vm5, %v10617_v59, %v10596_v39 }
 0x227   :  { %3389 = vmatprep.subr.bf16.mxu0 %v3216_v41  ;;  %3125 = vrot.lane.b32.xlu0 %v2927_v38, %s9351_s1  ;;  %v3196_v37 = vsel %vm16410_vm4, %v3052_v19, %v10822_v49  ;;  %v3195_v30 = vsel %vm16410_vm4, %v3050_v7, %v3052_v19  ;;  %v2864_v7 = vsel %vm737_vm6, %v2458_v57, %v2573_v34 }
 0x228   :  { %3173 = vrot.lane.b32.xlu1 %v16522_v6, %s9351_s1  ;;  %v2576_v19 = vsel %vm16263_vm8, %v10763_v56, %v16528_v2  ;;  %v2870_v41 = vsel %vm737_vm6, %v2460_v48, %v2575_v32  ;;  %v2349_v59 = vsel %vm16262_vm5, %v10596_v39, %v10630_v58  ;;  %v16531_v39 = vld [vmem:[#allocation34_spill] sm:$0xff] }
 0x229   :  { %v10868_v24 = vpop.permute.xlu0 %3141  ;;  %v2873_v56 = vsel %vm737_vm6, %v10643_v28, %v2576_v19 }
 0x22a   :  { %v10870_v13 = vpop.permute.xlu1 %3055  ;;  %3390 = vmatpush1.bf16.msra.mxu0 %v3215_v33  ;;  %v16529_v33 = vld [vmem:[#allocation35_spill] sm:$0xff] }
 0x22b   :  { %3391 = vmatprep.subr.bf16.mxu0 %v3196_v37  ;;  %3129 = vrot.lane.b32.xlu0 %v2933_v14, %s9351_s1  ;;  %v2801_v37 = vsel %vm737_vm6, %v16529_v33, %v2348_v17  ;;  %v16530_v14 = vld [vmem:[#allocation17_spill] sm:$0xff] }
 0x22c   :  { %3127 = vrot.lane.b32.xlu1 %v2930_v60, %s9351_s1  ;;  %v2350_v28 = vsel %vm16262_vm5, %v10630_v58, %v16530_v14  ;;  %v2938_v58 = vld [vmem:[%s16017_s12] sm:$0xff]  ;;  %s9358_s12 = smov 124  }
 0x22d   :  { %v3144_v8 = vpop.permute.xlu0 %3143 }
 0x22e   :  { %v3010_v62 = vpop.permute.xlu1 %3009  ;;  %3392 = vmatpush1.bf16.msra.mxu0 %v3195_v30  ;;  %v3239_v23 = vsel %vm16410_vm4, %v10868_v24, %v3144_v8 }
 0x22f   :  { %v3176_v40 = vsel %vm16410_vm4, %v3010_v62, %v10831_v31  ;;  %3083 = vrot.lane.b32.xlu0 %v2864_v7, %s9351_s1  ;;  %v3175_v6 = vsel %vm16410_vm4, %v16527_v51, %v3010_v62  ;;  %v3332_v60 = vsel %vm737_vm6, %v3239_v23, 0  ;;  %v16532_v62 = vld [vmem:[#allocation36_spill] sm:$0xff] }
 0x230   :  { %3131 = vrot.lane.b32.xlu1 %v2936_v44, %s9351_s1  ;;  %3393 = vmatprep.subr.bf16.mxu0 %v3176_v40  ;;  %v2807_v57 = vsel %vm737_vm6, %v16532_v62, %v2350_v28  ;;  %v9325_v40 = vld [vmem:[#allocation2 + $0x50] ss:$0 sps:$4 sm:$0xff]   ;;  %v16534_v28 = vld [vmem:[#allocation52_spill] sm:$0xff] }
 0x231   :  { %v10905_v42 = vpop.permute.xlu0 %3147  ;;  %v2810_v55 = vsel %vm737_vm6, %v9325_v40, %v16530_v14 }
 0x232   :  { %v10907_v63 = vpop.permute.xlu1 %3015  ;;  %3394 = vmatpush1.bf16.msra.mxu0 %v3175_v6 }
 0x233   :  { %3087 = vrot.lane.b32.xlu0 %v2870_v41, %s9351_s1 }
 0x234   :  { %3085 = vrot.lane.b32.xlu1 %v2867_v53, %s9351_s1  ;;  %v16533_v53 = vld [vmem:[#allocation27_spill] sm:$0xff] }
 0x235   :  { %8987 = vmatmul.mubr.msk.bf16.vlgmr.msra.gmra.mxu0 %vm16354_vm10, %v10916_v25  ;;  %v10931_v38 = vpop.permute.xlu0 %3097 }
 0x236   :  { %v10933_v10 = vpop.permute.xlu1 %3145  ;;  %3493 = vmatprep.mubr.bf16.mxu0 %v10574_v4 }
 0x237   :  { %v3240_v52 = vsel %vm16410_vm4, %v3144_v8, %v10933_v10  ;;  %3041 = vrot.lane.b32.xlu0 %v2801_v37, %s9351_s1  ;;  %v2804_v8 = vsel %vm737_vm6, %v16531_v39, %v2349_v59 }
 0x238   :  { %3089 = vrot.lane.b32.xlu1 %v2873_v56, %s9351_s1  ;;  %8990 = vmatprep.subr.msk.bf16.mxu0 %vm737_vm6, %v3240_v52 }
 0x239   :  { %3470 = vmatpush1.bf16.msra.mxu0 %v3332_v60  ;;  %v10952_v34 = vpop.permute.xlu0 %3057 }
 0x23a   :  { %v10954_v30 = vpop.permute.xlu1 %3149 }
 0x23b   :  { %3045 = vrot.lane.b32.xlu0 %v2807_v57, %s9351_s1  ;;  %v3243_v39 = vsel %vm16410_vm4, %v10954_v30, %v16534_v28 }
 0x23c   :  { %3043 = vrot.lane.b32.xlu1 %v2804_v8, %s9351_s1 }
 0x23d   :  { %v3102_v45 = vpop.permute.xlu0 %3101 }
 0x23e   :  { %v10962_v44 = vpop.permute.xlu1 %3099 }
 0x23f   :  { %2941 = vperm.xlu0 %9282, %v2938_v58   ;;  %v3219_v51 = vsel %vm16410_vm4, %v10962_v44, %v3102_v45 }
 0x240   :  { %3047 = vrot.lane.b32.xlu1 %v2810_v55, %s9351_s1 }
 0x241   :  { %v10970_v7 = vpop.permute.xlu0 %3105 }
 0x242   :  { %v10972_v32 = vpop.permute.xlu1 %3103 }
 0x243   :  { %v3220_v9 = vsel %vm16410_vm4, %v3102_v45, %v10972_v32  ;;  %6579 = vrot.lane.b32.xlu0 %v9784_v1, %s9357_s2  ;;  %v3344_v45 = vsel %vm737_vm6, %v3243_v39, 0  ;;  %v16541_v39 = vld [vmem:[#allocation53_spill] sm:$0xff] }
 0x244   :  { %6577 = vrot.lane.b32.xlu1 %v9782_v0, %s9357_s2  ;;  %3471 = vmatprep.subr.bf16.mxu0 %v3220_v9 }
 0x245   :  { %3472 = vmatpush1.bf16.msra.mxu0 %v3219_v51  ;;  %v3060_v6 = vpop.permute.xlu0 %3059 }
 0x246   :  { %v10982_v48 = vpop.permute.xlu1 %3107  ;;  %v3199_v17 = vsel %vm16410_vm4, %v10952_v34, %v3060_v6 }
 0x247   :  { %6583 = vrot.lane.b32.xlu0 %v9806_v27, %s9357_s2 }
 0x248   :  { %6581 = vrot.lane.b32.xlu1 %v16533_v53, %s9357_s2 }
 0x249   :  { %v10988_v2 = vpop.permute.xlu0 %3063 }
 0x24a   :  { %v10990_v19 = vpop.permute.xlu1 %3061 }
 0x24b   :  { %v3200_v41 = vsel %vm16410_vm4, %v3060_v6, %v10990_v19  ;;  %6455 = vrot.lane.b32.xlu0 %v16533_v53, %s9358_s12 }
 0x24c   :  { %6453 = vrot.lane.b32.xlu1 %v9784_v1, %s9358_s12  ;;  %3473 = vmatprep.subr.bf16.mxu0 %v3200_v41 }
 0x24d   :  { %3474 = vmatpush1.bf16.msra.mxu0 %v3199_v17  ;;  %v3018_v23 = vpop.permute.xlu0 %3017 }
 0x24e   :  { %v11000_v56 = vpop.permute.xlu1 %3065  ;;  %v3179_v37 = vsel %vm16410_vm4, %v10907_v63, %v3018_v23 }
 0x24f   :  { %6516 = vrot.lane.b32.xlu0 %v9784_v1, %s9359_s30 }
 0x250   :  { %6457 = vrot.lane.b32.xlu1 %v9806_v27, %s9358_s12 }
 0x251   :  { %v11006_v52 = vpop.permute.xlu0 %3021 }
 0x252   :  { %v11008_v59 = vpop.permute.xlu1 %3019 }
 0x253   :  { %v3180_v33 = vsel %vm16410_vm4, %v3018_v23, %v11008_v59  ;;  %6520 = vrot.lane.b32.xlu0 %v9806_v27, %s9359_s30 }
 0x254   :  { %6518 = vrot.lane.b32.xlu1 %v16533_v53, %s9359_s30  ;;  %3475 = vmatprep.subr.bf16.mxu0 %v3180_v33 }
 0x255   :  { %3476 = vmatpush1.bf16.msra.mxu0 %v3179_v37  ;;  %v3068_v60 = vpop.permute.xlu0 %3067 }
 0x256   :  { %v11018_v14 = vpop.permute.xlu1 %3023 }
 0x257   :  { %6514 = vrot.lane.b32.xlu0 %v9782_v0, %s9359_s30 }
 0x258   :  { %6451 = vrot.lane.b32.xlu1 %v9782_v0, %s9358_s12  ;;  %8991 = vmatmul.mubr.msk.bf16.vlgmr.msra.gmra.mxu0 %vm16354_vm10, %v10916_v25 }
 0x259   :  { %3575 = vmatprep.mubr.bf16.mxu0 %v10574_v4  ;;  %v3026_v8 = vpop.permute.xlu0 %3025 }
 0x25a   :  { %v11030_v62 = vpop.permute.xlu1 %3153 }
 0x25b   :  { %16535 = vst [vmem:[#allocation61_spill] sm:$0xff] %v11030_v62  ;;  %v3244_v57 = vsel %vm16410_vm4, %v16534_v28, %v11030_v62  ;;  %6331 = vrot.lane.b32.xlu0 %v16533_v53, %s9360_s24  ;;  %v3203_v28 = vsel %vm16410_vm4, %v11000_v56, %v3068_v60 }
 0x25c   :  { %6329 = vrot.lane.b32.xlu1 %v9784_v1, %s9360_s24  ;;  %8994 = vmatprep.subr.msk.bf16.mxu0 %vm737_vm6, %v3244_v57  ;;  %v3184_v57 = vsel %vm16410_vm4, %v3026_v8, %v16541_v39 }
 0x25d   :  { %3552 = vmatpush1.bf16.msra.mxu0 %v3344_v45  ;;  %v11041_v58 = vpop.permute.xlu0 %3155 }
 0x25e   :  { %v11043_v40 = vpop.permute.xlu1 %3157 }
 0x25f   :  { %16536 = vst [vmem:[#allocation66_spill] sm:$0xff] %v11043_v40  ;;  %6391 = vrot.lane.b32.xlu0 %v9784_v1, %s9361_s25 }
 0x260   :  { %6333 = vrot.lane.b32.xlu1 %v9806_v27, %s9360_s24 }
 0x261   :  { %v3160_v55 = vpop.permute.xlu0 %3159 }
 0x262   :  { %v11049_v9 = vpop.permute.xlu1 %3111 }
 0x263   :  { %16537 = vst [vmem:[#allocation64_spill] sm:$0xff] %v11049_v9  ;;  %6395 = vrot.lane.b32.xlu0 %v9806_v27, %s9361_s25 }
 0x264   :  { %6393 = vrot.lane.b32.xlu1 %v16533_v53, %s9361_s25 }
 0x265   :  { %v3110_v51 = vpop.permute.xlu0 %3109 }
 0x266   :  { %v11055_v6 = vpop.permute.xlu1 %3115  ;;  %v3224_v41 = vsel %vm16410_vm4, %v3110_v51, %v11049_v9  ;;  %v3223_v17 = vsel %vm16410_vm4, %v10982_v48, %v3110_v51 }
 0x267   :  { %16538 = vst [vmem:[#allocation20_spill] sm:$0xff] %v11055_v6  ;;  %3553 = vmatprep.subr.bf16.mxu0 %v3224_v41  ;;  %6389 = vrot.lane.b32.xlu0 %v9782_v0, %s9361_s25  ;;  %v3183_v41 = vsel %vm16410_vm4, %v11018_v14, %v3026_v8 }
 0x268   :  { %6327 = vrot.lane.b32.xlu1 %v9782_v0, %s9360_s24  ;;  %3554 = vmatpush1.bf16.msra.mxu0 %v3223_v17 }
 0x269   :  { %v11065_v23 = vpop.permute.xlu0 %3113 }
 0x26a   :  { %16539 = vst [vmem:[#allocation60_spill] sm:$0xff] %v11065_v23  ;;  %v11067_v33 = vpop.permute.xlu1 %3069 }
 0x26b   :  { %16540 = vst [vmem:[#allocation63_spill] sm:$0xff] %v11067_v33  ;;  %v3204_v37 = vsel %vm16410_vm4, %v3068_v60, %v11067_v33  ;;  %6269 = vrot.lane.b32.xlu0 %v16533_v53, %s9362_s5 }
 0x26c   :  { %6267 = vrot.lane.b32.xlu1 %v9784_v1, %s9362_s5  ;;  %3555 = vmatprep.subr.bf16.mxu0 %v3204_v37  ;;  %v3247_v37 = vsel %vm16410_vm4, %v11043_v40, %v3160_v55 }
 0x26d   :  { %3556 = vmatpush1.bf16.msra.mxu0 %v3203_v28  ;;  %v11079_v45 = vpop.permute.xlu0 %3071 }
 0x26e   :  { %16542 = vst [vmem:[#allocation21_spill] sm:$0xff] %v11079_v45  ;;  %v11081_v51 = vpop.permute.xlu1 %3073  ;;  %3557 = vmatprep.subr.bf16.mxu0 %v3184_v57 }
 0x26f   :  { %16543 = vst [vmem:[#allocation23_spill] sm:$0xff] %v11081_v51  ;;  %6265 = vrot.lane.b32.xlu0 %v9782_v0, %s9362_s5 }
 0x270   :  { %6271 = vrot.lane.b32.xlu1 %v9806_v27, %s9362_s5  ;;  %v9319_v27 = vld [vmem:[%s16018_s9] sm:$0xff]  }
 0x271   :  { %3558 = vmatpush1.bf16.msra.mxu0 %v3183_v41  ;;  %v11089_v60 = vpop.permute.xlu0 %3029  ;;  %v3356_v41 = vsel %vm737_vm6, %v3247_v37, 0  ;;  %9257 = vmatprep.mubr.msk.bf16.mxu1 %vm16263_vm8, %v9319_v27 }
 0x272   :  { %16544 = vst [vmem:[#allocation62_spill] sm:$0xff] %v11089_v60  ;;  %v11091_v17 = vpop.permute.xlu1 %3031 }
 0x273   :  { %16545 = vst [vmem:[#allocation67_spill] sm:$0xff] %v11091_v17  ;;  %6587 = vrot.lane.b32.xlu0 %v9914_v12, %s9357_s2 }
 0x274   :  { %6585 = vrot.lane.b32.xlu1 %v9912_v11, %s9357_s2  ;;  %8995 = vmatmul.mubr.msk.bf16.vlgmr.msra.gmra.mxu0 %vm16354_vm10, %v10916_v25 }
 0x275   :  { %3657 = vmatprep.mubr.bf16.mxu0 %v10574_v4  ;;  %v3076_v8 = vpop.permute.xlu0 %3075 }
 0x276   :  { %v11102_v28 = vpop.permute.xlu1 %3161 }
 0x277   :  { %16546 = vst [vmem:[#allocation65_spill] sm:$0xff] %v11102_v28  ;;  %v3248_v57 = vsel %vm16410_vm4, %v3160_v55, %v11102_v28  ;;  %6591 = vrot.lane.b32.xlu0 %v9922_v16, %s9357_s2 }
 0x278   :  { %6589 = vrot.lane.b32.xlu1 %v9920_v15, %s9357_s2  ;;  %8998 = vmatprep.subr.msk.bf16.mxu0 %vm737_vm6, %v3248_v57 }
 0x279   :  { %3634 = vmatpush1.bf16.msra.mxu0 %v3356_v41  ;;  %v11115_v0 = vpop.permute.xlu0 %3163 }
 0x27a   :  { %16547 = vst [vmem:[#allocation22_spill] sm:$0xff] %v11115_v0  ;;  %v11117_v53 = vpop.permute.xlu1 %3165  ;;  %v16560_v0 = vld [vmem:[#allocation5_spill] sm:$0xff] }
 0x27b   :  { %16548 = vst [vmem:[#allocation16_spill] sm:$0xff] %v11117_v53  ;;  %6461 = vrot.lane.b32.xlu0 %v9914_v12, %s9358_s12 }
 0x27c   :  { %6459 = vrot.lane.b32.xlu1 %v9912_v11, %s9358_s12 }
 0x27d   :  { %v3118_v55 = vpop.permute.xlu0 %3117 }
 0x27e   :  { %v11124_v37 = vpop.permute.xlu1 %3119  ;;  %v3227_v41 = vsel %vm16410_vm4, %v11055_v6, %v3118_v55 }
 0x27f   :  { %16549 = vst [vmem:[#allocation19_spill] sm:$0xff] %v11124_v37  ;;  %v3228_v57 = vsel %vm16410_vm4, %v3118_v55, %v11124_v37  ;;  %6524 = vrot.lane.b32.xlu0 %v9914_v12, %s9359_s30 }
 0x280   :  { %6522 = vrot.lane.b32.xlu1 %v9912_v11, %s9359_s30  ;;  %3635 = vmatprep.subr.bf16.mxu0 %v3228_v57 }
 0x281   :  { %3636 = vmatpush1.bf16.msra.mxu0 %v3227_v41  ;;  %v11134_v27 = vpop.permute.xlu0 %3121  ;;  %v3207_v41 = vsel %vm16410_vm4, %v11081_v51, %v3076_v8 }
 0x282   :  { %16550 = vst [vmem:[#allocation24_spill] sm:$0xff] %v11134_v27  ;;  %v11136_v1 = vpop.permute.xlu1 %3123 }
 0x283   :  { %16551 = vst [vmem:[#allocation18_spill] sm:$0xff] %v11136_v1  ;;  %6465 = vrot.lane.b32.xlu0 %v9922_v16, %s9358_s12 }
 0x284   :  { %6463 = vrot.lane.b32.xlu1 %v9920_v15, %s9358_s12 }
 0x285   :  { %v11142_v37 = vpop.permute.xlu0 %3079 }
 0x286   :  { %16552 = vst [vmem:[#allocation29_spill] sm:$0xff] %v11142_v37  ;;  %v11144_v55 = vpop.permute.xlu1 %3077 }
 0x287   :  { %16553 = vst [vmem:[#allocation31_spill] sm:$0xff] %v11144_v55  ;;  %v3208_v57 = vsel %vm16410_vm4, %v3076_v8, %v11144_v55  ;;  %6528 = vrot.lane.b32.xlu0 %v9922_v16, %s9359_s30 }
 0x288   :  { %6526 = vrot.lane.b32.xlu1 %v9920_v15, %s9359_s30  ;;  %3637 = vmatprep.subr.bf16.mxu0 %v3208_v57 }
 0x289   :  { %3638 = vmatpush1.bf16.msra.mxu0 %v3207_v41  ;;  %v3034_v27 = vpop.permute.xlu0 %3033 }
 0x28a   :  { %v11154_v39 = vpop.permute.xlu1 %3081  ;;  %v3187_v57 = vsel %vm16410_vm4, %v11091_v17, %v3034_v27 }
 0x28b   :  { %16554 = vst [vmem:[#allocation32_spill] sm:$0xff] %v11154_v39  ;;  %6337 = vrot.lane.b32.xlu0 %v9914_v12, %s9360_s24 }
 0x28c   :  { %6335 = vrot.lane.b32.xlu1 %v9912_v11, %s9360_s24 }
 0x28d   :  { %v11160_v55 = vpop.permute.xlu0 %3037 }
 0x28e   :  { %16555 = vst [vmem:[#allocation30_spill] sm:$0xff] %v11160_v55  ;;  %v11162_v37 = vpop.permute.xlu1 %3035 }
 0x28f   :  { %16556 = vst [vmem:[#allocation33_spill] sm:$0xff] %v11162_v37  ;;  %v3188_v8 = vsel %vm16410_vm4, %v3034_v27, %v11162_v37  ;;  %6399 = vrot.lane.b32.xlu0 %v9914_v12, %s9361_s25 }
 0x290   :  { %6397 = vrot.lane.b32.xlu1 %v9912_v11, %s9361_s25  ;;  %3639 = vmatprep.subr.bf16.mxu0 %v3188_v8 }
 0x291   :  { %3640 = vmatpush1.bf16.msra.mxu0 %v3187_v57  ;;  %v3168_v41 = vpop.permute.xlu0 %3167 }
 0x292   :  { %v11172_v28 = vpop.permute.xlu1 %3039  ;;  %v3251_v27 = vsel %vm16410_vm4, %v11117_v53, %v3168_v41 }
 0x293   :  { %16557 = vst [vmem:[#allocation43_spill] sm:$0xff] %v11172_v28  ;;  %6341 = vrot.lane.b32.xlu0 %v9922_v16, %s9360_s24  ;;  %v3368_v55 = vsel %vm737_vm6, %v3251_v27, 0 }
 0x294   :  { %6339 = vrot.lane.b32.xlu1 %v9920_v15, %s9360_s24  ;;  %8999 = vmatmul.mubr.msk.bf16.vlgmr.msra.gmra.mxu0 %vm16354_vm10, %v10916_v25 }
 0x295   :  { %3739 = vmatprep.mubr.bf16.mxu0 %v10574_v4  ;;  %v11188_v57 = vpop.permute.xlu0 %3171 }
 0x296   :  { %v11186_v8 = vpop.permute.xlu1 %3169  ;;  %16559 = vst [vmem:[#allocation48_spill] sm:$0xff] %v11188_v57 }
 0x297   :  { %16558 = vst [vmem:[#allocation44_spill] sm:$0xff] %v11186_v8  ;;  %v3252_v37 = vsel %vm16410_vm4, %v3168_v41, %v11186_v8  ;;  %6403 = vrot.lane.b32.xlu0 %v9922_v16, %s9361_s25  ;;  %v11202_v8 = vstv %s1612_s27  ;;  %s9366_s27 = smov 1  }
 0x298   :  { %6401 = vrot.lane.b32.xlu1 %v9920_v15, %s9361_s25  ;;  %9002 = vmatprep.subr.msk.bf16.mxu0 %vm737_vm6, %v3252_v37 }
 0x299   :  { %3716 = vmatpush1.bf16.msra.mxu0 %v3368_v55  ;;  %v1468_v4 = vpop.f32.mrf.mxu0  ;;  %v3126_v17 = vpop.permute.xlu0 %3125 }
 0x29a   :  { %v1521_v53 = vpop.f32.mrf.mxu1  ;;  %v1469_v60 = vadd.f32 %v1468_v4, %v16560_v0  ;;  %v11200_v41 = vpop.permute.xlu1 %3173 }
 0x29b   :  { %v1522_v57 = vadd.f32 %v1521_v53, %v16560_v0  ;;  %16561 = vst [vmem:[#allocation51_spill] sm:$0xff] %v11200_v41  ;;  %v1470_v33 = vpop.f32.mrf.mxu0  ;;  %6275 = vrot.lane.b32.xlu0 %v9914_v12, %s9362_s5 }
 0x29c   :  { %v1523_v45 = vpop.f32.mrf.mxu1  ;;  %6273 = vrot.lane.b32.xlu1 %v9912_v11, %s9362_s5  ;;  %v1589_v37 = vmax.f32 %v1469_v60, 0.0  ;;  %v1471_v55 = vadd.f32 %v1470_v33, %v16560_v0  ;;  %v16564_v60 = vld [vmem:[#allocation4_spill] sm:$0xff] }
 0x29d   :  { %v1591_v27 = vmax.f32 %v1522_v57, 0.0  ;;  %v1524_v51 = vadd.f32 %v1523_v45, %v16560_v0  ;;  %v1472_v53 = vpop.f32.mrf.mxu0  ;;  %v11212_v40 = vpop.permute.xlu0 %3129 }
 0x29e   :  { %v1525_v4 = vpop.f32.mrf.mxu1  ;;  %v1614_v41 = vmul.f32 %v11202_v8, %v1589_v37  ;;  %v1590_v23 = vmax.f32 %v1471_v55, 0.0  ;;  %16562 = vst [vmem:[#allocation47_spill] sm:$0xff] %v11212_v40  ;;  %v11214_v11 = vpop.permute.xlu1 %3127  ;;  %v1473_v57 = vadd.f32 %v1472_v53, %v16564_v60 }
 0x29f   :  { %v1616_v9 = vmul.f32 %v11202_v8, %v1591_v27  ;;  %v1592_v6 = vmax.f32 %v1524_v51, 0.0  ;;  %16563 = vst [vmem:[#allocation35_spill] sm:$0xff] %v11214_v11  ;;  %v1526_v33 = vadd.f32 %v1525_v4, %v16564_v60  ;;  %v1474_v45 = vpop.f32.mrf.mxu0  ;;  %v3232_v37 = vsel %vm16410_vm4, %v3126_v17, %v11214_v11  ;;  %6279 = vrot.lane.b32.xlu0 %v9922_v16, %s9362_s5 }
 0x2a0   :  { %v1527_v62 = vpop.f32.mrf.mxu1  ;;  %6277 = vrot.lane.b32.xlu1 %v9920_v15, %s9362_s5  ;;  %1630 = vst [vmem:[%s16019_s22] sm:$0xff] %v1614_v41  ;;  %v1615_v51 = vmul.f32 %v11202_v8, %v1590_v23  ;;  %v1475_v55 = vadd.f32 %v1474_v45, %v16564_v60  ;;  %v1594_v4 = vmax.f32 %v1473_v57, 0.0  ;;  %3717 = vmatprep.subr.bf16.mxu0 %v3232_v37 }
 0x2a1   :  { %8872 = vst [vmem:[%s16019_s22 + $0x40] sm:$0xff] %v1616_v9  ;;  %v1617_v27 = vmul.f32 %v11202_v8, %v1592_v6  ;;  %v1528_v53 = vadd.f32 %v1527_v62, %v16564_v60  ;;  %v1596_v12 = vmax.f32 %v1526_v33, 0.0  ;;  %v1478_v15 = vpop.f32.mrf.mxu0  ;;  %v3231_v41 = vsel %vm16410_vm4, %v11136_v1, %v3126_v17  ;;  %v16565_v6 = vld [vmem:[#allocation6_spill] sm:$0xff]  ;;  %v3084_v33 = vpop.permute.xlu0 %3083 }
 0x2a2   :  { %v1531_v11 = vpop.f32.mrf.mxu1  ;;  %1631 = vst [vmem:[%s16019_s22 + $0x8] sm:$0xff] %v1615_v51  ;;  %v1595_v62 = vmax.f32 %v1475_v55, 0.0  ;;  %v1479_v23 = vadd.f32 %v1478_v15, %v16565_v6  ;;  %3718 = vmatpush1.bf16.msra.mxu0 %v3231_v41  ;;  %v11244_v45 = vpop.permute.xlu1 %3131  ;;  %v1618_v17 = vmul.f32 %v11202_v8, %v1594_v4 }
 0x2a3   :  { %8873 = vst [vmem:[%s16019_s22 + $0x48] sm:$0xff] %v1617_v27  ;;  %v1597_v9 = vmax.f32 %v1528_v53, 0.0  ;;  %v1532_v57 = vadd.f32 %v1531_v11, %v16565_v6  ;;  %16566 = vst [vmem:[#allocation17_spill] sm:$0xff] %v11244_v45  ;;  %v1620_v37 = vmul.f32 %v11202_v8, %v1596_v12  ;;  %v1480_v16 = vpop.f32.mrf.mxu0  ;;  %6595 = vrot.lane.b32.xlu0 %v16508_v43, %s9357_s2 }
 0x2a4   :  { %v1533_v51 = vpop.f32.mrf.mxu1  ;;  %6593 = vrot.lane.b32.xlu1 %v9928_v22, %s9357_s2  ;;  %v1619_v27 = vmul.f32 %v11202_v8, %v1595_v62  ;;  %v1599_v15 = vmax.f32 %v1479_v23, 0.0  ;;  %1632 = vst [vmem:[%s16019_s22 + $0x10] sm:$0xff] %v1618_v17  ;;  %v1481_v11 = vadd.f32 %v1480_v16, %v16565_v6  ;;  %v16567_v23 = vld [vmem:[#allocation7_spill] sm:$0xff] }
 0x2a5   :  { %v1621_v55 = vmul.f32 %v11202_v8, %v1597_v9  ;;  %v1601_v53 = vmax.f32 %v1532_v57, 0.0  ;;  %8874 = vst [vmem:[%s16019_s22 + $0x50] sm:$0xff] %v1620_v37  ;;  %v1534_v12 = vadd.f32 %v1533_v51, %v16565_v6  ;;  %v1482_v4 = vpop.f32.mrf.mxu0  ;;  %v11272_v17 = vpop.permute.xlu0 %3087 }
 0x2a6   :  { %v1535_v41 = vpop.f32.mrf.mxu1  ;;  %1633 = vst [vmem:[%s16019_s22 + $0x18] sm:$0xff] %v1619_v27  ;;  %v1622_v62 = vmul.f32 %v11202_v8, %v1599_v15  ;;  %v1483_v57 = vadd.f32 %v1482_v4, %v16567_v23  ;;  %16568 = vst [vmem:[#allocation34_spill] sm:$0xff] %v11272_v17  ;;  %v11274_v37 = vpop.permute.xlu1 %3085  ;;  %v1600_v51 = vmax.f32 %v1481_v11, 0.0  ;;  %v3211_v15 = vsel %vm16410_vm4, %v11154_v39, %v3084_v33 }
 0x2a7   :  { %8875 = vst [vmem:[%s16019_s22 + $0x58] sm:$0xff] %v1621_v55  ;;  %v1624_v9 = vmul.f32 %v11202_v8, %v1601_v53  ;;  %v1536_v16 = vadd.f32 %v1535_v41, %v16567_v23  ;;  %16569 = vst [vmem:[#allocation36_spill] sm:$0xff] %v11274_v37  ;;  %v1602_v40 = vmax.f32 %v1534_v12, 0.0  ;;  %v1484_v45 = vpop.f32.mrf.mxu0  ;;  %v3212_v55 = vsel %vm16410_vm4, %v3084_v33, %v11274_v37 }
 0x2a8   :  { %v1537_v27 = vpop.f32.mrf.mxu1  ;;  %6599 = vrot.lane.b32.xlu1 %v16510_v35, %s9357_s2  ;;  %1634 = vst [vmem:[%s16019_s22 + $0x20] sm:$0xff] %v1622_v62  ;;  %v1604_v53 = vmax.f32 %v1483_v57, 0.0  ;;  %v1485_v12 = vadd.f32 %v1484_v45, %v16567_v23  ;;  %6597 = vrot.lane.b32.xlu0 %v16507_v26, %s9357_s2  ;;  %v1623_v33 = vmul.f32 %v11202_v8, %v1600_v51 }
 0x2a9   :  { %8876 = vst [vmem:[%s16019_s22 + $0x60] sm:$0xff] %v1624_v9  ;;  %v1606_v11 = vmax.f32 %v1536_v16, 0.0  ;;  %v1538_v4 = vadd.f32 %v1537_v27, %v16567_v23  ;;  %3719 = vmatprep.subr.bf16.mxu0 %v3212_v55  ;;  %v1625_v41 = vmul.f32 %v11202_v8, %v1602_v40  ;;  %v3042_v51 = vpop.permute.xlu0 %3041 }
 0x2aa   :  { %3720 = vmatpush1.bf16.msra.mxu0 %v3211_v15  ;;  %v1626_v62 = vmul.f32 %v11202_v8, %v1604_v53  ;;  %v1605_v9 = vmax.f32 %v1485_v12, 0.0  ;;  %v11296_v16 = vpop.permute.xlu1 %3089  ;;  %1635 = vst [vmem:[%s16019_s22 + $0x28] sm:$0xff] %v1623_v33  ;;  %v11340_v15 = vld [vmem:[#allocation2] sm:$0xff] }
 0x2ab   :  { %v1628_v37 = vmul.f32 %v11202_v8, %v1606_v11  ;;  %v1607_v57 = vmax.f32 %v1538_v4, 0.0  ;;  %16570 = vst [vmem:[#allocation52_spill] sm:$0xff] %v11296_v16  ;;  %8877 = vst [vmem:[%s16019_s22 + $0x68] sm:$0xff] %v1625_v41 }
 0x2ac   :  { %6469 = vrot.lane.b32.xlu1 %v16508_v43, %s9358_s12  ;;  %1636 = vst [vmem:[%s16019_s22 + $0x30] sm:$0xff] %v1626_v62  ;;  %v1627_v40 = vmul.f32 %v11202_v8, %v1605_v9  ;;  %6467 = vrot.lane.b32.xlu0 %v9928_v22, %s9358_s12 }
 0x2ad   :  { %8878 = vst [vmem:[%s16019_s22 + $0x70] sm:$0xff] %v1628_v37  ;;  %v1629_v45 = vmul.f32 %v11202_v8, %v1607_v57  ;;  %v3191_v37 = vsel %vm16410_vm4, %v11172_v28, %v3042_v51  ;;  %v11345_v11 = vpop.permute.xlu0 %3045 }
 0x2ae   :  { %1637 = vst [vmem:[%s16019_s22 + $0x38] sm:$0xff] %v1627_v40  ;;  %v11322_v27 = vpop.permute.xlu1 %3043  ;;  %16573 = vst [vmem:[#allocation6_spill] sm:$0xff] %v11345_v11 }
 0x2af   :  { %8879 = vst [vmem:[%s16019_s22 + $0x78] sm:$0xff] %v1629_v45  ;;  %16571 = vst [vmem:[#allocation5_spill] sm:$0xff] %v11322_v27  ;;  %v3192_v8 = vsel %vm16410_vm4, %v3042_v51, %v11322_v27  ;;  %s1813_s22 = smul.f32 0.015625, %s16014_s19 }
 0x2b0   :  { %6532 = vrot.lane.b32.xlu1 %v16508_v43, %s9359_s30  ;;  %6530 = vrot.lane.b32.xlu0 %v9928_v22, %s9359_s30 }
 0x2b1   :  { %3721 = vmatprep.subr.bf16.mxu0 %v3192_v8  ;;  %s1814_s28 = sadd.f32 1.0, %s1813_s22 }
 0x2b2   :  { %3722 = vmatpush1.bf16.msra.mxu0 %v3191_v37  ;;  %v11332_v55 = vpop.permute.xlu1 %3047 }
 0x2b3   :  { %16572 = vst [vmem:[#allocation4_spill] sm:$0xff] %v11332_v55 }
 0x2b4   :  { %6473 = vrot.lane.b32.xlu1 %v16510_v35, %s9358_s12  ;;  %6471 = vrot.lane.b32.xlu0 %v16507_v26, %s9358_s12 }
 0x2b5   :  { %9003 = vmatmul.mubr.msk.bf16.vlgmr.msra.gmra.mxu0 %vm16354_vm10, %v10916_v25 }
 0x2b6   :  { %5889 = vmatprep.mubr.bf16.mxu0 %v11340_v15  ;;  %v11343_v53 = vpop.permute.xlu1 %6577 }
 0x2b8   :  { %6536 = vrot.lane.b32.xlu1 %v16510_v35, %s9359_s30  ;;  %6534 = vrot.lane.b32.xlu0 %v16507_v26, %s9359_s30 }
 0x2ba   :  { %v11351_v12 = vpop.permute.xlu1 %6581  ;;  %v11353_v4 = vpop.permute.xlu0 %2941 }
 0x2bb   :  { %16574 = vst [vmem:[#allocation7_spill] sm:$0xff] %v11353_v4 }
 0x2bc   :  { %6345 = vrot.lane.b32.xlu1 %v16508_v43, %s9360_s24  ;;  %6343 = vrot.lane.b32.xlu0 %v9928_v22, %s9360_s24 }
 0x2be   :  { %v11359_v33 = vpop.permute.xlu1 %6453  ;;  %v11361_v41 = vpop.permute.xlu0 %6579 }
 0x2c0   :  { %6407 = vrot.lane.b32.xlu1 %v16508_v43, %s9361_s25  ;;  %6405 = vrot.lane.b32.xlu0 %v9928_v22, %s9361_s25 }
 0x2c2   :  { %v11367_v62 = vpop.permute.xlu1 %6457  ;;  %v11369_v9 = vpop.permute.xlu0 %6583 }
 0x2c4   :  { %6349 = vrot.lane.b32.xlu1 %v16510_v35, %s9360_s24  ;;  %6347 = vrot.lane.b32.xlu0 %v16507_v26, %s9360_s24 }
 0x2c6   :  { %v11375_v57 = vpop.permute.xlu1 %6518  ;;  %v11377_v40 = vpop.permute.xlu0 %6455 }
 0x2c8   :  { %6411 = vrot.lane.b32.xlu1 %v16510_v35, %s9361_s25  ;;  %6409 = vrot.lane.b32.xlu0 %v16507_v26, %s9361_s25 }
 0x2ca   :  { %v11383_v45 = vpop.permute.xlu1 %6451  ;;  %v11385_v51 = vpop.permute.xlu0 %6516 }
 0x2cc   :  { %6283 = vrot.lane.b32.xlu1 %v16508_v43, %s9362_s5  ;;  %6281 = vrot.lane.b32.xlu0 %v9928_v22, %s9362_s5 }
 0x2ce   :  { %v11391_v8 = vpop.permute.xlu1 %6329  ;;  %v11393_v37 = vpop.permute.xlu0 %6520 }
 0x2cf   :  { %16575 = vst [vmem:[#allocation68_spill] sm:$0xff] %v11391_v8 }
 0x2d0   :  { %6287 = vrot.lane.b32.xlu1 %v16510_v35, %s9362_s5  ;;  %6285 = vrot.lane.b32.xlu0 %v16507_v26, %s9362_s5 }
 0x2d2   :  { %v11399_v4 = vpop.permute.xlu1 %6333  ;;  %v11401_v27 = vpop.permute.xlu0 %6514 }
 0x2d3   :  { %16576 = vst [vmem:[#allocation69_spill] sm:$0xff] %v11399_v4 }
 0x2d4   :  { %6603 = vrot.lane.b32.xlu1 %v16513_v46, %s9357_s2  ;;  %6601 = vrot.lane.b32.xlu0 %v16509_v18, %s9357_s2 }
 0x2d6   :  { %v11407_v43 = vpop.permute.xlu1 %6393  ;;  %v11409_v22 = vpop.permute.xlu0 %6331 }
 0x2d7   :  { %16577 = vst [vmem:[#allocation70_spill] sm:$0xff] %v11409_v22 }
 0x2d8   :  { %6607 = vrot.lane.b32.xlu1 %v16515_v20, %s9357_s2  ;;  %6605 = vrot.lane.b32.xlu0 %v16514_v47, %s9357_s2 }
 0x2da   :  { %v11415_v35 = vpop.permute.xlu1 %6327  ;;  %v11417_v26 = vpop.permute.xlu0 %6391 }
 0x2db   :  { %16578 = vst [vmem:[#allocation71_spill] sm:$0xff] %v11415_v35  ;;  %16579 = vst [vmem:[#allocation72_spill] sm:$0xff] %v11417_v26 }
 0x2dc   :  { %6477 = vrot.lane.b32.xlu1 %v16513_v46, %s9358_s12  ;;  %6475 = vrot.lane.b32.xlu0 %v16509_v18, %s9358_s12 }
 0x2de   :  { %v11423_v11 = vpop.permute.xlu1 %6267  ;;  %v11425_v55 = vpop.permute.xlu0 %6395 }
 0x2df   :  { %16580 = vst [vmem:[#allocation73_spill] sm:$0xff] %v11423_v11  ;;  %16581 = vst [vmem:[#allocation74_spill] sm:$0xff] %v11425_v55 }
 0x2e0   :  { %6540 = vrot.lane.b32.xlu1 %v16513_v46, %s9359_s30  ;;  %6538 = vrot.lane.b32.xlu0 %v16509_v18, %s9359_s30 }
 0x2e2   :  { %v11431_v17 = vpop.permute.xlu1 %6271  ;;  %v11433_v16 = vpop.permute.xlu0 %6389 }
 0x2e3   :  { %16582 = vst [vmem:[#allocation75_spill] sm:$0xff] %v11431_v17  ;;  %16583 = vst [vmem:[#allocation76_spill] sm:$0xff] %v11433_v16 }
 0x2e4   :  { %6481 = vrot.lane.b32.xlu1 %v16515_v20, %s9358_s12  ;;  %6479 = vrot.lane.b32.xlu0 %v16514_v47, %s9358_s12 }
 0x2e5   :  { %v9251_v28 = vpop.f32.mrf.mxu0 }
 0x2e6   :  { %v11439_v11 = vpop.permute.xlu1 %6585  ;;  %v11441_v1 = vpop.permute.xlu0 %6269  ;;  %v1583_v35 = vadd.f32 %v9251_v28, %v16565_v6 }
 0x2e7   :  { %16584 = vst [vmem:[#allocation77_spill] sm:$0xff] %v11439_v11  ;;  %v1574_v39 = vpop.f32.mrf.mxu0  ;;  %16585 = vst [vmem:[#allocation78_spill] sm:$0xff] %v11441_v1 }
 0x2e8   :  { %6544 = vrot.lane.b32.xlu1 %v16515_v20, %s9359_s30  ;;  %6542 = vrot.lane.b32.xlu0 %v16514_v47, %s9359_s30  ;;  %v1575_v16 = vadd.f32 %v1574_v39, %v16560_v0  ;;  %v1603_v1 = vmax.f32 %v1583_v35, 0.0 }
 0x2e9   :  { %v9252_v17 = vpop.f32.mrf.mxu0 }
 0x2ea   :  { %v1586_v4 = vadd.f32 %v9252_v17, %v16567_v23  ;;  %v11450_v55 = vpop.permute.xlu1 %6589  ;;  %v11452_v11 = vpop.permute.xlu0 %6265  ;;  %v1593_v6 = vmax.f32 %v1575_v16, 0.0 }
 0x2eb   :  { %v1577_v8 = vpop.f32.mrf.mxu0 }
 0x2ec   :  { %6353 = vrot.lane.b32.xlu1 %v16513_v46, %s9360_s24  ;;  %v1608_v22 = vmax.f32 %v1586_v4, 0.0  ;;  %v1578_v28 = vadd.f32 %v1577_v8, %v16564_v60  ;;  %6351 = vrot.lane.b32.xlu0 %v16509_v18, %s9360_s24  ;;  %v9321_v8 = vld [vmem:[%s16018_s9 + $0x10] sm:$0xff]  }
 0x2ee   :  { %v1656_v26 = vpack.c.bf16 %v1608_v22, %v1603_v1  ;;  %v1598_v0 = vmax.f32 %v1578_v28, 0.0  ;;  %v11459_v39 = vpop.permute.xlu1 %6459  ;;  %v11461_v23 = vpop.permute.xlu0 %6587  ;;  %v9320_v1 = vld [vmem:[%s16018_s9 + $0x8] sm:$0xff]   ;;  %v3237_v22 = vsel %vm16410_vm4, %v10794_v5, %v10796_v61 }
 0x2ef   :  { %v3326_v5 = vsel %vm737_vm6, %v3237_v22, 0  ;;  %v3217_v22 = vsel %vm16410_vm4, %v10810_v50, %v10931_v38  ;;  %v3197_v50 = vsel %vm16410_vm4, %v10822_v49, %v10870_v13  ;;  %v3177_v49 = vsel %vm16410_vm4, %v10831_v31, %v10851_v3 }
 0x2f0   :  { %6415 = vrot.lane.b32.xlu1 %v16513_v46, %s9361_s25  ;;  %v1655_v17 = vpack.c.bf16 %v1598_v0, %v1593_v6  ;;  %9253 = vmatprep.subr.bf16.mxu1 %v1656_v26  ;;  %v6622_v31 = vsel %vm6619_vm11, %v11351_v12, %v11369_v9 }
 0x2f1   :  { %6413 = vrot.lane.b32.xlu0 %v16509_v18, %s9361_s25  ;;  %9254 = vmatpush3.bf16.msra.mxu1 %v1656_v26  ;;  %v3238_v26 = vsel %vm16410_vm4, %v10796_v61, %v10868_v24  ;;  %v3218_v61 = vsel %vm16410_vm4, %v10931_v38, %v10962_v44  ;;  %v9322_v44 = vld [vmem:[%s16018_s9 + $0x18] sm:$0xff]   ;;  %v3178_v38 = vsel %vm16410_vm4, %v10851_v3, %v10907_v63  ;;  %s9363_s9 = smov 99  }
 0x2f2   :  { %9255 = vmatprep.subr.bf16.mxu1 %v1655_v17  ;;  %v11467_v35 = vpop.permute.xlu1 %6522  ;;  %v11469_v60 = vpop.permute.xlu0 %6591  ;;  %v3241_v63 = vsel %vm16410_vm4, %v10933_v10, %v10905_v42  ;;  %v6558_v10 = vsel %vm6556_vm12, %v11385_v51, %v11375_v57 }
 0x2f4   :  { %6355 = vrot.lane.b32.xlu1 %v16514_v47, %s9360_s24 }
 0x2f5   :  { %6357 = vrot.lane.b32.xlu0 %v16515_v20, %s9360_s24  ;;  %9256 = vmatpush3.bf16.msra.mxu1 %v1655_v17  ;;  %v11484_v16 = vpop.f32.mrf.mxu0 }
 0x2f6   :  { %8988 = vmatprep.subr.msk.bf16.mxu1 %vm737_vm6, %v3238_v26  ;;  %v11487_v4 = vpop.permute.xlu1 %6463  ;;  %v11494_v6 = vpop.permute.xlu0 %6461  ;;  %v3198_v26 = vsel %vm16410_vm4, %v10870_v13, %v10952_v34  ;;  %v6621_v13 = vsel %vm6619_vm11, %v11361_v41, %v11351_v12 }
 0x2f7   :  { %v11492_v28 = vpop.f32.mrf.mxu0 }
 0x2f8   :  { %6417 = vrot.lane.b32.xlu1 %v16514_v47, %s9361_s25  ;;  %9258 = vmatmul.mubr.msk.bf16.vlgmr.msra.gmra.mxu1 %vm16263_vm8, %v9320_v1 }
 0x2f9   :  { %3429 = vmatpush1.bf16.msra.mxu1 %v3326_v5  ;;  %6419 = vrot.lane.b32.xlu0 %v16515_v20, %s9361_s25  ;;  %v3417_v24 = vpop.f32.mrf.mxu0 }
 0x2fa   :  { %3430 = vmatprep.subr.bf16.mxu1 %v3218_v61  ;;  %v11505_v0 = vpop.permute.xlu1 %6526  ;;  %9261 = vmatprep.mubr.msk.bf16.mxu1 %vm16263_vm8, %v9321_v8  ;;  %v11508_v17 = vpop.permute.xlu0 %6524  ;;  %v6620_v61 = vsel %vm6619_vm11, %v11343_v53, %v11361_v41  ;;  %v3242_v53 = vsel %vm16410_vm4, %v10905_v42, %v10954_v30  ;;  %v3338_v42 = vsel %vm737_vm6, %v3241_v63, 0  ;;  %v3222_v30 = vsel %vm16410_vm4, %v10970_v7, %v10982_v48  ;;  %v16587_v63 = vld [vmem:[#allocation66_spill] sm:$0xff] }
 0x2fb   :  { %v3418_v1 = vpop.f32.mrf.mxu0  ;;  %v6495_v41 = vsel %vm16305_vm13, %v11359_v33, %v11377_v40  ;;  %v3221_v48 = vsel %vm16410_vm4, %v10972_v32, %v10970_v7  ;;  %v3201_v7 = vsel %vm16410_vm4, %v10990_v19, %v10988_v2  ;;  %v6557_v32 = vsel %vm6556_vm12, %v11401_v27, %v11385_v51  ;;  %v16586_v27 = vld [vmem:[#allocation61_spill] sm:$0xff] }
 0x2fc   :  { %6291 = vrot.lane.b32.xlu1 %v16513_v46, %s9362_s5  ;;  %v3181_v19 = vsel %vm16410_vm4, %v11008_v59, %v11006_v52  ;;  %v3245_v51 = vsel %vm16410_vm4, %v16586_v27, %v11041_v58 }
 0x2fd   :  { %3431 = vmatpush1.bf16.msra.mxu1 %v3217_v22  ;;  %6289 = vrot.lane.b32.xlu0 %v16509_v18, %s9362_s5  ;;  %v6559_v22 = vsel %vm6556_vm12, %v11375_v57, %v11393_v37  ;;  %v3202_v57 = vsel %vm16410_vm4, %v10988_v2, %v11000_v56  ;;  %v3182_v56 = vsel %vm16410_vm4, %v11006_v52, %v11018_v14  ;;  %v3350_v59 = vsel %vm737_vm6, %v3245_v51, 0 }
 0x2fe   :  { %3432 = vmatprep.subr.bf16.mxu1 %v3198_v26  ;;  %v11523_v8 = vpop.permute.xlu1 %6335  ;;  %v11525_v5 = vpop.permute.xlu0 %6465  ;;  %v6750_v26 = vsel %vm737_vm6, %v6495_v41, %v6558_v10 }
 0x300   :  { %6293 = vrot.lane.b32.xlu1 %v16514_v47, %s9362_s5  ;;  %9262 = vmatmul.mubr.msk.bf16.gmra.mxu1 %vm16263_vm8, %v9322_v44  ;;  %v16624_v47 = vld [vmem:[#allocation51_spill] sm:$0xff] }
 0x301   :  { %3433 = vmatpush1.bf16.msra.mxu1 %v3197_v50  ;;  %6295 = vrot.lane.b32.xlu0 %v16515_v20, %s9362_s5  ;;  %v6496_v50 = vsel %vm16305_vm13, %v11377_v40, %v11367_v62 }
 0x302   :  { %3434 = vmatprep.subr.bf16.mxu1 %v3178_v38  ;;  %v11538_v34 = vpop.permute.xlu1 %6397  ;;  %3452 = vmatprep.mubr.bf16.mxu1 %v11340_v15  ;;  %v11544_v24 = vpop.permute.xlu0 %6528 }
 0x304   :  { %7104 = vrot.lane.b32.xlu1 %v6620_v61, %s9363_s9  ;;  %v6753_v61 = vsel %vm737_vm6, %v6496_v50, %v6559_v22  ;;  %v16591_v22 = vld [vmem:[#allocation64_spill] sm:$0xff]  ;;  %v16593_v50 = vld [vmem:[#allocation21_spill] sm:$0xff] }
 0x305   :  { %3435 = vmatpush1.bf16.msra.mxu1 %v3177_v49  ;;  %7106 = vrot.lane.b32.xlu0 %v6621_v13, %s9363_s9  ;;  %v6494_v13 = vsel %vm16305_vm13, %v11383_v45, %v11359_v33  ;;  %v3246_v33 = vsel %vm16410_vm4, %v11041_v58, %v16587_v63  ;;  %v16588_v58 = vld [vmem:[#allocation20_spill] sm:$0xff] }
 0x306   :  { %8992 = vmatprep.subr.msk.bf16.mxu1 %vm737_vm6, %v3242_v53  ;;  %v11561_v1 = vpop.permute.xlu1 %6339  ;;  %v11566_v3 = vpop.permute.xlu0 %6337  ;;  %v6747_v14 = vsel %vm737_vm6, %v6494_v13, %v6557_v32  ;;  %v16598_v63 = vld [vmem:[#allocation72_spill] sm:$0xff] }
 0x308   :  { %7108 = vrot.lane.b32.xlu1 %v6622_v31, %s9363_s9  ;;  %8989 = vmatmul.mubr.msk.bf16.vlgmr.msra.gmra.mxu1 %vm16354_vm10, %v10916_v25  ;;  %v16589_v31 = vld [vmem:[#allocation60_spill] sm:$0xff] }
 0x309   :  { %3511 = vmatpush1.bf16.msra.mxu1 %v3338_v42  ;;  %6609 = vrot.lane.b32.xlu0 %v16516_v36, %s9357_s2  ;;  %v3226_v42 = vsel %vm16410_vm4, %v16589_v31, %v16588_v58  ;;  %v16599_v58 = vld [vmem:[#allocation22_spill] sm:$0xff] }
 0x30a   :  { %3512 = vmatprep.subr.bf16.mxu1 %v3222_v30  ;;  %v11580_v12 = vpop.permute.xlu1 %6401  ;;  %3534 = vmatprep.mubr.bf16.mxu1 %v11340_v15  ;;  %v11589_v44 = vpop.permute.xlu0 %6399 }
 0x30c   :  { %6611 = vrot.lane.b32.xlu1 %v16523_v54, %s9357_s2 }
 0x30d   :  { %3513 = vmatpush1.bf16.msra.mxu1 %v3221_v48  ;;  %7064 = vrot.lane.b32.xlu0 %v6750_v26, %s9363_s9  ;;  %v3225_v48 = vsel %vm16410_vm4, %v16591_v22, %v16589_v31  ;;  %v16592_v26 = vld [vmem:[#allocation23_spill] sm:$0xff]  ;;  %v16600_v31 = vld [vmem:[#allocation65_spill] sm:$0xff] }
 0x30e   :  { %3514 = vmatprep.subr.bf16.mxu1 %v3202_v57  ;;  %v11604_v38 = vpop.permute.xlu1 %6273  ;;  %v11607_v49 = vpop.permute.xlu0 %6341  ;;  %v3206_v57 = vsel %vm16410_vm4, %v16593_v50, %v16592_v26  ;;  %v16603_v26 = vld [vmem:[#allocation68_spill] sm:$0xff] }
 0x310   :  { %7066 = vrot.lane.b32.xlu1 %v6753_v61, %s9363_s9 }
 0x311   :  { %3515 = vmatpush1.bf16.msra.mxu1 %v3201_v7  ;;  %6613 = vrot.lane.b32.xlu0 %v16525_v29, %s9357_s2 }
 0x312   :  { %3516 = vmatprep.subr.bf16.mxu1 %v3182_v56  ;;  %v11621_v40 = vpop.permute.xlu1 %6277  ;;  %v11626_v2 = vpop.permute.xlu0 %6403  ;;  %v16595_v56 = vld [vmem:[#allocation63_spill] sm:$0xff] }
 0x313   :  { %v3205_v13 = vsel %vm16410_vm4, %v16595_v56, %v16593_v50  ;;  %v16605_v56 = vld [vmem:[#allocation16_spill] sm:$0xff] }
 0x314   :  { %6615 = vrot.lane.b32.xlu1 %v16526_v21, %s9357_s2 }
 0x315   :  { %3517 = vmatpush1.bf16.msra.mxu1 %v3181_v19  ;;  %7062 = vrot.lane.b32.xlu0 %v6747_v14, %s9363_s9  ;;  %v16596_v19 = vld [vmem:[#allocation67_spill] sm:$0xff]  ;;  %v16597_v14 = vld [vmem:[#allocation62_spill] sm:$0xff] }
 0x316   :  { %8996 = vmatprep.subr.msk.bf16.mxu1 %vm737_vm6, %v3246_v33  ;;  %v11642_v45 = vpop.permute.xlu1 %6593  ;;  %v11644_v53 = vpop.permute.xlu0 %6275  ;;  %v3186_v27 = vsel %vm16410_vm4, %v16597_v14, %v16596_v19  ;;  %v6432_v33 = vsel %vm5364_vm14, %v16598_v63, %v11407_v43 }
 0x318   :  { %6483 = vrot.lane.b32.xlu1 %v16516_v36, %s9358_s12  ;;  %v11648_v52 = vpop.f32.mrf.mxu0  ;;  %8993 = vmatmul.mubr.msk.bf16.vlgmr.msra.gmra.mxu1 %vm16354_vm10, %v10916_v25 }
 0x319   :  { %3593 = vmatpush1.bf16.msra.mxu1 %v3350_v59  ;;  %6485 = vrot.lane.b32.xlu0 %v16523_v54, %s9358_s12 }
 0x31a   :  { %v11658_v10 = vpop.f32.mrf.mxu0  ;;  %3594 = vmatprep.subr.bf16.mxu1 %v3226_v42  ;;  %v11660_v30 = vpop.permute.xlu1 %6599  ;;  %3616 = vmatprep.mubr.bf16.mxu1 %v11340_v15  ;;  %v3249_v42 = vsel %vm16410_vm4, %v16600_v31, %v16599_v58 }
 0x31b   :  { %16590 = vst [vmem:[#allocation61_spill] sm:$0xff] %v11660_v30  ;;  %v11663_v41 = vpop.permute.xlu0 %6279  ;;  %v16637_v30 = vld [vmem:[#allocation34_spill] sm:$0xff] }
 0x31c   :  { %6546 = vrot.lane.b32.xlu1 %v16516_v36, %s9359_s30  ;;  %v3499_v25 = vpop.f32.mrf.mxu0 }
 0x31d   :  { %3595 = vmatpush1.bf16.msra.mxu1 %v3225_v48  ;;  %6548 = vrot.lane.b32.xlu0 %v16523_v54, %s9359_s30  ;;  %v16601_v25 = vld [vmem:[#allocation53_spill] sm:$0xff]  ;;  %v16602_v48 = vld [vmem:[#allocation70_spill] sm:$0xff] }
 0x31e   :  { %v3500_v61 = vpop.f32.mrf.mxu0  ;;  %3596 = vmatprep.subr.bf16.mxu1 %v3206_v57  ;;  %v11675_v7 = vpop.permute.xlu1 %6469  ;;  %v3185_v22 = vsel %vm16410_vm4, %v16601_v25, %v16597_v14  ;;  %v6370_v50 = vsel %vm5121_vm15, %v16603_v26, %v16602_v48  ;;  %v16604_v57 = vld [vmem:[#allocation74_spill] sm:$0xff] }
 0x31f   :  { %16594 = vst [vmem:[#allocation66_spill] sm:$0xff] %v11675_v7  ;;  %v11677_v32 = vpop.permute.xlu0 %6595  ;;  %v6433_v61 = vsel %vm5364_vm14, %v11407_v43, %v16604_v57  ;;  %v6687_v14 = vsel %vm737_vm6, %v6370_v50, %v6432_v33  ;;  %v16608_v43 = vld [vmem:[#allocation76_spill] sm:$0xff]  ;;  %v3362_v33 = vsel %vm737_vm6, %v3249_v42, 0  ;;  %v16609_v50 = vld [vmem:[#allocation71_spill] sm:$0xff] }
 0x320   :  { %6487 = vrot.lane.b32.xlu1 %v16525_v29, %s9358_s12  ;;  %v6431_v25 = vsel %vm5364_vm14, %v16608_v43, %v16598_v63  ;;  %v6369_v63 = vsel %vm5121_vm15, %v16609_v50, %v16603_v26  ;;  %v16613_v26 = vld [vmem:[#allocation19_spill] sm:$0xff] }
 0x321   :  { %3597 = vmatpush1.bf16.msra.mxu1 %v3205_v13  ;;  %6489 = vrot.lane.b32.xlu0 %v16526_v21, %s9358_s12  ;;  %v3250_v13 = vsel %vm16410_vm4, %v16599_v58, %v16605_v56  ;;  %v11731_v58 = vld [vmem:[%s16016_s11] sm:$0xf]  ;;  %v16610_v56 = vld [vmem:[#allocation18_spill] sm:$0xff]  ;;  %v6684_v20 = vsel %vm737_vm6, %v6369_v63, %v6431_v25  ;;  %v16638_v7 = vld [vmem:[#allocation27_spill] sm:$0xff]  ;;  %s9364_s11 = smov 3  }
 0x322   :  { %3598 = vmatprep.subr.bf16.mxu1 %v3186_v27  ;;  %v11689_v51 = vpop.permute.xlu1 %6532  ;;  %v16607_v27 = vld [vmem:[#allocation69_spill] sm:$0xff] }
 0x323   :  { %v11694_v59 = vpop.permute.xlu0 %6597  ;;  %v6371_v31 = vsel %vm5121_vm15, %v16602_v48, %v16607_v27 }
 0x324   :  { %6550 = vrot.lane.b32.xlu1 %v16525_v29, %s9359_s30  ;;  %v6690_v48 = vsel %vm737_vm6, %v6371_v31, %v6433_v61  ;;  %v16614_v31 = vld [vmem:[#allocation32_spill] sm:$0xff] }
 0x325   :  { %3599 = vmatpush1.bf16.msra.mxu1 %v3185_v22  ;;  %6552 = vrot.lane.b32.xlu0 %v16526_v21, %s9359_s30 }
 0x326   :  { %9000 = vmatprep.subr.msk.bf16.mxu1 %vm737_vm6, %v3250_v13  ;;  %v11716_v19 = vpop.permute.xlu1 %6473  ;;  %v16611_v13 = vld [vmem:[#allocation24_spill] sm:$0xff] }
 0x327   :  { %16606 = vst [vmem:[#allocation20_spill] sm:$0xff] %v11716_v19  ;;  %v11725_v22 = vpop.permute.xlu0 %6467  ;;  %v3229_v61 = vsel %vm16410_vm4, %v16613_v26, %v16611_v13 }
 0x328   :  { %7022 = vrot.lane.b32.xlu1 %v6687_v14, %s9363_s9  ;;  %8997 = vmatmul.mubr.msk.bf16.vlgmr.msra.gmra.mxu1 %vm16354_vm10, %v11731_v58  ;;  %v3230_v14 = vsel %vm16410_vm4, %v16611_v13, %v16610_v56  ;;  %v16618_v56 = vld [vmem:[#allocation43_spill] sm:$0xff]  ;;  %v16619_v13 = vld [vmem:[#allocation30_spill] sm:$0xff] }
 0x329   :  { %3675 = vmatpush1.bf16.msra.mxu1 %v3362_v33  ;;  %7024 = vrot.lane.b32.xlu0 %v6690_v48, %s9363_s9  ;;  %v16615_v33 = vld [vmem:[#allocation29_spill] sm:$0xff] }
 0x32a   :  { %3676 = vmatprep.subr.bf16.mxu1 %v3230_v14  ;;  %v11744_v43 = vpop.permute.xlu1 %6536  ;;  %3698 = vmatprep.mubr.bf16.mxu1 %v11340_v15  ;;  %v3210_v48 = vsel %vm16410_vm4, %v16615_v33, %v16614_v31  ;;  %v3190_v14 = vsel %vm16410_vm4, %v16619_v13, %v16618_v56 }
 0x32b   :  { %16612 = vst [vmem:[#allocation60_spill] sm:$0xff] %v11744_v43  ;;  %v11748_v42 = vpop.permute.xlu0 %6530  ;;  %v16635_v43 = vld [vmem:[#allocation26_spill] sm:$0xff] }
 0x32c   :  { %7020 = vrot.lane.b32.xlu1 %v6684_v20, %s9363_s9  ;;  %v16617_v20 = vld [vmem:[#allocation31_spill] sm:$0xff] }
 0x32d   :  { %3677 = vmatpush1.bf16.msra.mxu1 %v3229_v61  ;;  %6359 = vrot.lane.b32.xlu0 %v16516_v36, %s9360_s24  ;;  %v3209_v63 = vsel %vm16410_vm4, %v16617_v20, %v16615_v33  ;;  %v16621_v33 = vld [vmem:[#allocation33_spill] sm:$0xff]  ;;  %v16622_v20 = vld [vmem:[#allocation48_spill] sm:$0xff] }
 0x32e   :  { %3678 = vmatprep.subr.bf16.mxu1 %v3210_v48  ;;  %v11759_v25 = vpop.permute.xlu1 %6345  ;;  %v3189_v48 = vsel %vm16410_vm4, %v16621_v33, %v16619_v13 }
 0x32f   :  { %16616 = vst [vmem:[#allocation64_spill] sm:$0xff] %v11759_v25  ;;  %v11761_v50 = vpop.permute.xlu0 %6471  ;;  %v16629_v25 = vld [vmem:[#allocation17_spill] sm:$0xff] }
 0x330   :  { %6361 = vrot.lane.b32.xlu1 %v16523_v54, %s9360_s24 }
 0x331   :  { %3679 = vmatpush1.bf16.msra.mxu1 %v3209_v63  ;;  %6421 = vrot.lane.b32.xlu0 %v16516_v36, %s9361_s25  ;;  %v16623_v63 = vld [vmem:[#allocation44_spill] sm:$0xff] }
 0x332   :  { %3680 = vmatprep.subr.bf16.mxu1 %v3190_v14  ;;  %v11773_v26 = vpop.permute.xlu1 %6407  ;;  %v3253_v56 = vsel %vm16410_vm4, %v16623_v63, %v16622_v20  ;;  %v3254_v14 = vsel %vm16410_vm4, %v16622_v20, %v16624_v47  ;;  %v16628_v20 = vld [vmem:[#allocation73_spill] sm:$0xff] }
 0x333   :  { %16620 = vst [vmem:[#allocation23_spill] sm:$0xff] %v11773_v26  ;;  %v11775_v61 = vpop.permute.xlu0 %6534  ;;  %v3374_v47 = vsel %vm737_vm6, %v3253_v56, 0  ;;  %v16632_v26 = vld [vmem:[#allocation75_spill] sm:$0xff] }
 0x334   :  { %6423 = vrot.lane.b32.xlu1 %v16523_v54, %s9361_s25  ;;  %v11779_v31 = vpop.f32.mrf.mxu0 }
 0x335   :  { %3681 = vmatpush1.bf16.msra.mxu1 %v3189_v48  ;;  %6363 = vrot.lane.b32.xlu0 %v16525_v29, %s9360_s24  ;;  %v16627_v48 = vld [vmem:[#allocation78_spill] sm:$0xff] }
 0x336   :  { %v11792_v18 = vpop.f32.mrf.mxu0  ;;  %9004 = vmatprep.subr.msk.bf16.mxu1 %vm737_vm6, %v3254_v14  ;;  %v11795_v46 = vpop.permute.xlu1 %6349  ;;  %v6308_v63 = vsel %vm4878_vm0, %v16628_v20, %v16627_v48  ;;  %v16630_v14 = vld [vmem:[#allocation47_spill] sm:$0xff]  ;;  %v6309_v56 = vsel %vm4878_vm0, %v16627_v48, %v16632_v26 }
 0x337   :  { %16625 = vst [vmem:[#allocation21_spill] sm:$0xff] %v11795_v46  ;;  %v11797_v13 = vpop.permute.xlu0 %6343  ;;  %v3234_v46 = vsel %vm16410_vm4, %v16630_v14, %v16629_v25  ;;  %v16634_v25 = vld [vmem:[#allocation35_spill] sm:$0xff] }
 0x338   :  { %16626 = vst [vmem:[#allocation63_spill] sm:$0xff] %v11797_v13  ;;  %6365 = vrot.lane.b32.xlu1 %v16526_v21, %s9360_s24  ;;  %v3581_v33 = vpop.f32.mrf.mxu0  ;;  %9001 = vmatmul.mubr.msk.bf16.vlgmr.msra.gmra.mxu1 %vm16354_vm10, %v11731_v58 }
 0x339   :  { %3757 = vmatpush1.bf16.msra.mxu1 %v3374_v47  ;;  %6425 = vrot.lane.b32.xlu0 %v16525_v29, %s9361_s25  ;;  %v3233_v47 = vsel %vm16410_vm4, %v16634_v25, %v16630_v14  ;;  %v6645_v14 = vsel %vm737_vm6, %v16638_v7, %v6309_v56 }
 0x33a   :  { %v3582_v13 = vpop.f32.mrf.mxu0  ;;  %3758 = vmatprep.subr.bf16.mxu1 %v3234_v46  ;;  %v11812_v33 = vpop.permute.xlu1 %6411  ;;  %3780 = vmatprep.mubr.bf16.mxu1 %v11340_v15  ;;  %v6643_v46 = vsel %vm737_vm6, %v16635_v43, %v6308_v63  ;;  %v16639_v43 = vld [vmem:[#allocation36_spill] sm:$0xff] }
 0x33b   :  { %16631 = vst [vmem:[#allocation67_spill] sm:$0xff] %v11812_v33  ;;  %v11818_v19 = vpop.permute.xlu0 %6405  ;;  %v6307_v13 = vsel %vm4878_vm0, %v11452_v11, %v16628_v20  ;;  %v16636_v33 = vld [vmem:[#allocation52_spill] sm:$0xff]  ;;  %v3213_v11 = vsel %vm16410_vm4, %v16639_v43, %v16637_v30  ;;  %v16640_v20 = vld [vmem:[#allocation25_spill] sm:$0xff] }
 0x33c   :  { %16633 = vst [vmem:[#allocation62_spill] sm:$0xff] %v11818_v19  ;;  %6427 = vrot.lane.b32.xlu1 %v16526_v21, %s9361_s25  ;;  %v3214_v48 = vsel %vm16410_vm4, %v16637_v30, %v16636_v33  ;;  %v6641_v63 = vsel %vm737_vm6, %v16640_v20, %v6307_v13  ;;  %v16641_v33 = vld [vmem:[#allocation4_spill] sm:$0xff]  ;;  %v16643_v30 = vld [vmem:[#allocation5_spill] sm:$0xff] }
 0x33d   :  { %3759 = vmatpush1.bf16.msra.mxu1 %v3233_v47  ;;  %6980 = vrot.lane.b32.xlu0 %v6643_v46, %s9363_s9  ;;  %v16642_v47 = vld [vmem:[#allocation6_spill] sm:$0xff] }
 0x33e   :  { %3760 = vmatprep.subr.bf16.mxu1 %v3214_v48  ;;  %v11834_v19 = vpop.permute.xlu1 %6283  ;;  %v3194_v46 = vsel %vm16410_vm4, %v16642_v47, %v16641_v33  ;;  %v3193_v48 = vsel %vm16410_vm4, %v16643_v30, %v16642_v47  ;;  %v6497_v30 = vsel %vm16305_vm13, %v11367_v62, %v11459_v39 }
 0x33f   :  { %v11838_v25 = vpop.permute.xlu0 %6347 }
 0x340   :  { %6982 = vrot.lane.b32.xlu1 %v6645_v14, %s9363_s9  ;;  %v16644_v14 = vld [vmem:[#allocation77_spill] sm:$0xff] }
 0x341   :  { %3761 = vmatpush1.bf16.msra.mxu1 %v3213_v11  ;;  %6978 = vrot.lane.b32.xlu0 %v6641_v63, %s9363_s9  ;;  %v6623_v43 = vsel %vm6619_vm11, %v11369_v9, %v16644_v14  ;;  %v6624_v20 = vsel %vm6619_vm11, %v16644_v14, %v11461_v23  ;;  %v6498_v14 = vsel %vm16305_vm13, %v11459_v39, %v11494_v6 }
 0x342   :  { %3762 = vmatprep.subr.bf16.mxu1 %v3194_v46  ;;  %v11850_v7 = vpop.permute.xlu1 %6287  ;;  %v6626_v46 = vsel %vm6619_vm11, %v11450_v55, %v11469_v60 }
 0x343   :  { %v11852_v56 = vpop.permute.xlu0 %6409 }
 0x344   :  { %6297 = vrot.lane.b32.xlu1 %v16516_v36, %s9362_s5 }
 0x345   :  { %3763 = vmatpush1.bf16.msra.mxu1 %v3193_v48  ;;  %6299 = vrot.lane.b32.xlu0 %v16523_v54, %s9362_s5 }
 0x346   :  { %v11861_v13 = vpop.permute.xlu1 %6603 }
 0x347   :  { %v11866_v11 = vpop.permute.xlu0 %6281 }
 0x348   :  { %7110 = vrot.lane.b32.xlu1 %v6623_v43, %s9363_s9  ;;  %9005 = vmatmul.mubr.msk.bf16.vlgmr.msra.gmra.mxu1 %vm16354_vm10, %v11731_v58  ;;  %v6625_v58 = vsel %vm6619_vm11, %v11461_v23, %v11450_v55  ;;  %v6561_v23 = vsel %vm6556_vm12, %v11467_v35, %v11508_v17 }
 0x349   :  { %7112 = vrot.lane.b32.xlu0 %v6624_v20, %s9363_s9  ;;  %5930 = vmatprep.mubr.bf16.mxu1 %v11340_v15  ;;  %v6560_v15 = vsel %vm6556_vm12, %v11393_v37, %v11467_v35  ;;  %v6759_v62 = vsel %vm737_vm6, %v6498_v14, %v6561_v23  ;;  %v6562_v35 = vsel %vm6556_vm12, %v11508_v17, %v11505_v0  ;;  %v11935_v17 = vld [vmem:[#allocation2 + $0x54] ss:$0 sps:$4 sm:$0xff]  }
 0x34a   :  { %v11876_v63 = vpop.permute.xlu1 %6607  ;;  %v6756_v37 = vsel %vm737_vm6, %v6497_v30, %v6560_v15  ;;  %v16648_v15 = vld [vmem:[#allocation7_spill] sm:$0xff]  ;;  %v6563_v30 = vsel %vm6556_vm12, %v11505_v0, %v11544_v24 }
 0x34b   :  { %v11878_v33 = vpop.permute.xlu0 %6285  ;;  %v3414_v39 = vadd.f32 %v11484_v16, %v16648_v15  ;;  %v6500_v16 = vsel %vm16305_vm13, %v11487_v4, %v11525_v5 }
 0x34c   :  { %6301 = vrot.lane.b32.xlu1 %v16525_v29, %s9362_s5  ;;  %v6765_v0 = vsel %vm737_vm6, %v6500_v16, %v6563_v30 }
 0x34d   :  { %6303 = vrot.lane.b32.xlu0 %v16526_v21, %s9362_s5  ;;  %v11947_v21 = vpack.c.bf16 %v3414_v39, %v3414_v39 }
 0x34e   :  { %v11884_v9 = vpop.permute.xlu1 %6477 }
 0x34f   :  { %16645 = vst [vmem:[#allocation72_spill] sm:$0xff] %v11884_v9  ;;  %v11892_v47 = vpop.permute.xlu0 %6601 }
 0x350   :  { %7114 = vrot.lane.b32.xlu1 %v6625_v58, %s9363_s9 }
 0x351   :  { %7116 = vrot.lane.b32.xlu0 %v6626_v46, %s9363_s9  ;;  %v6499_v46 = vsel %vm16305_vm13, %v11494_v6, %v11487_v4  ;;  %v3416_v4 = vadd.f32 %v11492_v28, %v16648_v15 }
 0x352   :  { %v11905_v48 = vpop.permute.xlu1 %6540  ;;  %v6762_v14 = vsel %vm737_vm6, %v6499_v46, %v6562_v35 }
 0x353   :  { %16646 = vst [vmem:[#allocation22_spill] sm:$0xff] %v11905_v48  ;;  %v11911_v43 = vpop.permute.xlu0 %6605  ;;  %v11966_v30 = vpack.c.bf16 %v3416_v4, %v3416_v4  ;;  %v3496_v4 = vadd.f32 %v11648_v52, %v16648_v15 }
 0x354   :  { %7068 = vrot.lane.b32.xlu1 %v6756_v37, %s9363_s9  ;;  %v11914_v55 = vpop.f32.mrf.mxu0 }
 0x355   :  { %7070 = vrot.lane.b32.xlu0 %v6759_v62, %s9363_s9 }
 0x356   :  { %v11921_v20 = vpop.f32.mrf.mxu0  ;;  %v11923_v58 = vpop.permute.xlu1 %6481 }
 0x357   :  { %16647 = vst [vmem:[#allocation65_spill] sm:$0xff] %v11923_v58  ;;  %v11933_v23 = vpop.permute.xlu0 %6475 }
 0x358   :  { %6617 = vrot.lane.b32.xlu1 %v11935_v17, %s9357_s2  ;;  %v3663_v37 = vpop.f32.mrf.mxu0  ;;  %s9365_s2 = smov 2  }
 0x359   :  { %7072 = vrot.lane.b32.xlu0 %v6762_v14, %s9363_s9 }
 0x35a   :  { %v3664_v6 = vpop.f32.mrf.mxu0  ;;  %v11944_v62 = vpop.permute.xlu1 %6544 }
 0x35b   :  { %16649 = vst [vmem:[#allocation53_spill] sm:$0xff] %v11944_v62  ;;  %v11949_v29 = vpop.permute.xlu0 %6538 }
 0x35c   :  { %16650 = vst [vmem:[#allocation70_spill] sm:$0xff] %v11949_v29  ;;  %7074 = vrot.lane.b32.xlu1 %v6765_v0, %s9363_s9 }
 0x35d   :  { %5324 = vrot.lane.b32.xlu0 %v11947_v21, %s9361_s25 }
 0x35e   :  { %v11954_v35 = vpop.permute.xlu1 %6353 }
 0x35f   :  { %16651 = vst [vmem:[#allocation68_spill] sm:$0xff] %v11954_v35  ;;  %v11958_v46 = vpop.permute.xlu0 %6479 }
 0x360   :  { %16652 = vst [vmem:[#allocation74_spill] sm:$0xff] %v11958_v46  ;;  %3969 = vrot.lane.b32.xlu1 %v11947_v21, %s9364_s11 }
 0x361   :  { %4838 = vrot.lane.b32.xlu0 %v11947_v21, %s9362_s5 }
 0x362   :  { %v11964_v39 = vpop.permute.xlu1 %6415 }
 0x363   :  { %16653 = vst [vmem:[#allocation16_spill] sm:$0xff] %v11964_v39  ;;  %v11968_v37 = vpop.permute.xlu0 %6542 }
 0x364   :  { %16654 = vst [vmem:[#allocation69_spill] sm:$0xff] %v11968_v37  ;;  %4212 = vrot.lane.b32.xlu1 %v11947_v21, %s9365_s2  ;;  %v16702_v37 = vld [vmem:[#allocation8_spill] sm:$0xff] }
 0x365   :  { %3971 = vrot.lane.b32.xlu0 %v11966_v30, %s9364_s11 }
 0x366   :  { %v11974_v28 = vpop.permute.xlu1 %6355 }
 0x367   :  { %16655 = vst [vmem:[#allocation76_spill] sm:$0xff] %v11974_v28  ;;  %v11976_v14 = vpop.permute.xlu0 %6351 }
 0x368   :  { %16656 = vst [vmem:[#allocation71_spill] sm:$0xff] %v11976_v14  ;;  %5081 = vrot.lane.b32.xlu1 %v11947_v21, %s9360_s24 }
 0x369   :  { %4214 = vrot.lane.b32.xlu0 %v11966_v30, %s9365_s2 }
 0x36a   :  { %v11982_v16 = vpop.permute.xlu1 %6417 }
 0x36b   :  { %16657 = vst [vmem:[#allocation18_spill] sm:$0xff] %v11982_v16  ;;  %v11984_v6 = vpop.permute.xlu0 %6413  ;;  %v3498_v16 = vadd.f32 %v11658_v10, %v16648_v15 }
 0x36c   :  { %16658 = vst [vmem:[#allocation24_spill] sm:$0xff] %v11984_v6  ;;  %4455 = vrot.lane.b32.xlu1 %v11947_v21, %s9366_s27  ;;  %v12002_v6 = vpack.c.bf16 %v3496_v4, %v3496_v4 }
 0x36d   :  { %4840 = vrot.lane.b32.xlu0 %v11966_v30, %s9362_s5 }
 0x36e   :  { %v11990_v0 = vpop.permute.xlu1 %6291 }
 0x36f   :  { %16659 = vst [vmem:[#allocation19_spill] sm:$0xff] %v11990_v0  ;;  %v11994_v54 = vpop.permute.xlu0 %6357 }
 0x370   :  { %16660 = vst [vmem:[#allocation32_spill] sm:$0xff] %v11994_v54  ;;  %5326 = vrot.lane.b32.xlu1 %v11966_v30, %s9361_s25 }
 0x371   :  { %4457 = vrot.lane.b32.xlu0 %v11966_v30, %s9366_s27 }
 0x372   :  { %v12000_v36 = vpop.permute.xlu1 %6293 }
 0x373   :  { %16661 = vst [vmem:[#allocation29_spill] sm:$0xff] %v12000_v36  ;;  %v12004_v14 = vpop.permute.xlu0 %6419 }
 0x374   :  { %16662 = vst [vmem:[#allocation31_spill] sm:$0xff] %v12004_v14  ;;  %5083 = vrot.lane.b32.xlu1 %v11966_v30, %s9360_s24 }
 0x375   :  { %v12008_v0 = vpop.f32.mrf.mxu0  ;;  %5332 = vrot.lane.b32.xlu0 %v12002_v6, %s9361_s25 }
 0x376   :  { %v12012_v52 = vpop.permute.xlu1 %7104 }
 0x377   :  { %16663 = vst [vmem:[#allocation43_spill] sm:$0xff] %v12012_v52  ;;  %v12014_v54 = vpop.f32.mrf.mxu0  ;;  %v12016_v39 = vpop.permute.xlu0 %6289 }
 0x378   :  { %16664 = vst [vmem:[#allocation30_spill] sm:$0xff] %v12016_v39  ;;  %3977 = vrot.lane.b32.xlu1 %v12002_v6, %s9364_s11 }
 0x379   :  { %v3745_v4 = vpop.f32.mrf.mxu0  ;;  %5089 = vrot.lane.b32.xlu0 %v12002_v6, %s9360_s24 }
 0x37a   :  { %v12022_v14 = vpop.permute.xlu1 %7108  ;;  %v12034_v4 = vpack.c.bf16 %v3498_v16, %v3498_v16 }
 0x37b   :  { %16665 = vst [vmem:[#allocation33_spill] sm:$0xff] %v12022_v14  ;;  %v3746_v36 = vpop.f32.mrf.mxu0  ;;  %v12026_v35 = vpop.permute.xlu0 %6295 }
 0x37c   :  { %16666 = vst [vmem:[#allocation48_spill] sm:$0xff] %v12026_v35  ;;  %4220 = vrot.lane.b32.xlu1 %v12002_v6, %s9365_s2 }
 0x37d   :  { %4846 = vrot.lane.b32.xlu0 %v12002_v6, %s9362_s5 }
 0x37e   :  { %v12032_v52 = vpop.permute.xlu1 %6611 }
 0x37f   :  { %16667 = vst [vmem:[#allocation44_spill] sm:$0xff] %v12032_v52  ;;  %v12036_v39 = vpop.permute.xlu0 %7106  ;;  %v3578_v52 = vadd.f32 %v11779_v31, %v16648_v15 }
 0x380   :  { %16668 = vst [vmem:[#allocation51_spill] sm:$0xff] %v12036_v39  ;;  %4463 = vrot.lane.b32.xlu1 %v12002_v6, %s9366_s27 }
 0x381   :  { %3979 = vrot.lane.b32.xlu0 %v12034_v4, %s9364_s11 }
 0x382   :  { %v12042_v36 = vpop.permute.xlu1 %7066 }
 0x383   :  { %16669 = vst [vmem:[#allocation78_spill] sm:$0xff] %v12042_v36  ;;  %v12044_v10 = vpop.permute.xlu0 %6609 }
 0x384   :  { %16670 = vst [vmem:[#allocation73_spill] sm:$0xff] %v12044_v10  ;;  %5334 = vrot.lane.b32.xlu1 %v12034_v4, %s9361_s25  ;;  %v12062_v10 = vpack.c.bf16 %v3578_v52, %v3578_v52 }
 0x385   :  { %4222 = vrot.lane.b32.xlu0 %v12034_v4, %s9365_s2 }
 0x386   :  { %v12050_v16 = vpop.permute.xlu1 %6615 }
 0x387   :  { %16671 = vst [vmem:[#allocation17_spill] sm:$0xff] %v12050_v16  ;;  %v12054_v14 = vpop.permute.xlu0 %7064 }
 0x388   :  { %16672 = vst [vmem:[#allocation47_spill] sm:$0xff] %v12054_v14  ;;  %5091 = vrot.lane.b32.xlu1 %v12034_v4, %s9360_s24 }
 0x389   :  { %4465 = vrot.lane.b32.xlu0 %v12034_v4, %s9366_s27 }
 0x38a   :  { %v12060_v36 = vpop.permute.xlu1 %6483 }
 0x38b   :  { %16673 = vst [vmem:[#allocation75_spill] sm:$0xff] %v12060_v36  ;;  %v12064_v39 = vpop.permute.xlu0 %6613 }
 0x38c   :  { %16674 = vst [vmem:[#allocation35_spill] sm:$0xff] %v12064_v39  ;;  %4848 = vrot.lane.b32.xlu1 %v12034_v4, %s9362_s5  ;;  %v3580_v39 = vadd.f32 %v11792_v18, %v16648_v15 }
 0x38d   :  { %5340 = vrot.lane.b32.xlu0 %v12062_v10, %s9361_s25 }
 0x38e   :  { %v12070_v31 = vpop.permute.xlu1 %6546  ;;  %v12090_v36 = vpack.c.bf16 %v3580_v39, %v3580_v39 }
 0x38f   :  { %16675 = vst [vmem:[#allocation26_spill] sm:$0xff] %v12070_v31  ;;  %v12072_v16 = vpop.permute.xlu0 %7062 }
 0x390   :  { %16676 = vst [vmem:[#allocation52_spill] sm:$0xff] %v12072_v16  ;;  %3985 = vrot.lane.b32.xlu1 %v12062_v10, %s9364_s11 }
 0x391   :  { %5097 = vrot.lane.b32.xlu0 %v12062_v10, %s9360_s24 }
 0x392   :  { %v12078_v52 = vpop.permute.xlu1 %6487 }
 0x393   :  { %16677 = vst [vmem:[#allocation34_spill] sm:$0xff] %v12078_v52  ;;  %v12082_v14 = vpop.permute.xlu0 %6485 }
 0x394   :  { %16678 = vst [vmem:[#allocation27_spill] sm:$0xff] %v12082_v14  ;;  %4228 = vrot.lane.b32.xlu1 %v12062_v10, %s9365_s2 }
 0x395   :  { %4854 = vrot.lane.b32.xlu0 %v12062_v10, %s9362_s5 }
 0x396   :  { %v12088_v16 = vpop.permute.xlu1 %6550 }
 0x397   :  { %16679 = vst [vmem:[#allocation36_spill] sm:$0xff] %v12088_v16  ;;  %v12092_v31 = vpop.permute.xlu0 %6548  ;;  %v3660_v16 = vadd.f32 %v11914_v55, %v16648_v15 }
 0x398   :  { %16680 = vst [vmem:[#allocation25_spill] sm:$0xff] %v12092_v31  ;;  %4471 = vrot.lane.b32.xlu1 %v12062_v10, %s9366_s27 }
 0x399   :  { %3987 = vrot.lane.b32.xlu0 %v12090_v36, %s9364_s11  ;;  %v12114_v14 = vpack.c.bf16 %v3660_v16, %v3660_v16 }
 0x39a   :  { %v12098_v18 = vpop.permute.xlu1 %7022 }
 0x39b   :  { %16681 = vst [vmem:[#allocation4_spill] sm:$0xff] %v12098_v18  ;;  %v12100_v52 = vpop.permute.xlu0 %6489  ;;  %16685 = vst [vmem:[#allocation7_spill] sm:$0xff] %v12114_v14  ;;  %v3662_v18 = vadd.f32 %v11921_v20, %v16648_v15 }
 0x39c   :  { %16682 = vst [vmem:[#allocation6_spill] sm:$0xff] %v12100_v52  ;;  %5342 = vrot.lane.b32.xlu1 %v12090_v36, %s9361_s25 }
 0x39d   :  { %4230 = vrot.lane.b32.xlu0 %v12090_v36, %s9365_s2 }
 0x39e   :  { %v12108_v39 = vpop.permute.xlu1 %7020 }
 0x39f   :  { %16683 = vst [vmem:[#allocation5_spill] sm:$0xff] %v12108_v39  ;;  %v12110_v31 = vpop.permute.xlu0 %6552  ;;  %v12126_v39 = vpack.c.bf16 %v3662_v18, %v3662_v18 }
 0x3a0   :  { %16684 = vst [vmem:[#allocation77_spill] sm:$0xff] %v12110_v31  ;;  %5099 = vrot.lane.b32.xlu1 %v12090_v36, %s9360_s24 }
 0x3a1   :  { %4856 = vrot.lane.b32.xlu0 %v12090_v36, %s9362_s5  ;;  %16688 = vst [vmem:[#allocation81_spill] sm:$0xff] %v12126_v39 }
 0x3a2   :  { %v12120_v52 = vpop.permute.xlu1 %6361 }
 0x3a3   :  { %16686 = vst [vmem:[#allocation79_spill] sm:$0xff] %v12120_v52  ;;  %v12122_v55 = vpop.permute.xlu0 %7024 }
 0x3a4   :  { %16687 = vst [vmem:[#allocation80_spill] sm:$0xff] %v12122_v55  ;;  %3993 = vrot.lane.b32.xlu1 %v12114_v14, %s9364_s11 }
 0x3a5   :  { %4473 = vrot.lane.b32.xlu0 %v12090_v36, %s9366_s27 }
 0x3a6   :  { %v12130_v16 = vpop.permute.xlu1 %6423 }
 0x3a7   :  { %16689 = vst [vmem:[#allocation82_spill] sm:$0xff] %v12130_v16  ;;  %v12132_v31 = vpop.permute.xlu0 %6359 }
 0x3a8   :  { %16690 = vst [vmem:[#allocation83_spill] sm:$0xff] %v12132_v31  ;;  %5350 = vrot.lane.b32.xlu1 %v12126_v39, %s9361_s25 }
 0x3a9   :  { %5348 = vrot.lane.b32.xlu0 %v12114_v14, %s9361_s25 }
 0x3aa   :  { %v12138_v20 = vpop.permute.xlu1 %6365 }
 0x3ab   :  { %16691 = vst [vmem:[#allocation84_spill] sm:$0xff] %v12138_v20  ;;  %v12140_v52 = vpop.permute.xlu0 %6421 }
 0x3ac   :  { %16692 = vst [vmem:[#allocation85_spill] sm:$0xff] %v12140_v52  ;;  %5107 = vrot.lane.b32.xlu1 %v12126_v39, %s9360_s24 }
 0x3ad   :  { %5105 = vrot.lane.b32.xlu0 %v12114_v14, %s9360_s24 }
 0x3ae   :  { %v12146_v18 = vpop.permute.xlu1 %6427 }
 0x3af   :  { %16693 = vst [vmem:[#allocation86_spill] sm:$0xff] %v12146_v18  ;;  %v12148_v55 = vpop.permute.xlu0 %6363 }
 0x3b0   :  { %16694 = vst [vmem:[#allocation87_spill] sm:$0xff] %v12148_v55  ;;  %4864 = vrot.lane.b32.xlu1 %v12126_v39, %s9362_s5  ;;  %v3742_v55 = vadd.f32 %v12008_v0, %v16648_v15  ;;  %v1815_v0 = vstv %s1814_s28 }
 0x3b1   :  { %4862 = vrot.lane.b32.xlu0 %v12114_v14, %s9362_s5 }
 0x3b2   :  { %v12154_v31 = vpop.permute.xlu1 %6982  ;;  %v12173_v52 = vpack.c.bf16 %v3742_v55, %v3742_v55 }
 0x3b3   :  { %16695 = vst [vmem:[#allocation88_spill] sm:$0xff] %v12154_v31  ;;  %v12159_v20 = vpop.permute.xlu0 %6425 }
 0x3b4   :  { %16696 = vst [vmem:[#allocation89_spill] sm:$0xff] %v12159_v20  ;;  %4481 = vrot.lane.b32.xlu1 %v12126_v39, %s9366_s27  ;;  %16699 = vst [vmem:[#allocation92_spill] sm:$0xff] %v12173_v52  ;;  %v16700_v20 = vld [vmem:[#allocation10_spill] sm:$0xff] }
 0x3b5   :  { %4479 = vrot.lane.b32.xlu0 %v12114_v14, %s9366_s27 }
 0x3b6   :  { %v12167_v18 = vpop.permute.xlu1 %6297 }
 0x3b7   :  { %16697 = vst [vmem:[#allocation90_spill] sm:$0xff] %v12167_v18  ;;  %v12169_v16 = vpop.permute.xlu0 %6980 }
 0x3b8   :  { %16698 = vst [vmem:[#allocation91_spill] sm:$0xff] %v12169_v16  ;;  %4238 = vrot.lane.b32.xlu1 %v12126_v39, %s9365_s2  ;;  %v9259_v31 = vpop.f32.mrf.mxu1 }
 0x3b9   :  { %v1781_v35 = vadd.f32 %v9259_v31, %v16700_v20  ;;  %4236 = vrot.lane.b32.xlu0 %v12114_v14, %s9365_s2  ;;  %v16704_v31 = vld [vmem:[#allocation12_spill] sm:$0xff] }
 0x3ba   :  { %v1772_v28 = vpop.f32.mrf.mxu1  ;;  %v12178_v58 = vpop.permute.xlu1 %7110 }
 0x3bb   :  { %16701 = vst [vmem:[#allocation10_spill] sm:$0xff] %v12178_v58  ;;  %v1805_v46 = vmax.f32 %v1781_v35, 0.0  ;;  %v1773_v18 = vadd.f32 %v1772_v28, %v16702_v37  ;;  %v12181_v62 = vpop.permute.xlu0 %6978 }
 0x3bc   :  { %16703 = vst [vmem:[#allocation8_spill] sm:$0xff] %v12181_v62  ;;  %4001 = vrot.lane.b32.xlu1 %v12173_v52, %s9364_s11  ;;  %v9260_v16 = vpop.f32.mrf.mxu1 }
 0x3bd   :  { %v12185_v55 = vmul.f32 %v1815_v0, %v1805_v46  ;;  %v1803_v48 = vmax.f32 %v1773_v18, 0.0  ;;  %v1784_v20 = vadd.f32 %v9260_v16, %v16704_v31  ;;  %3995 = vrot.lane.b32.xlu0 %v12126_v39, %s9364_s11  ;;  %v16706_v46 = vld [vmem:[#allocation9_spill] sm:$0xff] }
 0x3be   :  { %v1775_v29 = vpop.f32.mrf.mxu1  ;;  %v12190_v9 = vpop.permute.xlu1 %6301 }
 0x3bf   :  { %16705 = vst [vmem:[#allocation12_spill] sm:$0xff] %v12190_v9  ;;  %1826 = vst.msk [vmem:[%s16020_s23 + $0x10] sm:$0xff] %vm16410_vm4, %v12185_v55  ;;  %v12197_v35 = vmul.f32 %v1815_v0, %v1803_v48  ;;  %v1806_v37 = vmax.f32 %v1784_v20, 0.0  ;;  %v1776_v28 = vadd.f32 %v1775_v29, %v16706_v46  ;;  %v12200_v18 = vpop.permute.xlu0 %6299  ;;  %v16708_v48 = vld [vmem:[#allocation13_spill] sm:$0xff]  ;;  %v3744_v46 = vadd.f32 %v12014_v54, %v16648_v15  ;;  %v16710_v9 = vld [vmem:[#allocation11_spill] sm:$0xff] }
 0x3c0   :  { %16707 = vst [vmem:[#allocation9_spill] sm:$0xff] %v12200_v18  ;;  %5356 = vrot.lane.b32.xlu1 %v12173_v52, %s9361_s25  ;;  %v9263_v16 = vpop.f32.mrf.mxu1 }
 0x3c1   :  { %1824 = vst.msk [vmem:[%s16020_s23] sm:$0xff] %vm16410_vm4, %v12197_v35  ;;  %v12209_v31 = vmul.f32 %v1815_v0, %v1806_v37  ;;  %v1804_v58 = vmax.f32 %v1776_v28, 0.0  ;;  %v1797_v62 = vadd.f32 %v9263_v16, %v16708_v48  ;;  %4487 = vrot.lane.b32.xlu0 %v12173_v52, %s9366_s27 }
 0x3c2   :  { %v1788_v29 = vpop.f32.mrf.mxu1  ;;  %v12214_v20 = vpop.permute.xlu1 %7114 }
 0x3c3   :  { %16709 = vst [vmem:[#allocation13_spill] sm:$0xff] %v12214_v20  ;;  %1827 = vst.msk [vmem:[%s16020_s23 + $0x18] sm:$0xff] %vm16410_vm4, %v12209_v31  ;;  %v12223_v37 = vmul.f32 %v1815_v0, %v1804_v58  ;;  %v1809_v28 = vmax.f32 %v1797_v62, 0.0  ;;  %v1789_v16 = vadd.f32 %v1788_v29, %v16710_v9  ;;  %v12226_v48 = vpop.permute.xlu0 %7112  ;;  %v16712_v58 = vld [vmem:[#allocation15_spill] sm:$0xff]  ;;  %v12242_v29 = vpack.c.bf16 %v3744_v46, %v3744_v46 }
 0x3c4   :  { %16711 = vst [vmem:[#allocation11_spill] sm:$0xff] %v12226_v48  ;;  %5113 = vrot.lane.b32.xlu1 %v12173_v52, %s9360_s24  ;;  %v9264_v20 = vpop.f32.mrf.mxu1 }
 0x3c5   :  { %1825 = vst.msk [vmem:[%s16020_s23 + $0x8] sm:$0xff] %vm16410_vm4, %v12223_v37  ;;  %v12235_v54 = vmul.f32 %v1815_v0, %v1809_v28  ;;  %v1807_v18 = vmax.f32 %v1789_v16, 0.0  ;;  %v1800_v14 = vadd.f32 %v9264_v20, %v16712_v58  ;;  %4244 = vrot.lane.b32.xlu0 %v12173_v52, %s9365_s2  ;;  %16714 = vst [vmem:[#allocation93_spill] sm:$0xff] %v12242_v29  ;;  %v16715_v16 = vld [vmem:[#allocation14_spill] sm:$0xff] }
 0x3c6   :  { %v1791_v9 = vpop.f32.mrf.mxu1  ;;  %v12240_v62 = vpop.permute.xlu1 %7068 }
 0x3c7   :  { %16713 = vst [vmem:[#allocation15_spill] sm:$0xff] %v12240_v62  ;;  %1830 = vst.msk [vmem:[%s16020_s23 + $0x30] sm:$0xff] %vm16410_vm4, %v12235_v54  ;;  %v12249_v48 = vmul.f32 %v1815_v0, %v1807_v18  ;;  %v1810_v28 = vmax.f32 %v1800_v14, 0.0  ;;  %v1792_v39 = vadd.f32 %v1791_v9, %v16715_v16  ;;  %v12252_v20 = vpop.permute.xlu0 %6303  ;;  %v6435_v16 = vsel %vm5364_vm14, %v11538_v34, %v11589_v44 }
 0x3c8   :  { %16716 = vst [vmem:[#allocation14_spill] sm:$0xff] %v12252_v20  ;;  %4870 = vrot.lane.b32.xlu1 %v12173_v52, %s9362_s5  ;;  %v12256_v58 = vpop.f32.mrf.mxu1 }
 0x3c9   :  { %1828 = vst.msk [vmem:[%s16020_s23 + $0x20] sm:$0xff] %vm16410_vm4, %v12249_v48  ;;  %v12263_v46 = vmul.f32 %v1815_v0, %v1810_v28  ;;  %v1808_v18 = vmax.f32 %v1792_v39, 0.0  ;;  %4003 = vrot.lane.b32.xlu0 %v12242_v29, %s9364_s11 }
 0x3ca   :  { %v12267_v14 = vpop.f32.mrf.mxu1  ;;  %v12269_v9 = vpop.permute.xlu1 %6617 }
 0x3cb   :  { %16717 = vst [vmem:[#allocation94_spill] sm:$0xff] %v12269_v9  ;;  %1831 = vst.msk [vmem:[%s16020_s23 + $0x38] sm:$0xff] %vm16410_vm4, %v12263_v46  ;;  %v12279_v28 = vmul.f32 %v1815_v0, %v1808_v18  ;;  %v12281_v39 = vpop.permute.xlu0 %7116  ;;  %v6373_v9 = vsel %vm5121_vm15, %v11523_v8, %v11566_v3 }
 0x3cc   :  { %16718 = vst [vmem:[#allocation95_spill] sm:$0xff] %v12281_v39  ;;  %6554 = vrot.lane.b32.xlu1 %v11935_v17, %s9359_s30  ;;  %v3458_v62 = vpop.f32.mrf.mxu1  ;;  %v6696_v18 = vsel %vm737_vm6, %v6373_v9, %v6435_v16  ;;  %v6437_v9 = vsel %vm5364_vm14, %v11580_v12, %v11626_v2 }
 0x3cd   :  { %1829 = vst.msk [vmem:[%s16020_s23 + $0x28] sm:$0xff] %vm16410_vm4, %v12279_v28  ;;  %5358 = vrot.lane.b32.xlu0 %v12242_v29, %s9361_s25 }
 0x3ce   :  { %v12295_v0 = vpop.permute.xlu1 %7074  ;;  %v3459_v39 = vpop.f32.mrf.mxu1 }
 0x3cf   :  { %16719 = vst [vmem:[#allocation96_spill] sm:$0xff] %v12295_v0  ;;  %v12298_v20 = vpop.permute.xlu0 %7070 }
 0x3d0   :  { %16720 = vst [vmem:[#allocation97_spill] sm:$0xff] %v12298_v20  ;;  %7028 = vrot.lane.b32.xlu1 %v6696_v18, %s9363_s9  ;;  %v6434_v18 = vsel %vm5364_vm14, %v16604_v57, %v11538_v34  ;;  %v6375_v20 = vsel %vm5121_vm15, %v11561_v1, %v11607_v49 }
 0x3d1   :  { %5115 = vrot.lane.b32.xlu0 %v12242_v29, %s9360_s24 }
 0x3d2   :  { %v12303_v62 = vpop.permute.xlu1 %3969 }
 0x3d3   :  { %16721 = vst [vmem:[#allocation98_spill] sm:$0xff] %v12303_v62  ;;  %v12305_v52 = vpop.permute.xlu0 %7072 }
 0x3d4   :  { %16722 = vst [vmem:[#allocation99_spill] sm:$0xff] %v12305_v52  ;;  %4489 = vrot.lane.b32.xlu1 %v12242_v29, %s9366_s27 }
 0x3d5   :  { %4872 = vrot.lane.b32.xlu0 %v12242_v29, %s9362_s5 }
 0x3d6   :  { %v12311_v0 = vpop.permute.xlu1 %4212 }
 0x3d7   :  { %16723 = vst [vmem:[#allocation100_spill] sm:$0xff] %v12311_v0  ;;  %v12316_v16 = vpop.permute.xlu0 %5324  ;;  %v6372_v0 = vsel %vm5121_vm15, %v16607_v27, %v11523_v8  ;;  %v6374_v8 = vsel %vm5121_vm15, %v11566_v3, %v11561_v1  ;;  %v6311_v27 = vsel %vm4878_vm0, %v11604_v38, %v11644_v53  ;;  %v6313_v1 = vsel %vm4878_vm0, %v11621_v40, %v11663_v41 }
 0x3d8   :  { %16724 = vst [vmem:[#allocation101_spill] sm:$0xff] %v12316_v16  ;;  %4246 = vrot.lane.b32.xlu1 %v12242_v29, %s9365_s2  ;;  %v12320_v39 = vpop.f32.mrf.mxu1  ;;  %v6702_v16 = vsel %vm737_vm6, %v6375_v20, %v6437_v9  ;;  %v6693_v34 = vsel %vm737_vm6, %v6372_v0, %v6434_v18  ;;  %v16728_v0 = vld [vmem:[#allocation37_spill] sm:$0xff]  ;;  %v6310_v18 = vsel %vm4878_vm0, %v16632_v26, %v11604_v38 }
 0x3d9   :  { %16725 = vst [vmem:[#allocation102_spill] sm:$0xff] %v12320_v39  ;;  %6491 = vrot.lane.b32.xlu0 %v11935_v17, %s9358_s12  ;;  %v6436_v39 = vsel %vm5364_vm14, %v11589_v44, %v11580_v12  ;;  %v6312_v38 = vsel %vm4878_vm0, %v11644_v53, %v11621_v40  ;;  %v6629_v53 = vsel %vm6619_vm11, %v11677_v32, %v11694_v59 }
 0x3da   :  { %v12330_v52 = vpop.f32.mrf.mxu1  ;;  %v12332_v62 = vpop.permute.xlu1 %5081  ;;  %v6699_v12 = vsel %vm737_vm6, %v6374_v8, %v6436_v39 }
 0x3db   :  { %16726 = vst [vmem:[#allocation103_spill] sm:$0xff] %v12332_v62  ;;  %v12338_v29 = vpop.permute.xlu0 %4838 }
 0x3dc   :  { %7032 = vrot.lane.b32.xlu1 %v6702_v16, %s9363_s9  ;;  %v3540_v57 = vpop.f32.mrf.mxu1  ;;  %v6649_v16 = vsel %vm737_vm6, %v16728_v0, %v6311_v27  ;;  %v16730_v27 = vld [vmem:[#allocation28_spill] sm:$0xff] }
 0x3dd   :  { %7026 = vrot.lane.b32.xlu0 %v6693_v34, %s9363_s9  ;;  %v16729_v34 = vld [vmem:[#allocation39_spill] sm:$0xff] }
 0x3de   :  { %v12346_v62 = vpop.permute.xlu1 %4455  ;;  %v3541_v20 = vpop.f32.mrf.mxu1  ;;  %v6653_v57 = vsel %vm737_vm6, %v16729_v34, %v6313_v1  ;;  %v16732_v34 = vld [vmem:[#allocation38_spill] sm:$0xff] }
 0x3df   :  { %v12354_v9 = vpop.permute.xlu0 %3971 }
 0x3e0   :  { %16727 = vst [vmem:[#allocation104_spill] sm:$0xff] %v12354_v9  ;;  %6429 = vrot.lane.b32.xlu1 %v11935_v17, %s9361_s25 }
 0x3e1   :  { %7030 = vrot.lane.b32.xlu0 %v6699_v12, %s9363_s9  ;;  %v6647_v12 = vsel %vm737_vm6, %v16730_v27, %v6310_v18  ;;  %v6651_v18 = vsel %vm737_vm6, %v16732_v34, %v6312_v38  ;;  %v6501_v38 = vsel %vm16305_vm13, %v11525_v5, %v11725_v22  ;;  %v16736_v5 = vld [vmem:[#allocation66_spill] sm:$0xff] }
 0x3e2   :  { %v12360_v44 = vpop.permute.xlu1 %5326 }
 0x3e3   :  { %v12367_v3 = vpop.permute.xlu0 %4214 }
 0x3e4   :  { %6986 = vrot.lane.b32.xlu1 %v6649_v16, %s9363_s9  ;;  %v6627_v16 = vsel %vm6619_vm11, %v11469_v60, %v11642_v45  ;;  %v6564_v60 = vsel %vm6556_vm12, %v11544_v24, %v11748_v42 }
 0x3e5   :  { %6367 = vrot.lane.b32.xlu0 %v11935_v17, %s9360_s24  ;;  %v6768_v34 = vsel %vm737_vm6, %v6501_v38, %v6564_v60 }
 0x3e6   :  { %v12375_v39 = vpop.permute.xlu1 %5083 }
 0x3e7   :  { %v12379_v20 = vpop.permute.xlu0 %4840 }
 0x3e8   :  { %6990 = vrot.lane.b32.xlu1 %v6653_v57, %s9363_s9  ;;  %v12382_v8 = vpop.f32.mrf.mxu1 }
 0x3e9   :  { %6984 = vrot.lane.b32.xlu0 %v6647_v12, %s9363_s9 }
 0x3ea   :  { %v12390_v26 = vpop.f32.mrf.mxu1  ;;  %v12392_v0 = vpop.permute.xlu1 %3977 }
 0x3eb   :  { %16731 = vst [vmem:[#allocation37_spill] sm:$0xff] %v12392_v0  ;;  %v12397_v1 = vpop.permute.xlu0 %4457 }
 0x3ec   :  { %7118 = vrot.lane.b32.xlu1 %v6627_v16, %s9363_s9  ;;  %v3622_v57 = vpop.f32.mrf.mxu1 }
 0x3ed   :  { %6988 = vrot.lane.b32.xlu0 %v6651_v18, %s9363_s9  ;;  %v6566_v18 = vsel %vm6556_vm12, %v11689_v51, %v11775_v61  ;;  %v6628_v57 = vsel %vm6619_vm11, %v11642_v45, %v11677_v32  ;;  %v6565_v32 = vsel %vm6556_vm12, %v11748_v42, %v11689_v51  ;;  %v16743_v51 = vld [vmem:[#allocation60_spill] sm:$0xff] }
 0x3ee   :  { %v12403_v40 = vpop.permute.xlu1 %4220  ;;  %v3623_v27 = vpop.f32.mrf.mxu1  ;;  %v6567_v42 = vsel %vm6556_vm12, %v11775_v61, %v16743_v51 }
 0x3ef   :  { %16733 = vst [vmem:[#allocation39_spill] sm:$0xff] %v12403_v40  ;;  %v12411_v12 = vpop.permute.xlu0 %5332 }
 0x3f0   :  { %16734 = vst [vmem:[#allocation28_spill] sm:$0xff] %v12411_v12  ;;  %7122 = vrot.lane.b32.xlu1 %v6629_v53, %s9363_s9  ;;  %v16745_v12 = vld [vmem:[#allocation20_spill] sm:$0xff] }
 0x3f1   :  { %6305 = vrot.lane.b32.xlu0 %v11935_v17, %s9362_s5  ;;  %v6503_v17 = vsel %vm16305_vm13, %v16736_v5, %v11761_v50 }
 0x3f2   :  { %v12419_v16 = vpop.permute.xlu1 %4463  ;;  %v6774_v27 = vsel %vm737_vm6, %v6503_v17, %v6566_v18  ;;  %v6502_v18 = vsel %vm16305_vm13, %v11725_v22, %v16736_v5  ;;  %v6504_v22 = vsel %vm16305_vm13, %v11761_v50, %v16745_v12 }
 0x3f3   :  { %16735 = vst [vmem:[#allocation38_spill] sm:$0xff] %v12419_v16  ;;  %v12425_v24 = vpop.permute.xlu0 %5089 }
 0x3f4   :  { %7076 = vrot.lane.b32.xlu1 %v6768_v34, %s9363_s9  ;;  %v16739_v34 = vld [vmem:[#allocation61_spill] sm:$0xff] }
 0x3f5   :  { %7120 = vrot.lane.b32.xlu0 %v6628_v57, %s9363_s9  ;;  %v6630_v45 = vsel %vm6619_vm11, %v11694_v59, %v16739_v34  ;;  %v1932_v59 = vlaneseq }
 0x3f6   :  { %v12435_v53 = vpop.permute.xlu1 %5334 }
 0x3f7   :  { %16737 = vst [vmem:[#allocation66_spill] sm:$0xff] %v12435_v53  ;;  %v12438_v60 = vpop.permute.xlu0 %4846 }
 0x3f8   :  { %16738 = vst [vmem:[#allocation105_spill] sm:$0xff] %v12438_v60  ;;  %7080 = vrot.lane.b32.xlu1 %v6774_v27, %s9363_s9  ;;  %v12441_v38 = vpop.f32.mrf.mxu1  ;;  %v6771_v27 = vsel %vm737_vm6, %v6502_v18, %v6565_v32 }
 0x3f9   :  { %7124 = vrot.lane.b32.xlu0 %v6630_v45, %s9363_s9 }
 0x3fa   :  { %v12450_v57 = vpop.f32.mrf.mxu1  ;;  %v12452_v16 = vpop.permute.xlu1 %5091 }
 0x3fb   :  { %16740 = vst [vmem:[#allocation61_spill] sm:$0xff] %v12450_v57  ;;  %16741 = vst [vmem:[#allocation106_spill] sm:$0xff] %v12452_v16  ;;  %v12457_v17 = vpop.permute.xlu0 %3979  ;;  %v16832_v57 = vld [vmem:[#allocation50_spill] sm:$0xff] }
 0x3fc   :  { %16742 = vst [vmem:[#allocation107_spill] sm:$0xff] %v12457_v17  ;;  %1844 = vrot.lane.b32.xlu1 %v12185_v55, %s9351_s1  ;;  %v3704_v60 = vpop.f32.mrf.mxu1  ;;  %v12475_v55 = vand.u32 127, %v1932_v59  ;;  %v4679_v59 = vmul.bf16 1.0|1.0, %v11966_v30 }
 0x3fd   :  { %7078 = vrot.lane.b32.xlu0 %v6771_v27, %s9363_s9  ;;  %v6777_v60 = vsel %vm737_vm6, %v6504_v22, %v6567_v42  ;;  %v4682_v27 = vmul.bf16 1.0|1.0, %v12002_v6  ;;  %v16754_v6 = vld [vmem:[#allocation23_spill] sm:$0xff] }
 0x3fe   :  { %v12466_v45 = vpop.permute.xlu1 %4848  ;;  %v3705_v0 = vpop.f32.mrf.mxu1  ;;  %v12486_v50 = vand.u32 31, %v12475_v55 }
 0x3ff   :  { %16744 = vst [vmem:[#allocation60_spill] sm:$0xff] %v12466_v45  ;;  %v12471_v5 = vpop.permute.xlu0 %4222  ;;  %v3455_v0 = vadd.f32 %v12256_v58, %v16648_v15  ;;  %v4686_v58 = vmul.bf16 1.0|1.0, %v12062_v10  ;;  %v16821_v45 = vld [vmem:[#allocation31_spill] sm:$0xff] }
 0x400   :  { %16746 = vst [vmem:[#allocation20_spill] sm:$0xff] %v12471_v5  ;;  %1840 = vrot.lane.b32.xlu1 %v12197_v35, %s9351_s1  ;;  %16749 = vst [vmem:[#allocation110_spill] sm:$0xff] %v12486_v50  ;;  %v4678_v35 = vmul.bf16 1.0|1.0, %v11947_v21  ;;  %v3809_v22 = vadd.s32 4294967293, %v12486_v50  ;;  %v4072_v10 = vadd.s32 4294967294, %v12486_v50 }
 0x401   :  { %7082 = vrot.lane.b32.xlu0 %v6777_v60, %s9363_s9  ;;  %v4687_v21 = vmul.bf16 1.0|1.0, %v12090_v36  ;;  %v16753_v60 = vld [vmem:[#allocation62_spill] sm:$0xff] }
 0x402   :  { %v12479_v61 = vpop.permute.xlu1 %3985  ;;  %v6438_v30 = vsel %vm5364_vm14, %v11626_v2, %v16753_v60  ;;  %v12525_v2 = vrot.slane %v4679_v59, 4  ;;  %vm3829_vm1 = vcmp.ge.s32.totalorder %v3809_v22, 0  ;;  %vm4092_vm3 = vcmp.ge.s32.totalorder %v4072_v10, 0  ;;  %v16777_v22 = vld [vmem:[#allocation40_spill] sm:$0xff] }
 0x403   :  { %16747 = vst [vmem:[#allocation108_spill] sm:$0xff] %v12479_v61  ;;  %v12481_v32 = vpop.permute.xlu0 %4465  ;;  %v12513_v61 = vpack.c.bf16 %v3455_v0, %v3455_v0 }
 0x404   :  { %16748 = vst [vmem:[#allocation109_spill] sm:$0xff] %v12481_v32  ;;  %1852 = vrot.lane.b32.xlu1 %v12235_v54, %s9351_s1  ;;  %v4683_v54 = vmul.bf16 1.0|1.0, %v12034_v4  ;;  %v12517_v4 = vrot.slane %v4678_v35, 4  ;;  %16757 = vst [vmem:[#allocation114_spill] sm:$0xff] %v12525_v2  ;;  %v16760_v32 = vld [vmem:[#allocation64_spill] sm:$0xff] }
 0x405   :  { %1846 = vrot.lane.b32.xlu0 %v12209_v31, %s9351_s1 }
 0x406   :  { %v12493_v18 = vpop.permute.xlu1 %4228 }
 0x407   :  { %16750 = vst [vmem:[#allocation111_spill] sm:$0xff] %v12493_v18  ;;  %v12497_v42 = vpop.permute.xlu0 %5340  ;;  %v6439_v18 = vsel %vm5364_vm14, %v16753_v60, %v16754_v6  ;;  %v16759_v60 = vld [vmem:[#allocation63_spill] sm:$0xff] }
 0x408   :  { %16751 = vst [vmem:[#allocation112_spill] sm:$0xff] %v12497_v42  ;;  %1848 = vrot.lane.b32.xlu1 %v12249_v48, %s9351_s1  ;;  %v12504_v31 = vpop.f32.mrf.mxu1  ;;  %v1934_v48 = vadd.s32 128, %v12475_v55  ;;  %v6376_v0 = vsel %vm5121_vm15, %v11607_v49, %v16759_v60 }
 0x409   :  { %16752 = vst [vmem:[#allocation113_spill] sm:$0xff] %v12504_v31  ;;  %1842 = vrot.lane.b32.xlu0 %v12223_v37, %s9351_s1  ;;  %v12527_v31 = vrot.slane %v4682_v27, 4  ;;  %v6377_v37 = vsel %vm5121_vm15, %v16759_v60, %v16760_v32  ;;  %v12547_v49 = vsel %vm737_vm6, %v6376_v0, %v6438_v30  ;;  %v6440_v60 = vsel %vm5364_vm14, %v16754_v6, %v11852_v56  ;;  %v16770_v0 = vld [vmem:[#allocation21_spill] sm:$0xff] }
 0x40a   :  { %v12521_v36 = vpop.f32.mrf.mxu1  ;;  %v12523_v42 = vpop.permute.xlu1 %4471  ;;  %v12544_v27 = vsel %vm737_vm6, %v6377_v37, %v6439_v18  ;;  %16765 = vst [vmem:[#allocation118_spill] sm:$0xff] %v12547_v49  ;;  %v6315_v18 = vsel %vm4878_vm0, %v11866_v11, %v11834_v19  ;;  %v6317_v30 = vsel %vm4878_vm0, %v11878_v33, %v11850_v7  ;;  %v16771_v37 = vmov 0.0  }
 0x40b   :  { %16755 = vst [vmem:[#allocation62_spill] sm:$0xff] %v12521_v36  ;;  %16756 = vst [vmem:[#allocation23_spill] sm:$0xff] %v12523_v42  ;;  %v12535_v35 = vpop.permute.xlu0 %5097  ;;  %v12539_v36 = vrot.slane %v4683_v54, 4  ;;  %v12541_v42 = vrot.slane %v4686_v58, 4  ;;  %v6314_v58 = vsel %vm4878_vm0, %v11663_v41, %v11866_v11  ;;  %v6378_v11 = vsel %vm5121_vm15, %v16760_v32, %v11838_v25 }
 0x40c   :  { %16758 = vst [vmem:[#allocation115_spill] sm:$0xff] %v12527_v31  ;;  %16761 = vst [vmem:[#allocation63_spill] sm:$0xff] %v12535_v35  ;;  %3973 = vrot.lane.b32.xlu1 %v12513_v61, %s9364_s11  ;;  %v3786_v59 = vpop.f32.mrf.mxu1  ;;  %v12549_v31 = vrot.slane %v4687_v21, 4  ;;  %v16767_v35 = vld [vmem:[#allocation67_spill] sm:$0xff]  ;;  %v6316_v21 = vsel %vm4878_vm0, %v11834_v19, %v11878_v33  ;;  %v12583_v19 = vsel %vm3829_vm1, 1.0, %v16771_v37  ;;  %v4315_v33 = vadd.s32 4294967295, %v12486_v50 }
 0x40d   :  { %16762 = vst [vmem:[#allocation64_spill] sm:$0xff] %v12539_v36  ;;  %16763 = vst [vmem:[#allocation116_spill] sm:$0xff] %v12541_v42  ;;  %v6441_v54 = vsel %vm5364_vm14, %v11852_v56, %v16767_v35  ;;  %1854 = vrot.lane.b32.xlu0 %v12263_v46, %s9351_s1  ;;  %v12571_v56 = vand.u32 31, %v1934_v48  ;;  %v6379_v46 = vsel %vm5121_vm15, %v11838_v25, %v16770_v0  ;;  %v16775_v59 = vld [vmem:[#allocation41_spill] sm:$0xff]  ;;  %v12605_v42 = vsel %vm4092_vm3, 1.0, %v16771_v37 }
 0x40e   :  { %16764 = vst [vmem:[#allocation117_spill] sm:$0xff] %v12544_v27  ;;  %16766 = vst [vmem:[#allocation119_spill] sm:$0xff] %v12549_v31  ;;  %v12573_v6 = vpop.permute.xlu1 %5342  ;;  %v3787_v41 = vpop.f32.mrf.mxu1  ;;  %v12591_v48 = vsel %vm737_vm6, %v6378_v11, %v6440_v60  ;;  %v12594_v32 = vsel %vm737_vm6, %v6379_v46, %v6441_v54  ;;  %v12598_v25 = vsel %vm737_vm6, %v16775_v59, %v6315_v18  ;;  %v16779_v31 = vld [vmem:[#allocation45_spill] sm:$0xff]  ;;  %v16781_v54 = vld [vmem:[#allocation42_spill] sm:$0xff]  ;;  %vm4335_vm7 = vcmp.ge.s32.totalorder %v4315_v33, 0 }
 0x40f   :  { %16768 = vst [vmem:[#allocation67_spill] sm:$0xff] %v12571_v56  ;;  %16769 = vst [vmem:[#allocation120_spill] sm:$0xff] %v12573_v6  ;;  %v12586_v10 = vpop.permute.xlu0 %4854  ;;  %v12602_v41 = vsel %vm737_vm6, %v16777_v22, %v6314_v58  ;;  %v12611_v60 = vsel %vm737_vm6, %v16779_v31, %v6317_v30  ;;  %v12615_v11 = vsel %vm737_vm6, %v16781_v54, %v6316_v21  ;;  %v3810_v46 = vadd.s32 4294967293, %v12571_v56  ;;  %v16789_v33 = vld [vmem:[#allocation81_spill] sm:$0xff] }
 0x410   :  { %16772 = vst [vmem:[#allocation21_spill] sm:$0xff] %v12586_v10  ;;  %4216 = vrot.lane.b32.xlu1 %v12513_v61, %s9365_s2  ;;  %16773 = vst [vmem:[#allocation121_spill] sm:$0xff] %v12591_v48  ;;  %v12620_v18 = vsel %vm6619_vm11, %v11892_v47, %v11861_v13  ;;  %v12631_v31 = vsel %vm6619_vm11, %v16739_v34, %v11892_v47  ;;  %v4073_v21 = vadd.s32 4294967294, %v12571_v56  ;;  %v4691_v58 = vmul.bf16 1.0|1.0, %v16789_v33 }
 0x411   :  { %16774 = vst [vmem:[#allocation122_spill] sm:$0xff] %v12594_v32  ;;  %16776 = vst [vmem:[#allocation41_spill] sm:$0xff] %v12598_v25  ;;  %1850 = vrot.lane.b32.xlu0 %v12279_v28, %s9351_s1  ;;  %v5184_v28 = vadd.s32 3, %v12486_v50  ;;  %v12641_v22 = vsel %vm6619_vm11, %v11911_v43, %v11876_v63  ;;  %v12646_v54 = vsel %vm6619_vm11, %v11861_v13, %v11911_v43  ;;  %v16793_v43 = vld [vmem:[#allocation22_spill] sm:$0xff]  ;;  %vm3830_vm9 = vcmp.ge.s32.totalorder %v3810_v46, 0 }
 0x412   :  { %16778 = vst [vmem:[#allocation40_spill] sm:$0xff] %v12602_v41  ;;  %16780 = vst [vmem:[#allocation45_spill] sm:$0xff] %v12611_v60  ;;  %v12626_v59 = vpop.permute.xlu1 %5099  ;;  %v6505_v47 = vsel %vm16305_vm13, %v16745_v12, %v11933_v23  ;;  %v16791_v60 = vld [vmem:[#allocation72_spill] sm:$0xff]  ;;  %v3457_v12 = vadd.f32 %v12267_v14, %v16648_v15  ;;  %vm4093_vm3 = vcmp.ge.s32.totalorder %v4073_v21, 0  ;;  %v1938_v34 = vadd.s32 640, %v12475_v55 }
 0x413   :  { %16782 = vst [vmem:[#allocation42_spill] sm:$0xff] %v12615_v11  ;;  %16783 = vst [vmem:[#allocation123_spill] sm:$0xff] %v12620_v18  ;;  %v12634_v30 = vpop.permute.xlu0 %3987  ;;  %v16790_v18 = vld [vmem:[#allocation7_spill] sm:$0xff]  ;;  %v16792_v11 = vld [vmem:[#allocation70_spill] sm:$0xff]  ;;  %vm5224_vm1 = vcmp.lt.s32.totalorder %v5184_v28, 32  ;;  %v4316_v25 = vadd.s32 4294967295, %v12571_v56 }
 0x414   :  { %16784 = vst [vmem:[#allocation124_spill] sm:$0xff] %v12626_v59  ;;  %16785 = vst [vmem:[#allocation125_spill] sm:$0xff] %v12631_v31  ;;  %4842 = vrot.lane.b32.xlu1 %v12513_v61, %s9362_s5  ;;  %v4690_v31 = vmul.bf16 1.0|1.0, %v16790_v18  ;;  %v6568_v13 = vsel %vm6556_vm12, %v16743_v51, %v16792_v11  ;;  %v12669_v18 = vsel %vm4335_vm7, 1.0, %v16771_v37  ;;  %v4698_v51 = vadd.s32 1, %v12486_v50 }
 0x415   :  { %16786 = vst [vmem:[#allocation126_spill] sm:$0xff] %v12634_v30  ;;  %16787 = vst [vmem:[#allocation127_spill] sm:$0xff] %v12641_v22  ;;  %v6506_v22 = vsel %vm16305_vm13, %v11933_v23, %v16791_v60  ;;  %5328 = vrot.lane.b32.xlu0 %v12513_v61, %s9361_s25  ;;  %v4941_v23 = vadd.s32 2, %v12486_v50  ;;  %v12685_v32 = vrot.slane %v4691_v58, 4  ;;  %v12689_v48 = vpack.c.bf16 %v3457_v12, %v3457_v12  ;;  %v16801_v58 = vld [vmem:[#allocation69_spill] sm:$0xff]  ;;  %v16806_v28 = vld [vmem:[#allocation74_spill] sm:$0xff] }
 0x416   :  { %16788 = vst [vmem:[#allocation128_spill] sm:$0xff] %v12646_v54  ;;  %v6569_v54 = vsel %vm6556_vm12, %v16792_v11, %v16793_v43  ;;  %v12672_v33 = vpop.permute.xlu1 %3993  ;;  %v1937_v11 = vadd.s32 512, %v12475_v55  ;;  %v12695_v49 = vsel %vm3830_vm9, 1.0, %v16771_v37  ;;  %v12700_v27 = vsel %vm737_vm6, %v6505_v47, %v6568_v13  ;;  %v16817_v30 = vld [vmem:[#allocation24_spill] sm:$0xff] }
 0x417   :  { %16794 = vst [vmem:[#allocation81_spill] sm:$0xff] %v12672_v33  ;;  %v12677_v14 = vpop.permute.xlu0 %4230  ;;  %v12683_v41 = vsel %vm737_vm6, %v6506_v22, %v6569_v54  ;;  %16797 = vst [vmem:[#allocation70_spill] sm:$0xff] %v12685_v32  ;;  %v12687_v33 = vrot.slane %v4690_v31, 4  ;;  %v16800_v22 = vld [vmem:[#allocation53_spill] sm:$0xff]  ;;  %v12707_v54 = vsel %vm5224_vm1, 1.0, %v16771_v37  ;;  %v12711_v12 = vsel %vm4093_vm3, 1.0, %v16771_v37 }
 0x418   :  { %16795 = vst [vmem:[#allocation7_spill] sm:$0xff] %v12677_v14  ;;  %4459 = vrot.lane.b32.xlu1 %v12513_v61, %s9366_s27  ;;  %16796 = vst [vmem:[#allocation72_spill] sm:$0xff] %v12683_v41  ;;  %v6571_v31 = vsel %vm6556_vm12, %v16801_v58, %v16800_v22  ;;  %vm4981_vm7 = vcmp.lt.s32.totalorder %v4941_v23, 32  ;;  %v6570_v47 = vsel %vm6556_vm12, %v16793_v43, %v16801_v58  ;;  %vm4738_vm9 = vcmp.lt.s32.totalorder %v4698_v51, 32  ;;  %v16807_v23 = vld [vmem:[#allocation65_spill] sm:$0xff]  ;;  %v16812_v32 = vld [vmem:[#allocation16_spill] sm:$0xff] }
 0x419   :  { %16798 = vst [vmem:[#allocation22_spill] sm:$0xff] %v12687_v33  ;;  %5085 = vrot.lane.b32.xlu0 %v12513_v61, %s9360_s24  ;;  %16799 = vst [vmem:[#allocation129_spill] sm:$0xff] %v12700_v27  ;;  %v12718_v13 = vand.u32 31, %v1937_v11  ;;  %v12720_v50 = vand.u32 31, %v1938_v34  ;;  %v6507_v21 = vsel %vm16305_vm13, %v16791_v60, %v16806_v28  ;;  %v6508_v41 = vsel %vm16305_vm13, %v16806_v28, %v16807_v23  ;;  %v16809_v28 = vld [vmem:[#allocation76_spill] sm:$0xff]  ;;  %v16816_v51 = vld [vmem:[#allocation71_spill] sm:$0xff] }
 0x41a   :  { %v12713_v46 = vpop.permute.xlu1 %5350  ;;  %vm4336_vm1 = vcmp.ge.s32.totalorder %v4316_v25, 0  ;;  %v12739_v58 = vsel %vm4981_vm7, 1.0, %v16771_v37  ;;  %v12744_v60 = vsel %vm737_vm6, %v6508_v41, %v6571_v31  ;;  %v16810_v27 = vld [vmem:[#allocation68_spill] sm:$0xff]  ;;  %v16811_v25 = vld [vmem:[#allocation18_spill] sm:$0xff]  ;;  %v12754_v11 = vsel %vm4738_vm9, 1.0, %v16771_v37 }
 0x41b   :  { %16802 = vst [vmem:[#allocation53_spill] sm:$0xff] %v12713_v46  ;;  %16803 = vst [vmem:[#allocation69_spill] sm:$0xff] %v12718_v13  ;;  %v12722_v33 = vpop.permute.xlu0 %4856  ;;  %v6382_v43 = vsel %vm5121_vm15, %v16810_v27, %v16809_v28  ;;  %v6444_v34 = vsel %vm5364_vm14, %v16812_v32, %v16811_v25  ;;  %v12759_v10 = vsel %vm737_vm6, %v6507_v21, %v6570_v47  ;;  %v12762_v41 = vsel %vm4336_vm1, 1.0, %v16771_v37  ;;  %v16820_v21 = vld [vmem:[#allocation19_spill] sm:$0xff] }
 0x41c   :  { %16804 = vst [vmem:[#allocation130_spill] sm:$0xff] %v12720_v50  ;;  %16805 = vst [vmem:[#allocation131_spill] sm:$0xff] %v12722_v33  ;;  %5330 = vrot.lane.b32.xlu1 %v12689_v48, %s9361_s25  ;;  %v5188_v31 = vadd.s32 3, %v12718_v13  ;;  %v3814_v33 = vadd.s32 4294967293, %v12720_v50  ;;  %v6381_v47 = vsel %vm5121_vm15, %v16816_v51, %v16810_v27  ;;  %vm16334_vm3 = vcmask 809984  }
 0x41d   :  { %3975 = vrot.lane.b32.xlu0 %v12689_v48, %s9364_s11  ;;  %16808 = vst [vmem:[#allocation74_spill] sm:$0xff] %v12744_v60  ;;  %16814 = vst [vmem:[#allocation76_spill] sm:$0xff] %v12759_v10  ;;  %v4945_v60 = vadd.s32 2, %v12718_v13  ;;  %v1941_v10 = vadd.s32 1024, %v12475_v55  ;;  %v6443_v59 = vsel %vm5364_vm14, %v16817_v30, %v16812_v32  ;;  %v4702_v27 = vadd.s32 1, %v12718_v13 }
 0x41e   :  { %v12756_v46 = vpop.permute.xlu1 %5107  ;;  %vm5228_vm7 = vcmp.lt.s32.totalorder %v5188_v31, 32  ;;  %vm3834_vm1 = vcmp.ge.s32.totalorder %v3814_v33, 0  ;;  %v4320_v53 = vadd.s32 4294967295, %v12720_v50  ;;  %v1945_v33 = vadd.s32 1536, %v12475_v55 }
 0x41f   :  { %16813 = vst [vmem:[#allocation65_spill] sm:$0xff] %v12756_v46  ;;  %v12767_v14 = vpop.permute.xlu0 %4473  ;;  %v6380_v46 = vsel %vm5121_vm15, %v16770_v0, %v16816_v51  ;;  %v16818_v0 = vld [vmem:[#allocation102_spill] sm:$0xff]  ;;  %v16819_v51 = vld [vmem:[#allocation29_spill] sm:$0xff]  ;;  %vm4985_vm9 = vcmp.lt.s32.totalorder %v4945_v60, 32  ;;  %v12812_v32 = vand.u32 31, %v1941_v10  ;;  %vm4742_vm5 = vcmp.lt.s32.totalorder %v4702_v27, 32 }
 0x420   :  { %16815 = vst [vmem:[#allocation68_spill] sm:$0xff] %v12767_v14  ;;  %5087 = vrot.lane.b32.xlu1 %v12689_v48, %s9360_s24  ;;  %v6442_v14 = vsel %vm5364_vm14, %v16767_v35, %v16817_v30  ;;  %v3537_v6 = vadd.f32 %v16818_v0, %v16648_v15  ;;  %v6320_v36 = vsel %vm4878_vm0, %v16820_v21, %v16819_v51  ;;  %vm4340_vm8 = vcmp.ge.s32.totalorder %v4320_v53, 0  ;;  %v16838_v60 = vld [vmem:[#allocation49_spill] sm:$0xff]  ;;  %v16851_v53 = vld [vmem:[#allocation56_spill] sm:$0xff] }
 0x421   :  { %4218 = vrot.lane.b32.xlu0 %v12689_v48, %s9365_s2  ;;  %v6445_v35 = vsel %vm5364_vm14, %v16811_v25, %v16821_v45  ;;  %v12803_v0 = vsel %vm737_vm6, %v6382_v43, %v6444_v34  ;;  %v4077_v25 = vadd.s32 4294967294, %v12720_v50  ;;  %16825 = vst [vmem:[#allocation24_spill] sm:$0xff] %v12812_v32  ;;  %v16826_v43 = vld [vmem:[#allocation32_spill] sm:$0xff]  ;;  %v12826_v13 = vsel %vm737_vm6, %v6380_v46, %v6442_v14  ;;  %v16829_v50 = vld [vmem:[#allocation30_spill] sm:$0xff] }
 0x422   :  { %v12800_v30 = vpop.permute.xlu1 %4864  ;;  %16823 = vst [vmem:[#allocation16_spill] sm:$0xff] %v12803_v0  ;;  %v6383_v34 = vsel %vm5121_vm15, %v16809_v28, %v16826_v43  ;;  %v12818_v0 = vpack.c.bf16 %v3537_v6, %v3537_v6  ;;  %16828 = vst [vmem:[#allocation29_spill] sm:$0xff] %v12826_v13  ;;  %v6318_v10 = vsel %vm4878_vm0, %v11850_v7, %v16829_v50  ;;  %v12836_v6 = vsel %vm5228_vm7, 1.0, %v16771_v37  ;;  %v16847_v13 = vld [vmem:[#allocation43_spill] sm:$0xff] }
 0x423   :  { %16822 = vst [vmem:[#allocation18_spill] sm:$0xff] %v12800_v30  ;;  %v12806_v17 = vpop.permute.xlu0 %5348  ;;  %v1942_v30 = vadd.s32 1152, %v12475_v55  ;;  %v6319_v2 = vsel %vm4878_vm0, %v16829_v50, %v16820_v21  ;;  %16830 = vst [vmem:[#allocation19_spill] sm:$0xff] %v12836_v6  ;;  %v12846_v14 = vsel %vm4985_vm9, 1.0, %v16771_v37  ;;  %v12850_v7 = vsel %vm3834_vm1, 1.0, %v16771_v37 }
 0x424   :  { %16824 = vst [vmem:[#allocation71_spill] sm:$0xff] %v12806_v17  ;;  %4844 = vrot.lane.b32.xlu1 %v12689_v48, %s9362_s5  ;;  %v12823_v17 = vsel %vm737_vm6, %v6381_v47, %v6443_v59  ;;  %v12842_v59 = vsel %vm737_vm6, %v16832_v57, %v6320_v36  ;;  %16834 = vst [vmem:[#allocation30_spill] sm:$0xff] %v12850_v7  ;;  %v12857_v46 = vsel %vm737_vm6, %v6383_v34, %v6445_v35  ;;  %v16840_v47 = vld [vmem:[#allocation46_spill] sm:$0xff]  ;;  %v16842_v35 = vld [vmem:[#allocation92_spill] sm:$0xff] }
 0x425   :  { %4461 = vrot.lane.b32.xlu0 %v12689_v48, %s9366_s27  ;;  %16827 = vst [vmem:[#allocation102_spill] sm:$0xff] %v12823_v17  ;;  %16833 = vst [vmem:[#allocation32_spill] sm:$0xff] %v12842_v59  ;;  %vm4097_vm7 = vcmp.ge.s32.totalorder %v4077_v25, 0  ;;  %v5192_v57 = vadd.s32 3, %v12812_v32  ;;  %v12860_v36 = vand.u32 31, %v1942_v30  ;;  %v12868_v31 = vsel %vm737_vm6, %v16838_v60, %v6319_v2  ;;  %v16843_v59 = vld [vmem:[#allocation48_spill] sm:$0xff] }
 0x426   :  { %v12838_v28 = vpop.permute.xlu1 %4481  ;;  %16836 = vst [vmem:[#allocation132_spill] sm:$0xff] %v12857_v46  ;;  %16839 = vst [vmem:[#allocation49_spill] sm:$0xff] %v12868_v31  ;;  %v12872_v21 = vsel %vm737_vm6, %v16840_v47, %v6318_v10  ;;  %v4694_v34 = vmul.bf16 1.0|1.0, %v16842_v35  ;;  %v6321_v30 = vsel %vm4878_vm0, %v16819_v51, %v16843_v59  ;;  %v16845_v2 = vld [vmem:[#allocation93_spill] sm:$0xff]  ;;  %v16846_v31 = vld [vmem:[#allocation51_spill] sm:$0xff]  ;;  %v3539_v25 = vadd.f32 %v12330_v52, %v16648_v15 }
 0x427   :  { %16831 = vst [vmem:[#allocation31_spill] sm:$0xff] %v12838_v28  ;;  %v12852_v50 = vpop.permute.xlu0 %5105  ;;  %16837 = vst [vmem:[#allocation133_spill] sm:$0xff] %v12860_v36  ;;  %v4695_v60 = vmul.bf16 1.0|1.0, %v16845_v2  ;;  %v7207_v10 = vsel %vm16334_vm3, %v16847_v13, %v16846_v31  ;;  %v12890_v47 = vsel %vm4742_vm5, 1.0, %v16771_v37  ;;  %v12894_v51 = vsel %vm4097_vm7, 1.0, %v16771_v37 }
 0x428   :  { %16835 = vst [vmem:[#allocation50_spill] sm:$0xff] %v12852_v50  ;;  %3981 = vrot.lane.b32.xlu1 %v12818_v0, %s9364_s11  ;;  %16841 = vst [vmem:[#allocation46_spill] sm:$0xff] %v12872_v21  ;;  %v12898_v35 = vsel %vm4340_vm8, 1.0, %v16771_v37  ;;  %vm5232_vm9 = vcmp.lt.s32.totalorder %v5192_v57, 32  ;;  %v4949_v13 = vadd.s32 2, %v12812_v32  ;;  %v3818_v27 = vadd.s32 4294967293, %v12860_v36 }
 0x429   :  { %5336 = vrot.lane.b32.xlu0 %v12818_v0, %s9361_s25  ;;  %16848 = vst [vmem:[#allocation48_spill] sm:$0xff] %v12890_v47  ;;  %16849 = vst [vmem:[#allocation93_spill] sm:$0xff] %v12898_v35  ;;  %v4081_v2 = vadd.s32 4294967294, %v12860_v36  ;;  %v12914_v21 = vsel %vm737_vm6, %v16851_v53, %v6321_v30  ;;  %v12924_v52 = vrot.slane %v4695_v60, 4  ;;  %v16856_v50 = vld [vmem:[#allocation33_spill] sm:$0xff]  ;;  %v16860_v57 = vld [vmem:[#allocation44_spill] sm:$0xff] }
 0x42a   :  { %v12882_v17 = vpop.permute.xlu1 %4238  ;;  %16852 = vst [vmem:[#allocation43_spill] sm:$0xff] %v12914_v21  ;;  %v12929_v7 = vsel %vm16334_vm3, %v16846_v31, %v16856_v50  ;;  %v16861_v28 = vld [vmem:[#allocation73_spill] sm:$0xff]  ;;  %v16864_v31 = vld [vmem:[#allocation26_spill] sm:$0xff]  ;;  %vm4989_vm5 = vcmp.lt.s32.totalorder %v4949_v13, 32  ;;  %vm3838_vm8 = vcmp.ge.s32.totalorder %v3818_v27, 0  ;;  %v12951_v50 = vpack.c.bf16 %v3539_v25, %v3539_v25 }
 0x42b   :  { %16844 = vst [vmem:[#allocation92_spill] sm:$0xff] %v12882_v17  ;;  %v12900_v46 = vpop.permute.xlu0 %4862  ;;  %v12916_v17 = vrot.slane %v4694_v34, 4  ;;  %16855 = vst [vmem:[#allocation135_spill] sm:$0xff] %v12924_v52  ;;  %v12934_v34 = vsel %vm5232_vm9, 1.0, %v16771_v37  ;;  %v12943_v60 = vsel %vm6619_vm11, %v16861_v28, %v16860_v57  ;;  %v6572_v30 = vsel %vm6556_vm12, %v16800_v22, %v16864_v31  ;;  %v16897_v47 = vld [vmem:[#allocation5_spill] sm:$0xff] }
 0x42c   :  { %16850 = vst [vmem:[#allocation51_spill] sm:$0xff] %v12900_v46  ;;  %4224 = vrot.lane.b32.xlu1 %v12818_v0, %s9365_s2  ;;  %16857 = vst [vmem:[#allocation136_spill] sm:$0xff] %v12929_v7  ;;  %vm4101_vm1 = vcmp.ge.s32.totalorder %v4081_v2, 0  ;;  %v4706_v7 = vadd.s32 1, %v12812_v32  ;;  %v4324_v52 = vadd.s32 4294967295, %v12860_v36  ;;  %v12955_v21 = vand.u32 31, %v1945_v33 }
 0x42d   :  { %5093 = vrot.lane.b32.xlu0 %v12818_v0, %s9360_s24  ;;  %16853 = vst [vmem:[#allocation56_spill] sm:$0xff] %v12916_v17  ;;  %16858 = vst [vmem:[#allocation137_spill] sm:$0xff] %v12934_v34  ;;  %v12946_v17 = vsel %vm737_vm6, %v7207_v10, 0  ;;  %v16866_v10 = vld [vmem:[#allocation75_spill] sm:$0xff]  ;;  %v1946_v22 = vadd.s32 1664, %v12475_v55  ;;  %v12968_v25 = vsel %vm6619_vm11, %v11876_v63, %v16861_v28  ;;  %v16878_v36 = vld [vmem:[#allocation52_spill] sm:$0xff]  ;;  %v3619_v27 = vadd.f32 %v12382_v8, %v16648_v15 }
 0x42e   :  { %v12922_v46 = vpop.permute.xlu1 %4001  ;;  %16862 = vst [vmem:[#allocation44_spill] sm:$0xff] %v12943_v60  ;;  %16863 = vst [vmem:[#allocation73_spill] sm:$0xff] %v12946_v17  ;;  %v6509_v17 = vsel %vm16305_vm13, %v16807_v23, %v16866_v10  ;;  %v16869_v60 = vld [vmem:[#allocation78_spill] sm:$0xff]  ;;  %v16875_v32 = vld [vmem:[#allocation35_spill] sm:$0xff]  ;;  %vm4746_vm7 = vcmp.lt.s32.totalorder %v4706_v7, 32  ;;  %vm4344_vm9 = vcmp.ge.s32.totalorder %v4324_v52, 0 }
 0x42f   :  { %16854 = vst [vmem:[#allocation134_spill] sm:$0xff] %v12922_v46  ;;  %v12936_v53 = vpop.permute.xlu0 %4479  ;;  %16865 = vst [vmem:[#allocation26_spill] sm:$0xff] %v12955_v21  ;;  %v16870_v46 = vld [vmem:[#allocation47_spill] sm:$0xff]  ;;  %v12992_v28 = vsel %vm6619_vm11, %v16860_v57, %v16875_v32  ;;  %v4953_v57 = vadd.s32 2, %v12955_v21  ;;  %v4710_v2 = vadd.s32 1, %v12955_v21  ;;  %v16888_v34 = vld [vmem:[#allocation36_spill] sm:$0xff] }
 0x430   :  { %16859 = vst [vmem:[#allocation138_spill] sm:$0xff] %v12936_v53  ;;  %4467 = vrot.lane.b32.xlu1 %v12818_v0, %s9366_s27  ;;  %16868 = vst [vmem:[#allocation139_spill] sm:$0xff] %v12968_v25  ;;  %v12973_v33 = vsel %vm16334_vm3, %v16870_v46, %v16869_v60  ;;  %v12978_v53 = vsel %vm4989_vm5, 1.0, %v16771_v37  ;;  %v12997_v60 = vsel %vm16334_vm3, %v16878_v36, %v16870_v46  ;;  %v13005_v25 = vsel %vm4101_vm1, 1.0, %v16771_v37  ;;  %v16883_v46 = vld [vmem:[#allocation27_spill] sm:$0xff] }
 0x431   :  { %4850 = vrot.lane.b32.xlu0 %v12818_v0, %s9362_s5  ;;  %16871 = vst [vmem:[#allocation47_spill] sm:$0xff] %v12973_v33  ;;  %16872 = vst [vmem:[#allocation140_spill] sm:$0xff] %v12978_v53  ;;  %v13001_v33 = vsel %vm3838_vm8, 1.0, %v16771_v37  ;;  %v6510_v36 = vsel %vm16305_vm13, %v16866_v10, %v16883_v46  ;;  %vm4993_vm8 = vcmp.lt.s32.totalorder %v4953_v57, 32  ;;  %vm4750_vm1 = vcmp.lt.s32.totalorder %v4710_v2, 32  ;;  %v16903_v57 = vld [vmem:[#allocation85_spill] sm:$0xff] }
 0x432   :  { %v12963_v13 = vpop.permute.xlu1 %5356  ;;  %16877 = vst [vmem:[#allocation35_spill] sm:$0xff] %v12992_v28  ;;  %16879 = vst [vmem:[#allocation52_spill] sm:$0xff] %v12997_v60  ;;  %v16886_v60 = vld [vmem:[#allocation34_spill] sm:$0xff]  ;;  %v16887_v28 = vld [vmem:[#allocation25_spill] sm:$0xff]  ;;  %v1949_v52 = vadd.s32 2048, %v12475_v55  ;;  %v6446_v2 = vsel %vm5364_vm14, %v16821_v45, %v16903_v57 }
 0x433   :  { %16867 = vst [vmem:[#allocation75_spill] sm:$0xff] %v12963_v13  ;;  %v12980_v23 = vpop.permute.xlu0 %4236  ;;  %v16874_v13 = vld [vmem:[#allocation17_spill] sm:$0xff]  ;;  %16880 = vst [vmem:[#allocation142_spill] sm:$0xff] %v13001_v33  ;;  %v6574_v10 = vsel %vm6556_vm12, %v16887_v28, %v16888_v34 }
 0x434   :  { %16873 = vst [vmem:[#allocation141_spill] sm:$0xff] %v12980_v23  ;;  %5338 = vrot.lane.b32.xlu1 %v12951_v50, %s9361_s25  ;;  %v12987_v63 = vsel %vm6619_vm11, %v16875_v32, %v16874_v13  ;;  %16881 = vst [vmem:[#allocation143_spill] sm:$0xff] %v13005_v25  ;;  %v5196_v32 = vadd.s32 3, %v12955_v21  ;;  %v6573_v23 = vsel %vm6556_vm12, %v16864_v31, %v16887_v28  ;;  %v13046_v31 = vsel %vm4746_vm7, 1.0, %v16771_v37 }
 0x435   :  { %16876 = vst [vmem:[#allocation17_spill] sm:$0xff] %v12987_v63  ;;  %v13008_v63 = vsel %vm737_vm6, %v6509_v17, %v6572_v30  ;;  %3983 = vrot.lane.b32.xlu0 %v12951_v50, %s9364_s11  ;;  %v13020_v17 = vand.u32 31, %v1946_v22  ;;  %v16890_v22 = vld [vmem:[#allocation77_spill] sm:$0xff]  ;;  %v13050_v28 = vsel %vm4344_vm9, 1.0, %v16771_v37  ;;  %v13072_v53 = vsel %vm737_vm6, %v6510_v36, %v6573_v23 }
 0x436   :  { %16882 = vst [vmem:[#allocation144_spill] sm:$0xff] %v13008_v63  ;;  %v13022_v30 = vpop.permute.xlu1 %5113  ;;  %v6511_v63 = vsel %vm16305_vm13, %v16883_v46, %v16886_v60  ;;  %v6575_v46 = vsel %vm6556_vm12, %v16888_v34, %v16890_v22  ;;  %vm5236_vm5 = vcmp.lt.s32.totalorder %v5196_v32, 32  ;;  %v1950_v34 = vadd.s32 2176, %v12475_v55  ;;  %16894 = vst [vmem:[#allocation146_spill] sm:$0xff] %v13072_v53  ;;  %v16913_v53 = vld [vmem:[#allocation89_spill] sm:$0xff] }
 0x437   :  { %16884 = vst [vmem:[#allocation27_spill] sm:$0xff] %v13020_v17  ;;  %16885 = vst [vmem:[#allocation145_spill] sm:$0xff] %v13022_v30  ;;  %v13035_v21 = vpop.permute.xlu0 %3995  ;;  %v4328_v30 = vadd.s32 4294967295, %v13020_v17  ;;  %v4085_v7 = vadd.s32 4294967294, %v13020_v17  ;;  %v13075_v35 = vsel %vm737_vm6, %v6511_v63, %v6574_v10  ;;  %v13086_v25 = vsel %vm5236_vm5, 1.0, %v16771_v37 }
 0x438   :  { %16889 = vst [vmem:[#allocation34_spill] sm:$0xff] %v13035_v21  ;;  %5095 = vrot.lane.b32.xlu1 %v12951_v50, %s9360_s24  ;;  %v16892_v21 = vld [vmem:[#allocation6_spill] sm:$0xff]  ;;  %16895 = vst [vmem:[#allocation147_spill] sm:$0xff] %v13075_v35  ;;  %v13091_v23 = vpack.c.bf16 %v3619_v27, %v3619_v27  ;;  %v13095_v63 = vsel %vm4993_vm8, 1.0, %v16771_v37  ;;  %v13103_v36 = vand.u32 31, %v1950_v34  ;;  %vm4252_vm7 = vcmask 15360  }
 0x439   :  { %4226 = vrot.lane.b32.xlu0 %v12951_v50, %s9365_s2  ;;  %v6512_v8 = vsel %vm16305_vm13, %v16886_v60, %v16892_v21  ;;  %vm4348_vm9 = vcmp.ge.s32.totalorder %v4328_v30, 0  ;;  %vm4105_vm5 = vcmp.ge.s32.totalorder %v4085_v7, 0  ;;  %v3822_v32 = vadd.s32 4294967293, %v13020_v17  ;;  %v16906_v30 = vld [vmem:[#allocation80_spill] sm:$0xff] }
 0x43a   :  { %v13059_v22 = vpop.permute.xlu1 %4870  ;;  %v13089_v21 = vsel %vm737_vm6, %v6512_v8, %v6575_v46  ;;  %16900 = vst [vmem:[#allocation148_spill] sm:$0xff] %v13103_v36  ;;  %v13108_v10 = vand.u32 31, %v1949_v52  ;;  %v16904_v46 = vld [vmem:[#allocation82_spill] sm:$0xff]  ;;  %v16908_v52 = vld [vmem:[#allocation83_spill] sm:$0xff]  ;;  %v13138_v35 = vsel %vm4348_vm9, 1.0, %v16771_v37 }
 0x43b   :  { %16891 = vst [vmem:[#allocation25_spill] sm:$0xff] %v13059_v22  ;;  %v13067_v33 = vpop.permute.xlu0 %4487  ;;  %v16896_v22 = vld [vmem:[#allocation4_spill] sm:$0xff]  ;;  %16899 = vst [vmem:[#allocation5_spill] sm:$0xff] %v13089_v21  ;;  %v6447_v8 = vsel %vm5364_vm14, %v16903_v57, %v16904_v46  ;;  %v6384_v45 = vsel %vm5121_vm15, %v16826_v43, %v16908_v52  ;;  %v3826_v43 = vadd.s32 4294967293, %v13103_v36  ;;  %vm3842_vm8 = vcmp.ge.s32.totalorder %v3822_v32, 0 }
 0x43c   :  { %16893 = vst [vmem:[#allocation36_spill] sm:$0xff] %v13067_v33  ;;  %4852 = vrot.lane.b32.xlu1 %v12951_v50, %s9362_s5  ;;  %v13080_v6 = vsel %vm16334_vm3, %v16897_v47, %v16896_v22  ;;  %v13099_v47 = vsel %vm4750_vm1, 1.0, %v16771_v37  ;;  %16902 = vst [vmem:[#allocation150_spill] sm:$0xff] %v13108_v10  ;;  %v13125_v7 = vsel %vm16334_vm3, %v16896_v22, %v16906_v30  ;;  %v13141_v22 = vsel %vm4105_vm5, 1.0, %v16771_v37  ;;  %v16924_v32 = vld [vmem:[#allocation12_spill] sm:$0xff] }
 0x43d   :  { %16898 = vst [vmem:[#allocation4_spill] sm:$0xff] %v13080_v6  ;;  %4469 = vrot.lane.b32.xlu0 %v12951_v50, %s9366_s27  ;;  %16907 = vst [vmem:[#allocation82_spill] sm:$0xff] %v13125_v7  ;;  %v16909_v6 = vld [vmem:[#allocation79_spill] sm:$0xff]  ;;  %v4332_v30 = vadd.s32 4294967295, %v13103_v36  ;;  %v5200_v34 = vadd.s32 3, %v13108_v10  ;;  %v13154_v7 = vsel %vm737_vm6, %v6384_v45, %v6446_v2  ;;  %v6448_v17 = vsel %vm5364_vm14, %v16904_v46, %v16913_v53  ;;  %v16917_v46 = vld [vmem:[#allocation84_spill] sm:$0xff] }
 0x43e   :  { %v13106_v27 = vpop.permute.xlu1 %6554  ;;  %v6385_v57 = vsel %vm5121_vm15, %v16908_v52, %v16909_v6  ;;  %16912 = vst [vmem:[#allocation151_spill] sm:$0xff] %v13154_v7  ;;  %vm4495_vm1 = vcmask 7168   ;;  %v4089_v2 = vadd.s32 4294967294, %v13103_v36  ;;  %v13184_v36 = vsel %vm3842_vm8, 1.0, %v16771_v37 }
 0x43f   :  { %16901 = vst [vmem:[#allocation149_spill] sm:$0xff] %v13106_v27  ;;  %v13118_v60 = vpop.permute.xlu0 %4244  ;;  %v13151_v21 = vsel %vm737_vm6, %v6385_v57, %v6447_v8  ;;  %v16916_v8 = vld [vmem:[#allocation87_spill] sm:$0xff]  ;;  %vm3846_vm9 = vcmp.ge.s32.totalorder %v3826_v43, 0  ;;  %vm4352_vm5 = vcmp.ge.s32.totalorder %v4332_v30, 0  ;;  %vm5240_vm13 = vcmp.lt.s32.totalorder %v5200_v34, 32 }
 0x440   :  { %16905 = vst [vmem:[#allocation85_spill] sm:$0xff] %v13118_v60  ;;  %3989 = vrot.lane.b32.xlu1 %v13091_v23, %s9364_s11  ;;  %16911 = vst [vmem:[#allocation79_spill] sm:$0xff] %v13151_v21  ;;  %v16914_v60 = vld [vmem:[#allocation86_spill] sm:$0xff]  ;;  %v6386_v45 = vsel %vm5121_vm15, %v16909_v6, %v16916_v8  ;;  %v6387_v57 = vsel %vm5121_vm15, %v16916_v8, %v16917_v46  ;;  %v16920_v6 = vld [vmem:[#allocation9_spill] sm:$0xff]  ;;  %vm4109_vm8 = vcmp.ge.s32.totalorder %v4089_v2, 0  ;;  %v13215_v34 = vsel %vm4352_vm5, 1.0, %v16771_v37 }
 0x441   :  { %5344 = vrot.lane.b32.xlu0 %v13091_v23, %s9361_s25  ;;  %v6449_v33 = vsel %vm5364_vm14, %v16913_v53, %v16914_v60  ;;  %v16918_v21 = vld [vmem:[#allocation90_spill] sm:$0xff]  ;;  %16919 = vst [vmem:[#allocation87_spill] sm:$0xff] %v13184_v36  ;;  %v6324_v43 = vsel %vm4878_vm0, %v16920_v6, %v16924_v32  ;;  %16926 = vst [vmem:[#allocation153_spill] sm:$0xff] %v13215_v34  ;;  %v16930_v2 = vld [vmem:[#allocation100_spill] sm:$0xff]  ;;  %v13233_v60 = vsel %vm4109_vm8, 1.0, %v16771_v37 }
 0x442   :  { %v13147_v52 = vpop.permute.xlu1 %7028  ;;  %v6322_v7 = vsel %vm4878_vm0, %v16843_v59, %v16918_v21  ;;  %v6323_v8 = vsel %vm4878_vm0, %v16918_v21, %v16920_v6  ;;  %v13197_v59 = vsel %vm737_vm6, %v6386_v45, %v6448_v17  ;;  %v4957_v21 = vadd.s32 2, %v13108_v10  ;;  %v16927_v45 = vld [vmem:[#allocation54_spill] sm:$0xff]  ;;  %16932 = vst [vmem:[#allocation154_spill] sm:$0xff] %v13233_v60  ;;  %v16943_v36 = vld [vmem:[#allocation59_spill] sm:$0xff] }
 0x443   :  { %16910 = vst [vmem:[#allocation83_spill] sm:$0xff] %v13147_v52  ;;  %v3621_v52 = vadd.f32 %v12390_v26, %v16648_v15  ;;  %v13164_v27 = vpop.permute.xlu0 %4003  ;;  %v13194_v26 = vsel %vm737_vm6, %v6387_v57, %v6449_v33  ;;  %16923 = vst [vmem:[#allocation152_spill] sm:$0xff] %v13197_v59  ;;  %v13212_v17 = vsel %vm3846_vm9, 1.0, %v16771_v37  ;;  %v16929_v57 = vld [vmem:[#allocation14_spill] sm:$0xff]  ;;  %v13227_v59 = vsel %vm5240_vm13, 1.0, %v16771_v37 }
 0x444   :  { %16915 = vst [vmem:[#allocation89_spill] sm:$0xff] %v13164_v27  ;;  %4232 = vrot.lane.b32.xlu1 %v13091_v23, %s9365_s2  ;;  %16922 = vst [vmem:[#allocation9_spill] sm:$0xff] %v13194_v26  ;;  %v6325_v6 = vsel %vm4878_vm0, %v16924_v32, %v16929_v57  ;;  %v4293_v26 = vsel %vm4252_vm7, 0, %v16930_v2  ;;  %v4714_v33 = vadd.s32 1, %v13108_v10  ;;  %v16936_v32 = vld [vmem:[#allocation55_spill] sm:$0xff]  ;;  %v3701_v10 = vadd.f32 %v12441_v38, %v16648_v15 }
 0x445   :  { %5101 = vrot.lane.b32.xlu0 %v13091_v23, %s9360_s24  ;;  %v13202_v46 = vpack.c.bf16 %v3621_v52, %v3621_v52  ;;  %v13219_v52 = vsel %vm737_vm6, %v16927_v45, %v6322_v7  ;;  %16931 = vst [vmem:[#allocation100_spill] sm:$0xff] %v13227_v59  ;;  %v16934_v45 = vld [vmem:[#allocation58_spill] sm:$0xff]  ;;  %v13243_v57 = vsel %vm737_vm6, %v16936_v32, %v6324_v43  ;;  %vm4997_vm13 = vcmp.lt.s32.totalorder %v4957_v21, 32 }
 0x446   :  { %v13191_v53 = vpop.permute.xlu1 %4489  ;;  %16928 = vst [vmem:[#allocation54_spill] sm:$0xff] %v13219_v52  ;;  %v13239_v52 = vsel %vm737_vm6, %v16934_v45, %v6323_v8  ;;  %16937 = vst [vmem:[#allocation55_spill] sm:$0xff] %v13243_v57  ;;  %v16942_v43 = vpack.c.bf16 %v12605_v42, %v12605_v42  ;;  %v4253_v38 = vsel %vm4252_vm7, %v16930_v2, %v12367_v3  ;;  %v16945_v21 = vld [vmem:[#allocation98_spill] sm:$0xff]  ;;  %vm4754_vm9 = vcmp.lt.s32.totalorder %v4714_v33, 32  ;;  %v16951_v33 = vld [vmem:[#allocation101_spill] sm:$0xff] }
 0x447   :  { %16921 = vst [vmem:[#allocation90_spill] sm:$0xff] %v13191_v53  ;;  %v13204_v30 = vpop.permute.xlu0 %5358  ;;  %16935 = vst [vmem:[#allocation58_spill] sm:$0xff] %v13239_v52  ;;  %v16939_v53 = vld [vmem:[#allocation91_spill] sm:$0xff]  ;;  %v16946_v42 = vld [vmem:[#allocation94_spill] sm:$0xff]  ;;  %v4536_v2 = vsel %vm4495_vm1, 0, %v12346_v62 }
 0x448   :  { %16925 = vst [vmem:[#allocation12_spill] sm:$0xff] %v13204_v30  ;;  %4858 = vrot.lane.b32.xlu1 %v13091_v23, %s9362_s5  ;;  %v16938_v30 = vld [vmem:[#allocation88_spill] sm:$0xff]  ;;  %v4295_v45 = vmul.bf16 %v4293_v26, %v16942_v43  ;;  %v13281_v26 = vsel %vm6619_vm11, %v16874_v13, %v16946_v42  ;;  %v13289_v43 = vsel %vm4997_vm13, 1.0, %v16771_v37  ;;  %v4680_v32 = vmul.bf16 1.0|1.0, %v12513_v61 }
 0x449   :  { %3991 = vrot.lane.b32.xlu0 %v13202_v46, %s9364_s11  ;;  %v13248_v27 = vsel %vm16334_vm3, %v16939_v53, %v16938_v30  ;;  %v4050_v30 = vsel %vm151_vm2, 0, %v16945_v21  ;;  %16947 = vst [vmem:[#allocation98_spill] sm:$0xff] %v13281_v26  ;;  %v5365_v53 = vsel %vm5364_vm14, %v16951_v33, %v12360_v44  ;;  %v16952_v13 = vpack.c.bf16 %v12711_v12, %v12711_v12 }
 0x44a   :  { %v13235_v7 = vpop.permute.xlu1 %4246  ;;  %16940 = vst [vmem:[#allocation156_spill] sm:$0xff] %v13248_v27  ;;  %v13300_v26 = vpack.c.bf16 %v3701_v10, %v3701_v10  ;;  %v16955_v61 = vpack.c.bf16 %v12583_v19, %v12583_v19  ;;  %v5448_v57 = vrot.slane %v4295_v45, 4  ;;  %v13311_v33 = vsel %vm4754_vm9, 1.0, %v16771_v37 }
 0x44b   :  { %16933 = vst [vmem:[#allocation155_spill] sm:$0xff] %v13235_v7  ;;  %v13256_v8 = vpop.permute.xlu0 %5115  ;;  %v13270_v7 = vsel %vm737_vm6, %v16943_v36, %v6325_v6  ;;  %v16948_v36 = vld [vmem:[#allocation103_spill] sm:$0xff]  ;;  %v4296_v42 = vmul.bf16 %v4253_v38, %v16952_v13  ;;  %16956 = vst [vmem:[#allocation160_spill] sm:$0xff] %v13311_v33  ;;  %v4681_v12 = vmul.bf16 1.0|1.0, %v12689_v48  ;;  %v16957_v10 = vpack.c.bf16 %v12669_v18, %v12669_v18  ;;  %v16985_v33 = vld [vmem:[#allocation109_spill] sm:$0xff] }
 0x44c   :  { %16941 = vst [vmem:[#allocation157_spill] sm:$0xff] %v13256_v8  ;;  %4475 = vrot.lane.b32.xlu1 %v13091_v23, %s9366_s27  ;;  %16944 = vst [vmem:[#allocation59_spill] sm:$0xff] %v13270_v7  ;;  %v5122_v6 = vsel %vm5121_vm15, %v16948_v36, %v12375_v39  ;;  %v1935_v36 = vadd.s32 256, %v12475_v55  ;;  %v16958_v13 = vpack.c.bf16 %v12739_v58, %v12739_v58  ;;  %v4685_v19 = vmul.bf16 1.0|1.0, %v12951_v50 }
 0x44d   :  { %4477 = vrot.lane.b32.xlu0 %v13202_v46, %s9366_s27  ;;  %16949 = vst [vmem:[#allocation103_spill] sm:$0xff] %v13289_v43  ;;  %16953 = vst [vmem:[#allocation101_spill] sm:$0xff] %v13300_v26  ;;  %v4538_v38 = vmul.bf16 %v4536_v2, %v16957_v10  ;;  %v4010_v45 = vsel %vm151_vm2, %v16945_v21, %v12354_v9  ;;  %v16959_v48 = vpack.c.bf16 %v12707_v54, %v12707_v54 }
 0x44e   :  { %v13291_v27 = vpop.permute.xlu1 %7032  ;;  %v5164_v52 = vmul.bf16 %v5122_v6, %v16958_v13  ;;  %v4879_v58 = vsel %vm4878_vm0, %v12338_v29, %v12379_v20  ;;  %v4496_v2 = vsel %vm4495_vm1, %v12346_v62, %v12397_v1  ;;  %v5449_v50 = vrot.slane %v4296_v42, 4 }
 0x44f   :  { %16950 = vst [vmem:[#allocation158_spill] sm:$0xff] %v13291_v27  ;;  %v13302_v7 = vpop.permute.xlu0 %4872  ;;  %v4052_v27 = vmul.bf16 %v4050_v30, %v16955_v61  ;;  %v4684_v30 = vmul.bf16 1.0|1.0, %v12818_v0  ;;  %v5407_v18 = vmul.bf16 %v5365_v53, %v16959_v48  ;;  %v13344_v54 = vand.u32 31, %v1935_v36 }
 0x450   :  { %16954 = vst [vmem:[#allocation159_spill] sm:$0xff] %v13302_v7  ;;  %5346 = vrot.lane.b32.xlu1 %v13202_v46, %s9361_s25  ;;  %v13346_v53 = vrot.slane %v4680_v32, 4  ;;  %v1936_v62 = vadd.s32 384, %v12475_v55  ;;  %v13354_v42 = vrot.slane %v4681_v12, 4  ;;  %v16966_v10 = vpack.c.bf16 %v12695_v49, %v12695_v49  ;;  %v16986_v7 = vld [vmem:[#allocation38_spill] sm:$0xff] }
 0x451   :  { %5352 = vrot.lane.b32.xlu0 %v13300_v26, %s9361_s25  ;;  %16962 = vst [vmem:[#allocation163_spill] sm:$0xff] %v13344_v54  ;;  %v13352_v21 = vsel %vm737_vm6, %v4052_v27, %v5448_v57  ;;  %v5528_v48 = vrot.slane %v5164_v52, 4  ;;  %v16967_v36 = vpack.c.bf16 %v12754_v11, %v12754_v11  ;;  %v16968_v0 = vpack.c.bf16 %v12762_v41, %v12762_v41 }
 0x452   :  { %v13336_v6 = vpop.permute.xlu1 %6429  ;;  %16963 = vst [vmem:[#allocation164_spill] sm:$0xff] %v13346_v53  ;;  %16964 = vst [vmem:[#allocation165_spill] sm:$0xff] %v13352_v21  ;;  %v4053_v13 = vmul.bf16 %v4010_v45, %v16966_v10  ;;  %v13370_v57 = vsel %vm737_vm6, %v5407_v18, 0  ;;  %v13374_v49 = vsel %vm737_vm6, %v4538_v38, %v12517_v4  ;;  %v13376_v52 = vrot.slane %v4685_v19, 4 }
 0x453   :  { %16960 = vst [vmem:[#allocation161_spill] sm:$0xff] %v13336_v6  ;;  %v13340_v61 = vpop.permute.xlu0 %6491  ;;  %16965 = vst [vmem:[#allocation166_spill] sm:$0xff] %v13354_v42  ;;  %v4921_v32 = vmul.bf16 %v4879_v58, %v16967_v36  ;;  %v4539_v29 = vmul.bf16 %v4496_v2, %v16968_v0  ;;  %v13378_v11 = vrot.slane %v4684_v30, 4  ;;  %v4257_v41 = vsel %vm4252_vm7, %v12403_v40, %v12471_v5  ;;  %v16974_v2 = vld [vmem:[#allocation61_spill] sm:$0xff]  ;;  %v16980_v6 = vld [vmem:[#allocation60_spill] sm:$0xff] }
 0x454   :  { %16961 = vst [vmem:[#allocation162_spill] sm:$0xff] %v13340_v61  ;;  %5103 = vrot.lane.b32.xlu1 %v13202_v46, %s9360_s24  ;;  %16970 = vst [vmem:[#allocation168_spill] sm:$0xff] %v13376_v52  ;;  %v3811_v45 = vadd.s32 4294967293, %v13344_v54  ;;  %v4074_v18 = vadd.s32 4294967294, %v13344_v54  ;;  %v13390_v4 = vsel %vm737_vm6, %v4053_v13, %v5449_v50  ;;  %v5126_v38 = vsel %vm5121_vm15, %v12425_v24, %v12452_v16  ;;  %v16975_v50 = vld [vmem:[#allocation114_spill] sm:$0xff]  ;;  %v16979_v61 = vld [vmem:[#allocation37_spill] sm:$0xff] }
 0x455   :  { %5109 = vrot.lane.b32.xlu0 %v13300_v26, %s9360_s24  ;;  %16971 = vst [vmem:[#allocation169_spill] sm:$0xff] %v13378_v11  ;;  %v4699_v19 = vadd.s32 1, %v12571_v56  ;;  %v13396_v30 = vand.u32 31, %v1936_v62  ;;  %v4688_v58 = vmul.bf16 1.0|1.0, %v13091_v23  ;;  %v3703_v0 = vadd.f32 %v16974_v2, %v16648_v15  ;;  %v16977_v62 = vld [vmem:[#allocation28_spill] sm:$0xff] }
 0x456   :  { %v13367_v27 = vpop.permute.xlu1 %6986  ;;  %v13404_v10 = vsel %vm737_vm6, %v4921_v32, %v5528_v48  ;;  %v13408_v13 = vsel %vm737_vm6, %v4539_v29, %v16975_v50  ;;  %v16978_v23 = vld [vmem:[#allocation107_spill] sm:$0xff]  ;;  %v16981_v11 = vld [vmem:[#allocation105_spill] sm:$0xff]  ;;  %v16982_v48 = vpack.c.bf16 %v12894_v51, %v12894_v51  ;;  %v16984_v50 = vpack.c.bf16 %v12846_v14, %v12846_v14 }
 0x457   :  { %16969 = vst [vmem:[#allocation167_spill] sm:$0xff] %v13367_v27  ;;  %v13383_v12 = vpop.permute.xlu0 %7026  ;;  %16973 = vst [vmem:[#allocation171_spill] sm:$0xff] %v13396_v30  ;;  %v4014_v2 = vsel %vm151_vm2, %v16979_v61, %v16978_v23  ;;  %v4883_v52 = vsel %vm4878_vm0, %v16981_v11, %v16980_v6  ;;  %v4500_v5 = vsel %vm4495_vm1, %v16986_v7, %v16985_v33  ;;  %vm3831_vm11 = vcmp.ge.s32.totalorder %v3811_v45, 0  ;;  %v16994_v45 = vld [vmem:[#allocation48_spill] sm:$0xff] }
 0x458   :  { %16972 = vst [vmem:[#allocation170_spill] sm:$0xff] %v13383_v12  ;;  %4860 = vrot.lane.b32.xlu1 %v13202_v46, %s9362_s5  ;;  %v16976_v12 = vld [vmem:[#allocation66_spill] sm:$0xff]  ;;  %v4300_v32 = vmul.bf16 %v4257_v41, %v16982_v48  ;;  %v5168_v36 = vmul.bf16 %v5126_v38, %v16984_v50  ;;  %vm4094_vm5 = vcmp.ge.s32.totalorder %v4074_v18, 0  ;;  %vm4739_vm8 = vcmp.lt.s32.totalorder %v4699_v19, 32  ;;  %v16990_v38 = vld [vmem:[#allocation19_spill] sm:$0xff]  ;;  %v17005_v6 = vld [vmem:[#allocation64_spill] sm:$0xff] }
 0x459   :  { %4866 = vrot.lane.b32.xlu0 %v13300_v26, %s9362_s5  ;;  %v5369_v27 = vsel %vm5364_vm14, %v16977_v62, %v16976_v12  ;;  %v4317_v51 = vadd.s32 4294967295, %v13344_v54  ;;  %v5187_v41 = vadd.s32 3, %v13396_v30  ;;  %v13437_v48 = vrot.slane %v4688_v58, 4 }
 0x45a   :  { %v13423_v29 = vpop.permute.xlu1 %6990  ;;  %v13439_v14 = vpack.c.bf16 %v3703_v0, %v3703_v0  ;;  %v16991_v50 = vpack.c.bf16 %v16990_v38, %v16990_v38  ;;  %v16995_v18 = vpack.c.bf16 %v16994_v45, %v16994_v45  ;;  %v5453_v58 = vrot.slane %v4300_v32, 4 }
 0x45b   :  { %16983 = vst [vmem:[#allocation61_spill] sm:$0xff] %v13423_v29  ;;  %v13431_v43 = vpop.permute.xlu0 %7030  ;;  %16988 = vst [vmem:[#allocation28_spill] sm:$0xff] %v13437_v48  ;;  %v16996_v48 = vld [vmem:[#allocation93_spill] sm:$0xff]  ;;  %v5185_v32 = vadd.s32 3, %v12571_v56  ;;  %vm4337_vm13 = vcmp.ge.s32.totalorder %v4317_v51, 0  ;;  %vm5227_vm9 = vcmp.lt.s32.totalorder %v5187_v41, 32 }
 0x45c   :  { %16987 = vst [vmem:[#allocation114_spill] sm:$0xff] %v13431_v43  ;;  %4234 = vrot.lane.b32.xlu1 %v13202_v46, %s9365_s2  ;;  %16989 = vst [vmem:[#allocation105_spill] sm:$0xff] %v13439_v14  ;;  %v13444_v29 = vmul.bf16 %v5369_v27, %v16991_v50  ;;  %v16992_v43 = vld [vmem:[#allocation30_spill] sm:$0xff]  ;;  %v4925_v61 = vmul.bf16 %v4883_v52, %v16995_v18  ;;  %v16997_v0 = vpack.c.bf16 %v16996_v48, %v16996_v48 }
 0x45d   :  { %v16993_v23 = vpack.c.bf16 %v16992_v43, %v16992_v43  ;;  %4483 = vrot.lane.b32.xlu0 %v13300_v26, %s9366_s27  ;;  %v13460_v27 = vsel %vm3831_vm11, 1.0, %v16771_v37  ;;  %v13463_v43 = vsel %vm4094_vm5, 1.0, %v16771_v37  ;;  %v5186_v48 = vadd.s32 3, %v13344_v54 }
 0x45e   :  { %v4543_v7 = vmul.bf16 %v4500_v5, %v16997_v0  ;;  %v13457_v60 = vpop.permute.xlu1 %7118  ;;  %16999 = vst [vmem:[#allocation30_spill] sm:$0xff] %v13460_v27  ;;  %v13473_v5 = vsel %vm4739_vm8, 1.0, %v16771_v37  ;;  %v4942_v19 = vadd.s32 2, %v12571_v56  ;;  %v17003_v0 = vld [vmem:[#allocation62_spill] sm:$0xff]  ;;  %vm5225_vm11 = vcmp.lt.s32.totalorder %v5185_v32, 32 }
 0x45f   :  { %v4057_v33 = vmul.bf16 %v4014_v2, %v16993_v23  ;;  %16998 = vst [vmem:[#allocation19_spill] sm:$0xff] %v13457_v60  ;;  %v5532_v23 = vrot.slane %v5168_v36, 4  ;;  %v17000_v2 = vld [vmem:[#allocation113_spill] sm:$0xff]  ;;  %v13467_v38 = vpop.permute.xlu0 %6367  ;;  %v4944_v36 = vadd.s32 2, %v13396_v30  ;;  %vm5226_vm5 = vcmp.lt.s32.totalorder %v5186_v48, 32 }
 0x460   :  { %v3783_v52 = vadd.f32 %v17000_v2, %v16648_v15  ;;  %17001 = vst [vmem:[#allocation48_spill] sm:$0xff] %v13467_v38  ;;  %3997 = vrot.lane.b32.xlu1 %v13300_v26, %s9364_s11  ;;  %v3785_v2 = vadd.f32 %v17003_v0, %v16648_v15  ;;  %v13496_v40 = vsel %vm737_vm6, %v4543_v7, %v17005_v6  ;;  %v13509_v15 = vsel %vm4337_vm13, 1.0, %v16771_v37  ;;  %v17010_v7 = vld [vmem:[#allocation120_spill] sm:$0xff]  ;;  %v17022_v48 = vld [vmem:[#allocation69_spill] sm:$0xff] }
 0x461   :  { %4240 = vrot.lane.b32.xlu0 %v13300_v26, %s9365_s2  ;;  %v13486_v18 = vsel %vm737_vm6, %v4925_v61, %v5532_v23  ;;  %17006 = vst [vmem:[#allocation62_spill] sm:$0xff] %v13496_v40  ;;  %v13499_v50 = vsel %vm737_vm6, %v4057_v33, %v5453_v58  ;;  %v13513_v61 = vsel %vm5227_vm9, 1.0, %v16771_v37  ;;  %v17011_v6 = vld [vmem:[#allocation112_spill] sm:$0xff]  ;;  %vm4984_vm8 = vcmp.lt.s32.totalorder %v4944_v36, 32  ;;  %v17018_v40 = vld [vmem:[#allocation63_spill] sm:$0xff] }
 0x462   :  { %17002 = vst [vmem:[#allocation93_spill] sm:$0xff] %v13486_v18  ;;  %v13490_v60 = vpop.permute.xlu1 %7122  ;;  %17007 = vst [vmem:[#allocation64_spill] sm:$0xff] %v13499_v50  ;;  %v13501_v45 = vpack.c.bf16 %v3783_v52, %v3783_v52  ;;  %v5373_v33 = vsel %vm5364_vm14, %v17011_v6, %v17010_v7  ;;  %v4943_v58 = vadd.s32 2, %v13344_v54  ;;  %vm4982_vm3 = vcmp.lt.s32.totalorder %v4942_v19, 32  ;;  %v17017_v50 = vld [vmem:[#allocation124_spill] sm:$0xff]  ;;  %v17027_v6 = vld [vmem:[#allocation142_spill] sm:$0xff] }
 0x463   :  { %17004 = vst [vmem:[#allocation113_spill] sm:$0xff] %v13490_v60  ;;  %v13503_v56 = vpop.permute.xlu0 %6984  ;;  %v4700_v51 = vadd.s32 1, %v13344_v54  ;;  %v4701_v23 = vadd.s32 1, %v13396_v30  ;;  %v1939_v41 = vadd.s32 768, %v12475_v55  ;;  %v13524_v52 = vpack.c.bf16 %v3785_v2, %v3785_v2  ;;  %v17014_v60 = vld [vmem:[#allocation137_spill] sm:$0xff]  ;;  %v17031_v19 = vld [vmem:[#allocation111_spill] sm:$0xff] }
 0x464   :  { %17008 = vst [vmem:[#allocation172_spill] sm:$0xff] %v13501_v45  ;;  %17009 = vst [vmem:[#allocation173_spill] sm:$0xff] %v13503_v56  ;;  %4485 = vrot.lane.b32.xlu1 %v13439_v14, %s9366_s27  ;;  %v13533_v56 = vsel %vm5225_vm11, 1.0, %v16771_v37  ;;  %v17015_v54 = vpack.c.bf16 %v17014_v60, %v17014_v60  ;;  %v5130_v2 = vsel %vm5121_vm15, %v17018_v40, %v17017_v50  ;;  %v13549_v0 = vsel %vm5226_vm5, 1.0, %v16771_v37  ;;  %v17020_v60 = vld [vmem:[#allocation126_spill] sm:$0xff]  ;;  %v17024_v40 = vld [vmem:[#allocation140_spill] sm:$0xff] }
 0x465   :  { %3999 = vrot.lane.b32.xlu0 %v13439_v14, %s9364_s11  ;;  %17012 = vst [vmem:[#allocation174_spill] sm:$0xff] %v13524_v52  ;;  %v13553_v38 = vsel %vm4984_vm8, 1.0, %v16771_v37  ;;  %vm4983_vm13 = vcmp.lt.s32.totalorder %v4943_v58, 32  ;;  %vm4740_vm9 = vcmp.lt.s32.totalorder %v4700_v51, 32  ;;  %vm4741_vm11 = vcmp.lt.s32.totalorder %v4701_v23, 32 }
 0x466   :  { %v13526_v32 = vpop.permute.xlu1 %7076  ;;  %v13538_v7 = vmul.bf16 %v5373_v33, %v17015_v54  ;;  %v17021_v54 = vld [vmem:[#allocation108_spill] sm:$0xff]  ;;  %v3813_v36 = vadd.s32 4294967293, %v17022_v48  ;;  %v13566_v50 = vand.u32 31, %v1939_v41  ;;  %v17025_v8 = vpack.c.bf16 %v17024_v40, %v17024_v40 }
 0x467   :  { %17013 = vst [vmem:[#allocation175_spill] sm:$0xff] %v13526_v32  ;;  %v13543_v18 = vpop.permute.xlu0 %6988  ;;  %v4018_v33 = vsel %vm151_vm2, %v17021_v54, %v17020_v60  ;;  %v13560_v32 = vsel %vm4982_vm3, 1.0, %v16771_v37  ;;  %v4075_v16 = vadd.s32 4294967294, %v13396_v30  ;;  %v17028_v59 = vpack.c.bf16 %v17027_v6, %v17027_v6 }
 0x468   :  { %17016 = vst [vmem:[#allocation137_spill] sm:$0xff] %v13538_v7  ;;  %17019 = vst [vmem:[#allocation176_spill] sm:$0xff] %v13543_v18  ;;  %4242 = vrot.lane.b32.xlu1 %v13439_v14, %s9365_s2  ;;  %v3812_v18 = vadd.s32 4294967293, %v13396_v30  ;;  %v13571_v60 = vmul.bf16 %v5130_v2, %v17025_v8  ;;  %v13593_v8 = vsel %vm4983_vm13, 1.0, %v16771_v37  ;;  %v17030_v7 = vld [vmem:[#allocation7_spill] sm:$0xff]  ;;  %v13602_v6 = vsel %vm4740_vm9, 1.0, %v16771_v37 }
 0x469   :  { %5354 = vrot.lane.b32.xlu0 %v13439_v14, %s9361_s25  ;;  %17023 = vst [vmem:[#allocation177_spill] sm:$0xff] %v13566_v50  ;;  %v13583_v41 = vmul.bf16 %v4018_v33, %v17028_v59  ;;  %v4261_v59 = vsel %vm4252_vm7, %v17031_v19, %v17030_v7  ;;  %v13606_v33 = vsel %vm4741_vm11, 1.0, %v16771_v37  ;;  %vm3833_vm5 = vcmp.ge.s32.totalorder %v3813_v36, 0  ;;  %v17032_v7 = vld [vmem:[#allocation143_spill] sm:$0xff] }
 0x46a   :  { %v13573_v54 = vpop.permute.xlu1 %7080  ;;  %vm3832_vm3 = vcmp.ge.s32.totalorder %v3812_v18, 0  ;;  %v3815_v58 = vadd.s32 4294967293, %v13566_v50  ;;  %v4076_v2 = vadd.s32 4294967294, %v17022_v48  ;;  %v4078_v40 = vadd.s32 4294967294, %v13566_v50 }
 0x46b   :  { %17026 = vst [vmem:[#allocation140_spill] sm:$0xff] %v13573_v54  ;;  %v13585_v26 = vpop.permute.xlu0 %6305  ;;  %vm4095_vm8 = vcmp.ge.s32.totalorder %v4075_v16, 0  ;;  %v1940_v23 = vadd.s32 896, %v12475_v55  ;;  %v17033_v19 = vpack.c.bf16 %v17032_v7, %v17032_v7  ;;  %v4319_v54 = vadd.s32 4294967295, %v17022_v48  ;;  %v17048_v48 = vld [vmem:[#allocation117_spill] sm:$0xff] }
 0x46c   :  { %17029 = vst [vmem:[#allocation142_spill] sm:$0xff] %v13585_v26  ;;  %4005 = vrot.lane.b32.xlu1 %v13501_v45, %s9364_s11  ;;  %v4318_v26 = vadd.s32 4294967295, %v13396_v30  ;;  %vm3835_vm13 = vcmp.ge.s32.totalorder %v3815_v58, 0  ;;  %vm4096_vm9 = vcmp.ge.s32.totalorder %v4076_v2, 0  ;;  %v13651_v7 = vsel %vm4095_vm8, 1.0, %v16771_v37 }
 0x46d   :  { %5111 = vrot.lane.b32.xlu0 %v13439_v14, %s9360_s24  ;;  %v13619_v27 = vmul.bf16 %v4261_v59, %v17033_v19  ;;  %v17035_v19 = vld [vmem:[#allocation131_spill] sm:$0xff]  ;;  %v17036_v59 = vld [vmem:[#allocation21_spill] sm:$0xff]  ;;  %vm4098_vm11 = vcmp.ge.s32.totalorder %v4078_v40, 0  ;;  %v4321_v18 = vadd.s32 4294967295, %v13566_v50  ;;  %v5190_v58 = vadd.s32 3, %v13566_v50 }
 0x46e   :  { %v1845_v51 = vpop.permute.xlu1 %1844  ;;  %v4887_v12 = vsel %vm4878_vm0, %v17036_v59, %v17035_v19  ;;  %vm4338_vm10 = vcmp.ge.s32.totalorder %v4318_v26, 0  ;;  %v17039_v19 = vld [vmem:[#allocation130_spill] sm:$0xff]  ;;  %v13655_v59 = vand.u32 31, %v1940_v23  ;;  %v17047_v23 = vld [vmem:[#allocation23_spill] sm:$0xff] }
 0x46f   :  { %8890 = vst.msk [vmem:[%s16020_s23 + $0x50] sm:$0xff] %vm16410_vm4, %v1845_v51  ;;  %v13625_v53 = vpop.permute.xlu0 %7120  ;;  %v13640_v51 = vsel %vm3832_vm3, 1.0, %v16771_v37  ;;  %v5189_v36 = vadd.s32 3, %v17039_v19  ;;  %vm4339_vm3 = vcmp.ge.s32.totalorder %v4319_v54, 0  ;;  %v13696_v2 = vsel %vm4338_vm10, 1.0, %v16771_v37  ;;  %v17056_v54 = vld [vmem:[#allocation65_spill] sm:$0xff] }
 0x470   :  { %17034 = vst [vmem:[#allocation143_spill] sm:$0xff] %v13625_v53  ;;  %5360 = vrot.lane.b32.xlu1 %v13501_v45, %s9361_s25  ;;  %17037 = vst [vmem:[#allocation178_spill] sm:$0xff] %v13640_v51  ;;  %v13644_v53 = vsel %vm3833_vm5, 1.0, %v16771_v37  ;;  %vm4341_vm5 = vcmp.ge.s32.totalorder %v4321_v18, 0  ;;  %v5191_v40 = vadd.s32 3, %v13655_v59  ;;  %v4948_v21 = vadd.s32 2, %v13655_v59 }
 0x471   :  { %17038 = vst [vmem:[#allocation179_spill] sm:$0xff] %v13644_v53  ;;  %4868 = vrot.lane.b32.xlu0 %v13439_v14, %s9362_s5  ;;  %17040 = vst [vmem:[#allocation180_spill] sm:$0xff] %v13655_v59  ;;  %v17041_v14 = vpack.c.bf16 %v13046_v31, %v13046_v31  ;;  %v13677_v31 = vsel %vm3835_vm13, 1.0, %v16771_v37  ;;  %vm5229_vm8 = vcmp.lt.s32.totalorder %v5189_v36, 32  ;;  %v17050_v51 = vpack.c.bf16 %v13050_v28, %v13050_v28  ;;  %v17059_v36 = vld [vmem:[#allocation118_spill] sm:$0xff] }
 0x472   :  { %v1841_v30 = vpop.permute.xlu1 %1840  ;;  %17043 = vst [vmem:[#allocation182_spill] sm:$0xff] %v13677_v31  ;;  %v17053_v31 = vld [vmem:[#allocation71_spill] sm:$0xff]  ;;  %v13735_v28 = vsel %vm4341_vm5, 1.0, %v16771_v37  ;;  %vm5230_vm10 = vcmp.lt.s32.totalorder %v5190_v58, 32  ;;  %vm5231_vm13 = vcmp.lt.s32.totalorder %v5191_v40, 32  ;;  %v4705_v58 = vadd.s32 1, %v13655_v59 }
 0x473   :  { %v13661_v34 = vmul.bf16 %v4887_v12, %v17041_v14  ;;  %8888 = vst.msk [vmem:[%s16020_s23 + $0x40] sm:$0xff] %vm16410_vm4, %v1841_v30  ;;  %v13667_v16 = vpop.permute.xlu0 %7124  ;;  %v13681_v12 = vsel %vm4096_vm9, 1.0, %v16771_v37  ;;  %v13687_v14 = vsel %vm4098_vm11, 1.0, %v16771_v37  ;;  %v4946_v30 = vadd.s32 2, %v17039_v19  ;;  %17054 = vst [vmem:[#allocation186_spill] sm:$0xff] %v13735_v28  ;;  %v17066_v40 = vld [vmem:[#allocation121_spill] sm:$0xff] }
 0x474   :  { %17042 = vst [vmem:[#allocation181_spill] sm:$0xff] %v13667_v16  ;;  %5117 = vrot.lane.b32.xlu1 %v13501_v45, %s9360_s24  ;;  %17044 = vst [vmem:[#allocation183_spill] sm:$0xff] %v13681_v12  ;;  %v17046_v16 = vld [vmem:[#allocation68_spill] sm:$0xff]  ;;  %v17069_v28 = vrot.slane %v13571_v60, 4 }
 0x475   :  { %17045 = vst [vmem:[#allocation184_spill] sm:$0xff] %v13687_v14  ;;  %v4504_v42 = vsel %vm4495_vm1, %v17047_v23, %v17046_v16  ;;  %7036 = vrot.lane.b32.xlu0 %v17048_v48, %s9363_s9  ;;  %v4947_v23 = vadd.s32 2, %v13566_v50  ;;  %v17052_v16 = vld [vmem:[#allocation53_spill] sm:$0xff]  ;;  %vm4986_vm9 = vcmp.lt.s32.totalorder %v4946_v30, 32  ;;  %v3816_v30 = vadd.s32 4294967293, %v13655_v59  ;;  %v17067_v14 = vld [vmem:[#allocation24_spill] sm:$0xff] }
 0x476   :  { %v1853_v53 = vpop.permute.xlu1 %1852  ;;  %v13718_v9 = vmul.bf16 %v4504_v42, %v17050_v51  ;;  %v5377_v12 = vsel %vm5364_vm14, %v17053_v31, %v17052_v16  ;;  %v13739_v42 = vsel %vm5229_vm8, 1.0, %v16771_v37  ;;  %v17057_v51 = vld [vmem:[#allocation50_spill] sm:$0xff]  ;;  %v4703_v16 = vadd.s32 1, %v17039_v19 }
 0x477   :  { %8894 = vst.msk [vmem:[%s16020_s23 + $0x70] sm:$0xff] %vm16410_vm4, %v1853_v53  ;;  %v13705_v48 = vpop.permute.xlu0 %7078  ;;  %17055 = vst [vmem:[#allocation187_spill] sm:$0xff] %v13739_v42  ;;  %v5134_v53 = vsel %vm5121_vm15, %v17057_v51, %v17056_v54  ;;  %vm4987_vm11 = vcmp.lt.s32.totalorder %v4947_v23, 32  ;;  %v4704_v31 = vadd.s32 1, %v13566_v50  ;;  %v1943_v54 = vadd.s32 1280, %v12475_v55  ;;  %v17072_v42 = vld [vmem:[#allocation51_spill] sm:$0xff] }
 0x478   :  { %17049 = vst [vmem:[#allocation117_spill] sm:$0xff] %v13705_v48  ;;  %4874 = vrot.lane.b32.xlu1 %v13501_v45, %s9362_s5  ;;  %v13724_v48 = vsel %vm4339_vm3, 1.0, %v16771_v37  ;;  %vm4988_vm3 = vcmp.lt.s32.totalorder %v4948_v21, 32  ;;  %v17060_v51 = vpack.c.bf16 %v13086_v25, %v13086_v25  ;;  %v17062_v21 = vpack.c.bf16 %v13095_v63, %v13095_v63 }
 0x479   :  { %17051 = vst [vmem:[#allocation185_spill] sm:$0xff] %v13724_v48  ;;  %4491 = vrot.lane.b32.xlu0 %v13501_v45, %s9366_s27  ;;  %v13775_v25 = vsel %vm5230_vm10, 1.0, %v16771_v37  ;;  %v13788_v63 = vsel %vm4987_vm11, 1.0, %v16771_v37  ;;  %vm4743_vm5 = vcmp.lt.s32.totalorder %v4703_v16, 32  ;;  %vm4744_vm8 = vcmp.lt.s32.totalorder %v4704_v31, 32  ;;  %v17071_v48 = vld [vmem:[#allocation18_spill] sm:$0xff] }
 0x47a   :  { %v1849_v26 = vpop.permute.xlu1 %1848  ;;  %v13758_v19 = vmul.bf16 %v5377_v12, %v17060_v51  ;;  %v13769_v23 = vmul.bf16 %v5134_v53, %v17062_v21  ;;  %v13779_v12 = vsel %vm5231_vm13, 1.0, %v16771_v37  ;;  %v13783_v51 = vsel %vm4986_vm9, 1.0, %v16771_v37  ;;  %17064 = vst [vmem:[#allocation190_spill] sm:$0xff] %v13788_v63  ;;  %v17076_v63 = vld [vmem:[#allocation31_spill] sm:$0xff]  ;;  %v17081_v31 = vld [vmem:[#allocation141_spill] sm:$0xff] }
 0x47b   :  { %8892 = vst.msk [vmem:[%s16020_s23 + $0x60] sm:$0xff] %vm16410_vm4, %v1849_v26  ;;  %v13749_v18 = vpop.permute.xlu0 %7082  ;;  %17063 = vst [vmem:[#allocation189_spill] sm:$0xff] %v13783_v51  ;;  %v13791_v53 = vsel %vm4988_vm3, 1.0, %v16771_v37  ;;  %v13798_v50 = vand.u32 31, %v1943_v54  ;;  %v13814_v54 = vsel %vm737_vm6, %v13661_v34, %v17069_v28  ;;  %vm4745_vm10 = vcmp.lt.s32.totalorder %v4705_v58, 32  ;;  %v17077_v51 = vld [vmem:[#allocation138_spill] sm:$0xff] }
 0x47c   :  { %17058 = vst [vmem:[#allocation188_spill] sm:$0xff] %v13749_v18  ;;  %7034 = vrot.lane.b32.xlu1 %v17059_v36, %s9363_s9  ;;  %17061 = vst [vmem:[#allocation118_spill] sm:$0xff] %v13758_v19  ;;  %v3817_v36 = vadd.s32 4294967293, %v17067_v14  ;;  %v5540_v19 = vrot.slane %v13769_v23, 4  ;;  %v13834_v28 = vsel %vm4744_vm8, 1.0, %v16771_v37  ;;  %v4079_v23 = vadd.s32 4294967294, %v13655_v59 }
 0x47d   :  { %4248 = vrot.lane.b32.xlu0 %v13501_v45, %s9365_s2  ;;  %17065 = vst [vmem:[#allocation191_spill] sm:$0xff] %v13791_v53  ;;  %17068 = vst [vmem:[#allocation121_spill] sm:$0xff] %v13798_v50  ;;  %vm3836_vm13 = vcmp.ge.s32.totalorder %v3816_v30, 0  ;;  %v3819_v16 = vadd.s32 4294967293, %v13798_v50  ;;  %v4080_v45 = vadd.s32 4294967294, %v17067_v14  ;;  %v17073_v34 = vpack.c.bf16 %v13099_v47, %v13099_v47 }
 0x47e   :  { %v13785_v26 = vpop.permute.xlu1 %3973  ;;  %17070 = vst [vmem:[#allocation192_spill] sm:$0xff] %v13814_v54  ;;  %vm3837_vm9 = vcmp.ge.s32.totalorder %v3817_v36, 0  ;;  %v17074_v54 = vld [vmem:[#allocation119_spill] sm:$0xff]  ;;  %v4508_v47 = vsel %vm4495_vm1, %v17077_v51, %v17076_v63  ;;  %v13880_v58 = vsel %vm3836_vm13, 1.0, %v16771_v37  ;;  %vm4099_vm11 = vcmp.ge.s32.totalorder %v4079_v23, 0  ;;  %v17084_v36 = vld [vmem:[#allocation133_spill] sm:$0xff] }
 0x47f   :  { %v1847_v21 = vpop.permute.xlu0 %1846  ;;  %v13854_v53 = vsel %vm737_vm6, %v13718_v9, %v17074_v54  ;;  %v17080_v54 = vld [vmem:[#allocation92_spill] sm:$0xff]  ;;  %vm3839_vm3 = vcmp.ge.s32.totalorder %v3819_v16, 0  ;;  %v17083_v30 = vpack.c.bf16 %v13138_v35, %v13138_v35  ;;  %v17085_v16 = vpack.c.bf16 %v13141_v22, %v13141_v22  ;;  %v17090_v35 = vld [vmem:[#allocation81_spill] sm:$0xff] }
 0x480   :  { %7038 = vrot.lane.b32.xlu1 %v17066_v40, %s9363_s9  ;;  %8891 = vst.msk [vmem:[%s16020_s23 + $0x58] sm:$0xff] %vm16410_vm4, %v1847_v21  ;;  %v4891_v21 = vsel %vm4878_vm0, %v17072_v42, %v17071_v48  ;;  %v13826_v40 = vsel %vm4743_vm5, 1.0, %v16771_v37  ;;  %v4082_v42 = vadd.s32 4294967294, %v13798_v50  ;;  %17075 = vst [vmem:[#allocation119_spill] sm:$0xff] %v13854_v53  ;;  %v4265_v63 = vsel %vm4252_vm7, %v17081_v31, %v17080_v54 }
 0x481   :  { %4007 = vrot.lane.b32.xlu0 %v13524_v52, %s9364_s11  ;;  %v4933_v48 = vmul.bf16 %v4891_v21, %v17073_v34  ;;  %v17078_v34 = vrot.slane %v13619_v27, 4  ;;  %v13884_v53 = vsel %vm3837_vm9, 1.0, %v16771_v37  ;;  %vm4100_vm5 = vcmp.ge.s32.totalorder %v4080_v45, 0 }
 0x482   :  { %v13828_v60 = vpop.permute.xlu1 %4216  ;;  %17082 = vst [vmem:[#allocation194_spill] sm:$0xff] %v13884_v53  ;;  %v4551_v21 = vmul.bf16 %v4508_v47, %v17083_v30  ;;  %vm4102_vm8 = vcmp.ge.s32.totalorder %v4082_v42, 0  ;;  %v4707_v54 = vadd.s32 1, %v17084_v36  ;;  %v5193_v31 = vadd.s32 3, %v17084_v36  ;;  %v17089_v47 = vld [vmem:[#allocation34_spill] sm:$0xff] }
 0x483   :  { %v1843_v18 = vpop.permute.xlu0 %1842  ;;  %v13871_v9 = vsel %vm737_vm6, %v13583_v41, %v17078_v34  ;;  %v4322_v41 = vadd.s32 4294967295, %v13655_v59  ;;  %v4323_v34 = vadd.s32 4294967295, %v17067_v14  ;;  %v13902_v59 = vmul.bf16 %v4265_v63, %v17085_v16  ;;  %v17094_v42 = vld [vmem:[#allocation122_spill] sm:$0xff] }
 0x484   :  { %5119 = vrot.lane.b32.xlu1 %v13524_v52, %s9360_s24  ;;  %8889 = vst.msk [vmem:[%s16020_s23 + $0x48] sm:$0xff] %vm16410_vm4, %v1843_v18  ;;  %v13863_v18 = vsel %vm4745_vm10, 1.0, %v16771_v37  ;;  %17079 = vst [vmem:[#allocation193_spill] sm:$0xff] %v13871_v9  ;;  %v13915_v14 = vsel %vm3839_vm3, 1.0, %v16771_v37  ;;  %v13919_v22 = vsel %vm4099_vm11, 1.0, %v16771_v37  ;;  %v13923_v63 = vsel %vm4100_vm5, 1.0, %v16771_v37 }
 0x485   :  { %5362 = vrot.lane.b32.xlu0 %v13524_v52, %s9361_s25  ;;  %17086 = vst [vmem:[#allocation195_spill] sm:$0xff] %v13915_v14  ;;  %17087 = vst [vmem:[#allocation196_spill] sm:$0xff] %v13923_v63  ;;  %v13926_v16 = vsel %vm737_vm6, %v4933_v48, %v5540_v19  ;;  %v13935_v23 = vsel %vm4102_vm8, 1.0, %v16771_v37  ;;  %vm4342_vm10 = vcmp.ge.s32.totalorder %v4322_v41, 0  ;;  %vm4343_vm13 = vcmp.ge.s32.totalorder %v4323_v34, 0  ;;  %v17092_v19 = vld [vmem:[#allocation70_spill] sm:$0xff] }
 0x486   :  { %v13876_v51 = vpop.permute.xlu1 %4842  ;;  %17088 = vst [vmem:[#allocation197_spill] sm:$0xff] %v13926_v16  ;;  %17091 = vst [vmem:[#allocation198_spill] sm:$0xff] %v13935_v23  ;;  %vm4747_vm9 = vcmp.lt.s32.totalorder %v4707_v54, 32  ;;  %vm5233_vm11 = vcmp.lt.s32.totalorder %v5193_v31, 32  ;;  %v1944_v45 = vadd.s32 1408, %v12475_v55  ;;  %v13944_v48 = vsel %vm737_vm6, %v4551_v21, %v17092_v19  ;;  %v17102_v63 = vld [vmem:[#allocation41_spill] sm:$0xff] }
 0x487   :  { %v1855_v27 = vpop.permute.xlu0 %1854  ;;  %17093 = vst [vmem:[#allocation70_spill] sm:$0xff] %v13944_v48  ;;  %v13966_v41 = vsel %vm4343_vm13, 1.0, %v16771_v37  ;;  %v17098_v19 = vpack.c.bf16 %v13513_v61, %v13513_v61  ;;  %v17100_v54 = vpack.c.bf16 %v13533_v56, %v13533_v56  ;;  %v17101_v31 = vpack.c.bf16 %v13549_v0, %v13549_v0  ;;  %v17137_v56 = vld [vmem:[#allocation165_spill] sm:$0xff] }
 0x488   :  { %4493 = vrot.lane.b32.xlu1 %v13524_v52, %s9366_s27  ;;  %8895 = vst.msk [vmem:[%s16020_s23 + $0x78] sm:$0xff] %vm16410_vm4, %v1855_v27  ;;  %v4022_v27 = vsel %vm151_vm2, %v17090_v35, %v17089_v47  ;;  %v17095_v47 = vld [vmem:[#allocation87_spill] sm:$0xff]  ;;  %v4950_v0 = vadd.s32 2, %v17084_v36  ;;  %v17141_v36 = vld [vmem:[#allocation66_spill] sm:$0xff] }
 0x489   :  { %4876 = vrot.lane.b32.xlu0 %v13524_v52, %s9362_s5  ;;  %v17096_v35 = vpack.c.bf16 %v17095_v47, %v17095_v47  ;;  %v13978_v47 = vsel %vm5233_vm11, 1.0, %v16771_v37 }
 0x48a   :  { %v13912_v30 = vpop.permute.xlu1 %4459  ;;  %vm4990_vm5 = vcmp.lt.s32.totalorder %v4950_v0, 32 }
 0x48b   :  { %v1851_v9 = vpop.permute.xlu0 %1850  ;;  %v13958_v16 = vmul.bf16 %v4022_v27, %v17096_v35  ;;  %v13974_v35 = vsel %vm4747_vm9, 1.0, %v16771_v37  ;;  %v4325_v27 = vadd.s32 4294967295, %v13798_v50 }
 0x48c   :  { %4250 = vrot.lane.b32.xlu1 %v13524_v52, %s9365_s2  ;;  %8893 = vst.msk [vmem:[%s16020_s23 + $0x68] sm:$0xff] %vm16410_vm4, %v1851_v9  ;;  %v17097_v9 = vld [vmem:[#allocation40_spill] sm:$0xff] }
 0x48d   :  { %7040 = vrot.lane.b32.xlu0 %v17094_v42, %s9363_s9  ;;  %v13963_v42 = vsel %vm4342_vm10, 1.0, %v16771_v37  ;;  %vm4345_vm3 = vcmp.ge.s32.totalorder %v4325_v27, 0 }
 0x48e   :  { %v5331_v21 = vpop.permute.xlu1 %5330 }
 0x48f   :  { %v5368_v34 = vsel %vm5364_vm14, %v5331_v21, %v16977_v62  ;;  %v5329_v52 = vpop.permute.xlu0 %5328 }
 0x490   :  { %6992 = vrot.lane.b32.xlu1 %v17097_v9, %s9363_s9  ;;  %v5410_v48 = vmul.bf16 %v5368_v34, %v17098_v19  ;;  %v5366_v62 = vsel %vm5364_vm14, %v12360_v44, %v5329_v52  ;;  %v5367_v14 = vsel %vm5364_vm14, %v5329_v52, %v5331_v21  ;;  %v13987_v9 = vand.u32 31, %v1944_v45  ;;  %v17103_v21 = vld [vmem:[#allocation42_spill] sm:$0xff] }
 0x491   :  { %v5408_v23 = vmul.bf16 %v5366_v62, %v17100_v54  ;;  %v5409_v53 = vmul.bf16 %v5367_v14, %v17101_v31  ;;  %6994 = vrot.lane.b32.xlu0 %v17102_v63, %s9363_s9  ;;  %v5194_v14 = vadd.s32 3, %v13798_v50  ;;  %v4880_v63 = vsel %vm4878_vm0, %v12379_v20, %v13876_v51 }
 0x492   :  { %17099 = vst [vmem:[#allocation122_spill] sm:$0xff] %v13987_v9  ;;  %9128 = vmatprep.subr.msk.bf16.mxu1 %vm737_vm6, %v5410_v48  ;;  %v5088_v52 = vpop.permute.xlu1 %5087  ;;  %v17104_v62 = vpack.c.bf16 %v13553_v38, %v13553_v38  ;;  %v17107_v38 = vld [vmem:[#allocation45_spill] sm:$0xff] }
 0x493   :  { %v5125_v34 = vsel %vm5121_vm15, %v5088_v52, %v12425_v24  ;;  %9126 = vmatprep.subr.msk.bf16.mxu0 %vm737_vm6, %v5408_v23  ;;  %v5086_v48 = vpop.permute.xlu0 %5085  ;;  %v5804_v19 = vsel %vm737_vm6, %v5409_v53, 0  ;;  %v5195_v24 = vadd.s32 3, %v13987_v9  ;;  %v17105_v23 = vpack.c.bf16 %v13560_v32, %v13560_v32 }
 0x494   :  { %6996 = vrot.lane.b32.xlu1 %v17103_v21, %s9363_s9  ;;  %v5167_v54 = vmul.bf16 %v5125_v34, %v17104_v62  ;;  %v5123_v31 = vsel %vm5121_vm15, %v12375_v39, %v5086_v48  ;;  %v5124_v20 = vsel %vm5121_vm15, %v5086_v48, %v5088_v52  ;;  %5866 = vmatpush1.bf16.msra.mxu0 %v13370_v57  ;;  %v3820_v39 = vadd.s32 4294967293, %v13987_v9  ;;  %v17108_v34 = vld [vmem:[#allocation26_spill] sm:$0xff] }
 0x495   :  { %5907 = vmatpush1.bf16.msra.mxu1 %v5804_v19  ;;  %v5165_v21 = vmul.bf16 %v5123_v31, %v17105_v23  ;;  %v17106_v53 = vpack.c.bf16 %v13593_v8, %v13593_v8  ;;  %6998 = vrot.lane.b32.xlu0 %v17107_v38, %s9363_s9  ;;  %v3821_v52 = vadd.s32 4294967293, %v17108_v34  ;;  %v17109_v57 = vpack.c.bf16 %v13473_v5, %v13473_v5 }
 0x496   :  { %v4845_v19 = vpop.permute.xlu1 %4844  ;;  %v14039_v62 = vsel %vm4345_vm3, 1.0, %v16771_v37  ;;  %vm5234_vm8 = vcmp.lt.s32.totalorder %v5194_v14, 32  ;;  %v5531_v5 = vrot.slane %v5167_v54, 4  ;;  %vm5235_vm10 = vcmp.lt.s32.totalorder %v5195_v24, 32 }
 0x497   :  { %v5166_v27 = vmul.bf16 %v5124_v20, %v17106_v53  ;;  %v4922_v48 = vmul.bf16 %v4880_v63, %v17109_v57  ;;  %v5529_v32 = vrot.slane %v5165_v21, 4  ;;  %v4881_v31 = vsel %vm4878_vm0, %v13876_v51, %v4845_v19  ;;  %v14045_v23 = vpop.permute.xlu0 %3975  ;;  %v17110_v53 = vld [vmem:[#allocation125_spill] sm:$0xff]  ;;  %v17113_v51 = vld [vmem:[#allocation123_spill] sm:$0xff] }
 0x498   :  { %v4882_v20 = vsel %vm4878_vm0, %v4845_v19, %v16981_v11  ;;  %7126 = vrot.lane.b32.xlu1 %v17110_v53, %s9363_s9  ;;  %v17111_v63 = vpack.c.bf16 %v13602_v6, %v13602_v6  ;;  %v17112_v21 = vpack.c.bf16 %v13606_v33, %v13606_v33  ;;  %vm3840_vm13 = vcmp.ge.s32.totalorder %v3820_v39, 0  ;;  %v17115_v6 = vld [vmem:[#allocation149_spill] sm:$0xff]  ;;  %v17118_v53 = vld [vmem:[#allocation134_spill] sm:$0xff] }
 0x499   :  { %v5530_v8 = vrot.slane %v5166_v27, 4  ;;  %7128 = vrot.lane.b32.xlu0 %v17113_v51, %s9363_s9  ;;  %v5714_v11 = vsel %vm737_vm6, %v4922_v48, %v5529_v32  ;;  %vm3841_vm9 = vcmp.ge.s32.totalorder %v3821_v52, 0  ;;  %v17114_v57 = vrot.slane %v13902_v59, 4  ;;  %v17116_v19 = vld [vmem:[#allocation77_spill] sm:$0xff]  ;;  %v17121_v51 = vld [vmem:[#allocation127_spill] sm:$0xff] }
 0x49a   :  { %v4923_v38 = vmul.bf16 %v4881_v31, %v17111_v63  ;;  %v4924_v27 = vmul.bf16 %v4882_v20, %v17112_v21  ;;  %v14067_v31 = vsel %vm6556_vm12, %v17116_v19, %v17115_v6  ;;  %5867 = vmatprep.subr.bf16.mxu0 %v5714_v11  ;;  %v14069_v33 = vpop.permute.xlu1 %3981  ;;  %v14075_v32 = vsel %vm4990_vm5, 1.0, %v16771_v37  ;;  %v17117_v59 = vld [vmem:[#allocation89_spill] sm:$0xff]  ;;  %v17133_v21 = vld [vmem:[#allocation75_spill] sm:$0xff] }
 0x49b   :  { %v14062_v54 = vsel %vm737_vm6, %v13958_v16, %v17114_v57  ;;  %v4026_v16 = vsel %vm151_vm2, %v17118_v53, %v17117_v59  ;;  %v14080_v63 = vpop.permute.xlu0 %4218  ;;  %5868 = vmatpush1.bf16.msra.mxu0 %v13404_v10  ;;  %v14091_v0 = vsel %vm5235_vm10, 1.0, %v16771_v37  ;;  %v14104_v14 = vsel %vm3840_vm13, 1.0, %v16771_v37  ;;  %v17145_v59 = vld [vmem:[#allocation30_spill] sm:$0xff]  ;;  %v17147_v53 = vld [vmem:[#allocation187_spill] sm:$0xff] }
 0x49c   :  { %v5722_v20 = vsel %vm737_vm6, %v4924_v27, %v5531_v5  ;;  %v5718_v48 = vsel %vm737_vm6, %v4923_v38, %v5530_v8  ;;  %v14087_v5 = vsel %vm5234_vm8, 1.0, %v16771_v37  ;;  %v4254_v8 = vsel %vm4252_vm7, %v12367_v3, %v13828_v60  ;;  %v17119_v38 = vld [vmem:[#allocation128_spill] sm:$0xff]  ;;  %5869 = vmatprep.subr.bf16.mxu0 %v13408_v13  ;;  %v17138_v13 = vld [vmem:[#allocation166_spill] sm:$0xff] }
 0x49d   :  { %5908 = vmatprep.subr.bf16.mxu1 %v5722_v20  ;;  %v4255_v10 = vsel %vm4252_vm7, %v13828_v60, %v14080_v63  ;;  %7130 = vrot.lane.b32.xlu1 %v17119_v38, %s9363_s9  ;;  %v14108_v24 = vsel %vm3841_vm9, 1.0, %v16771_v37  ;;  %v4497_v3 = vsel %vm4495_vm1, %v12397_v1, %v13912_v30  ;;  %v17120_v60 = vpack.c.bf16 %v13651_v7, %v13651_v7 }
 0x49e   :  { %7132 = vrot.lane.b32.xlu0 %v17121_v51, %s9363_s9  ;;  %5909 = vmatpush1.bf16.msra.mxu1 %v5718_v48  ;;  %v17122_v39 = vmul.bf16 1.0|1.0, %v13202_v46  ;;  %v17123_v11 = vpack.c.bf16 %v13212_v17, %v13212_v17  ;;  %v14129_v1 = vpop.permute.xlu1 %4224  ;;  %v4951_v20 = vadd.s32 2, %v13798_v50  ;;  %v17125_v46 = vpack.c.bf16 %v13463_v43, %v13463_v43  ;;  %v17131_v17 = vld [vmem:[#allocation72_spill] sm:$0xff] }
 0x49f   :  { %v4298_v27 = vmul.bf16 %v4255_v10, %v17120_v60  ;;  %v14139_v10 = vpop.permute.xlu0 %4461  ;;  %5870 = vmatpush1.bf16.msra.mxu0 %v13374_v49  ;;  %v4952_v38 = vadd.s32 2, %v13987_v9  ;;  %v17126_v60 = vpack.c.bf16 %v13509_v15, %v13509_v15  ;;  %v4012_v43 = vsel %vm151_vm2, %v13785_v26, %v14045_v23 }
 0x4a0   :  { %v14122_v52 = vrot.slane %v17122_v39, 4  ;;  %v14127_v57 = vmul.bf16 %v4026_v16, %v17123_v11  ;;  %v4297_v48 = vmul.bf16 %v4254_v8, %v17125_v46  ;;  %v4498_v49 = vsel %vm4495_vm1, %v13912_v30, %v14139_v10  ;;  %v17127_v8 = vld [vmem:[#allocation129_spill] sm:$0xff]  ;;  %5871 = vmatprep.subr.bf16.mxu0 %v13390_v4  ;;  %v17128_v11 = vld [vmem:[#allocation90_spill] sm:$0xff]  ;;  %v17129_v46 = vld [vmem:[#allocation36_spill] sm:$0xff] }
 0x4a1   :  { %v4540_v51 = vmul.bf16 %v4497_v3, %v17126_v60  ;;  %7084 = vrot.lane.b32.xlu1 %v17127_v8, %s9363_s9  ;;  %v5810_v39 = vsel %vm737_vm6, %v13444_v29, 0  ;;  %v4512_v15 = vsel %vm4495_vm1, %v17129_v46, %v17128_v11  ;;  %v5451_v3 = vrot.slane %v4298_v27, 4  ;;  %v17132_v8 = vld [vmem:[#allocation12_spill] sm:$0xff] }
 0x4a2   :  { %17124 = vst [vmem:[#allocation87_spill] sm:$0xff] %v14127_v57  ;;  %v17130_v60 = vpack.c.bf16 %v13696_v2, %v13696_v2  ;;  %7086 = vrot.lane.b32.xlu0 %v17131_v17, %s9363_s9  ;;  %v4326_v30 = vadd.s32 4294967295, %v13987_v9  ;;  %v5381_v4 = vsel %vm5364_vm14, %v17133_v21, %v17132_v8  ;;  %v17134_v29 = vld [vmem:[#allocation104_spill] sm:$0xff]  ;;  %v14176_v19 = vpop.permute.xlu1 %4467  ;;  %vm4991_vm12 = vcmp.lt.s32.totalorder %v4951_v20, 32 }
 0x4a3   :  { %v4011_v44 = vsel %vm151_vm2, %v17134_v29, %v13785_v26  ;;  %v4327_v27 = vadd.s32 4294967295, %v17108_v34  ;;  %v5450_v2 = vrot.slane %v4297_v48, 4  ;;  %v5337_v7 = vpop.permute.xlu0 %5336  ;;  %5872 = vmatpush1.bf16.msra.mxu0 %v17137_v56  ;;  %v14188_v26 = vld [vmem:[%s16021_s13] sm:$0xf]  ;;  %vm4992_vm11 = vcmp.lt.s32.totalorder %v4952_v38, 32  ;;  %v17143_v56 = vld [vmem:[#allocation164_spill] sm:$0xff] }
 0x4a4   :  { %v4541_v16 = vmul.bf16 %v4498_v49, %v17130_v60  ;;  %v17135_v49 = vld [vmem:[#allocation178_spill] sm:$0xff]  ;;  %v17139_v29 = vld [vmem:[#allocation153_spill] sm:$0xff]  ;;  %v17146_v11 = vpack.c.bf16 %v17145_v59, %v17145_v59  ;;  %v17151_v46 = vld [vmem:[#allocation100_spill] sm:$0xff]  ;;  %vm17153_vm3 = vcmask 457728   ;;  %vm4346_vm5 = vcmp.ge.s32.totalorder %v4326_v30, 0 }
 0x4a5   :  { %v17136_v60 = vpack.c.bf16 %v17135_v49, %v17135_v49  ;;  %v17140_v61 = vpack.c.bf16 %v17139_v29, %v17139_v29  ;;  %v17142_v49 = vld [vmem:[#allocation76_spill] sm:$0xff]  ;;  %v17149_v29 = vld [vmem:[#allocation74_spill] sm:$0xff]  ;;  %vm4347_vm8 = vcmp.ge.s32.totalorder %v4327_v27, 0  ;;  %v17155_v20 = vpack.c.bf16 %v13775_v25, %v13775_v25  ;;  %vm17176_vm10 = vmmov %vm17153_vm3 }
 0x4a6   :  { %v5642_v45 = vsel %vm737_vm6, %v4541_v16, %v17138_v13  ;;  %7088 = vrot.lane.b32.xlu1 %v17142_v49, %s9363_s9  ;;  %v5638_v13 = vsel %vm737_vm6, %v4540_v51, %v17143_v56  ;;  %v17144_v16 = vld [vmem:[#allocation105_spill] sm:$0xff]  ;;  %v4054_v57 = vmul.bf16 %v4011_v44, %v17146_v11  ;;  %7090 = vrot.lane.b32.xlu0 %v17149_v29, %s9363_s9  ;;  %v5339_v59 = vpop.permute.xlu1 %5338  ;;  %v14221_v44 = vsel %vm4991_vm12, 1.0, %v16771_v37  ;;  %v17162_v25 = vld [vmem:[#allocation102_spill] sm:$0xff] }
 0x4a7   :  { %v4055_v17 = vmul.bf16 %v4012_v43, %v17136_v60  ;;  %v14193_v48 = vmul.bf16 %v4512_v15, %v17140_v61  ;;  %v5370_v43 = vsel %vm5364_vm14, %v17141_v36, %v5337_v7  ;;  %5910 = vmatprep.subr.bf16.mxu1 %v5642_v45  ;;  %v4693_v60 = vmul.bf16 1.0|1.0, %v17144_v16  ;;  %9127 = vmatmul.mubr.msk.bf16.vlgmr.msra.gmra.mxu0 %vm17153_vm3, %v14188_v26  ;;  %v17157_v16 = vld [vmem:[#allocation106_spill] sm:$0xff]  ;;  %v17174_v45 = vld [vmem:[#allocation60_spill] sm:$0xff] }
 0x4a8   :  { %v17148_v61 = vpack.c.bf16 %v17147_v53, %v17147_v53  ;;  %5911 = vmatpush1.bf16.msra.mxu1 %v5638_v13  ;;  %v17152_v51 = vpack.c.bf16 %v17151_v46, %v17151_v46  ;;  %v14225_v53 = vsel %vm4992_vm11, 1.0, %v16771_v37  ;;  %v5371_v11 = vsel %vm5364_vm14, %v5337_v7, %v5339_v59  ;;  %v17170_v49 = vld [vmem:[#allocation190_spill] sm:$0xff] }
 0x4a9   :  { %v5562_v36 = vsel %vm737_vm6, %v4055_v17, %v5451_v3  ;;  %v17154_v3 = vld [vmem:[#allocation112_spill] sm:$0xff]  ;;  %v5558_v17 = vsel %vm737_vm6, %v4054_v57, %v5450_v2  ;;  %v5413_v38 = vmul.bf16 %v5371_v11, %v17155_v20  ;;  %v17156_v7 = vpack.c.bf16 %v13779_v12, %v13779_v12  ;;  %v17160_v2 = vld [vmem:[#allocation189_spill] sm:$0xff] }
 0x4aa   :  { %v5412_v15 = vmul.bf16 %v5370_v43, %v17148_v61  ;;  %v14215_v56 = vmul.bf16 %v5381_v4, %v17152_v51  ;;  %5912 = vmatprep.subr.bf16.mxu1 %v5562_v36  ;;  %v5372_v46 = vsel %vm5364_vm14, %v5339_v59, %v17154_v3  ;;  %v5094_v4 = vpop.permute.xlu0 %5093  ;;  %v14232_v43 = vld [vmem:[#allocation2] sm:$0xff]  ;;  %v14245_v57 = vrot.slane %v4693_v60, 4  ;;  %7044 = vrot.lane.b32.xlu0 %v17162_v25, %s9363_s9  ;;  %v17164_v60 = vld [vmem:[#allocation155_spill] sm:$0xff] }
 0x4ab   :  { %5971 = vmatprep.mubr.bf16.mxu0 %v14232_v43  ;;  %v5414_v13 = vmul.bf16 %v5372_v46, %v17156_v7  ;;  %v5127_v61 = vsel %vm5121_vm15, %v17157_v16, %v5094_v4  ;;  %v17161_v29 = vpack.c.bf16 %v17160_v2, %v17160_v2  ;;  %v17163_v51 = vld [vmem:[#allocation137_spill] sm:$0xff]  ;;  %v5096_v46 = vpop.permute.xlu1 %5095  ;;  %v14270_v20 = vsel %vm4347_vm8, 1.0, %v16771_v37  ;;  %v17168_v2 = vld [vmem:[#allocation39_spill] sm:$0xff]  ;;  %vm17231_vm8 = vmmov %vm17176_vm10 }
 0x4ac   :  { %9130 = vmatprep.subr.msk.bf16.mxu0 %vm737_vm6, %v5412_v15  ;;  %v17158_v15 = vld [vmem:[#allocation29_spill] sm:$0xff]  ;;  %17159 = vst [vmem:[#allocation40_spill] sm:$0xff] %v14245_v57  ;;  %5913 = vmatpush1.bf16.msra.mxu1 %v5558_v17  ;;  %v14254_v12 = vsel %vm737_vm6, %v17163_v51, 0  ;;  %v14266_v17 = vsel %vm4346_vm5, 1.0, %v16771_v37  ;;  %v4708_v7 = vadd.s32 1, %v13798_v50  ;;  %v17169_v25 = vld [vmem:[#allocation63_spill] sm:$0xff]  ;;  %v17171_v27 = vpack.c.bf16 %v17170_v49, %v17170_v49 }
 0x4ad   :  { %7042 = vrot.lane.b32.xlu1 %v17158_v15, %s9363_s9  ;;  %5948 = vmatpush1.bf16.msra.mxu0 %v5810_v39  ;;  %v5169_v36 = vmul.bf16 %v5127_v61, %v17161_v29  ;;  %v17165_v11 = vld [vmem:[#allocation85_spill] sm:$0xff]  ;;  %v4256_v29 = vsel %vm4252_vm7, %v14080_v63, %v17168_v2  ;;  %v5129_v30 = vsel %vm5121_vm15, %v5096_v46, %v17169_v25  ;;  %v17172_v59 = vld [vmem:[#allocation191_spill] sm:$0xff]  ;;  %v5816_v63 = vsel %vm737_vm6, %v5413_v38, 0 }
 0x4ae   :  { %v4269_v3 = vsel %vm4252_vm7, %v17165_v11, %v17164_v60  ;;  %9132 = vmatprep.subr.msk.bf16.mxu1 %vm737_vm6, %v5414_v13  ;;  %v17166_v16 = vld [vmem:[#allocation157_spill] sm:$0xff]  ;;  %v5128_v13 = vsel %vm5121_vm15, %v5094_v4, %v5096_v46  ;;  %v4851_v51 = vpop.permute.xlu0 %4850  ;;  %v17173_v50 = vpack.c.bf16 %v17172_v59, %v17172_v59  ;;  %v17175_v11 = vld [vmem:[#allocation16_spill] sm:$0xff]  ;;  %v17177_v4 = vld [vmem:[#allocation154_spill] sm:$0xff]  ;;  %vm4748_vm13 = vcmp.lt.s32.totalorder %v4708_v7, 32 }
 0x4af   :  { %v17167_v61 = vld [vmem:[#allocation145_spill] sm:$0xff]  ;;  %v5170_v39 = vmul.bf16 %v5128_v13, %v17171_v27  ;;  %v4884_v57 = vsel %vm4878_vm0, %v17174_v45, %v4851_v51  ;;  %9129 = vmatmul.mubr.msk.bf16.vlgmr.msra.gmra.mxu1 %vm17176_vm10, %v14188_v26  ;;  %v17178_v46 = vpack.c.bf16 %v17177_v4, %v17177_v4  ;;  %v5533_v2 = vrot.slane %v5169_v36, 4  ;;  %v17181_v45 = vld [vmem:[#allocation132_spill] sm:$0xff]  ;;  %v17182_v13 = vld [vmem:[#allocation103_spill] sm:$0xff]  ;;  %v4853_v36 = vpop.permute.xlu1 %4852 }
 0x4b0   :  { %v5138_v15 = vsel %vm5121_vm15, %v17167_v61, %v17166_v16  ;;  %v5171_v60 = vmul.bf16 %v5129_v30, %v17173_v50  ;;  %v17180_v50 = vpack.c.bf16 %v13826_v40, %v13826_v40  ;;  %7048 = vrot.lane.b32.xlu0 %v17181_v45, %s9363_s9  ;;  %5989 = vmatpush1.bf16.msra.mxu1 %v5816_v63  ;;  %v17184_v30 = vld [vmem:[#allocation38_spill] sm:$0xff]  ;;  %v17185_v40 = vld [vmem:[#allocation27_spill] sm:$0xff]  ;;  %v17200_v7 = vld [vmem:[#allocation20_spill] sm:$0xff]  ;;  %vm17234_vm10 = vcmask 1014784  }
 0x4b1   :  { %7046 = vrot.lane.b32.xlu1 %v17175_v11, %s9363_s9  ;;  %v14298_v49 = vmul.bf16 %v4269_v3, %v17178_v46  ;;  %v4709_v11 = vadd.s32 1, %v13987_v9  ;;  %v17183_v25 = vpack.c.bf16 %v17182_v13, %v17182_v13  ;;  %v4499_v3 = vsel %vm4495_vm1, %v14139_v10, %v17184_v30  ;;  %6012 = vmatprep.mubr.bf16.mxu1 %v14232_v43  ;;  %v17186_v27 = vld [vmem:[#allocation183_spill] sm:$0xff] }
 0x4b2   :  { %v4926_v59 = vmul.bf16 %v4884_v57, %v17180_v50  ;;  %v5197_v57 = vadd.s32 3, %v17185_v40  ;;  %v17187_v63 = vpack.c.bf16 %v17186_v27, %v17186_v27  ;;  %v4885_v46 = vsel %vm4878_vm0, %v4851_v51, %v4853_v36  ;;  %v17188_v50 = vld [vmem:[#allocation21_spill] sm:$0xff]  ;;  %v14322_v45 = vpop.permute.xlu0 %3983 }
 0x4b3   :  { %17179 = vst [vmem:[#allocation41_spill] sm:$0xff] %v14298_v49  ;;  %v14309_v38 = vmul.bf16 %v5138_v15, %v17183_v25  ;;  %v4886_v15 = vsel %vm4878_vm0, %v4853_v36, %v17188_v50  ;;  %v5534_v10 = vrot.slane %v5170_v39, 4  ;;  %v5535_v25 = vrot.slane %v5171_v60, 4  ;;  %v17192_v51 = vld [vmem:[#allocation185_spill] sm:$0xff]  ;;  %v17195_v60 = vld [vmem:[#allocation118_spill] sm:$0xff] }
 0x4b4   :  { %v4299_v4 = vmul.bf16 %v4256_v29, %v17187_v63  ;;  %v5730_v13 = vsel %vm737_vm6, %v4926_v59, %v5533_v2  ;;  %v17189_v30 = vpack.c.bf16 %v13834_v28, %v13834_v28  ;;  %v17190_v16 = vpack.c.bf16 %v13863_v18, %v13863_v18  ;;  %v17191_v29 = vld [vmem:[#allocation46_spill] sm:$0xff]  ;;  %v17194_v50 = vld [vmem:[#allocation49_spill] sm:$0xff]  ;;  %v14348_v59 = vpop.permute.xlu1 %3989 }
 0x4b5   :  { %7000 = vrot.lane.b32.xlu1 %v17191_v29, %s9363_s9  ;;  %v17193_v36 = vpack.c.bf16 %v17192_v51, %v17192_v51  ;;  %7002 = vrot.lane.b32.xlu0 %v17194_v50, %s9363_s9  ;;  %v14344_v18 = vsel %vm737_vm6, %v17195_v60, 0  ;;  %v17196_v2 = vld [vmem:[#allocation93_spill] sm:$0xff]  ;;  %vm4749_vm9 = vcmp.lt.s32.totalorder %v4709_v11, 32  ;;  %v14358_v29 = vsel %vm4748_vm13, 1.0, %v16771_v37  ;;  %v17199_v50 = vld [vmem:[#allocation32_spill] sm:$0xff] }
 0x4b6   :  { %v4927_v61 = vmul.bf16 %v4885_v46, %v17189_v30  ;;  %v4928_v27 = vmul.bf16 %v4886_v15, %v17190_v16  ;;  %5949 = vmatprep.subr.bf16.mxu0 %v5730_v13  ;;  %v4083_v15 = vadd.s32 4294967294, %v13987_v9  ;;  %v17197_v13 = vld [vmem:[#allocation62_spill] sm:$0xff]  ;;  %v14354_v30 = vpop.permute.xlu0 %4226  ;;  %vm5237_vm12 = vcmp.lt.s32.totalorder %v5197_v57, 32 }
 0x4b7   :  { %v4542_v63 = vmul.bf16 %v4499_v3, %v17193_v36  ;;  %5950 = vmatpush1.bf16.msra.mxu0 %v17196_v2  ;;  %v4084_v51 = vadd.s32 4294967294, %v17108_v34  ;;  %v4258_v60 = vsel %vm4252_vm7, %v17200_v7, %v14129_v1  ;;  %v17201_v2 = vld [vmem:[#allocation109_spill] sm:$0xff]  ;;  %v14390_v7 = vsel %vm4749_vm9, 1.0, %v16771_v37  ;;  %v17212_v36 = vld [vmem:[#allocation186_spill] sm:$0xff]  ;;  %vm17251_vm9 = vmmov %vm17231_vm8 }
 0x4b8   :  { %v5738_v3 = vsel %vm737_vm6, %v4928_v27, %v5535_v25  ;;  %v5734_v46 = vsel %vm737_vm6, %v4927_v61, %v5534_v10  ;;  %5951 = vmatprep.subr.bf16.mxu0 %v17197_v13  ;;  %v17198_v25 = vld [vmem:[#allocation37_spill] sm:$0xff]  ;;  %v5452_v10 = vrot.slane %v4299_v4, 4  ;;  %v4259_v27 = vsel %vm4252_vm7, %v14129_v1, %v14354_v30  ;;  %v17203_v13 = vld [vmem:[#allocation43_spill] sm:$0xff]  ;;  %v14386_v1 = vpop.permute.xlu1 %4232 }
 0x4b9   :  { %5990 = vmatprep.subr.bf16.mxu1 %v5738_v3  ;;  %v4013_v61 = vsel %vm151_vm2, %v14045_v23, %v17198_v25  ;;  %7004 = vrot.lane.b32.xlu1 %v17199_v50, %s9363_s9  ;;  %v4501_v3 = vsel %vm4495_vm1, %v17201_v2, %v14176_v19  ;;  %v17202_v23 = vpack.c.bf16 %v13919_v22, %v13919_v22  ;;  %v17204_v25 = vld [vmem:[#allocation115_spill] sm:$0xff]  ;;  %vm4103_vm11 = vcmp.ge.s32.totalorder %v4083_v15, 0 }
 0x4ba   :  { %5991 = vmatpush1.bf16.msra.mxu1 %v5734_v46  ;;  %7006 = vrot.lane.b32.xlu0 %v17203_v13, %s9363_s9  ;;  %v5646_v16 = vsel %vm737_vm6, %v4542_v63, %v17204_v25  ;;  %v17205_v50 = vld [vmem:[#allocation159_spill] sm:$0xff]  ;;  %v17206_v46 = vld [vmem:[#allocation25_spill] sm:$0xff]  ;;  %v17209_v13 = vld [vmem:[#allocation64_spill] sm:$0xff]  ;;  %vm4104_vm3 = vcmp.ge.s32.totalorder %v4084_v51, 0  ;;  %v4954_v11 = vadd.s32 2, %v17185_v40  ;;  %v17213_v57 = vpack.c.bf16 %v17212_v36, %v17212_v36 }
 0x4bb   :  { %v4302_v4 = vmul.bf16 %v4259_v27, %v17202_v23  ;;  %v4895_v28 = vsel %vm4878_vm0, %v17206_v46, %v17205_v50  ;;  %5952 = vmatpush1.bf16.msra.mxu0 %v5646_v16  ;;  %v14396_v27 = vsel %vm5237_vm12, 1.0, %v16771_v37  ;;  %v17207_v2 = vld [vmem:[#allocation179_spill] sm:$0xff]  ;;  %v14402_v16 = vpop.permute.xlu0 %4469  ;;  %v17210_v25 = vld [vmem:[#allocation184_spill] sm:$0xff]  ;;  %v1947_v15 = vadd.s32 1792, %v12475_v55 }
 0x4bc   :  { %v17208_v63 = vpack.c.bf16 %v17207_v2, %v17207_v2  ;;  %5953 = vmatprep.subr.bf16.mxu0 %v17209_v13  ;;  %v17211_v39 = vpack.c.bf16 %v17210_v25, %v17210_v25  ;;  %v4544_v34 = vmul.bf16 %v4501_v3, %v17213_v57  ;;  %v4502_v2 = vsel %vm4495_vm1, %v14176_v19, %v14402_v16  ;;  %v17217_v57 = vld [vmem:[#allocation160_spill] sm:$0xff]  ;;  %v14430_v49 = vpop.permute.xlu1 %4858  ;;  %v17224_v3 = vld [vmem:[#allocation169_spill] sm:$0xff] }
 0x4bd   :  { %v5455_v13 = vrot.slane %v4302_v4, 4  ;;  %v17215_v25 = vpack.c.bf16 %v13963_v42, %v13963_v42  ;;  %v17218_v9 = vpack.c.bf16 %v17217_v57, %v17217_v57  ;;  %v14436_v42 = vsel %vm4103_vm11, 1.0, %v16771_v37  ;;  %v17222_v57 = vld [vmem:[#allocation120_spill] sm:$0xff]  ;;  %v17223_v4 = vld [vmem:[#allocation35_spill] sm:$0xff] }
 0x4be   :  { %v4056_v23 = vmul.bf16 %v4013_v61, %v17208_v63  ;;  %v4301_v22 = vmul.bf16 %v4258_v60, %v17211_v39  ;;  %v4016_v61 = vsel %vm151_vm2, %v14069_v33, %v14322_v45  ;;  %v17214_v63 = vld [vmem:[#allocation139_spill] sm:$0xff]  ;;  %v17216_v60 = vld [vmem:[#allocation44_spill] sm:$0xff]  ;;  %vm4994_vm5 = vcmp.lt.s32.totalorder %v4954_v11, 32 }
 0x4bf   :  { %7134 = vrot.lane.b32.xlu1 %v17214_v63, %s9363_s9  ;;  %v4545_v39 = vmul.bf16 %v4502_v2, %v17215_v25  ;;  %7136 = vrot.lane.b32.xlu0 %v17216_v60, %s9363_s9  ;;  %v4937_v19 = vmul.bf16 %v4895_v28, %v17218_v9  ;;  %v17220_v9 = vpack.c.bf16 %v13880_v58, %v13880_v58  ;;  %v5345_v63 = vpop.permute.xlu0 %5344  ;;  %v17221_v25 = vld [vmem:[#allocation168_spill] sm:$0xff] }
 0x4c0   :  { %v5566_v36 = vsel %vm737_vm6, %v4056_v23, %v5452_v10  ;;  %v14440_v10 = vsel %vm4104_vm3, 1.0, %v16771_v37  ;;  %v17219_v23 = vld [vmem:[#allocation107_spill] sm:$0xff]  ;;  %v5374_v51 = vsel %vm5364_vm14, %v17222_v57, %v5345_v63  ;;  %v17225_v58 = vpack.c.bf16 %v13978_v47, %v13978_v47  ;;  %v14474_v57 = vpop.permute.xlu1 %4475  ;;  %v17239_v11 = vld [vmem:[#allocation144_spill] sm:$0xff] }
 0x4c1   :  { %5954 = vmatpush1.bf16.msra.mxu0 %v5566_v36  ;;  %v4015_v2 = vsel %vm151_vm2, %v17219_v23, %v14069_v33  ;;  %v4059_v28 = vmul.bf16 %v4016_v61, %v17220_v9  ;;  %v5658_v60 = vsel %vm737_vm6, %v4545_v39, %v17221_v25  ;;  %v5454_v36 = vrot.slane %v4301_v22, 4  ;;  %v17226_v39 = vld [vmem:[#allocation17_spill] sm:$0xff]  ;;  %v17228_v25 = vld [vmem:[#allocation86_spill] sm:$0xff] }
 0x4c2   :  { %5992 = vmatprep.subr.bf16.mxu1 %v5658_v60  ;;  %v5654_v33 = vsel %vm737_vm6, %v4544_v34, %v17224_v3  ;;  %v5416_v61 = vmul.bf16 %v5374_v51, %v17225_v58  ;;  %v17227_v9 = vld [vmem:[#allocation161_spill] sm:$0xff]  ;;  %v17229_v3 = vld [vmem:[#allocation182_spill] sm:$0xff] }
 0x4c3   :  { %7138 = vrot.lane.b32.xlu1 %v17223_v4, %s9363_s9  ;;  %7140 = vrot.lane.b32.xlu0 %v17226_v39, %s9363_s9  ;;  %v5578_v22 = vsel %vm737_vm6, %v4059_v28, %v5455_v13  ;;  %v4711_v4 = vadd.s32 1, %v17185_v40  ;;  %v14469_v34 = vsel %vm5364_vm14, %v17228_v25, %v17227_v9  ;;  %v17230_v47 = vpack.c.bf16 %v17229_v3, %v17229_v3  ;;  %v17232_v51 = vld [vmem:[#allocation162_spill] sm:$0xff]  ;;  %v5102_v39 = vpop.permute.xlu0 %5101  ;;  %v17237_v3 = vld [vmem:[#allocation131_spill] sm:$0xff] }
 0x4c4   :  { %5993 = vmatpush1.bf16.msra.mxu1 %v5654_v33  ;;  %9131 = vmatmul.mubr.msk.bf16.vlgmr.msra.gmra.mxu0 %vm17231_vm8, %v14188_v26  ;;  %v14482_v28 = vsel %vm737_vm6, %v14215_v56, 0  ;;  %v17233_v33 = vld [vmem:[#allocation6_spill] sm:$0xff]  ;;  %v17235_v25 = vrot.slane %v14309_v38, 4  ;;  %v17241_v38 = vpack.c.bf16 %v14075_v32, %v14075_v32  ;;  %v5347_v40 = vpop.permute.xlu1 %5346  ;;  %v14526_v32 = vsel %vm737_vm6, %v17232_v51, %v17115_v6 }
 0x4c5   :  { %v4058_v60 = vmul.bf16 %v4015_v2, %v17230_v47  ;;  %5994 = vmatprep.subr.bf16.mxu1 %v5578_v22  ;;  %v6513_v58 = vsel %vm17234_vm10, %v17233_v33, %v17232_v51  ;;  %9134 = vmatprep.subr.msk.bf16.mxu0 %vm737_vm6, %v5416_v61  ;;  %v14490_v2 = vsel %vm4994_vm5, 1.0, %v16771_v37  ;;  %v14493_v22 = vand.u32 31, %v1947_v15  ;;  %v17238_v33 = vld [vmem:[#allocation124_spill] sm:$0xff]  ;;  %v17240_v13 = vld [vmem:[#allocation150_spill] sm:$0xff]  ;;  %vm17287_vm10 = vmmov %vm17251_vm9 }
 0x4c6   :  { %6053 = vmatprep.mubr.bf16.mxu0 %v14232_v43  ;;  %v14498_v56 = vsel %vm737_vm6, %v4937_v19, %v17235_v25  ;;  %v4888_v47 = vsel %vm4878_vm0, %v17237_v3, %v14430_v49  ;;  %v5131_v61 = vsel %vm5121_vm15, %v17238_v33, %v5102_v39  ;;  %6030 = vmatpush1.bf16.msra.mxu0 %v14254_v12  ;;  %v4331_v23 = vadd.s32 4294967295, %v17240_v13  ;;  %v17242_v25 = vld [vmem:[#allocation146_spill] sm:$0xff] }
 0x4c7   :  { %17236 = vst [vmem:[#allocation42_spill] sm:$0xff] %v14498_v56  ;;  %7092 = vrot.lane.b32.xlu1 %v17239_v11, %s9363_s9  ;;  %v5574_v15 = vsel %vm737_vm6, %v4058_v60, %v5454_v36  ;;  %v5173_v19 = vmul.bf16 %v5131_v61, %v17241_v38  ;;  %7094 = vrot.lane.b32.xlu0 %v17242_v25, %s9363_s9  ;;  %vm4751_vm13 = vcmp.lt.s32.totalorder %v4711_v4, 32  ;;  %v1948_v3 = vadd.s32 1920, %v12475_v55  ;;  %v17243_v11 = vld [vmem:[#allocation111_spill] sm:$0xff] }
 0x4c8   :  { %5995 = vmatpush1.bf16.msra.mxu1 %v5574_v15  ;;  %v4329_v33 = vadd.s32 4294967295, %v14493_v22  ;;  %v4260_v12 = vsel %vm4252_vm7, %v14354_v30, %v17243_v11  ;;  %v17244_v36 = vld [vmem:[#allocation23_spill] sm:$0xff]  ;;  %v14530_v61 = vsel %vm737_vm6, %v6513_v58, %v14067_v31  ;;  %v17245_v15 = vpack.c.bf16 %v13974_v35, %v13974_v35 }
 0x4c9   :  { %v4503_v60 = vsel %vm4495_vm1, %v14402_v16, %v17244_v36  ;;  %v5537_v25 = vrot.slane %v5173_v19, 4  ;;  %v5375_v30 = vsel %vm5364_vm14, %v5345_v63, %v5347_v40  ;;  %v17246_v11 = vld [vmem:[#allocation71_spill] sm:$0xff]  ;;  %v14538_v36 = vpop.permute.xlu0 %3991  ;;  %v17247_v6 = vpack.c.bf16 %v14087_v5, %v14087_v5  ;;  %v17253_v19 = vld [vmem:[#allocation196_spill] sm:$0xff] }
 0x4ca   :  { %v4930_v38 = vmul.bf16 %v4888_v47, %v17245_v15  ;;  %v5376_v16 = vsel %vm5364_vm14, %v5347_v40, %v17246_v11  ;;  %v17248_v31 = vpack.c.bf16 %v14091_v0, %v14091_v0  ;;  %v17249_v56 = vld [vmem:[#allocation147_spill] sm:$0xff]  ;;  %v5074_v35 = vpack.c.bf16 %v14490_v2, %v14490_v2  ;;  %v17250_v40 = vld [vmem:[#allocation5_spill] sm:$0xff] }
 0x4cb   :  { %v5417_v51 = vmul.bf16 %v5375_v30, %v17247_v6  ;;  %7096 = vrot.lane.b32.xlu1 %v17249_v56, %s9363_s9  ;;  %v14552_v63 = vsel %vm4751_vm13, 1.0, %v16771_v37  ;;  %7098 = vrot.lane.b32.xlu0 %v17250_v40, %s9363_s9  ;;  %vm4351_vm12 = vcmp.ge.s32.totalorder %v4331_v23, 0  ;;  %v14559_v0 = vand.u32 31, %v1948_v3  ;;  %v17252_v56 = vld [vmem:[#allocation108_spill] sm:$0xff] }
 0x4cc   :  { %v5418_v58 = vmul.bf16 %v5376_v16, %v17248_v31  ;;  %v5746_v5 = vsel %vm737_vm6, %v4930_v38, %v5537_v25  ;;  %9133 = vmatmul.mubr.msk.bf16.vlgmr.msra.gmra.mxu1 %vm17251_vm9, %v14188_v26  ;;  %vm4349_vm11 = vcmp.ge.s32.totalorder %v4329_v33, 0  ;;  %v4017_v47 = vsel %vm151_vm2, %v14322_v45, %v17252_v56  ;;  %v5104_v38 = vpop.permute.xlu1 %5103  ;;  %v17256_v16 = vld [vmem:[#allocation50_spill] sm:$0xff]  ;;  %v17257_v31 = vld [vmem:[#allocation192_spill] sm:$0xff] }
 0x4cd   :  { %v17254_v4 = vpack.c.bf16 %v17253_v19, %v17253_v19  ;;  %v17255_v30 = vpack.c.bf16 %v13966_v41, %v13966_v41  ;;  %6031 = vmatprep.subr.bf16.mxu0 %v5746_v5  ;;  %v5828_v3 = vsel %vm737_vm6, %v5417_v51, 0  ;;  %v5132_v25 = vsel %vm5121_vm15, %v5102_v39, %v5104_v38  ;;  %v14575_v45 = vpop.permute.xlu0 %4477  ;;  %v17258_v41 = vld [vmem:[#allocation135_spill] sm:$0xff]  ;;  %6093 = vmatprep.mubr.bf16.mxu1 %v14232_v43  ;;  %v17268_v33 = vld [vmem:[#allocation68_spill] sm:$0xff] }
 0x4ce   :  { %9136 = vmatprep.subr.msk.bf16.mxu1 %vm737_vm6, %v5418_v58  ;;  %v5133_v6 = vsel %vm5121_vm15, %v5104_v38, %v17256_v16  ;;  %6032 = vmatpush1.bf16.msra.mxu0 %v17257_v31  ;;  %v17259_v51 = vpack.c.bf16 %v14221_v44, %v14221_v44  ;;  %v17260_v58 = vpack.c.bf16 %v14225_v53, %v14225_v53  ;;  %v17261_v5 = vld [vmem:[#allocation151_spill] sm:$0xff]  ;;  %v14598_v19 = vsel %vm4351_vm12, 1.0, %v16771_v37 }
 0x4cf   :  { %v4303_v15 = vmul.bf16 %v4260_v12, %v17254_v4  ;;  %v4546_v11 = vmul.bf16 %v4503_v60, %v17255_v30  ;;  %6070 = vmatpush1.bf16.msra.mxu1 %v5828_v3  ;;  %v14579_v12 = vadd.s32 4294967293, %v14493_v22  ;;  %v14584_v60 = vsel %vm737_vm6, %v14193_v48, %v17258_v41  ;;  %7050 = vrot.lane.b32.xlu1 %v17261_v5, %s9363_s9  ;;  %v17262_v48 = vld [vmem:[#allocation194_spill] sm:$0xff]  ;;  %v17264_v44 = vld [vmem:[#allocation79_spill] sm:$0xff]  ;;  %v17267_v41 = vld [vmem:[#allocation116_spill] sm:$0xff] }
 0x4d0   :  { %v5174_v39 = vmul.bf16 %v5132_v25, %v17259_v51  ;;  %v5175_v40 = vmul.bf16 %v5133_v6, %v17260_v58  ;;  %v17263_v4 = vpack.c.bf16 %v17262_v48, %v17262_v48  ;;  %7052 = vrot.lane.b32.xlu0 %v17264_v44, %s9363_s9  ;;  %v17265_v38 = vld [vmem:[#allocation119_spill] sm:$0xff]  ;;  %v4330_v53 = vadd.s32 4294967295, %v14559_v0  ;;  %v4861_v31 = vpop.permute.xlu1 %4860 }
 0x4d1   :  { %6033 = vmatprep.subr.bf16.mxu0 %v17265_v38  ;;  %v14609_v3 = vsel %vm4349_vm11, 1.0, %v16771_v37  ;;  %v4088_v25 = vadd.s32 4294967294, %v17240_v13  ;;  %v5456_v23 = vrot.slane %v4303_v15, 4  ;;  %v17266_v16 = vld [vmem:[#allocation7_spill] sm:$0xff]  ;;  %v5662_v51 = vsel %vm737_vm6, %v4546_v11, %v17267_v41  ;;  %v14628_v44 = vpop.permute.xlu0 %5352 }
 0x4d2   :  { %v4060_v30 = vmul.bf16 %v4017_v47, %v17263_v4  ;;  %v4262_v6 = vsel %vm4252_vm7, %v17266_v16, %v14386_v1  ;;  %v4506_v47 = vsel %vm4495_vm1, %v14474_v57, %v14575_v45  ;;  %v4505_v58 = vsel %vm4495_vm1, %v17268_v33, %v14474_v57  ;;  %v17269_v48 = vld [vmem:[#allocation51_spill] sm:$0xff]  ;;  %6034 = vmatpush1.bf16.msra.mxu0 %v5662_v51  ;;  %v17272_v57 = vld [vmem:[#allocation53_spill] sm:$0xff] }
 0x4d3   :  { %v5538_v5 = vrot.slane %v5174_v39, 4  ;;  %v4889_v15 = vsel %vm4878_vm0, %v14430_v49, %v4861_v31  ;;  %v4890_v4 = vsel %vm4878_vm0, %v4861_v31, %v17269_v48  ;;  %v5539_v38 = vrot.slane %v5175_v40, 4  ;;  %v17273_v49 = vld [vmem:[#allocation152_spill] sm:$0xff]  ;;  %v17274_v31 = vld [vmem:[#allocation193_spill] sm:$0xff]  ;;  %v17278_v48 = vld [vmem:[#allocation198_spill] sm:$0xff] }
 0x4d4   :  { %v17270_v11 = vpack.c.bf16 %v14358_v29, %v14358_v29  ;;  %v17271_v41 = vpack.c.bf16 %v14390_v7, %v14390_v7  ;;  %v5378_v39 = vsel %vm5364_vm14, %v17272_v57, %v14628_v44  ;;  %7054 = vrot.lane.b32.xlu1 %v17273_v49, %s9363_s9  ;;  %6035 = vmatprep.subr.bf16.mxu0 %v17274_v31  ;;  %v17277_v7 = vld [vmem:[#allocation9_spill] sm:$0xff]  ;;  %vm4108_vm3 = vcmp.ge.s32.totalorder %v4088_v25, 0 }
 0x4d5   :  { %v17275_v40 = vpack.c.bf16 %v14266_v17, %v14266_v17  ;;  %v17276_v29 = vpack.c.bf16 %v14396_v27, %v14396_v27  ;;  %7056 = vrot.lane.b32.xlu0 %v17277_v7, %s9363_s9  ;;  %v5582_v57 = vsel %vm737_vm6, %v4060_v30, %v5456_v23  ;;  %v17280_v27 = vpack.c.bf16 %v14039_v62, %v14039_v62  ;;  %v17282_v62 = vld [vmem:[#allocation65_spill] sm:$0xff] }
 0x4d6   :  { %v4931_v16 = vmul.bf16 %v4889_v15, %v17270_v11  ;;  %v4932_v56 = vmul.bf16 %v4890_v4, %v17271_v41  ;;  %v4086_v15 = vadd.s32 4294967294, %v14493_v22  ;;  %v17279_v4 = vpack.c.bf16 %v17278_v48, %v17278_v48  ;;  %v4235_v41 = vpop.permute.xlu1 %4234  ;;  %6036 = vmatpush1.bf16.msra.mxu0 %v5582_v57  ;;  %v17289_v57 = vld [vmem:[#allocation18_spill] sm:$0xff] }
 0x4d7   :  { %v4549_v51 = vmul.bf16 %v4506_v47, %v17275_v40  ;;  %v5420_v33 = vmul.bf16 %v5378_v39, %v17276_v29  ;;  %v4548_v39 = vmul.bf16 %v4505_v58, %v17280_v27  ;;  %v4020_v49 = vsel %vm151_vm2, %v14348_v59, %v14538_v36  ;;  %v14665_v40 = vpop.permute.xlu0 %5109  ;;  %v17283_v58 = vld [vmem:[#allocation54_spill] sm:$0xff]  ;;  %v17291_v27 = vld [vmem:[#allocation195_spill] sm:$0xff] }
 0x4d8   :  { %v4305_v11 = vmul.bf16 %v4262_v6, %v17279_v4  ;;  %v5754_v17 = vsel %vm737_vm6, %v4932_v56, %v5539_v38  ;;  %v5750_v47 = vsel %vm737_vm6, %v4931_v16, %v5538_v5  ;;  %v4263_v31 = vsel %vm4252_vm7, %v14386_v1, %v4235_v41  ;;  %7008 = vrot.lane.b32.xlu1 %v17283_v58, %s9363_s9  ;;  %v17284_v38 = vld [vmem:[#allocation58_spill] sm:$0xff] }
 0x4d9   :  { %6071 = vmatprep.subr.bf16.mxu1 %v5754_v17  ;;  %v4087_v30 = vadd.s32 4294967294, %v14559_v0  ;;  %v17281_v56 = vpack.c.bf16 %v14436_v42, %v14436_v42  ;;  %v5135_v6 = vsel %vm5121_vm15, %v17282_v62, %v14665_v40  ;;  %v4451_v1 = vpack.c.bf16 %v14598_v19, %v14598_v19  ;;  %7010 = vrot.lane.b32.xlu0 %v17284_v38, %s9363_s9  ;;  %v17285_v29 = vld [vmem:[#allocation126_spill] sm:$0xff]  ;;  %v17294_v62 = vld [vmem:[#allocation59_spill] sm:$0xff] }
 0x4da   :  { %6072 = vmatpush1.bf16.msra.mxu1 %v5750_v47  ;;  %vm4350_vm5 = vcmp.ge.s32.totalorder %v4330_v53, 0  ;;  %v5177_v5 = vmul.bf16 %v5135_v6, %v5074_v35  ;;  %9138 = vmatprep.subr.msk.bf16.mxu0 %vm737_vm6, %v5420_v33  ;;  %v5674_v42 = vsel %vm737_vm6, %v4549_v51, %v14122_v52  ;;  %v14688_v16 = vsel %vm4108_vm3, 1.0, %v16771_v37  ;;  %v14696_v4 = vpop.permute.xlu1 %3997  ;;  %v17295_v6 = vld [vmem:[#allocation148_spill] sm:$0xff]  ;;  %v17296_v38 = vld [vmem:[#allocation138_spill] sm:$0xff] }
 0x4db   :  { %v4306_v23 = vmul.bf16 %v4263_v31, %v17281_v56  ;;  %vm4106_vm8 = vcmp.ge.s32.totalorder %v4086_v15, 0  ;;  %v4019_v7 = vsel %vm151_vm2, %v17285_v29, %v14348_v59  ;;  %v17286_v2 = vpack.c.bf16 %v14104_v14, %v14104_v14  ;;  %6073 = vmatprep.subr.bf16.mxu1 %v5674_v42  ;;  %9135 = vmatmul.mubr.msk.bf16.vlgmr.msra.gmra.mxu0 %vm17287_vm10, %v14188_v26  ;;  %v14702_v51 = vpop.permute.xlu0 %4866  ;;  %v17288_v59 = vld [vmem:[#allocation28_spill] sm:$0xff]  ;;  %v17297_v42 = vld [vmem:[#allocation141_spill] sm:$0xff] }
 0x4dc   :  { %v4449_v52 = vpack.c.bf16 %v14609_v3, %v14609_v3  ;;  %v5458_v25 = vrot.slane %v4305_v11, 4  ;;  %6111 = vmatpush1.bf16.msra.mxu0 %v14344_v18  ;;  %v5670_v33 = vsel %vm737_vm6, %v4548_v39, %v17288_v59  ;;  %v14709_v14 = vsel %vm4350_vm5, 1.0, %v16771_v37  ;;  %6134 = vmatprep.mubr.bf16.mxu0 %v14232_v43  ;;  %v17290_v11 = vld [vmem:[#allocation55_spill] sm:$0xff]  ;;  %v17322_v3 = vld [vmem:[#allocation40_spill] sm:$0xff] }
 0x4dd   :  { %v4063_v35 = vmul.bf16 %v4020_v49, %v17286_v2  ;;  %v5459_v48 = vrot.slane %v4306_v23, 4  ;;  %vm4107_vm13 = vcmp.ge.s32.totalorder %v4087_v30, 0  ;;  %v4892_v17 = vsel %vm4878_vm0, %v17289_v57, %v14702_v51  ;;  %7012 = vrot.lane.b32.xlu1 %v17290_v11, %s9363_s9  ;;  %7014 = vrot.lane.b32.xlu0 %v17294_v62, %s9363_s9 }
 0x4de   :  { %6074 = vmatpush1.bf16.msra.mxu1 %v5670_v33  ;;  %v4208_v47 = vpack.c.bf16 %v14688_v16, %v14688_v16  ;;  %v14722_v53 = vsel %vm4106_vm8, 1.0, %v16771_v37  ;;  %v17292_v39 = vpack.c.bf16 %v17291_v27, %v17291_v27  ;;  %v5541_v31 = vrot.slane %v5177_v5, 4  ;;  %v14738_v2 = vpop.permute.xlu1 %4485  ;;  %v17298_v33 = vld [vmem:[#allocation48_spill] sm:$0xff]  ;;  %vm17306_vm8 = vmmov %vm17287_vm10 }
 0x4df   :  { %v5594_v18 = vsel %vm737_vm6, %v4063_v35, %v5459_v48  ;;  %v17293_v56 = vpack.c.bf16 %v14552_v63, %v14552_v63  ;;  %v5201_v58 = vadd.s32 3, %v17295_v6  ;;  %v4507_v15 = vsel %vm4495_vm1, %v14575_v45, %v17296_v38 }
 0x4e0   :  { %v4062_v49 = vmul.bf16 %v4019_v7, %v17292_v39  ;;  %6075 = vmatprep.subr.bf16.mxu1 %v5594_v18  ;;  %v4264_v29 = vsel %vm4252_vm7, %v4235_v41, %v17297_v42  ;;  %v14742_v5 = vsel %vm4107_vm13, 1.0, %v16771_v37  ;;  %v5198_v63 = vadd.s32 3, %v14493_v22  ;;  %v14745_v7 = vpop.permute.xlu0 %4483  ;;  %v17299_v41 = vld [vmem:[#allocation84_spill] sm:$0xff]  ;;  %v17305_v42 = vld [vmem:[#allocation70_spill] sm:$0xff] }
 0x4e1   :  { %v4934_v23 = vmul.bf16 %v4892_v17, %v17293_v56  ;;  %v5199_v59 = vadd.s32 3, %v14559_v0  ;;  %v4958_v45 = vadd.s32 2, %v17295_v6  ;;  %v6388_v57 = vsel %vm5121_vm15, %v17299_v41, %v17298_v33  ;;  %v17300_v17 = vld [vmem:[#allocation98_spill] sm:$0xff] }
 0x4e2   :  { %v5590_v35 = vsel %vm737_vm6, %v4062_v49, %v5458_v25  ;;  %v4450_v30 = vpack.c.bf16 %v14709_v14, %v14709_v14  ;;  %7142 = vrot.lane.b32.xlu1 %v17300_v17, %s9363_s9  ;;  %v14759_v11 = vadd.s32 2304, %v12475_v55  ;;  %v3824_v25 = vadd.s32 4294967293, %v14559_v0  ;;  %v14773_v62 = vpop.permute.xlu1 %4242 }
 0x4e3   :  { %v5762_v48 = vsel %vm737_vm6, %v4934_v23, %v5541_v31  ;;  %6076 = vmatpush1.bf16.msra.mxu1 %v5590_v35  ;;  %v17301_v18 = vpack.c.bf16 %v14270_v20, %v14270_v20  ;;  %v17302_v39 = vpack.c.bf16 %v14440_v10, %v14440_v10  ;;  %v17303_v31 = vld [vmem:[#allocation94_spill] sm:$0xff]  ;;  %vm5241_vm9 = vcmp.lt.s32.totalorder %v5201_v58, 32  ;;  %v17304_v23 = vld [vmem:[#allocation197_spill] sm:$0xff] }
 0x4e4   :  { %7144 = vrot.lane.b32.xlu0 %v17303_v31, %s9363_s9  ;;  %6112 = vmatprep.subr.bf16.mxu0 %v5762_v48  ;;  %v4955_v56 = vadd.s32 2, %v14493_v22  ;;  %vm3843_vm12 = vcmp.ge.s32.totalorder %v14579_v12, 0  ;;  %v4206_v20 = vpack.c.bf16 %v14722_v53, %v14722_v53  ;;  %v4207_v10 = vpack.c.bf16 %v14742_v5, %v14742_v5  ;;  %v17307_v48 = vld [vmem:[#allocation81_spill] sm:$0xff]  ;;  %v17310_v31 = vld [vmem:[#allocation14_spill] sm:$0xff] }
 0x4e5   :  { %v4550_v27 = vmul.bf16 %v4507_v15, %v17301_v18  ;;  %v4307_v49 = vmul.bf16 %v4264_v29, %v17302_v39  ;;  %6113 = vmatpush1.bf16.msra.mxu0 %v17304_v23  ;;  %v14780_v38 = vadd.s32 4294967293, %v17240_v13  ;;  %v6744_v15 = vsel %vm737_vm6, %v17298_v33, %v17227_v9  ;;  %v14786_v29 = vpop.permute.xlu0 %4240  ;;  %v17308_v18 = vld [vmem:[#allocation22_spill] sm:$0xff]  ;;  %v17323_v53 = vld [vmem:[#allocation101_spill] sm:$0xff] }
 0x4e6   :  { %6114 = vmatprep.subr.bf16.mxu0 %v17305_v42  ;;  %vm5238_vm11 = vcmp.lt.s32.totalorder %v5198_v63, 32  ;;  %vm5239_vm3 = vcmp.lt.s32.totalorder %v5199_v59, 32  ;;  %vm4998_vm5 = vcmp.lt.s32.totalorder %v4958_v45, 32  ;;  %v4956_v35 = vadd.s32 2, %v14559_v0  ;;  %9137 = vmatmul.mubr.msk.bf16.vlgmr.msra.gmra.mxu1 %vm17306_vm8, %v14188_v26 }
 0x4e7   :  { %v4021_v41 = vsel %vm151_vm2, %v14538_v36, %v17307_v48  ;;  %7100 = vrot.lane.b32.xlu1 %v14530_v61, %s9363_s9  ;;  %vm3844_vm10 = vcmp.ge.s32.totalorder %v3824_v25, 0  ;;  %v6741_v9 = vsel %vm737_vm6, %v6388_v57, %v14469_v34  ;;  %v9123_v33 = vsel %vm5241_vm9, 1.0, %v16771_v37  ;;  %6175 = vmatprep.mubr.bf16.mxu1 %v14232_v43  ;;  %v17309_v61 = vld [vmem:[#allocation142_spill] sm:$0xff]  ;;  %v14809_v34 = vpop.permute.xlu1 %4005 }
 0x4e8   :  { %v5460_v17 = vrot.slane %v4307_v49, 4  ;;  %7102 = vrot.lane.b32.xlu0 %v14526_v32, %s9363_s9  ;;  %v5678_v39 = vsel %vm737_vm6, %v4550_v27, %v17308_v18  ;;  %vm4995_vm13 = vcmp.lt.s32.totalorder %v4955_v56, 32  ;;  %v4715_v36 = vadd.s32 1, %v17295_v6 }
 0x4e9   :  { %v6326_v23 = vsel %vm4878_vm0, %v17310_v31, %v17309_v61  ;;  %6115 = vmatpush1.bf16.msra.mxu0 %v5678_v39  ;;  %v9120_v58 = vsel %vm5238_vm11, 1.0, %v16771_v37  ;;  %v9121_v57 = vsel %vm5239_vm3, 1.0, %v16771_v37  ;;  %v9103_v32 = vsel %vm4998_vm5, 1.0, %v16771_v37  ;;  %v14821_v42 = vpop.permute.xlu0 %3999  ;;  %v9330_v31 = vld [vmem:[#allocation2 + $0x54] ss:$0 sps:$4 sm:$0xff]  }
 0x4ea   :  { %v17311_v27 = vpack.c.bf16 %v14108_v24, %v14108_v24  ;;  %6116 = vmatprep.subr.bf16.mxu0 %v14062_v54  ;;  %vm4996_vm9 = vcmp.lt.s32.totalorder %v4956_v35, 32  ;;  %v4712_v48 = vadd.s32 1, %v14493_v22  ;;  %v4713_v63 = vadd.s32 1, %v14559_v0 }
 0x4eb   :  { %vm3845_vm11 = vcmp.ge.s32.totalorder %v14780_v38, 0  ;;  %v14828_v59 = vsel %vm3844_vm10, 1.0, %v16771_v37  ;;  %7058 = vrot.lane.b32.xlu1 %v6741_v9, %s9363_s9  ;;  %v5321_v45 = vpack.c.bf16 %v9123_v33, %v9123_v33  ;;  %v9100_v24 = vsel %vm4995_vm13, 1.0, %v16771_v37  ;;  %v14835_v39 = vpop.permute.xlu1 %5360 }
 0x4ec   :  { %v4064_v49 = vmul.bf16 %v4021_v41, %v17311_v27  ;;  %7060 = vrot.lane.b32.xlu0 %v6744_v15, %s9363_s9  ;;  %v5318_v41 = vpack.c.bf16 %v9120_v58, %v9120_v58  ;;  %v5319_v18 = vpack.c.bf16 %v9121_v57, %v9121_v57  ;;  %vm4755_vm3 = vcmp.lt.s32.totalorder %v4715_v36, 32  ;;  %v17312_v27 = vld [vmem:[#allocation57_spill] sm:$0xff] }
 0x4ed   :  { %v6681_v25 = vsel %vm737_vm6, %v9330_v31, %v17309_v61  ;;  %v6679_v9 = vsel %vm737_vm6, %v17312_v27, %v6326_v23  ;;  %v5078_v33 = vpack.c.bf16 %v9103_v32, %v9103_v32  ;;  %v9101_v56 = vsel %vm4996_vm9, 1.0, %v16771_v37 }
 0x4ee   :  { %v5598_v54 = vsel %vm737_vm6, %v4064_v49, %v5460_v17  ;;  %v5382_v15 = vsel %vm5364_vm14, %v17132_v8, %v14835_v39  ;;  %v5355_v17 = vpop.permute.xlu0 %5354  ;;  %v5075_v58 = vpack.c.bf16 %v9100_v24, %v9100_v24  ;;  %vm4752_vm5 = vcmp.lt.s32.totalorder %v4712_v48, 32 }
 0x4ef   :  { %6117 = vmatpush1.bf16.msra.mxu0 %v5598_v54  ;;  %vm4753_vm8 = vcmp.lt.s32.totalorder %v4713_v63, 32  ;;  %v5424_v57 = vmul.bf16 %v5382_v15, %v5321_v45  ;;  %v5379_v49 = vsel %vm5364_vm14, %v14628_v44, %v5355_v17  ;;  %v5380_v61 = vsel %vm5364_vm14, %v5355_v17, %v17133_v21  ;;  %7016 = vrot.lane.b32.xlu1 %v6679_v9, %s9363_s9  ;;  %v6909_v21 = vld [vmem:[%s16022_s16] sm:$0xff]  ;;  %v14872_v36 = vpop.permute.xlu1 %5117 }
 0x4f0   :  { %v9083_v35 = vsel %vm4755_vm3, 1.0, %v16771_v37  ;;  %v14856_v8 = vsel %vm3843_vm12, 1.0, %v16771_v37  ;;  %v5421_v23 = vmul.bf16 %v5379_v49, %v5318_v41  ;;  %v5422_v32 = vmul.bf16 %v5380_v61, %v5319_v18  ;;  %7018 = vrot.lane.b32.xlu0 %v6681_v25, %s9363_s9  ;;  %v17314_v41 = vld [vmem:[#allocation157_spill] sm:$0xff] }
 0x4f1   :  { %v5076_v45 = vpack.c.bf16 %v9101_v56, %v9101_v56  ;;  %vm17313_vm10 = vcmask 457728   ;;  %v14867_v44 = vsel %vm3845_vm11, 1.0, %v16771_v37  ;;  %v3944_v12 = vpack.c.bf16 %v14828_v59, %v14828_v59  ;;  %9142 = vmatprep.subr.msk.bf16.mxu0 %vm737_vm6, %v5424_v57  ;;  %v17315_v9 = vld [vmem:[#allocation145_spill] sm:$0xff] }
 0x4f2   :  { %9139 = vmatmul.mubr.msk.bf16.vlgmr.msra.gmra.mxu0 %vm17313_vm10, %v14188_v26  ;;  %v9080_v24 = vsel %vm4752_vm5, 1.0, %v16771_v37  ;;  %v9081_v54 = vsel %vm4753_vm8, 1.0, %v16771_v37  ;;  %v4510_v38 = vsel %vm4495_vm1, %v14745_v7, %v14738_v2  ;;  %v5139_v59 = vsel %vm5121_vm15, %v17314_v41, %v14872_v36  ;;  %v5112_v18 = vpop.permute.xlu0 %5111  ;;  %9140 = vmatprep.subr.msk.bf16.mxu1 %vm737_vm6, %v5422_v32  ;;  %v17318_v32 = vld [vmem:[#allocation92_spill] sm:$0xff] }
 0x4f3   :  { %6216 = vmatprep.mubr.bf16.mxu0 %v14232_v43  ;;  %6193 = vmatpush1.bf16.msra.mxu0 %v14482_v28  ;;  %v5840_v48 = vsel %vm737_vm6, %v5421_v23, 0  ;;  %v4835_v31 = vpack.c.bf16 %v9083_v35, %v9083_v35  ;;  %v14889_v63 = vand.u32 31, %v14759_v11  ;;  %v5181_v25 = vmul.bf16 %v5139_v59, %v5078_v33  ;;  %v17316_v28 = vld [vmem:[#allocation36_spill] sm:$0xff]  ;;  %v17317_v11 = vld [vmem:[#allocation31_spill] sm:$0xff]  ;;  %v14903_v35 = vpop.permute.xlu1 %4874  ;;  %v17319_v59 = vld [vmem:[#allocation85_spill] sm:$0xff] }
 0x4f4   :  { %v5136_v27 = vsel %vm5121_vm15, %v14665_v40, %v5112_v18  ;;  %v5137_v56 = vsel %vm5121_vm15, %v5112_v18, %v17315_v9  ;;  %6912 = vperm.xlu1 %9283, %v6909_v21   ;;  %6152 = vmatpush1.bf16.msra.mxu1 %v5840_v48  ;;  %v4832_v57 = vpack.c.bf16 %v9080_v24, %v9080_v24  ;;  %v1952_v23 = vadd.s32 2432, %v12475_v55 }
 0x4f5   :  { %v5178_v15 = vmul.bf16 %v5136_v27, %v5075_v58  ;;  %v5179_v17 = vmul.bf16 %v5137_v56, %v5076_v45  ;;  %v4833_v49 = vpack.c.bf16 %v9081_v54, %v9081_v54  ;;  %v4511_v61 = vsel %vm4495_vm1, %v14738_v2, %v17316_v28 }
 0x4f6   :  { %v4509_v33 = vsel %vm4495_vm1, %v17317_v11, %v14745_v7  ;;  %v3945_v40 = vpack.c.bf16 %v14867_v44, %v14867_v44  ;;  %v4553_v58 = vmul.bf16 %v4510_v38, %v4450_v30  ;;  %v4266_v45 = vsel %vm4252_vm7, %v17318_v32, %v14786_v29  ;;  %v4869_v21 = vpop.permute.xlu0 %4868 }
 0x4f7   :  { %v4267_v2 = vsel %vm4252_vm7, %v14786_v29, %v14773_v62  ;;  %v4896_v7 = vsel %vm4878_vm0, %v17205_v50, %v14903_v35  ;;  %v5545_v44 = vrot.slane %v5181_v25, 4  ;;  %v4893_v55 = vsel %vm4878_vm0, %v14702_v51, %v4869_v21  ;;  %v14928_v18 = vpop.permute.xlu1 %7034 }
 0x4f8   :  { %v4938_v24 = vmul.bf16 %v4896_v7, %v4835_v31  ;;  %v4894_v14 = vsel %vm4878_vm0, %v4869_v21, %v17206_v46  ;;  %v5542_v30 = vrot.slane %v5178_v15, 4  ;;  %v5543_v54 = vrot.slane %v5179_v17, 4  ;;  %v17329_v7 = vld [vmem:[#allocation87_spill] sm:$0xff] }
 0x4f9   :  { %v4935_v38 = vmul.bf16 %v4893_v55, %v4832_v57  ;;  %v4936_v41 = vmul.bf16 %v4894_v14, %v4833_v49  ;;  %v4268_v29 = vsel %vm4252_vm7, %v14773_v62, %v17319_v59  ;;  %v4024_v50 = vsel %vm151_vm2, %v14696_v4, %v14821_v42 }
 0x4fa   :  { %v5778_v48 = vsel %vm737_vm6, %v4938_v24, %v5545_v44  ;;  %v14931_v51 = vand.u32 31, %v1952_v23  ;;  %v4554_v46 = vmul.bf16 %v4511_v61, %v4451_v1  ;;  %v4310_v31 = vmul.bf16 %v4267_v2, %v4207_v10  ;;  %v14939_v25 = vpop.permute.xlu0 %7036  ;;  %v17320_v1 = vld [vmem:[#allocation134_spill] sm:$0xff]  ;;  %v17326_v23 = vld [vmem:[#allocation56_spill] sm:$0xff] }
 0x4fb   :  { %6194 = vmatprep.subr.bf16.mxu0 %v5778_v48  ;;  %v5770_v62 = vsel %vm737_vm6, %v4936_v41, %v5543_v54  ;;  %v5766_v27 = vsel %vm737_vm6, %v4935_v38, %v5542_v30  ;;  %v4552_v9 = vmul.bf16 %v4509_v33, %v4449_v52  ;;  %v4309_v19 = vmul.bf16 %v4266_v45, %v4206_v20  ;;  %v17321_v10 = vld [vmem:[#allocation42_spill] sm:$0xff]  ;;  %v14964_v49 = vpop.permute.xlu1 %7038  ;;  %v17327_v45 = vld [vmem:[#allocation41_spill] sm:$0xff] }
 0x4fc   :  { %v4025_v5 = vsel %vm151_vm2, %v14821_v42, %v17320_v1  ;;  %6153 = vmatprep.subr.bf16.mxu1 %v5770_v62  ;;  %6195 = vmatpush1.bf16.msra.mxu0 %v17321_v10  ;;  %v4959_v56 = vadd.s32 2, %v14889_v63  ;;  %v4311_v15 = vmul.bf16 %v4268_v29, %v4208_v47  ;;  %v4067_v17 = vmul.bf16 %v4024_v50, %v3944_v12  ;;  %v17330_v29 = vld [vmem:[#allocation91_spill] sm:$0xff]  ;;  %v17331_v50 = vld [vmem:[#allocation8_spill] sm:$0xff] }
 0x4fd   :  { %6154 = vmatpush1.bf16.msra.mxu1 %v5766_v27  ;;  %6196 = vmatprep.subr.bf16.mxu0 %v14584_v60  ;;  %v5690_v52 = vsel %vm737_vm6, %v4553_v58, %v17322_v3  ;;  %v17324_v20 = vmul.bf16 1.0|1.0, %v17323_v53  ;;  %v3943_v42 = vpack.c.bf16 %v14856_v8, %v14856_v8  ;;  %v4960_v28 = vadd.s32 2, %v14931_v51  ;;  %v17325_v60 = vld [vmem:[#allocation34_spill] sm:$0xff] }
 0x4fe   :  { %6155 = vmatprep.subr.bf16.mxu1 %v5690_v52  ;;  %v5202_v16 = vadd.s32 3, %v14889_v63  ;;  %v5203_v47 = vadd.s32 3, %v14931_v51  ;;  %v4023_v12 = vsel %vm151_vm2, %v17325_v60, %v14696_v4  ;;  %v5463_v61 = vrot.slane %v4310_v31, 4  ;;  %v14972_v33 = vpop.permute.xlu0 %4491 }
 0x4ff   :  { %v5502_v57 = vrot.slane %v17324_v20, 4  ;;  %v4068_v11 = vmul.bf16 %v4025_v5, %v3945_v40  ;;  %v5694_v8 = vsel %vm737_vm6, %v4554_v46, %v17326_v23  ;;  %v5462_v58 = vrot.slane %v4309_v19, 4  ;;  %v5120_v30 = vpop.permute.xlu1 %5119  ;;  %v17334_v19 = vld [vmem:[#allocation174_spill] sm:$0xff] }
 0x500   :  { %6197 = vmatpush1.bf16.msra.mxu0 %v5694_v8  ;;  %v17328_v2 = vrot.slane %v17327_v45, 4  ;;  %vm4999_vm12 = vcmp.lt.s32.totalorder %v4959_v56, 32  ;;  %v5464_v44 = vrot.slane %v4311_v15, 4  ;;  %v5610_v4 = vsel %vm737_vm6, %v4067_v17, %v5463_v61 }
 0x501   :  { %v5686_v32 = vsel %vm737_vm6, %v4552_v9, %v5502_v57  ;;  %v4334_v40 = vadd.s32 4294967295, %v14931_v51  ;;  %v4091_v24 = vadd.s32 4294967294, %v14931_v51  ;;  %v4066_v55 = vmul.bf16 %v4023_v12, %v3943_v42  ;;  %v17333_v9 = vld [vmem:[#allocation136_spill] sm:$0xff]  ;;  %v17336_v57 = vld [vmem:[#allocation73_spill] sm:$0xff] }
 0x502   :  { %v5618_v21 = vsel %vm737_vm6, %v17329_v7, %v17328_v2  ;;  %6156 = vmatpush1.bf16.msra.mxu1 %v5686_v32  ;;  %v4333_v14 = vadd.s32 4294967295, %v14889_v63  ;;  %vm5000_vm13 = vcmp.lt.s32.totalorder %v4960_v28, 32  ;;  %v4716_v54 = vadd.s32 1, %v14889_v63  ;;  %v14986_v38 = vpop.permute.xlu0 %4248  ;;  %v15023_v28 = vld [vmem:[%s16021_s13] sm:$0xf] }
 0x503   :  { %6198 = vmatprep.subr.bf16.mxu0 %v5618_v21  ;;  %6157 = vmatprep.subr.bf16.mxu1 %v5610_v4  ;;  %v5614_v41 = vsel %vm737_vm6, %v4068_v11, %v5464_v44  ;;  %vm5242_vm9 = vcmp.lt.s32.totalorder %v5202_v16, 32  ;;  %vm5243_vm11 = vcmp.lt.s32.totalorder %v5203_v47, 32  ;;  %v4717_v59 = vadd.s32 1, %v14931_v51  ;;  %v4494_v10 = vpop.permute.xlu1 %4493  ;;  %v17338_v47 = vld [vmem:[#allocation47_spill] sm:$0xff]  ;;  %v17339_v4 = vld [vmem:[#allocation52_spill] sm:$0xff] }
 0x504   :  { %vm17332_vm3 = vcmask 809984   ;;  %v9104_v46 = vsel %vm4999_vm12, 1.0, %v16771_v37  ;;  %v4090_v31 = vadd.s32 4294967294, %v14889_v63  ;;  %6199 = vmatpush1.bf16.msra.mxu0 %v5614_v41  ;;  %v5606_v62 = vsel %vm737_vm6, %v4066_v55, %v5462_v58  ;;  %v17340_v55 = vld [vmem:[#allocation82_spill] sm:$0xff] }
 0x505   :  { %v14993_v48 = vsel %vm17332_vm3, %v17331_v50, %v17330_v29  ;;  %v9105_v27 = vsel %vm5000_vm13, 1.0, %v16771_v37  ;;  %9166 = vmatprep.subr.msk.bf16.mxu0 %vm737_vm6, %v17333_v9  ;;  %vm4354_vm5 = vcmp.ge.s32.totalorder %v4334_v40, 0  ;;  %vm4111_vm8 = vcmp.ge.s32.totalorder %v4091_v24, 0 }
 0x506   :  { %6158 = vmatpush1.bf16.msra.mxu1 %v5606_v62  ;;  %v4697_v1 = vmul.bf16 1.0|1.0, %v17334_v19  ;;  %v15004_v5 = vadd.s32 4294967293, %v14889_v63  ;;  %vm4353_vm10 = vcmp.ge.s32.totalorder %v4333_v14, 0  ;;  %v9124_v56 = vsel %vm5242_vm9, 1.0, %v16771_v37  ;;  %v15011_v52 = vpop.permute.xlu0 %4007 }
 0x507   :  { %v9125_v15 = vsel %vm5243_vm11, 1.0, %v16771_v37  ;;  %v5079_v17 = vpack.c.bf16 %v9104_v46, %v9104_v46  ;;  %v3828_v3 = vadd.s32 4294967293, %v14931_v51  ;;  %vm17335_vm12 = vcmask 457728   ;;  %v4251_v11 = vpop.permute.xlu1 %4250  ;;  %v17342_v46 = vld [vmem:[#allocation155_spill] sm:$0xff] }
 0x508   :  { %9143 = vmatmul.mubr.msk.bf16.vlgmr.msra.gmra.mxu0 %vm17335_vm12, %v14188_v26  ;;  %vm4756_vm13 = vcmp.lt.s32.totalorder %v4716_v54, 32  ;;  %vm4757_vm3 = vcmp.lt.s32.totalorder %v4717_v59, 32  ;;  %v5080_v53 = vpack.c.bf16 %v9105_v27, %v9105_v27  ;;  %vm4110_vm4 = vcmp.ge.s32.totalorder %v4090_v31, 0  ;;  %vm17337_vm9 = vmmov %vm17335_vm12 }
 0x509   :  { %v9065_v20 = vsel %vm4354_vm5, 1.0, %v16771_v37  ;;  %7359 = vmatpush1.bf16.msra.mxu0 %v17336_v57  ;;  %v9045_v42 = vsel %vm4111_vm8, 1.0, %v16771_v37  ;;  %9141 = vmatmul.mubr.msk.bf16.vlgmr.msra.gmra.mxu1 %vm17337_vm9, %v15023_v28  ;;  %v5140_v26 = vsel %vm5121_vm15, %v14872_v36, %v5120_v30  ;;  %v5162_v16 = vsel %vm5121_vm15, %v5120_v30, 0  ;;  %v17344_v57 = vld [vmem:[#allocation156_spill] sm:$0xff] }
 0x50a   :  { %7360 = vmatprep.subr.bf16.mxu0 %v17338_v47  ;;  %v5322_v60 = vpack.c.bf16 %v9124_v56, %v9124_v56  ;;  %v5323_v12 = vpack.c.bf16 %v9125_v15, %v9125_v15  ;;  %7382 = vmatprep.mubr.bf16.mxu0 %v14232_v43  ;;  %vm3847_vm11 = vcmp.ge.s32.totalorder %v15004_v5, 0  ;;  %v9064_v61 = vsel %vm4353_vm10, 1.0, %v16771_v37  ;;  %v5363_v45 = vpop.permute.xlu0 %5362 }
 0x50b   :  { %v9084_v23 = vsel %vm4756_vm13, 1.0, %v16771_v37  ;;  %v9085_v36 = vsel %vm4757_vm3, 1.0, %v16771_v37  ;;  %6257 = vmatprep.mubr.bf16.mxu1 %v14232_v43  ;;  %v9044_v8 = vsel %vm4110_vm4, 1.0, %v16771_v37  ;;  %v4454_v58 = vpack.c.bf16 %v9065_v20, %v9065_v20  ;;  %v15051_v29 = vpop.permute.xlu1 %6992 }
 0x50c   :  { %vm3848_vm15 = vcmp.ge.s32.totalorder %v3828_v3, 0  ;;  %v4211_v32 = vpack.c.bf16 %v9045_v42, %v9045_v42  ;;  %v5182_v2 = vmul.bf16 %v5140_v26, %v5079_v17  ;;  %v5183_v7 = vmul.bf16 %v5162_v16, %v5080_v53  ;;  %v17345_v42 = vld [vmem:[#allocation13_spill] sm:$0xff]  ;;  %v17346_v26 = vld [vmem:[#allocation11_spill] sm:$0xff] }
 0x50d   :  { %v5383_v21 = vsel %vm5364_vm14, %v14835_v39, %v5363_v45  ;;  %v5405_v44 = vsel %vm5364_vm14, %v5363_v45, 0  ;;  %7361 = vmatpush1.bf16.msra.mxu0 %v17339_v4  ;;  %v4836_v43 = vpack.c.bf16 %v9084_v23, %v9084_v23  ;;  %v4837_v14 = vpack.c.bf16 %v9085_v36, %v9085_v36  ;;  %v17341_v39 = vld [vmem:[#allocation90_spill] sm:$0xff] }
 0x50e   :  { %v5425_v40 = vmul.bf16 %v5383_v21, %v5322_v60  ;;  %v5426_v24 = vmul.bf16 %v5405_v44, %v5323_v12  ;;  %7362 = vmatprep.subr.bf16.mxu0 %v17340_v55  ;;  %v4453_v30 = vpack.c.bf16 %v9064_v61, %v9064_v61  ;;  %v4210_v54 = vpack.c.bf16 %v9044_v8, %v9044_v8  ;;  %v4877_v27 = vpop.permute.xlu0 %4876  ;;  %v17348_v60 = vld [vmem:[#allocation95_spill] sm:$0xff]  ;;  %v17350_v61 = vld [vmem:[#allocation172_spill] sm:$0xff] }
 0x50f   :  { %v4514_v41 = vsel %vm4495_vm1, %v14972_v33, %v4494_v10  ;;  %v4271_v59 = vsel %vm4252_vm7, %v14986_v38, %v4251_v11  ;;  %v4513_v50 = vsel %vm4495_vm1, %v17341_v39, %v14972_v33  ;;  %v4270_v31 = vsel %vm4252_vm7, %v17342_v46, %v14986_v38  ;;  %v17343_v33 = vld [vmem:[#allocation4_spill] sm:$0xff]  ;;  %v15071_v47 = vpop.permute.xlu1 %6996 }
 0x510   :  { %v9025_v62 = vsel %vm3848_vm15, 1.0, %v16771_v37  ;;  %9144 = vmatprep.subr.msk.bf16.mxu1 %vm737_vm6, %v5426_v24  ;;  %v5852_v9 = vsel %vm737_vm6, %v5425_v40, 0  ;;  %v5546_v10 = vrot.slane %v5182_v2, 4  ;;  %v5547_v56 = vrot.slane %v5183_v7, 4 }
 0x511   :  { %v4897_v15 = vsel %vm4878_vm0, %v14903_v35, %v4877_v27  ;;  %v4919_v17 = vsel %vm4878_vm0, %v4877_v27, 0  ;;  %6234 = vmatpush1.bf16.msra.mxu1 %v5852_v9  ;;  %7363 = vmatpush1.bf16.msra.mxu0 %v17343_v33  ;;  %v4557_v53 = vmul.bf16 %v4514_v41, %v4454_v58  ;;  %v4314_v38 = vmul.bf16 %v4271_v59, %v4211_v32  ;;  %vm17352_vm0 = vmmov %vm17337_vm9  ;;  %v15111_v59 = vld [vmem:[#allocation2] sm:$0xff]  ;;  %v17358_v9 = vld [vmem:[#allocation158_spill] sm:$0xff] }
 0x512   :  { %v4939_v20 = vmul.bf16 %v4897_v15, %v4836_v43  ;;  %v4940_v3 = vmul.bf16 %v4919_v17, %v4837_v14  ;;  %7364 = vmatprep.subr.bf16.mxu0 %v17344_v57  ;;  %vm17347_vm4 = vcmask 809984   ;;  %v5507_v12 = vrot.slane %v4697_v1, 4  ;;  %v15082_v8 = vpop.permute.xlu0 %7040  ;;  %v15093_v1 = vld [vmem:[%s16023_s15] sm:$0xf]  ;;  %v17361_v15 = vld [vmem:[#allocation10_spill] sm:$0xff]  ;;  %vm17367_vm12 = vmmov %vm17352_vm0 }
 0x513   :  { %v7211_v16 = vsel %vm17347_vm4, %v17346_v26, %v17345_v42  ;;  %vm17349_vm14 = vmmov %vm17347_vm4  ;;  %v4696_v11 = vmul.bf16 1.0|1.0, %v17350_v61  ;;  %v9024_v23 = vsel %vm3847_vm11, 1.0, %v16771_v37  ;;  %v3948_v36 = vpack.c.bf16 %v9025_v62, %v9025_v62  ;;  %v15097_v44 = vpop.permute.xlu1 %7126  ;;  %v17362_v17 = vld [vmem:[#allocation33_spill] sm:$0xff] }
 0x514   :  { %v7212_v35 = vsel %vm17349_vm14, %v17345_v42, %v17348_v60  ;;  %v5786_v58 = vsel %vm737_vm6, %v4940_v3, %v5547_v56  ;;  %v5782_v32 = vsel %vm737_vm6, %v4939_v20, %v5546_v10  ;;  %v4556_v45 = vmul.bf16 %v4513_v50, %v4453_v30  ;;  %v17353_v30 = vld [vmem:[#allocation96_spill] sm:$0xff]  ;;  %vm17355_vm7 = vmmov %vm17347_vm4  ;;  %v17359_v10 = vld [vmem:[#allocation114_spill] sm:$0xff] }
 0x515   :  { %v4313_v2 = vmul.bf16 %v4270_v31, %v4210_v54  ;;  %v4028_v19 = vsel %vm151_vm2, %v14809_v34, %v15011_v52  ;;  %6235 = vmatprep.subr.bf16.mxu1 %v5786_v58  ;;  %7365 = vmatpush1.bf16.msra.mxu0 %v14993_v48  ;;  %v5467_v5 = vrot.slane %v4314_v38, 4  ;;  %v5706_v7 = vsel %vm737_vm6, %v4557_v53, %v5507_v12  ;;  %v17351_v52 = vld [vmem:[#allocation89_spill] sm:$0xff]  ;;  %v17354_v54 = vld [vmem:[#allocation99_spill] sm:$0xff] }
 0x516   :  { %6236 = vmatpush1.bf16.msra.mxu1 %v5782_v32  ;;  %9170 = vmatprep.subr.msk.bf16.mxu0 %vm737_vm6, %v7212_v35  ;;  %v3947_v21 = vpack.c.bf16 %v9024_v23, %v9024_v23  ;;  %v5506_v4 = vrot.slane %v4696_v11, 4  ;;  %v4027_v48 = vsel %vm151_vm2, %v17351_v52, %v14809_v34  ;;  %v4071_v40 = vmul.bf16 %v4028_v19, %v3948_v36  ;;  %v15102_v24 = vpop.permute.xlu0 %6994  ;;  %v17356_v31 = vld [vmem:[#allocation97_spill] sm:$0xff]  ;;  %vm17357_vm2 = vmmov %vm17347_vm4  ;;  %v17365_v3 = vld [vmem:[#allocation83_spill] sm:$0xff] }
 0x517   :  { %6237 = vmatprep.subr.bf16.mxu1 %v5706_v7  ;;  %v7303_v55 = vsel %vm737_vm6, %v7211_v16, 0  ;;  %v5466_v43 = vrot.slane %v4313_v2, 4  ;;  %v7192_v41 = vsel %vm17355_vm7, %v17354_v54, %v17353_v30  ;;  %v15115_v50 = vpop.permute.xlu1 %7130  ;;  %v7191_v62 = vsel %vm17357_vm2, %v17356_v31, %v17354_v54  ;;  %vm17360_vm1 = vmmov %vm17357_vm2  ;;  %v17368_v16 = vld [vmem:[#allocation61_spill] sm:$0xff]  ;;  %v17369_v35 = vld [vmem:[#allocation176_spill] sm:$0xff] }
 0x518   :  { %9167 = vmatmul.mubr.msk.bf16.vlgmr.msra.gmra.mxu0 %vm17352_vm0, %v15093_v1  ;;  %v5702_v14 = vsel %vm737_vm6, %v4556_v45, %v5506_v4  ;;  %v5626_v34 = vsel %vm737_vm6, %v4071_v40, %v5467_v5  ;;  %v4070_v39 = vmul.bf16 %v4027_v48, %v3947_v21  ;;  %v7172_v56 = vsel %vm17360_vm1, %v17359_v10, %v17358_v9  ;;  %vm17363_vm5 = vmmov %vm17360_vm1  ;;  %v17371_v12 = vld [vmem:[#allocation15_spill] sm:$0xff]  ;;  %v17375_v58 = vld [vmem:[#allocation113_spill] sm:$0xff] }
 0x519   :  { %7441 = vmatpush1.bf16.msra.mxu0 %v7303_v55  ;;  %7464 = vmatprep.mubr.bf16.mxu0 %v15111_v59  ;;  %v7209_v33 = vsel %vm17363_vm5, %v17362_v17, %v17361_v15  ;;  %vm17364_vm8 = vmmov %vm17360_vm1  ;;  %v17376_v32 = vld [vmem:[#allocation143_spill] sm:$0xff]  ;;  %v17378_v2 = vld [vmem:[#allocation78_spill] sm:$0xff] }
 0x51a   :  { %6238 = vmatpush1.bf16.msra.mxu1 %v5702_v14  ;;  %7442 = vmatprep.subr.bf16.mxu0 %v7192_v41  ;;  %v15117_v46 = vpop.permute.xlu0 %6998  ;;  %v5622_v27 = vsel %vm737_vm6, %v4070_v39, %v5466_v43  ;;  %v7210_v53 = vsel %vm17364_vm8, %v17361_v15, %v17346_v26  ;;  %vm17366_vm10 = vmmov %vm17360_vm1  ;;  %v7297_v42 = vsel %vm737_vm6, %v7209_v33, 0  ;;  %v17380_v5 = vld [vmem:[#allocation181_spill] sm:$0xff]  ;;  %v17382_v21 = vld [vmem:[#allocation170_spill] sm:$0xff] }
 0x51b   :  { %6239 = vmatprep.subr.bf16.mxu1 %v5626_v34  ;;  %v15133_v38 = vpop.permute.xlu1 %7084  ;;  %v7171_v57 = vsel %vm17366_vm10, %v17365_v3, %v17359_v10  ;;  %vm17370_vm13 = vmmov %vm17360_vm1  ;;  %v17384_v55 = vld [vmem:[#allocation80_spill] sm:$0xff]  ;;  %v17389_v34 = vld [vmem:[#allocation173_spill] sm:$0xff] }
 0x51c   :  { %v7152_v26 = vsel %vm17370_vm13, %v17369_v35, %v17368_v16  ;;  %vm17372_vm3 = vmmov %vm17360_vm1  ;;  %v17386_v14 = vld [vmem:[#allocation188_spill] sm:$0xff]  ;;  %v17395_v33 = vld [vmem:[#allocation19_spill] sm:$0xff] }
 0x51d   :  { %7443 = vmatpush1.bf16.msra.mxu0 %v7191_v62  ;;  %v7190_v61 = vsel %vm17372_vm3, %v17371_v12, %v17356_v31  ;;  %vm17374_vm9 = vmmov %vm17360_vm1  ;;  %v17387_v54 = vld [vmem:[#allocation140_spill] sm:$0xff] }
 0x51e   :  { %6240 = vmatpush1.bf16.msra.mxu1 %v5622_v27  ;;  %7444 = vmatprep.subr.bf16.mxu0 %v7172_v56  ;;  %v15135_v20 = vpop.permute.xlu0 %7128  ;;  %vm17377_vm11 = vmmov %vm17360_vm1  ;;  %v17390_v27 = vld [vmem:[#allocation117_spill] sm:$0xff]  ;;  %v17392_v56 = vld [vmem:[#allocation88_spill] sm:$0xff] }
 0x51f   :  { %9168 = vmatprep.subr.msk.bf16.mxu1 %vm737_vm6, %v7210_v53  ;;  %v15149_v11 = vpop.permute.xlu1 %7088  ;;  %v7215_v45 = vsel %vm17377_vm11, %v17376_v32, %v17375_v58  ;;  %vm17379_vm15 = vmmov %vm17360_vm1 }
 0x520   :  { %v7189_v19 = vsel %vm17379_vm15, %v17378_v2, %v17371_v12  ;;  %vm17381_vm4 = vmmov %vm17360_vm1  ;;  %v7315_v40 = vsel %vm737_vm6, %v7215_v45, 0  ;;  %v17401_v12 = vld [vmem:[#allocation175_spill] sm:$0xff] }
 0x521   :  { %9145 = vmatmul.mubr.msk.bf16.vlgmr.msra.gmra.mxu1 %vm17367_vm12, %v15023_v28  ;;  %7445 = vmatpush1.bf16.msra.mxu0 %v7171_v57  ;;  %v17373_v28 = vld [vmem:[#allocation167_spill] sm:$0xff]  ;;  %v7216_v7 = vsel %vm17381_vm4, %v17375_v58, %v17380_v5  ;;  %vm17383_vm14 = vmmov %vm17360_vm1 }
 0x522   :  { %7400 = vmatpush1.bf16.msra.mxu1 %v7297_v42  ;;  %7446 = vmatprep.subr.bf16.mxu0 %v7152_v26  ;;  %v15152_v23 = vpop.permute.xlu0 %7132  ;;  %v7151_v36 = vsel %vm17374_vm9, %v17373_v28, %v17369_v35  ;;  %v7170_v4 = vsel %vm17383_vm14, %v17382_v21, %v17365_v3  ;;  %vm17385_vm7 = vmmov %vm17360_vm1  ;;  %v7150_v39 = vsel %vm17360_vm1, %v17389_v34, %v17373_v28 }
 0x523   :  { %7401 = vmatprep.subr.bf16.mxu1 %v7190_v61  ;;  %7423 = vmatprep.mubr.bf16.mxu1 %v15111_v59  ;;  %v15170_v52 = vpop.permute.xlu1 %7042  ;;  %v7169_v43 = vsel %vm17385_vm7, %v17384_v55, %v17382_v21  ;;  %vm17388_vm2 = vmmov %vm17360_vm1 }
 0x524   :  { %v7196_v41 = vsel %vm17388_vm2, %v17387_v54, %v17386_v14  ;;  %vm17391_vm5 = vmmov %vm17360_vm1 }
 0x525   :  { %7447 = vmatpush1.bf16.msra.mxu0 %v7151_v36  ;;  %v7195_v10 = vsel %vm17391_vm5, %v17390_v27, %v17387_v54  ;;  %vm17393_vm8 = vmmov %vm17360_vm1 }
 0x526   :  { %7402 = vmatpush1.bf16.msra.mxu1 %v7189_v19  ;;  %9174 = vmatprep.subr.msk.bf16.mxu0 %vm737_vm6, %v7216_v7  ;;  %v15172_v48 = vpop.permute.xlu0 %7086  ;;  %v7149_v15 = vsel %vm17393_vm8, %v17392_v56, %v17389_v34  ;;  %vm17394_vm10 = vmmov %vm17360_vm1 }
 0x527   :  { %7403 = vmatprep.subr.bf16.mxu1 %v7170_v4  ;;  %v7047_v31 = vpop.permute.xlu1 %7046  ;;  %v7176_v17 = vsel %vm17394_vm10, %v14964_v49, %v15082_v8  ;;  %vm17396_vm12 = vmmov %vm17360_vm1 }
 0x528   :  { %9171 = vmatmul.mubr.msk.bf16.vlgmr.msra.gmra.mxu0 %vm17352_vm0, %v15093_v1  ;;  %v7213_v53 = vsel %vm17396_vm12, %v17348_v60, %v17395_v33  ;;  %vm17397_vm13 = vmmov %vm17360_vm1 }
 0x529   :  { %7523 = vmatpush1.bf16.msra.mxu0 %v7315_v40  ;;  %7546 = vmatprep.mubr.bf16.mxu0 %v15111_v59  ;;  %v7214_v3 = vsel %vm17397_vm13, %v17395_v33, %v17376_v32  ;;  %vm17398_vm3 = vmmov %vm17360_vm1  ;;  %v7309_v60 = vsel %vm737_vm6, %v7213_v53, 0 }
 0x52a   :  { %7404 = vmatpush1.bf16.msra.mxu1 %v7169_v43  ;;  %7524 = vmatprep.subr.bf16.mxu0 %v7196_v41  ;;  %v15187_v62 = vpop.permute.xlu0 %7090  ;;  %v7175_v35 = vsel %vm17398_vm3, %v14939_v25, %v14964_v49  ;;  %vm17399_vm9 = vmmov %vm17352_vm0 }
 0x52b   :  { %7405 = vmatprep.subr.bf16.mxu1 %v7150_v39  ;;  %v15205_v57 = vpop.permute.xlu1 %7000  ;;  %vm17400_vm11 = vmmov %vm17360_vm1 }
 0x52c   :  { %v7156_v26 = vsel %vm17400_vm11, %v15071_v47, %v15117_v46  ;;  %vm17402_vm15 = vmmov %vm17360_vm1 }
 0x52d   :  { %7525 = vmatpush1.bf16.msra.mxu0 %v7195_v10  ;;  %v7194_v61 = vsel %vm17402_vm15, %v17401_v12, %v17390_v27  ;;  %vm17403_vm4 = vmmov %vm17360_vm1 }
 0x52e   :  { %7406 = vmatpush1.bf16.msra.mxu1 %v7149_v15  ;;  %7526 = vmatprep.subr.bf16.mxu0 %v7176_v17  ;;  %v15207_v42 = vpop.permute.xlu0 %7044  ;;  %v7155_v36 = vsel %vm17403_vm4, %v15102_v24, %v15071_v47  ;;  %vm17404_vm14 = vmmov %vm17360_vm1 }
 0x52f   :  { %9172 = vmatprep.subr.msk.bf16.mxu1 %vm737_vm6, %v7214_v3  ;;  %v7005_v28 = vpop.permute.xlu1 %7004  ;;  %v7219_v58 = vsel %vm17404_vm14, %v15135_v20, %v15115_v50  ;;  %vm17405_vm0 = vmmov %vm17360_vm1 }
 0x530   :  { %v7193_v32 = vsel %vm17405_vm0, %v17353_v30, %v17401_v12  ;;  %vm17406_vm7 = vmmov %vm17405_vm0  ;;  %v7327_v30 = vsel %vm737_vm6, %v7219_v58, 0 }
 0x531   :  { %9169 = vmatmul.mubr.msk.bf16.vlgmr.msra.gmra.mxu1 %vm17399_vm9, %v15093_v1  ;;  %7527 = vmatpush1.bf16.msra.mxu0 %v7175_v35  ;;  %v7220_v45 = vsel %vm17406_vm7, %v15115_v50, %v15152_v23  ;;  %vm17407_vm2 = vmmov %vm17405_vm0 }
 0x532   :  { %7482 = vmatpush1.bf16.msra.mxu1 %v7309_v60  ;;  %7528 = vmatprep.subr.bf16.mxu0 %v7156_v26  ;;  %v15222_v49 = vpop.permute.xlu0 %7048  ;;  %v7174_v47 = vsel %vm17407_vm2, %v14928_v18, %v14939_v25  ;;  %vm17408_vm1 = vmmov %vm17399_vm9 }
 0x533   :  { %7483 = vmatprep.subr.bf16.mxu1 %v7194_v61  ;;  %7505 = vmatprep.mubr.bf16.mxu1 %v15111_v59  ;;  %v15240_v2 = vpop.permute.xlu1 %7134  ;;  %vm17409_vm5 = vmmov %vm17405_vm0 }
 0x534   :  { %v7173_v50 = vsel %vm17409_vm5, %v17358_v9, %v14928_v18  ;;  %vm17410_vm8 = vmmov %vm17405_vm0 }
 0x535   :  { %7529 = vmatpush1.bf16.msra.mxu0 %v7155_v36  ;;  %v7200_v7 = vsel %vm17410_vm8, %v15149_v11, %v15187_v62  ;;  %vm17411_vm10 = vmmov %vm17405_vm0 }
 0x536   :  { %7484 = vmatpush1.bf16.msra.mxu1 %v7193_v32  ;;  %9178 = vmatprep.subr.msk.bf16.mxu0 %vm737_vm6, %v7220_v45  ;;  %v7003_v19 = vpop.permute.xlu0 %7002  ;;  %v7154_v25 = vsel %vm17411_vm10, %v15051_v29, %v15102_v24  ;;  %vm17412_vm12 = vmmov %vm17405_vm0 }
 0x537   :  { %7485 = vmatprep.subr.bf16.mxu1 %v7174_v47  ;;  %v7139_v21 = vpop.permute.xlu1 %7138  ;;  %v7199_v18 = vsel %vm17412_vm12, %v15172_v48, %v15149_v11  ;;  %vm17413_vm13 = vmmov %vm17405_vm0 }
 0x538   :  { %9175 = vmatmul.mubr.msk.bf16.vlgmr.msra.gmra.mxu0 %vm17408_vm1, %v15093_v1  ;;  %v7153_v9 = vsel %vm17413_vm13, %v17368_v16, %v15051_v29  ;;  %vm17414_vm3 = vmmov %vm17405_vm0 }
 0x539   :  { %7605 = vmatpush1.bf16.msra.mxu0 %v7327_v30  ;;  %7628 = vmatprep.mubr.bf16.mxu0 %v15111_v59  ;;  %v7180_v40 = vsel %vm17414_vm3, %v7047_v31, %v15222_v49  ;;  %vm17415_vm9 = vmmov %vm17405_vm0 }
 0x53a   :  { %7486 = vmatpush1.bf16.msra.mxu1 %v7173_v50  ;;  %7606 = vmatprep.subr.bf16.mxu0 %v7200_v7  ;;  %v15255_v4 = vpop.permute.xlu0 %7006  ;;  %v7217_v24 = vsel %vm17415_vm9, %v17380_v5, %v15097_v44  ;;  %vm17416_vm11 = vmmov %vm17405_vm0 }
 0x53b   :  { %7487 = vmatprep.subr.bf16.mxu1 %v7154_v25  ;;  %v7218_v55 = vsel %vm17416_vm11, %v15097_v44, %v15135_v20  ;;  %v7093_v11 = vpop.permute.xlu1 %7092  ;;  %vm17417_vm15 = vmmov %vm17405_vm0  ;;  %v7321_v16 = vsel %vm737_vm6, %v7217_v24, 0  ;;  %v7198_v44 = vsel %vm17405_vm0, %v15133_v38, %v15172_v48 }
 0x53c   :  { %v7179_v29 = vsel %vm17417_vm15, %v15207_v42, %v7047_v31  ;;  %vm17418_vm4 = vmmov %vm17408_vm1 }
 0x53d   :  { %7607 = vmatpush1.bf16.msra.mxu0 %v7199_v18  ;;  %vm17419_vm14 = vmmov %vm17405_vm0 }
 0x53e   :  { %7488 = vmatpush1.bf16.msra.mxu1 %v7153_v9  ;;  %7608 = vmatprep.subr.bf16.mxu0 %v7180_v40  ;;  %v7137_v43 = vpop.permute.xlu0 %7136  ;;  %v7160_v5 = vsel %vm17419_vm14, %v7005_v28, %v15255_v4  ;;  %vm17420_vm7 = vmmov %vm17405_vm0 }
 0x53f   :  { %9176 = vmatprep.subr.msk.bf16.mxu1 %vm737_vm6, %v7218_v55  ;;  %v7097_v20 = vpop.permute.xlu1 %7096  ;;  %v7159_v41 = vsel %vm17420_vm7, %v7003_v19, %v7005_v28  ;;  %vm17421_vm2 = vmmov %vm17405_vm0 }
 0x540   :  { %v7223_v34 = vsel %vm17421_vm2, %v7137_v43, %v7139_v21  ;;  %vm17422_vm1 = vmmov %vm17405_vm0 }
 0x541   :  { %9173 = vmatmul.mubr.msk.bf16.vlgmr.msra.gmra.mxu1 %vm17418_vm4, %v15093_v1  ;;  %7609 = vmatpush1.bf16.msra.mxu0 %v7179_v29  ;;  %v7197_v39 = vsel %vm17422_vm1, %v17386_v14, %v15133_v38  ;;  %vm17423_vm5 = vmmov %vm17405_vm0  ;;  %v7339_v56 = vsel %vm737_vm6, %v7223_v34, 0 }
 0x542   :  { %7564 = vmatpush1.bf16.msra.mxu1 %v7321_v16  ;;  %7610 = vmatprep.subr.bf16.mxu0 %v7160_v5  ;;  %v7141_v54 = vpop.permute.xlu0 %7140  ;;  %vm17424_vm8 = vmmov %vm17405_vm0 }
 0x543   :  { %7565 = vmatprep.subr.bf16.mxu1 %v7198_v44  ;;  %7587 = vmatprep.mubr.bf16.mxu1 %v15111_v59  ;;  %v7224_v31 = vsel %vm17423_vm5, %v7139_v21, %v7141_v54  ;;  %v7178_v48 = vsel %vm17424_vm8, %v15170_v52, %v15207_v42  ;;  %v7051_v27 = vpop.permute.xlu1 %7050  ;;  %vm17425_vm10 = vmmov %vm17418_vm4 }
 0x544   :  { %vm17426_vm12 = vmmov %vm17405_vm0 }
 0x545   :  { %7611 = vmatpush1.bf16.msra.mxu0 %v7159_v41  ;;  %v7177_v38 = vsel %vm17426_vm12, %v15082_v8, %v15170_v52  ;;  %vm17427_vm13 = vmmov %vm17405_vm0 }
 0x546   :  { %7566 = vmatpush1.bf16.msra.mxu1 %v7197_v39  ;;  %9182 = vmatprep.subr.msk.bf16.mxu0 %vm737_vm6, %v7224_v31  ;;  %v7095_v10 = vpop.permute.xlu0 %7094  ;;  %v7158_v14 = vsel %vm17427_vm13, %v15205_v57, %v7003_v19  ;;  %vm17428_vm3 = vmmov %vm17405_vm0 }
 0x547   :  { %7567 = vmatprep.subr.bf16.mxu1 %v7178_v48  ;;  %v7055_v15 = vpop.permute.xlu1 %7054  ;;  %v7157_v33 = vsel %vm17428_vm3, %v15117_v46, %v15205_v57  ;;  %vm17429_vm9 = vmmov %vm17405_vm0 }
 0x548   :  { %9179 = vmatmul.mubr.msk.bf16.vlgmr.msra.gmra.mxu0 %vm17425_vm10, %v15093_v1  ;;  %vm17430_vm11 = vmmov %vm17405_vm0 }
 0x549   :  { %7687 = vmatpush1.bf16.msra.mxu0 %v7339_v56  ;;  %7710 = vmatprep.mubr.bf16.mxu0 %v15111_v59  ;;  %v7221_v3 = vsel %vm17430_vm11, %v15152_v23, %v15240_v2  ;;  %vm17431_vm15 = vmmov %vm17405_vm0  ;;  %v7202_v23 = vsel %vm17405_vm0, %v7093_v11, %v7095_v10 }
 0x54a   :  { %7568 = vmatpush1.bf16.msra.mxu1 %v7177_v38  ;;  %v7099_v17 = vpop.permute.xlu0 %7098  ;;  %v7222_v8 = vsel %vm17431_vm15, %v15240_v2, %v7137_v43  ;;  %vm17432_vm4 = vmmov %vm17405_vm0  ;;  %v7333_v46 = vsel %vm737_vm6, %v7221_v3, 0 }
 0x54b   :  { %7569 = vmatprep.subr.bf16.mxu1 %v7158_v14  ;;  %v7204_v53 = vsel %vm17429_vm9, %v7097_v20, %v7099_v17  ;;  %v7203_v52 = vsel %vm17432_vm4, %v7095_v10, %v7097_v20  ;;  %v7009_v42 = vpop.permute.xlu1 %7008  ;;  %vm17433_vm14 = vmmov %vm17425_vm10 }
 0x54c   :  { %7688 = vmatprep.subr.bf16.mxu0 %v7204_v53  ;;  %vm17434_vm7 = vmmov %vm17405_vm0 }
 0x54d   :  { %7689 = vmatpush1.bf16.msra.mxu0 %v7203_v52  ;;  %v7201_v26 = vsel %vm17434_vm7, %v15187_v62, %v7093_v11  ;;  %vm17435_vm2 = vmmov %vm17405_vm0 }
 0x54e   :  { %7570 = vmatpush1.bf16.msra.mxu1 %v7157_v33  ;;  %v7053_v35 = vpop.permute.xlu0 %7052  ;;  %vm17436_vm1 = vmmov %vm17405_vm0 }
 0x54f   :  { %9180 = vmatprep.subr.msk.bf16.mxu1 %vm737_vm6, %v7222_v8  ;;  %v7013_v57 = vpop.permute.xlu1 %7012  ;;  %v7183_v61 = vsel %vm17436_vm1, %v7053_v35, %v7055_v15  ;;  %vm17437_vm5 = vmmov %vm17405_vm0 }
 0x550   :  { %v7182_v28 = vsel %vm17437_vm5, %v7051_v27, %v7053_v35  ;;  %vm17438_vm8 = vmmov %vm17405_vm0 }
 0x551   :  { %9177 = vmatmul.mubr.msk.bf16.vlgmr.msra.gmra.mxu1 %vm17433_vm14, %v15093_v1  ;;  %v7181_v58 = vsel %vm17438_vm8, %v15222_v49, %v7051_v27  ;;  %vm17439_vm10 = vmmov %vm17405_vm0 }
 0x552   :  { %7646 = vmatpush1.bf16.msra.mxu1 %v7333_v46  ;;  %7669 = vmatprep.mubr.bf16.mxu1 %v15111_v59  ;;  %v7057_v60 = vpop.permute.xlu0 %7056  ;;  %vm17440_vm12 = vmmov %vm17405_vm0 }
 0x553   :  { %7647 = vmatprep.subr.bf16.mxu1 %v7202_v23  ;;  %v7184_v12 = vsel %vm17435_vm2, %v7055_v15, %v7057_v60  ;;  %v7161_v47 = vsel %vm17440_vm12, %v15255_v4, %v7009_v42  ;;  %vm17441_vm13 = vmmov %vm17405_vm0 }
 0x554   :  { %7690 = vmatprep.subr.bf16.mxu0 %v7184_v12  ;;  %v7143_v32 = vpop.permute.xlu1 %7142  ;;  %vm17442_vm3 = vmmov %vm17405_vm0 }
 0x555   :  { %7691 = vmatpush1.bf16.msra.mxu0 %v7183_v61  ;;  %vm17443_vm9 = vmmov %vm17405_vm0 }
 0x556   :  { %7648 = vmatpush1.bf16.msra.mxu1 %v7201_v26  ;;  %v7011_v36 = vpop.permute.xlu0 %7010  ;;  %v7225_v30 = vsel %vm17443_vm9, %v7141_v54, %v7143_v32  ;;  %vm17444_vm11 = vmmov %vm17405_vm0 }
 0x557   :  { %7649 = vmatprep.subr.bf16.mxu1 %v7182_v28  ;;  %v7162_v45 = vsel %vm17439_vm10, %v7009_v42, %v7011_v36  ;;  %v7163_v19 = vsel %vm17442_vm3, %v7011_v36, %v7013_v57  ;;  %vm17445_vm15 = vmmov %vm17433_vm14  ;;  %v7345_v25 = vsel %vm737_vm6, %v7225_v30, 0 }
 0x558   :  { %vm17446_vm4 = vmmov %vm17433_vm14 }
 0x559   :  { %v7101_v50 = vpop.permute.xlu1 %7100  ;;  %vm17447_vm14 = vmmov %vm17405_vm0 }
 0x55a   :  { %7650 = vmatpush1.bf16.msra.mxu1 %v7181_v58  ;;  %v7015_v62 = vpop.permute.xlu0 %7014  ;;  %v7205_v9 = vsel %vm17405_vm0, %v7099_v17, %v7101_v50  ;;  %vm17448_vm7 = vmmov %vm17405_vm0 }
 0x55b   :  { %7651 = vmatprep.subr.bf16.mxu1 %v7162_v45  ;;  %v7164_v2 = vsel %vm17441_vm13, %v7013_v57, %v7015_v62  ;;  %vm17449_vm2 = vmmov %vm17405_vm0  ;;  %v17453_v45 = vld [vmem:[#allocation110_spill] sm:$0xff] }
 0x55c   :  { %7692 = vmatprep.subr.bf16.mxu0 %v7164_v2  ;;  %vm17450_vm1 = vmmov %vm17405_vm0  ;;  %vm6808_vm10 = vcmp.ge.s32.totalorder %v17453_v45, 3  ;;  %vm6828_vm12 = vcmp.lt.s32.totalorder %v17453_v45, 29  ;;  %v17458_v45 = vld [vmem:[#allocation130_spill] sm:$0xff] }
 0x55d   :  { %7693 = vmatpush1.bf16.msra.mxu0 %v7163_v19  ;;  %v7059_v4 = vpop.permute.xlu1 %7058  ;;  %vm17451_vm5 = vmmov %vm17405_vm0 }
 0x55e   :  { %7652 = vmatpush1.bf16.msra.mxu1 %v7161_v47  ;;  %v7145_v49 = vpop.permute.xlu0 %7144  ;;  %v7185_v55 = vsel %vm17449_vm2, %v7057_v60, %v7059_v4  ;;  %vm17452_vm8 = vmmov %vm17446_vm4 }
 0x55f   :  { %v7226_v7 = vsel %vm17444_vm11, %v7143_v32, %v7145_v49  ;;  %vm6848_vm9 = vmand %vm6808_vm10, %vm6828_vm12  ;;  %vm6813_vm10 = vcmp.ge.s32.totalorder %v17458_v45, 3  ;;  %vm6833_vm12 = vcmp.lt.s32.totalorder %v17458_v45, 29 }
 0x560   :  { %9183 = vmatmul.mubr.msk.bf16.vlgmr.msra.gmra.mxu0 %vm17446_vm4, %v15093_v1  ;;  %9184 = vmatprep.subr.msk.bf16.mxu1 %vm737_vm6, %v7226_v7  ;;  %v9146_v2 = vsel %vm6848_vm9, 1.0, %v16771_v37 }
 0x561   :  { %9181 = vmatmul.mubr.msk.bf16.vlgmr.msra.gmra.mxu1 %vm17445_vm15, %v15093_v1  ;;  %8296 = vmatprep.mubr.bf16.mxu0 %v15111_v59  ;;  %v7017_v11 = vpop.permute.xlu1 %7016 }
 0x562   :  { %7728 = vmatpush1.bf16.msra.mxu1 %v7345_v25  ;;  %7751 = vmatprep.mubr.bf16.mxu1 %v15111_v59  ;;  %v7103_v21 = vpop.permute.xlu0 %7102  ;;  %v7165_v16 = vsel %vm17451_vm5, %v7015_v62, %v7017_v11  ;;  %v17454_v62 = vld [vmem:[#allocation67_spill] sm:$0xff] }
 0x563   :  { %v7206_v18 = vsel %vm17447_vm14, %v7101_v50, %v7103_v21  ;;  %vm6809_vm13 = vcmp.ge.s32.totalorder %v17454_v62, 3  ;;  %vm6829_vm3 = vcmp.lt.s32.totalorder %v17454_v62, 29 }
 0x564   :  { %7729 = vmatprep.subr.bf16.mxu1 %v7206_v18  ;;  %vm6849_vm11 = vmand %vm6809_vm13, %vm6829_vm3 }
 0x565   :  { %v9147_v50 = vsel %vm6849_vm11, 1.0, %v16771_v37  ;;  %vm6853_vm13 = vmand %vm6813_vm10, %vm6833_vm12 }
 0x566   :  { %7730 = vmatpush1.bf16.msra.mxu1 %v7205_v9  ;;  %v7061_v40 = vpop.permute.xlu0 %7060 }
 0x567   :  { %v7186_v24 = vsel %vm17448_vm7, %v7059_v4, %v7061_v40  ;;  %v15348_v5 = vpop.f32.mrf.mxu0 }
 0x568   :  { %7731 = vmatprep.subr.bf16.mxu1 %v7186_v24 }
 0x569   :  { %v15351_v44 = vpop.f32.mrf.mxu0 }
 0x56a   :  { %7732 = vmatpush1.bf16.msra.mxu1 %v7185_v55  ;;  %v7019_v43 = vpop.permute.xlu0 %7018 }
 0x56b   :  { %v7166_v29 = vsel %vm17450_vm1, %v7017_v11, %v7019_v43  ;;  %v5895_v20 = vpop.f32.mrf.mxu0 }
 0x56c   :  { %7733 = vmatprep.subr.bf16.mxu1 %v7166_v29  ;;  %v17455_v20 = vld [vmem:[#allocation163_spill] sm:$0xff] }
 0x56d   :  { %v5896_v54 = vpop.f32.mrf.mxu0  ;;  %vm6810_vm15 = vcmp.ge.s32.totalorder %v17455_v20, 3  ;;  %vm6830_vm4 = vcmp.lt.s32.totalorder %v17455_v20, 29 }
 0x56e   :  { %7734 = vmatpush1.bf16.msra.mxu1 %v7165_v16  ;;  %vm6850_vm7 = vmand %vm6810_vm15, %vm6830_vm4 }
 0x56f   :  { %v15353_v41 = vpop.f32.mrf.mxu1  ;;  %v15387_v47 = vpop.permute.xlu1 %6912 }
 0x571   :  { %9185 = vmatmul.mubr.msk.bf16.vlgmr.msra.gmra.mxu1 %vm17452_vm8, %v15093_v1  ;;  %v15355_v34 = vpop.f32.mrf.mxu1 }
 0x572   :  { %8337 = vmatprep.mubr.bf16.mxu1 %v15111_v59 }
 0x573   :  { %v5936_v39 = vpop.f32.mrf.mxu1 }
 0x574   :  { %v17456_v39 = vld [vmem:[#allocation171_spill] sm:$0xff] }
 0x575   :  { %v5937_v31 = vpop.f32.mrf.mxu1  ;;  %vm6811_vm14 = vcmp.ge.s32.totalorder %v17456_v39, 3  ;;  %vm6831_vm0 = vcmp.lt.s32.totalorder %v17456_v39, 29 }
 0x576   :  { %vm6851_vm2 = vmand %vm6811_vm14, %vm6831_vm0 }
 0x584   :  { %v15357_v48 = vpop.f32.mrf.mxu0 }
 0x586   :  { %v15359_v27 = vpop.f32.mrf.mxu0 }
 0x588   :  { %v5977_v10 = vpop.f32.mrf.mxu0 }
 0x589   :  { %v17457_v10 = vld [vmem:[#allocation69_spill] sm:$0xff] }
 0x58a   :  { %v5978_v1 = vpop.f32.mrf.mxu0  ;;  %vm6812_vm1 = vcmp.ge.s32.totalorder %v17457_v10, 3  ;;  %vm6832_vm5 = vcmp.lt.s32.totalorder %v17457_v10, 29 }
 0x58b   :  { %v9148_v1 = vsel %vm6850_vm7, 1.0, %v16771_v37  ;;  %vm6852_vm8 = vmand %vm6812_vm1, %vm6832_vm5 }
 0x58c   :  { %v15361_v56 = vpop.f32.mrf.mxu1 }
 0x58e   :  { %v15363_v38 = vpop.f32.mrf.mxu1 }
 0x590   :  { %v6018_v59 = vpop.f32.mrf.mxu1 }
 0x592   :  { %v6019_v14 = vpop.f32.mrf.mxu1 }
 0x59b   :  { %v15365_v15 = vpop.f32.mrf.mxu0 }
 0x59d   :  { %v6057_v17 = vpop.f32.mrf.mxu0 }
 0x59e   :  { %v9149_v17 = vsel %vm6851_vm2, 1.0, %v16771_v37 }
 0x59f   :  { %v6058_v33 = vpop.f32.mrf.mxu0 }
 0x5a1   :  { %v6059_v53 = vpop.f32.mrf.mxu0 }
 0x5a6   :  { %v15367_v3 = vpop.f32.mrf.mxu1 }
 0x5a8   :  { %v15369_v8 = vpop.f32.mrf.mxu1 }
 0x5aa   :  { %v6099_v52 = vpop.f32.mrf.mxu1 }
 0x5ac   :  { %v6100_v42 = vpop.f32.mrf.mxu1 }
 0x5b2   :  { %v15371_v35 = vpop.f32.mrf.mxu0 }
 0x5b4   :  { %v15373_v46 = vpop.f32.mrf.mxu0 }
 0x5b6   :  { %v6140_v23 = vpop.f32.mrf.mxu0 }
 0x5b8   :  { %v6141_v57 = vpop.f32.mrf.mxu0 }
 0x5c8   :  { %v15375_v60 = vpop.f32.mrf.mxu0 }
 0x5c9   :  { %v15377_v26 = vpop.f32.mrf.mxu1 }
 0x5ca   :  { %v15379_v12 = vpop.f32.mrf.mxu0 }
 0x5cb   :  { %v15381_v61 = vpop.f32.mrf.mxu1 }
 0x5cc   :  { %v6222_v28 = vpop.f32.mrf.mxu0 }
 0x5cd   :  { %v6181_v36 = vpop.f32.mrf.mxu1 }
 0x5ce   :  { %v6223_v58 = vpop.f32.mrf.mxu0  ;;  %v9150_v36 = vsel %vm6852_vm8, 1.0, %v16771_v37 }
 0x5cf   :  { %v6182_v32 = vpop.f32.mrf.mxu1 }
 0x5d8   :  { %v7384_v19 = vpop.f32.mrf.mxu0 }
 0x5d9   :  { %v7385_v30 = vadd.f32 %v7384_v19, %v15387_v47 }
 0x5da   :  { %v7386_v49 = vpop.f32.mrf.mxu0 }
 0x5db   :  { %v7760_v7 = vmul.f32 %v9146_v2, %v7385_v30  ;;  %v7387_v25 = vadd.f32 %v7386_v49, %v15387_v47 }
 0x5dc   :  { %v7388_v21 = vpop.f32.mrf.mxu0 }
 0x5dd   :  { %v15393_v4 = vpack.c.bf16 %v7760_v7, %v7760_v7  ;;  %v7761_v18 = vmul.f32 %v9147_v50, %v7387_v25  ;;  %v9151_v25 = vsel %vm6853_vm13, 1.0, %v16771_v37  ;;  %v17459_v21 = vld [vmem:[#allocation177_spill] sm:$0xff] }
 0x5de   :  { %v7389_v9 = vpop.f32.mrf.mxu0  ;;  %vm6814_vm3 = vcmp.ge.s32.totalorder %v17459_v21, 3  ;;  %vm6834_vm9 = vcmp.lt.s32.totalorder %v17459_v21, 29 }
 0x5df   :  { %7883 = vrot.lane.b32.xlu1 %v15393_v4, %s9351_s1  ;;  %7944 = vrot.lane.b32.xlu0 %v15393_v4, %s9356_s0  ;;  %v15399_v40 = vpack.c.bf16 %v7761_v18, %v7761_v18  ;;  %vm6854_vm11 = vmand %vm6814_vm3, %vm6834_vm9 }
 0x5e0   :  { %v9152_v20 = vsel %vm6854_vm11, 1.0, %v16771_v37 }
 0x5e1   :  { %v15401_v24 = vpop.f32.mrf.mxu1 }
 0x5e3   :  { %v6261_v55 = vpop.f32.mrf.mxu1  ;;  %7946 = vrot.lane.b32.xlu1 %v15399_v40, %s9356_s0  ;;  %7821 = vrot.lane.b32.xlu0 %v15393_v4, %s9353_s4 }
 0x5e5   :  { %v6262_v11 = vpop.f32.mrf.mxu1 }
 0x5e6   :  { %v17460_v11 = vld [vmem:[#allocation180_spill] sm:$0xff] }
 0x5e7   :  { %v6263_v43 = vpop.f32.mrf.mxu1  ;;  %7885 = vrot.lane.b32.xlu1 %v15399_v40, %s9351_s1  ;;  %vm6815_vm15 = vcmp.ge.s32.totalorder %v17460_v11, 3  ;;  %vm6835_vm4 = vcmp.lt.s32.totalorder %v17460_v11, 29 }
 0x5e8   :  { %v7466_v29 = vpop.f32.mrf.mxu0  ;;  %vm6855_vm14 = vmand %vm6815_vm15, %vm6835_vm4 }
 0x5e9   :  { %v7467_v23 = vadd.f32 %v7466_v29, %v15387_v47 }
 0x5ea   :  { %v7468_v16 = vpop.f32.mrf.mxu0 }
 0x5eb   :  { %v7764_v62 = vmul.f32 %v9150_v36, %v7467_v23  ;;  %v7469_v49 = vadd.f32 %v7468_v16, %v15387_v47 }
 0x5ec   :  { %v7470_v54 = vpop.f32.mrf.mxu0 }
 0x5ed   :  { %v15435_v50 = vpack.c.bf16 %v7764_v62, %v7764_v62  ;;  %v7765_v9 = vmul.f32 %v9151_v25, %v7469_v49 }
 0x5ee   :  { %v7471_v31 = vpop.f32.mrf.mxu0 }
 0x5ef   :  { %v15451_v29 = vpack.c.bf16 %v7765_v9, %v7765_v9 }
 0x5f1   :  { %v7425_v59 = vpop.f32.mrf.mxu1 }
 0x5f2   :  { %v7426_v14 = vadd.f32 %v7425_v59, %v15387_v47  ;;  %v9153_v59 = vsel %vm6855_vm14, 1.0, %v16771_v37 }
 0x5f3   :  { %v7427_v33 = vpop.f32.mrf.mxu1 }
 0x5f4   :  { %v7762_v53 = vmul.f32 %v9148_v1, %v7426_v14  ;;  %v7428_v52 = vadd.f32 %v7427_v33, %v15387_v47 }
 0x5f5   :  { %v7429_v42 = vpop.f32.mrf.mxu1 }
 0x5f6   :  { %v15420_v57 = vpack.c.bf16 %v7762_v53, %v7762_v53  ;;  %v7763_v28 = vmul.f32 %v9149_v17, %v7428_v52  ;;  %v17461_v17 = vld [vmem:[#allocation24_spill] sm:$0xff]  ;;  %v17462_v42 = vld [vmem:[#allocation133_spill] sm:$0xff] }
 0x5f7   :  { %v7430_v58 = vpop.f32.mrf.mxu1  ;;  %vm6816_vm0 = vcmp.ge.s32.totalorder %v17461_v17, 3  ;;  %vm6836_vm7 = vcmp.lt.s32.totalorder %v17461_v17, 29  ;;  %vm6817_vm1 = vcmp.ge.s32.totalorder %v17462_v42, 3  ;;  %vm6837_vm5 = vcmp.lt.s32.totalorder %v17462_v42, 29 }
 0x5f8   :  { %v7548_v32 = vpop.f32.mrf.mxu0  ;;  %7825 = vrot.lane.b32.xlu1 %v15420_v57, %s9353_s4  ;;  %7948 = vrot.lane.b32.xlu0 %v15420_v57, %s9356_s0  ;;  %v15429_v2 = vpack.c.bf16 %v7763_v28, %v7763_v28  ;;  %vm6856_vm2 = vmand %vm6816_vm0, %vm6836_vm7 }
 0x5f9   :  { %v7549_v28 = vadd.f32 %v7548_v32, %v15387_v47  ;;  %v9154_v58 = vsel %vm6856_vm2, 1.0, %v16771_v37  ;;  %vm6857_vm8 = vmand %vm6817_vm1, %vm6837_vm5  ;;  %v17463_v32 = vld [vmem:[#allocation121_spill] sm:$0xff]  ;;  %vm6822_vm1 = vcmp.ge.s32.totalorder %v14493_v22, 3  ;;  %vm6842_vm5 = vcmp.lt.s32.totalorder %v14493_v22, 29 }
 0x5fa   :  { %v7550_v19 = vpop.f32.mrf.mxu0  ;;  %vm6818_vm10 = vcmp.ge.s32.totalorder %v17463_v32, 3  ;;  %vm6838_vm12 = vcmp.lt.s32.totalorder %v17463_v32, 29 }
 0x5fb   :  { %v7551_v49 = vadd.f32 %v7550_v19, %v15387_v47  ;;  %vm6858_vm13 = vmand %vm6818_vm10, %vm6838_vm12  ;;  %v17464_v19 = vld [vmem:[#allocation122_spill] sm:$0xff]  ;;  %vm6823_vm10 = vcmp.ge.s32.totalorder %v14559_v0, 3  ;;  %vm6843_vm12 = vcmp.lt.s32.totalorder %v14559_v0, 29 }
 0x5fc   :  { %7827 = vrot.lane.b32.xlu1 %v15429_v2, %s9353_s4  ;;  %7887 = vrot.lane.b32.xlu0 %v15420_v57, %s9351_s1  ;;  %v7552_v30 = vpop.f32.mrf.mxu0  ;;  %vm6819_vm3 = vcmp.ge.s32.totalorder %v17464_v19, 3  ;;  %vm6839_vm9 = vcmp.lt.s32.totalorder %v17464_v19, 29  ;;  %v9156_v11 = vsel %vm6858_vm13, 1.0, %v16771_v37  ;;  %vm6863_vm13 = vmand %vm6823_vm10, %vm6843_vm12  ;;  %vm17467_vm10 = vcmask 261120  }
 0x5fd   :  { %v7768_v30 = vmul.f32 %v9154_v58, %v7549_v28  ;;  %vm6859_vm11 = vmand %vm6819_vm3, %vm6839_vm9  ;;  %v17466_v58 = vld [vmem:[#allocation27_spill] sm:$0xff]  ;;  %v9161_v0 = vsel %vm6863_vm13, 1.0, %v16771_v37  ;;  %vm6824_vm3 = vcmp.ge.s32.totalorder %v17240_v13, 3  ;;  %vm6844_vm9 = vcmp.lt.s32.totalorder %v17240_v13, 29 }
 0x5fe   :  { %v7553_v7 = vpop.f32.mrf.mxu0  ;;  %vm6821_vm0 = vcmp.ge.s32.totalorder %v17466_v58, 3  ;;  %vm6841_vm7 = vcmp.lt.s32.totalorder %v17466_v58, 29  ;;  %vm17468_vm12 = vmmov %vm17467_vm10  ;;  %vm17469_vm13 = vcmask 523264  }
 0x5ff   :  { %v9155_v7 = vsel %vm6857_vm8, 1.0, %v16771_v37  ;;  %v15495_v21 = vpack.c.bf16 %v7768_v30, %v7768_v30  ;;  %vm6861_vm2 = vmand %vm6821_vm0, %vm6841_vm7  ;;  %vm6826_vm0 = vcmp.ge.s32.totalorder %v14889_v63, 3  ;;  %vm6846_vm7 = vcmp.lt.s32.totalorder %v14889_v63, 29 }
 0x600   :  { %7952 = vrot.lane.b32.xlu1 %v15435_v50, %s9356_s0  ;;  %7823 = vrot.lane.b32.xlu0 %v15399_v40, %s9353_s4  ;;  %vm6862_vm8 = vmand %vm6822_vm1, %vm6842_vm5  ;;  %vm6827_vm1 = vcmp.ge.s32.totalorder %v14931_v51, 3  ;;  %vm6847_vm5 = vcmp.lt.s32.totalorder %v14931_v51, 29 }
 0x601   :  { %v7507_v18 = vpop.f32.mrf.mxu1 }
 0x602   :  { %v7508_v16 = vadd.f32 %v7507_v18, %v15387_v47  ;;  %v7769_v18 = vmul.f32 %v9155_v7, %v7551_v49 }
 0x603   :  { %v7509_v55 = vpop.f32.mrf.mxu1 }
 0x604   :  { %7891 = vrot.lane.b32.xlu1 %v15435_v50, %s9351_s1  ;;  %7950 = vrot.lane.b32.xlu0 %v15429_v2, %s9356_s0  ;;  %v7766_v31 = vmul.f32 %v9152_v20, %v7508_v16  ;;  %v7510_v10 = vadd.f32 %v7509_v55, %v15387_v47  ;;  %v15503_v9 = vpack.c.bf16 %v7769_v18, %v7769_v18 }
 0x605   :  { %v7511_v43 = vpop.f32.mrf.mxu1 }
 0x606   :  { %v15471_v33 = vpack.c.bf16 %v7766_v31, %v7766_v31  ;;  %v7767_v53 = vmul.f32 %v9153_v59, %v7510_v10  ;;  %v9157_v31 = vsel %vm6859_vm11, 1.0, %v16771_v37  ;;  %vm6864_vm11 = vmand %vm6824_vm3, %vm6844_vm9  ;;  %vm17471_vm9 = vcmask 785408  }
 0x607   :  { %v7512_v54 = vpop.f32.mrf.mxu1  ;;  %v9162_v13 = vsel %vm6864_vm11, 1.0, %v16771_v37  ;;  %vm17470_vm3 = vmmov %vm17469_vm13 }
 0x608   :  { %v15455_v39 = vpop.f32.mrf.mxu0  ;;  %7954 = vrot.lane.b32.xlu1 %v15451_v29, %s9356_s0  ;;  %7889 = vrot.lane.b32.xlu0 %v15429_v2, %s9351_s1  ;;  %v15480_v36 = vpack.c.bf16 %v7767_v53, %v7767_v53  ;;  %vm17472_vm11 = vmmov %vm17471_vm9 }
 0x60a   :  { %v15462_v1 = vpop.f32.mrf.mxu0 }
 0x60b   :  { %v7633_v7 = vadd.f32 %v15462_v1, %v15387_v47 }
 0x60c   :  { %7893 = vrot.lane.b32.xlu1 %v15451_v29, %s9351_s1  ;;  %7829 = vrot.lane.b32.xlu0 %v15435_v50, %s9353_s4  ;;  %v7634_v14 = vpop.f32.mrf.mxu0 }
 0x60d   :  { %v17465_v14 = vld [vmem:[#allocation26_spill] sm:$0xff] }
 0x60e   :  { %v7635_v52 = vpop.f32.mrf.mxu0  ;;  %vm6820_vm15 = vcmp.ge.s32.totalorder %v17465_v14, 3  ;;  %vm6840_vm4 = vcmp.lt.s32.totalorder %v17465_v14, 29 }
 0x60f   :  { %vm6860_vm14 = vmand %vm6820_vm15, %vm6840_vm4  ;;  %vm6825_vm15 = vcmp.ge.s32.totalorder %v17295_v6, 3  ;;  %vm6845_vm4 = vcmp.lt.s32.totalorder %v17295_v6, 29 }
 0x610   :  { %7831 = vrot.lane.b32.xlu1 %v15451_v29, %s9353_s4  ;;  %7956 = vrot.lane.b32.xlu0 %v15471_v33, %s9356_s0  ;;  %v9158_v30 = vsel %vm6860_vm14, 1.0, %v16771_v37  ;;  %vm6865_vm14 = vmand %vm6825_vm15, %vm6845_vm4 }
 0x611   :  { %v7589_v23 = vpop.f32.mrf.mxu1  ;;  %v9163_v6 = vsel %vm6865_vm14, 1.0, %v16771_v37  ;;  %vm17473_vm15 = vmmov %vm17467_vm10 }
 0x612   :  { %v7590_v55 = vadd.f32 %v7589_v23, %v15387_v47  ;;  %vm17474_vm4 = vmmov %vm17467_vm10 }
 0x613   :  { %v7591_v45 = vpop.f32.mrf.mxu1  ;;  %vm17475_vm14 = vmmov %vm17474_vm4 }
 0x614   :  { %7958 = vrot.lane.b32.xlu1 %v15480_v36, %s9356_s0  ;;  %7895 = vrot.lane.b32.xlu0 %v15471_v33, %s9351_s1  ;;  %v7770_v16 = vmul.f32 %v9156_v11, %v7590_v55  ;;  %v7592_v20 = vadd.f32 %v7591_v45, %v15387_v47  ;;  %v7631_v45 = vadd.f32 %v15455_v39, %v15387_v47  ;;  %v9160_v11 = vsel %vm6862_vm8, 1.0, %v16771_v37  ;;  %vm6867_vm8 = vmand %vm6827_vm1, %vm6847_vm5 }
 0x615   :  { %v7593_v62 = vpop.f32.mrf.mxu1 }
 0x616   :  { %v15523_v53 = vpack.c.bf16 %v7770_v16, %v7770_v16  ;;  %v7771_v52 = vmul.f32 %v9157_v31, %v7592_v20  ;;  %v7772_v49 = vmul.f32 %v9158_v30, %v7631_v45  ;;  %v9165_v30 = vsel %vm6867_vm8, 1.0, %v16771_v37 }
 0x617   :  { %v7594_v25 = vpop.f32.mrf.mxu1 }
 0x618   :  { %7897 = vrot.lane.b32.xlu1 %v15480_v36, %s9351_s1  ;;  %7833 = vrot.lane.b32.xlu0 %v15471_v33, %s9353_s4  ;;  %v15533_v62 = vpack.c.bf16 %v7771_v52, %v7771_v52  ;;  %v9159_v25 = vsel %vm6861_vm2, 1.0, %v16771_v37  ;;  %v15549_v39 = vpack.c.bf16 %v7772_v49, %v7772_v49  ;;  %vm6866_vm2 = vmand %vm6826_vm0, %vm6846_vm7 }
 0x619   :  { %v7773_v32 = vmul.f32 %v9159_v25, %v7633_v7  ;;  %v9164_v63 = vsel %vm6866_vm2, 1.0, %v16771_v37  ;;  %vm17476_vm0 = vmmov %vm17470_vm3 }
 0x61a   :  { %vm17477_vm7 = vmmov %vm17471_vm9 }
 0x61b   :  { %v15557_v1 = vpack.c.bf16 %v7773_v32, %v7773_v32  ;;  %v8215_v32 = vld [vmem:[%s16024_s18] sm:$0xff]  ;;  %vm17478_vm2 = vmmov %vm17476_vm0 }
 0x61c   :  { %7835 = vrot.lane.b32.xlu1 %v15480_v36, %s9353_s4  ;;  %7960 = vrot.lane.b32.xlu0 %v15495_v21, %s9356_s0  ;;  %vm17479_vm1 = vmmov %vm17476_vm0 }
 0x61d   :  { %vm17480_vm5 = vmmov %vm17477_vm7 }
 0x61e   :  { %vm17481_vm8 = vmmov %vm17480_vm5 }
 0x620   :  { %7962 = vrot.lane.b32.xlu1 %v15503_v9, %s9356_s0  ;;  %7899 = vrot.lane.b32.xlu0 %v15495_v21, %s9351_s1  ;;  %v15512_v54 = vpop.f32.mrf.mxu0 }
 0x621   :  { %v7671_v43 = vpop.f32.mrf.mxu1 }
 0x622   :  { %v15515_v59 = vpop.f32.mrf.mxu0  ;;  %v7672_v22 = vadd.f32 %v7671_v43, %v15387_v47 }
 0x623   :  { %v7673_v10 = vpop.f32.mrf.mxu1 }
 0x624   :  { %7901 = vrot.lane.b32.xlu1 %v15503_v9, %s9351_s1  ;;  %7837 = vrot.lane.b32.xlu0 %v15495_v21, %s9353_s4  ;;  %v7716_v42 = vpop.f32.mrf.mxu0  ;;  %v7774_v20 = vmul.f32 %v9160_v11, %v7672_v22  ;;  %v7674_v31 = vadd.f32 %v7673_v10, %v15387_v47  ;;  %v7713_v10 = vadd.f32 %v15512_v54, %v15387_v47 }
 0x625   :  { %v7675_v17 = vpop.f32.mrf.mxu1  ;;  %v7715_v42 = vadd.f32 %v15515_v59, %v15387_v47 }
 0x626   :  { %v7717_v28 = vpop.f32.mrf.mxu0  ;;  %v15573_v43 = vpack.c.bf16 %v7774_v20, %v7774_v20  ;;  %v7775_v14 = vmul.f32 %v9161_v0, %v7674_v31  ;;  %v7776_v52 = vmul.f32 %v9162_v13, %v7713_v10 }
 0x627   :  { %v7676_v23 = vpop.f32.mrf.mxu1 }
 0x628   :  { %7839 = vrot.lane.b32.xlu1 %v15503_v9, %s9353_s4  ;;  %7964 = vrot.lane.b32.xlu0 %v15523_v53, %s9356_s0  ;;  %v15583_v17 = vpack.c.bf16 %v7775_v14, %v7775_v14  ;;  %v15599_v54 = vpack.c.bf16 %v7776_v52, %v7776_v52  ;;  %v7777_v23 = vmul.f32 %v9163_v6, %v7715_v42 }
 0x62a   :  { %v15607_v59 = vpack.c.bf16 %v7777_v23, %v7777_v23 }
 0x62c   :  { %7966 = vrot.lane.b32.xlu1 %v15533_v62, %s9356_s0  ;;  %7903 = vrot.lane.b32.xlu0 %v15523_v53, %s9351_s1 }
 0x630   :  { %7905 = vrot.lane.b32.xlu1 %v15533_v62, %s9351_s1  ;;  %7841 = vrot.lane.b32.xlu0 %v15523_v53, %s9353_s4 }
 0x631   :  { %v7753_v18 = vpop.f32.mrf.mxu1 }
 0x632   :  { %v7754_v28 = vadd.f32 %v7753_v18, %v15387_v47  ;;  %v5788_v18 = vld [vmem:[%s16025_s14] sm:$0xff] }
 0x633   :  { %v7755_v19 = vpop.f32.mrf.mxu1 }
 0x634   :  { %7843 = vrot.lane.b32.xlu1 %v15533_v62, %s9353_s4  ;;  %7968 = vrot.lane.b32.xlu0 %v15549_v39, %s9356_s0  ;;  %v7778_v58 = vmul.f32 %v9164_v63, %v7754_v28  ;;  %v7756_v45 = vadd.f32 %v7755_v19, %v15387_v47 }
 0x635   :  { %v7757_v55 = vpop.f32.mrf.mxu1 }
 0x636   :  { %v15621_v51 = vpack.c.bf16 %v7778_v58, %v7778_v58  ;;  %v7779_v49 = vmul.f32 %v9165_v30, %v7756_v45  ;;  %v8033_v30 = vrot.slane %v15399_v40, 4 }
 0x637   :  { %v7758_v16 = vpop.f32.mrf.mxu1 }
 0x638   :  { %7970 = vrot.lane.b32.xlu1 %v15557_v1, %s9356_s0  ;;  %7907 = vrot.lane.b32.xlu0 %v15549_v39, %s9351_s1  ;;  %v15627_v7 = vpack.c.bf16 %v7779_v49, %v7779_v49 }
 0x63c   :  { %7909 = vrot.lane.b32.xlu1 %v15557_v1, %s9351_s1  ;;  %7845 = vrot.lane.b32.xlu0 %v15549_v39, %s9353_s4 }
 0x640   :  { %7847 = vrot.lane.b32.xlu1 %v15557_v1, %s9353_s4  ;;  %7972 = vrot.lane.b32.xlu0 %v15573_v43, %s9356_s0 }
 0x644   :  { %7974 = vrot.lane.b32.xlu1 %v15583_v17, %s9356_s0  ;;  %7911 = vrot.lane.b32.xlu0 %v15573_v43, %s9351_s1 }
 0x648   :  { %7913 = vrot.lane.b32.xlu1 %v15583_v17, %s9351_s1  ;;  %7849 = vrot.lane.b32.xlu0 %v15573_v43, %s9353_s4 }
 0x64c   :  { %7851 = vrot.lane.b32.xlu1 %v15583_v17, %s9353_s4  ;;  %7976 = vrot.lane.b32.xlu0 %v15599_v54, %s9356_s0 }
 0x650   :  { %7978 = vrot.lane.b32.xlu1 %v15607_v59, %s9356_s0  ;;  %7915 = vrot.lane.b32.xlu0 %v15599_v54, %s9351_s1 }
 0x651   :  { %v7884_v47 = vpop.permute.xlu1 %7883  ;;  %v7945_v37 = vpop.permute.xlu0 %7944 }
 0x652   :  { %v8004_v49 = vsel %vm17473_vm15, 0, %v7945_v37  ;;  %vm17488_vm15 = vmmov %vm17480_vm5 }
 0x654   :  { %7917 = vrot.lane.b32.xlu1 %v15607_v59, %s9351_s1  ;;  %7853 = vrot.lane.b32.xlu0 %v15599_v54, %s9353_s4 }
 0x655   :  { %v7947_v25 = vpop.permute.xlu1 %7946  ;;  %v7822_v19 = vpop.permute.xlu0 %7821 }
 0x656   :  { %v7984_v55 = vsel %vm17467_vm10, %v7945_v37, %v7947_v25  ;;  %vm17482_vm10 = vmmov %vm17474_vm4 }
 0x657   :  { %v8224_v31 = vsel %vm737_vm6, %v7984_v55, 0 }
 0x658   :  { %7857 = vrot.lane.b32.xlu1 %v15621_v51, %s9353_s4  ;;  %7980 = vrot.lane.b32.xlu0 %v15621_v51, %s9356_s0 }
 0x659   :  { %v7886_v22 = vpop.permute.xlu1 %7885 }
 0x65a   :  { %v7923_v10 = vsel %vm17469_vm13, %v7884_v47, %v7886_v22  ;;  %vm17484_vm13 = vmmov %vm17474_vm4 }
 0x65b   :  { %v8013_v52 = vrot.slane %v7923_v10, 4  ;;  %v8032_v10 = vrot.slane %v15393_v4, 4 }
 0x65c   :  { %7982 = vrot.lane.b32.xlu1 %v15627_v7, %s9356_s0  ;;  %7919 = vrot.lane.b32.xlu0 %v15621_v51, %s9351_s1 }
 0x65d   :  { %v8134_v37 = vsel %vm737_vm6, %v8004_v49, %v8032_v10 }
 0x660   :  { %7859 = vrot.lane.b32.xlu1 %v15627_v7, %s9353_s4  ;;  %7855 = vrot.lane.b32.xlu0 %v15607_v59, %s9353_s4 }
 0x664   :  { %8218 = vperm.xlu1 %9283, %v8215_v32   ;;  %7921 = vrot.lane.b32.xlu0 %v15627_v7, %s9351_s1 }
 0x668   :  { %5791 = vperm.xlu0 %9282, %v5788_v18   ;;  %v8138_v18 = vsel %vm737_vm6, %v7984_v55, %v8033_v30  ;;  %v7882_v55 = vsel %vm17477_vm7, 0, %v7822_v19  ;;  %vm17491_vm7 = vmmov %vm17479_vm1 }
 0x66a   :  { %v7826_v11 = vpop.permute.xlu1 %7825  ;;  %v7949_v16 = vpop.permute.xlu0 %7948 }
 0x66b   :  { %v15647_v20 = vsel %vm17468_vm12, %v7947_v25, %v7949_v16  ;;  %vm17483_vm12 = vcmask 457728  }
 0x66c   :  { %9186 = vmatprep.subr.msk.bf16.mxu0 %vm737_vm6, %v15647_v20 }
 0x66d   :  { %8273 = vmatpush1.bf16.msra.mxu0 %v8224_v31 }
 0x66e   :  { %v7828_v0 = vpop.permute.xlu1 %7827  ;;  %v7888_v14 = vpop.permute.xlu0 %7887 }
 0x66f   :  { %v7924_v13 = vsel %vm17470_vm3, %v7886_v22, %v7888_v14  ;;  %vm17485_vm3 = vmmov %vm17476_vm0 }
 0x670   :  { %v8014_v42 = vrot.slane %v7924_v13, 4  ;;  %v7943_v13 = vsel %vm17476_vm0, 0, %v7884_v47 }
 0x672   :  { %v7953_v6 = vpop.permute.xlu1 %7952  ;;  %v7824_v23 = vpop.permute.xlu0 %7823 }
 0x673   :  { %v7861_v28 = vsel %vm17471_vm9, %v7822_v19, %v7824_v23  ;;  %v7862_v63 = vsel %vm17472_vm11, %v7824_v23, %v7826_v11  ;;  %v15681_v19 = vld [vmem:[%s16026_s17] sm:$0xf]  ;;  %vm17486_vm9 = vmmov %vm17476_vm0 }
 0x674   :  { %v15657_v58 = vsel %vm737_vm6, %v7862_v63, %v8014_v42  ;;  %v8059_v45 = vsel %vm737_vm6, %v7861_v28, %v8013_v52  ;;  %v8012_v42 = vrot.slane %v7943_v13, 4  ;;  %vm17487_vm11 = vmmov %vm17480_vm5 }
 0x675   :  { %8274 = vmatprep.subr.bf16.mxu0 %v15657_v58  ;;  %vm17490_vm0 = vmmov %vm17474_vm4 }
 0x676   :  { %v7892_v25 = vpop.permute.xlu1 %7891  ;;  %8275 = vmatpush1.bf16.msra.mxu0 %v8059_v45  ;;  %v7951_v32 = vpop.permute.xlu0 %7950  ;;  %v8055_v28 = vsel %vm737_vm6, %v7882_v55, %v8012_v42 }
 0x677   :  { %v7986_v22 = vsel %vm17474_vm4, %v7949_v16, %v7951_v32  ;;  %v15666_v31 = vsel %vm17475_vm14, %v7951_v32, %v7953_v6  ;;  %8276 = vmatprep.subr.bf16.mxu0 %v8138_v18  ;;  %v7863_v18 = vsel %vm17481_vm8, %v7826_v11, %v7828_v0  ;;  %vm17489_vm14 = vmmov %vm17483_vm12 }
 0x678   :  { %v8228_v40 = vsel %vm737_vm6, %v7986_v22, 0  ;;  %9188 = vmatprep.subr.msk.bf16.mxu1 %vm737_vm6, %v15666_v31  ;;  %vm17495_vm8 = vmmov %vm17490_vm0 }
 0x679   :  { %8314 = vmatpush1.bf16.msra.mxu1 %v8228_v40 }
 0x67a   :  { %v7955_v52 = vpop.permute.xlu1 %7954  ;;  %v7890_v16 = vpop.permute.xlu0 %7889  ;;  %8277 = vmatpush1.bf16.msra.mxu0 %v8134_v37 }
 0x67b   :  { %v7925_v23 = vsel %vm17478_vm2, %v7888_v14, %v7890_v16  ;;  %v7926_v4 = vsel %vm17479_vm1, %v7890_v16, %v7892_v25  ;;  %8278 = vmatprep.subr.bf16.mxu0 %v8059_v45  ;;  %v8035_v45 = vrot.slane %v15429_v2, 4  ;;  %v7988_v10 = vsel %vm17482_vm10, %v7953_v6, %v7955_v52  ;;  %v15692_v16 = vld [vmem:[#allocation2] sm:$0xff]  ;;  %vm17492_vm2 = vmmov %vm17479_vm1 }
 0x67c   :  { %v8015_v47 = vrot.slane %v7925_v23, 4  ;;  %v8016_v63 = vrot.slane %v7926_v4, 4  ;;  %v8034_v2 = vrot.slane %v15420_v57, 4  ;;  %vm17493_vm1 = vmmov %vm17480_vm5 }
 0x67d   :  { %v8146_v55 = vsel %vm737_vm6, %v7986_v22, %v8035_v45  ;;  %vm17496_vm10 = vmmov %vm17483_vm12 }
 0x67e   :  { %v7894_v30 = vpop.permute.xlu1 %7893  ;;  %v7830_v32 = vpop.permute.xlu0 %7829  ;;  %8279 = vmatpush1.bf16.msra.mxu0 %v8055_v28  ;;  %v8067_v13 = vsel %vm737_vm6, %v7863_v18, %v8015_v47  ;;  %v8142_v6 = vsel %vm737_vm6, %v15647_v20, %v8034_v2  ;;  %v8037_v18 = vrot.slane %v15451_v29, 4  ;;  %v8036_v29 = vrot.slane %v15435_v50, 4 }
 0x67f   :  { %v7864_v49 = vsel %vm17480_vm5, %v7828_v0, %v7830_v32  ;;  %v8232_v0 = vsel %vm737_vm6, %v7988_v10, 0  ;;  %vm17494_vm5 = vmmov %vm17493_vm1 }
 0x680   :  { %v8071_v14 = vsel %vm737_vm6, %v7864_v49, %v8016_v63 }
 0x681   :  { %9187 = vmatmul.mubr.msk.bf16.vlgmr.msra.gmra.mxu0 %vm17483_vm12, %v15681_v19  ;;  %8315 = vmatprep.subr.bf16.mxu1 %v8071_v14  ;;  %vm17497_vm12 = vmmov %vm17490_vm0 }
 0x682   :  { %v7832_v40 = vpop.permute.xlu1 %7831  ;;  %8316 = vmatpush1.bf16.msra.mxu1 %v8067_v13  ;;  %v7957_v37 = vpop.permute.xlu0 %7956  ;;  %8378 = vmatprep.mubr.bf16.mxu0 %v15692_v16 }
 0x683   :  { %v15696_v11 = vsel %vm17484_vm13, %v7955_v52, %v7957_v37  ;;  %8317 = vmatprep.subr.bf16.mxu1 %v8146_v55  ;;  %v7927_v52 = vsel %vm17486_vm9, %v7892_v25, %v7894_v30  ;;  %v7865_v4 = vsel %vm17487_vm11, %v7830_v32, %v7832_v40  ;;  %vm17498_vm13 = vmmov %vm17492_vm2 }
 0x684   :  { %9190 = vmatprep.subr.msk.bf16.mxu0 %vm737_vm6, %v15696_v11  ;;  %v8017_v63 = vrot.slane %v7927_v52, 4  ;;  %vm17500_vm9 = vmmov %vm17493_vm1 }
 0x685   :  { %8355 = vmatpush1.bf16.msra.mxu0 %v8232_v0  ;;  %vm17501_vm11 = vmmov %vm17493_vm1 }
 0x686   :  { %v7959_v22 = vpop.permute.xlu1 %7958  ;;  %8318 = vmatpush1.bf16.msra.mxu1 %v8142_v6  ;;  %v7896_v42 = vpop.permute.xlu0 %7895  ;;  %v8075_v25 = vsel %vm737_vm6, %v7865_v4, %v8017_v63 }
 0x687   :  { %v7928_v23 = vsel %vm17485_vm3, %v7894_v30, %v7896_v42  ;;  %8319 = vmatprep.subr.bf16.mxu1 %v8067_v13  ;;  %v7990_v45 = vsel %vm17474_vm4, %v7957_v37, %v7959_v22  ;;  %v8150_v37 = vsel %vm737_vm6, %v15666_v31, %v8036_v29  ;;  %v8039_v31 = vrot.slane %v15480_v36, 4  ;;  %vm17499_vm3 = vmmov %vm17492_vm2 }
 0x688   :  { %v8018_v57 = vrot.slane %v7928_v23, 4  ;;  %v8038_v36 = vrot.slane %v15471_v33, 4  ;;  %vm17503_vm4 = vmmov %vm17496_vm10 }
 0x68a   :  { %v7898_v47 = vpop.permute.xlu1 %7897  ;;  %8320 = vmatpush1.bf16.msra.mxu1 %v15657_v58  ;;  %v7834_v28 = vpop.permute.xlu0 %7833  ;;  %v8154_v58 = vsel %vm737_vm6, %v7988_v10, %v8037_v18 }
 0x68b   :  { %v7866_v49 = vsel %vm17488_vm15, %v7832_v40, %v7834_v28  ;;  %v8236_v40 = vsel %vm737_vm6, %v7990_v45, 0  ;;  %v7929_v0 = vsel %vm17492_vm2, %v7896_v42, %v7898_v47  ;;  %vm17502_vm15 = vmmov %vm17490_vm0 }
 0x68c   :  { %v8079_v20 = vsel %vm737_vm6, %v7866_v49, %v8018_v57  ;;  %v8019_v52 = vrot.slane %v7929_v0, 4 }
 0x68d   :  { %9189 = vmatmul.mubr.msk.bf16.vlgmr.msra.gmra.mxu1 %vm17489_vm14, %v15681_v19  ;;  %8356 = vmatprep.subr.bf16.mxu0 %v8079_v20  ;;  %vm17504_vm14 = vmmov %vm17490_vm0 }
 0x68e   :  { %v7836_v30 = vpop.permute.xlu1 %7835  ;;  %v7961_v32 = vpop.permute.xlu0 %7960  ;;  %8357 = vmatpush1.bf16.msra.mxu0 %v8075_v25  ;;  %8419 = vmatprep.mubr.bf16.mxu1 %v15692_v16 }
 0x68f   :  { %v15718_v13 = vsel %vm17490_vm0, %v7959_v22, %v7961_v32  ;;  %8358 = vmatprep.subr.bf16.mxu0 %v8154_v58  ;;  %v7867_v6 = vsel %vm17493_vm1, %v7834_v28, %v7836_v30  ;;  %vm17505_vm0 = vmmov %vm17492_vm2 }
 0x690   :  { %9192 = vmatprep.subr.msk.bf16.mxu1 %vm737_vm6, %v15718_v13  ;;  %v8083_v42 = vsel %vm737_vm6, %v7867_v6, %v8019_v52  ;;  %vm17507_vm2 = vmmov %vm17493_vm1 }
 0x691   :  { %8396 = vmatpush1.bf16.msra.mxu1 %v8236_v40 }
 0x692   :  { %v7963_v55 = vpop.permute.xlu1 %7962  ;;  %v7900_v2 = vpop.permute.xlu0 %7899  ;;  %8359 = vmatpush1.bf16.msra.mxu0 %v8150_v37 }
 0x693   :  { %v7930_v10 = vsel %vm17491_vm7, %v7898_v47, %v7900_v2  ;;  %8360 = vmatprep.subr.bf16.mxu0 %v8075_v25  ;;  %v7992_v63 = vsel %vm17495_vm8, %v7961_v32, %v7963_v55  ;;  %v8158_v25 = vsel %vm737_vm6, %v15696_v11, %v8038_v36  ;;  %v8041_v11 = vrot.slane %v15503_v9, 4  ;;  %vm17506_vm7 = vmmov %vm17505_vm0 }
 0x694   :  { %v8020_v50 = vrot.slane %v7930_v10, 4  ;;  %v8240_v18 = vsel %vm737_vm6, %v7992_v63, 0  ;;  %v8040_v9 = vrot.slane %v15495_v21, 4 }
 0x696   :  { %v7902_v22 = vpop.permute.xlu1 %7901  ;;  %v7838_v23 = vpop.permute.xlu0 %7837  ;;  %8361 = vmatpush1.bf16.msra.mxu0 %v8071_v14  ;;  %v8162_v14 = vsel %vm737_vm6, %v7990_v45, %v8039_v31 }
 0x697   :  { %v7868_v4 = vsel %vm17494_vm5, %v7836_v30, %v7838_v23  ;;  %v7931_v58 = vsel %vm17499_vm3, %v7900_v2, %v7902_v22  ;;  %vm17508_vm5 = vmmov %vm17495_vm8 }
 0x698   :  { %v8087_v57 = vsel %vm737_vm6, %v7868_v4, %v8020_v50  ;;  %v8166_v4 = vsel %vm737_vm6, %v15718_v13, %v8040_v9  ;;  %v8043_v13 = vrot.slane %v15533_v62, 4  ;;  %vm17509_vm8 = vmmov %vm17503_vm4  ;;  %v8042_v62 = vrot.slane %v15523_v53, 4 }
 0x699   :  { %9191 = vmatmul.mubr.msk.bf16.vlgmr.msra.gmra.mxu0 %vm17496_vm10, %v15681_v19  ;;  %8397 = vmatprep.subr.bf16.mxu1 %v8087_v57  ;;  %vm17510_vm10 = vmmov %vm17508_vm5 }
 0x69a   :  { %v7840_v47 = vpop.permute.xlu1 %7839  ;;  %8398 = vmatpush1.bf16.msra.mxu1 %v8083_v42  ;;  %v7965_v28 = vpop.permute.xlu0 %7964  ;;  %8460 = vmatprep.mubr.bf16.mxu0 %v15692_v16  ;;  %vm17513_vm3 = vmmov %vm17493_vm1 }
 0x69b   :  { %v15739_v49 = vsel %vm17497_vm12, %v7963_v55, %v7965_v28  ;;  %8399 = vmatprep.subr.bf16.mxu1 %v8162_v14  ;;  %v7869_v29 = vsel %vm17500_vm9, %v7838_v23, %v7840_v47  ;;  %v8021_v55 = vrot.slane %v7931_v58, 4  ;;  %vm17511_vm12 = vmmov %vm17505_vm0 }
 0x69c   :  { %9194 = vmatprep.subr.msk.bf16.mxu0 %vm737_vm6, %v15739_v49  ;;  %vm17514_vm9 = vmmov %vm17493_vm1 }
 0x69d   :  { %8437 = vmatpush1.bf16.msra.mxu0 %v8240_v18  ;;  %v8091_v2 = vsel %vm737_vm6, %v7869_v29, %v8021_v55 }
 0x69e   :  { %v7967_v30 = vpop.permute.xlu1 %7966  ;;  %8400 = vmatpush1.bf16.msra.mxu1 %v8158_v25  ;;  %v7904_v45 = vpop.permute.xlu0 %7903 }
 0x69f   :  { %v7932_v32 = vsel %vm17498_vm13, %v7902_v22, %v7904_v45  ;;  %8401 = vmatprep.subr.bf16.mxu1 %v8083_v42  ;;  %v7994_v6 = vsel %vm17502_vm15, %v7965_v28, %v7967_v30  ;;  %vm17512_vm13 = vmmov %vm17505_vm0 }
 0x6a0   :  { %v8022_v33 = vrot.slane %v7932_v32, 4  ;;  %v8244_v52 = vsel %vm737_vm6, %v7994_v6, 0  ;;  %vm17516_vm15 = vmmov %vm17503_vm4 }
 0x6a2   :  { %v7906_v40 = vpop.permute.xlu1 %7905  ;;  %8402 = vmatpush1.bf16.msra.mxu1 %v8079_v20  ;;  %v7842_v37 = vpop.permute.xlu0 %7841  ;;  %v8170_v20 = vsel %vm737_vm6, %v7992_v63, %v8041_v11 }
 0x6a3   :  { %v7870_v10 = vsel %vm17501_vm11, %v7840_v47, %v7842_v37  ;;  %v7933_v47 = vsel %vm17506_vm7, %v7904_v45, %v7906_v40  ;;  %vm17515_vm11 = vmmov %vm17508_vm5 }
 0x6a4   :  { %v8095_v0 = vsel %vm737_vm6, %v7870_v10, %v8022_v33  ;;  %v8023_v18 = vrot.slane %v7933_v47, 4  ;;  %vm17519_vm7 = vmmov %vm17493_vm1 }
 0x6a5   :  { %9193 = vmatmul.mubr.msk.bf16.vlgmr.msra.gmra.mxu1 %vm17503_vm4, %v15681_v19  ;;  %8438 = vmatprep.subr.bf16.mxu0 %v8095_v0  ;;  %vm17517_vm4 = vmmov %vm17508_vm5 }
 0x6a6   :  { %v7844_v50 = vpop.permute.xlu1 %7843  ;;  %v7969_v22 = vpop.permute.xlu0 %7968  ;;  %8439 = vmatpush1.bf16.msra.mxu0 %v8091_v2  ;;  %8500 = vmatprep.mubr.bf16.mxu1 %v15692_v16 }
 0x6a7   :  { %v15760_v23 = vsel %vm17504_vm14, %v7967_v30, %v7969_v22  ;;  %8440 = vmatprep.subr.bf16.mxu0 %v8170_v20  ;;  %v7871_v28 = vsel %vm17507_vm2, %v7842_v37, %v7844_v50  ;;  %v8174_v37 = vsel %vm737_vm6, %v15739_v49, %v8042_v62  ;;  %v8045_v49 = vrot.slane %v15557_v1, 4  ;;  %vm17518_vm14 = vmmov %vm17505_vm0 }
 0x6a8   :  { %9196 = vmatprep.subr.msk.bf16.mxu1 %vm737_vm6, %v15760_v23  ;;  %v8099_v45 = vsel %vm737_vm6, %v7871_v28, %v8023_v18  ;;  %v8044_v1 = vrot.slane %v15549_v39, 4  ;;  %vm17520_vm2 = vmmov %vm17493_vm1 }
 0x6a9   :  { %8477 = vmatpush1.bf16.msra.mxu1 %v8244_v52 }
 0x6aa   :  { %v7971_v31 = vpop.permute.xlu1 %7970  ;;  %v7908_v42 = vpop.permute.xlu0 %7907  ;;  %8441 = vmatpush1.bf16.msra.mxu0 %v8166_v4 }
 0x6ab   :  { %v7934_v63 = vsel %vm17505_vm0, %v7906_v40, %v7908_v42  ;;  %8442 = vmatprep.subr.bf16.mxu0 %v8091_v2  ;;  %v7996_v32 = vsel %vm17508_vm5, %v7969_v22, %v7971_v31  ;;  %vm17522_vm5 = vmmov %vm17509_vm8 }
 0x6ac   :  { %v8024_v21 = vrot.slane %v7934_v63, 4  ;;  %v8248_v40 = vsel %vm737_vm6, %v7996_v32, 0 }
 0x6ae   :  { %v7910_v14 = vpop.permute.xlu1 %7909  ;;  %v7846_v36 = vpop.permute.xlu0 %7845  ;;  %8443 = vmatpush1.bf16.msra.mxu0 %v8087_v57  ;;  %v8178_v57 = vsel %vm737_vm6, %v7994_v6, %v8043_v13 }
 0x6af   :  { %v7872_v25 = vsel %vm17493_vm1, %v7844_v50, %v7846_v36  ;;  %v7935_v6 = vsel %vm17512_vm13, %v7908_v42, %v7910_v14  ;;  %vm17521_vm1 = vmmov %vm17517_vm4 }
 0x6b0   :  { %v8103_v30 = vsel %vm737_vm6, %v7872_v25, %v8024_v21  ;;  %v8025_v20 = vrot.slane %v7935_v6, 4  ;;  %v8182_v21 = vsel %vm737_vm6, %v15760_v23, %v8044_v1  ;;  %v8047_v23 = vrot.slane %v15583_v17, 4  ;;  %vm17526_vm13 = vmmov %vm17521_vm1 }
 0x6b1   :  { %9195 = vmatmul.mubr.msk.bf16.vlgmr.msra.gmra.mxu0 %vm17509_vm8, %v15681_v19  ;;  %8478 = vmatprep.subr.bf16.mxu1 %v8103_v30  ;;  %vm17523_vm8 = vmmov %vm17521_vm1  ;;  %v8046_v17 = vrot.slane %v15573_v43, 4 }
 0x6b2   :  { %v7848_v58 = vpop.permute.xlu1 %7847  ;;  %8479 = vmatpush1.bf16.msra.mxu1 %v8099_v45  ;;  %v7973_v29 = vpop.permute.xlu0 %7972  ;;  %8541 = vmatprep.mubr.bf16.mxu0 %v15692_v16 }
 0x6b3   :  { %v15781_v33 = vsel %vm17510_vm10, %v7971_v31, %v7973_v29  ;;  %8480 = vmatprep.subr.bf16.mxu1 %v8178_v57  ;;  %v7873_v2 = vsel %vm17513_vm3, %v7846_v36, %v7848_v58  ;;  %vm17524_vm10 = vmmov %vm17505_vm0 }
 0x6b4   :  { %9198 = vmatprep.subr.msk.bf16.mxu0 %vm737_vm6, %v15781_v33  ;;  %v8107_v31 = vsel %vm737_vm6, %v7873_v2, %v8025_v20  ;;  %v8190_v6 = vsel %vm737_vm6, %v15781_v33, %v8046_v17  ;;  %vm17527_vm3 = vmmov %vm17521_vm1 }
 0x6b5   :  { %8518 = vmatpush1.bf16.msra.mxu0 %v8248_v40 }
 0x6b6   :  { %v7975_v55 = vpop.permute.xlu1 %7974  ;;  %8481 = vmatpush1.bf16.msra.mxu1 %v8174_v37  ;;  %v7912_v10 = vpop.permute.xlu0 %7911 }
 0x6b7   :  { %v7936_v11 = vsel %vm17511_vm12, %v7910_v14, %v7912_v10  ;;  %8482 = vmatprep.subr.bf16.mxu1 %v8099_v45  ;;  %v7998_v4 = vsel %vm17515_vm11, %v7973_v29, %v7975_v55  ;;  %vm17525_vm12 = vmmov %vm17505_vm0 }
 0x6b8   :  { %v8026_v53 = vrot.slane %v7936_v11, 4  ;;  %v8252_v28 = vsel %vm737_vm6, %v7998_v4, 0  ;;  %vm17529_vm11 = vmmov %vm17520_vm2 }
 0x6ba   :  { %v7914_v50 = vpop.permute.xlu1 %7913  ;;  %8483 = vmatpush1.bf16.msra.mxu1 %v8095_v0  ;;  %v7850_v22 = vpop.permute.xlu0 %7849  ;;  %v8186_v0 = vsel %vm737_vm6, %v7996_v32, %v8045_v49 }
 0x6bb   :  { %v7874_v9 = vsel %vm17514_vm9, %v7848_v58, %v7850_v22  ;;  %v7937_v25 = vsel %vm17505_vm0, %v7912_v10, %v7914_v50  ;;  %vm17528_vm9 = vmmov %vm17520_vm2 }
 0x6bc   :  { %v8111_v52 = vsel %vm737_vm6, %v7874_v9, %v8026_v53  ;;  %v8027_v58 = vrot.slane %v7937_v25, 4 }
 0x6bd   :  { %9197 = vmatmul.mubr.msk.bf16.vlgmr.msra.gmra.mxu1 %vm17516_vm15, %v15681_v19  ;;  %8519 = vmatprep.subr.bf16.mxu0 %v8111_v52  ;;  %vm17530_vm15 = vmmov %vm17522_vm5 }
 0x6be   :  { %v7852_v42 = vpop.permute.xlu1 %7851  ;;  %v7977_v63 = vpop.permute.xlu0 %7976  ;;  %8520 = vmatpush1.bf16.msra.mxu0 %v8107_v31  ;;  %8582 = vmatprep.mubr.bf16.mxu1 %v15692_v16 }
 0x6bf   :  { %v15802_v47 = vsel %vm17517_vm4, %v7975_v55, %v7977_v63  ;;  %8521 = vmatprep.subr.bf16.mxu0 %v8186_v0  ;;  %v7875_v13 = vsel %vm17519_vm7, %v7850_v22, %v7852_v42  ;;  %v8194_v55 = vsel %vm737_vm6, %v7998_v4, %v8047_v23  ;;  %v8049_v0 = vrot.slane %v15607_v59, 4  ;;  %vm17531_vm4 = vmmov %vm17505_vm0 }
 0x6c0   :  { %9200 = vmatprep.subr.msk.bf16.mxu1 %vm737_vm6, %v15802_v47  ;;  %v8115_v40 = vsel %vm737_vm6, %v7875_v13, %v8027_v58 }
 0x6c1   :  { %8559 = vmatpush1.bf16.msra.mxu1 %v8252_v28 }
 0x6c2   :  { %v7979_v14 = vpop.permute.xlu1 %7978  ;;  %v7916_v36 = vpop.permute.xlu0 %7915  ;;  %8522 = vmatpush1.bf16.msra.mxu0 %v8182_v21 }
 0x6c3   :  { %v7938_v18 = vsel %vm17518_vm14, %v7914_v50, %v7916_v36  ;;  %8523 = vmatprep.subr.bf16.mxu0 %v8107_v31  ;;  %v8000_v62 = vsel %vm17521_vm1, %v7977_v63, %v7979_v14  ;;  %vm17532_vm14 = vmmov %vm17505_vm0 }
 0x6c4   :  { %v8028_v39 = vrot.slane %v7938_v18, 4  ;;  %v8256_v11 = vsel %vm737_vm6, %v8000_v62, 0  ;;  %v8202_v21 = vsel %vm737_vm6, %v8000_v62, %v8049_v0  ;;  %v8048_v18 = vrot.slane %v15599_v54, 4  ;;  %vm17533_vm0 = vmmov %vm17520_vm2 }
 0x6c5   :  { %vm17534_vm7 = vmmov %vm17533_vm0 }
 0x6c6   :  { %v7918_v32 = vpop.permute.xlu1 %7917  ;;  %v7854_v45 = vpop.permute.xlu0 %7853  ;;  %8524 = vmatpush1.bf16.msra.mxu0 %v8103_v30 }
 0x6c7   :  { %v7876_v29 = vsel %vm17520_vm2, %v7852_v42, %v7854_v45  ;;  %v7939_v53 = vsel %vm17524_vm10, %v7916_v36, %v7918_v32  ;;  %vm17535_vm2 = vmmov %vm17522_vm5 }
 0x6c8   :  { %v15815_v57 = vsel %vm737_vm6, %v7876_v29, %v8028_v39  ;;  %v8029_v20 = vrot.slane %v7939_v53, 4  ;;  %v8051_v29 = vrot.slane %v15627_v7, 4  ;;  %vm17536_vm1 = vmmov %vm17535_vm2 }
 0x6c9   :  { %9199 = vmatmul.mubr.msk.bf16.vlgmr.msra.gmra.mxu0 %vm17522_vm5, %v15681_v19  ;;  %8560 = vmatprep.subr.bf16.mxu1 %v15815_v57  ;;  %vm17538_vm5 = vmmov %vm17527_vm3 }
 0x6ca   :  { %v7858_v37 = vpop.permute.xlu1 %7857  ;;  %8561 = vmatpush1.bf16.msra.mxu1 %v8115_v40  ;;  %v7981_v30 = vpop.permute.xlu0 %7980  ;;  %8623 = vmatprep.mubr.bf16.mxu0 %v15692_v16  ;;  %vm17540_vm10 = vmmov %vm17527_vm3 }
 0x6cb   :  { %v8001_v10 = vsel %vm17523_vm8, %v7979_v14, %v7981_v30  ;;  %8562 = vmatprep.subr.bf16.mxu1 %v8194_v55  ;;  %vm17539_vm8 = vmmov %vm17527_vm3 }
 0x6cc   :  { %9202 = vmatprep.subr.msk.bf16.mxu0 %vm737_vm6, %v8001_v10 }
 0x6cd   :  { %8600 = vmatpush1.bf16.msra.mxu0 %v8256_v11 }
 0x6ce   :  { %8563 = vmatpush1.bf16.msra.mxu1 %v8190_v6  ;;  %v7920_v2 = vpop.permute.xlu0 %7919  ;;  %v7983_v50 = vpop.permute.xlu1 %7982 }
 0x6cf   :  { %v7940_v22 = vsel %vm17525_vm12, %v7918_v32, %v7920_v2  ;;  %8564 = vmatprep.subr.bf16.mxu1 %v8115_v40  ;;  %v8002_v9 = vsel %vm17526_vm13, %v7981_v30, %v7983_v50  ;;  %v8010_v43 = vsel %vm17527_vm3, %v7983_v50, 0  ;;  %v8198_v32 = vsel %vm737_vm6, %v15802_v47, %v8048_v18  ;;  %vm17541_vm12 = vmmov %vm17527_vm3 }
 0x6d0   :  { %v8030_v49 = vrot.slane %v7940_v22, 4  ;;  %v8260_v1 = vsel %vm737_vm6, %v8002_v9, 0  ;;  %v8210_v54 = vsel %vm737_vm6, %v8002_v9, %v8051_v29  ;;  %vm17542_vm13 = vmmov %vm17527_vm3 }
 0x6d2   :  { %8565 = vmatpush1.bf16.msra.mxu1 %v8111_v52  ;;  %v7856_v4 = vpop.permute.xlu0 %7855  ;;  %v7860_v52 = vpop.permute.xlu1 %7859 }
 0x6d3   :  { %v7877_v31 = vsel %vm17528_vm9, %v7854_v45, %v7856_v4  ;;  %v7878_v33 = vsel %vm17529_vm11, %v7856_v4, %v7858_v37  ;;  %9204 = vmatprep.subr.msk.bf16.mxu1 %vm737_vm6, %v8010_v43  ;;  %v7879_v13 = vsel %vm17533_vm0, %v7858_v37, %v7860_v52  ;;  %v8006_v39 = vsel %vm17534_vm7, %v7860_v52, 0  ;;  %vm17543_vm9 = vmmov %vm17527_vm3 }
 0x6d4   :  { %v8127_v42 = vsel %vm737_vm6, %v7878_v33, %v8030_v49  ;;  %v8123_v63 = vsel %vm737_vm6, %v7877_v31, %v8029_v20  ;;  %vm17544_vm11 = vmmov %vm17527_vm3 }
 0x6d5   :  { %9201 = vmatmul.mubr.msk.bf16.vlgmr.msra.gmra.mxu1 %vm17530_vm15, %v15681_v19  ;;  %8601 = vmatprep.subr.bf16.mxu0 %v8127_v42  ;;  %vm17545_vm15 = vmmov %vm17527_vm3 }
 0x6d6   :  { %8641 = vmatpush1.bf16.msra.mxu1 %v8260_v1  ;;  %v7922_v28 = vpop.permute.xlu0 %7921  ;;  %8602 = vmatpush1.bf16.msra.mxu0 %v8123_v63  ;;  %vm17548_vm0 = vmmov %vm17527_vm3 }
 0x6d7   :  { %v7941_v14 = vsel %vm17531_vm4, %v7920_v2, %v7922_v28  ;;  %v8008_v36 = vsel %vm17532_vm14, %v7922_v28, 0  ;;  %8603 = vmatprep.subr.bf16.mxu0 %v8202_v21  ;;  %8664 = vmatprep.mubr.bf16.mxu1 %v15692_v16  ;;  %v8050_v16 = vrot.slane %v15621_v51, 4  ;;  %vm17546_vm4 = vmmov %vm17527_vm3 }
 0x6d8   :  { %v8031_v59 = vrot.slane %v7941_v14, 4  ;;  %v8053_v25 = vrot.slane %v8008_v36, 4  ;;  %vm17547_vm14 = vmmov %vm17527_vm3 }
 0x6d9   :  { %v8206_v23 = vsel %vm737_vm6, %v8001_v10, %v8050_v16  ;;  %vm17549_vm7 = vmmov %vm17548_vm0 }
 0x6da   :  { %8604 = vmatpush1.bf16.msra.mxu0 %v8198_v32  ;;  %v8213_v45 = vsel %vm737_vm6, %v8006_v39, %v8053_v25  ;;  %v8131_v58 = vsel %vm737_vm6, %v7879_v13, %v8031_v59  ;;  %vm17537_vm6 = vmmov %vm17527_vm3 }
 0x6db   :  { %8605 = vmatprep.subr.bf16.mxu0 %v8123_v63  ;;  %8642 = vmatprep.subr.bf16.mxu1 %v8213_v45 }
 0x6dc   :  { %8643 = vmatpush1.bf16.msra.mxu1 %v8131_v58 }
 0x6dd   :  { %8644 = vmatprep.subr.bf16.mxu1 %v8210_v54 }
 0x6de   :  { %8606 = vmatpush1.bf16.msra.mxu0 %v15815_v57 }
 0x6df   :  { %v15866_v47 = vpop.permute.xlu1 %8218 }
 0x6e0   :  { %8645 = vmatpush1.bf16.msra.mxu1 %v8206_v23 }
 0x6e1   :  { %9203 = vmatmul.mubr.msk.bf16.vlgmr.msra.gmra.mxu0 %vm17535_vm2, %v15681_v19  ;;  %8646 = vmatprep.subr.bf16.mxu1 %v8131_v58  ;;  %vm17550_vm2 = vmmov %vm17548_vm0 }
 0x6e3   :  { %v15864_v7 = vpop.permute.xlu0 %5791 }
 0x6e4   :  { %8647 = vmatpush1.bf16.msra.mxu1 %v8127_v42  ;;  %v5892_v51 = vadd.f32 %v15348_v5, %v15864_v7  ;;  %v5894_v30 = vadd.f32 %v15351_v44, %v15864_v7  ;;  %v5933_v5 = vadd.f32 %v15353_v41, %v15864_v7  ;;  %v5935_v44 = vadd.f32 %v15355_v34, %v15864_v7 }
 0x6e5   :  { %v5974_v41 = vadd.f32 %v15357_v48, %v15864_v7  ;;  %v5976_v34 = vadd.f32 %v15359_v27, %v15864_v7  ;;  %v6015_v48 = vadd.f32 %v15361_v56, %v15864_v7  ;;  %v6017_v27 = vadd.f32 %v15363_v38, %v15864_v7 }
 0x6e6   :  { %v6056_v56 = vadd.f32 %v15365_v15, %v15864_v7  ;;  %v6096_v29 = vadd.f32 %v15367_v3, %v15864_v7  ;;  %v6137_v3 = vadd.f32 %v15371_v35, %v15864_v7  ;;  %v6178_v35 = vadd.f32 %v15377_v26, %v15864_v7 }
 0x6e7   :  { %9205 = vmatmul.mubr.msk.bf16.vlgmr.msra.gmra.mxu1 %vm17536_vm1, %v15681_v19  ;;  %v6219_v26 = vadd.f32 %v15375_v60, %v15864_v7  ;;  %vm17551_vm1 = vmmov %vm17548_vm0 }
 0x741   :  { %v8298_v62 = vpop.f32.mrf.mxu0 }
 0x742   :  { %v8299_v57 = vadd.f32 %v8298_v62, %v15866_v47  ;;  %v6098_v62 = vadd.f32 %v15369_v8, %v15864_v7  ;;  %v6139_v8 = vadd.f32 %v15373_v46, %v15864_v7  ;;  %v6180_v46 = vadd.f32 %v15381_v61, %v15864_v7 }
 0x743   :  { %v8300_v40 = vpop.f32.mrf.mxu0  ;;  %v6221_v61 = vadd.f32 %v15379_v12, %v15864_v7 }
 0x744   :  { %v8672_v37 = vadd.f32 %v8299_v57, %v5892_v51  ;;  %v8301_v55 = vadd.f32 %v8300_v40, %v15866_v47 }
 0x745   :  { %v8302_v10 = vpop.f32.mrf.mxu0 }
 0x746   :  { %v8673_v17 = vadd.f32 %v8301_v55, %v5894_v30  ;;  %8699 = vrot.lane.b32.xlu0 %v8672_v37, %s9356_s0 }
 0x747   :  { %v8303_v19 = vpop.f32.mrf.mxu0 }
 0x748   :  { %8701 = vrot.lane.b32.xlu1 %v8673_v17, %s9356_s0 }
 0x74d   :  { %v8339_v11 = vpop.f32.mrf.mxu1 }
 0x74e   :  { %v8340_v6 = vadd.f32 %v8339_v11, %v15866_v47 }
 0x74f   :  { %v8341_v2 = vpop.f32.mrf.mxu1 }
 0x750   :  { %v8674_v53 = vadd.f32 %v8340_v6, %v5933_v5  ;;  %v8342_v50 = vadd.f32 %v8341_v2, %v15866_v47 }
 0x751   :  { %v8343_v22 = vpop.f32.mrf.mxu1 }
 0x752   :  { %v8675_v20 = vadd.f32 %v8342_v50, %v5935_v44  ;;  %8703 = vrot.lane.b32.xlu0 %v8674_v53, %s9356_s0 }
 0x753   :  { %v8344_v9 = vpop.f32.mrf.mxu1 }
 0x754   :  { %8705 = vrot.lane.b32.xlu1 %v8675_v20, %s9356_s0 }
 0x759   :  { %v8380_v43 = vpop.f32.mrf.mxu0 }
 0x75a   :  { %v8381_v49 = vadd.f32 %v8380_v43, %v15866_v47 }
 0x75b   :  { %v8382_v4 = vpop.f32.mrf.mxu0 }
 0x75c   :  { %v8676_v31 = vadd.f32 %v8381_v49, %v5974_v41  ;;  %v8383_v33 = vadd.f32 %v8382_v4, %v15866_v47 }
 0x75d   :  { %v8384_v42 = vpop.f32.mrf.mxu0 }
 0x75e   :  { %v8677_v63 = vadd.f32 %v8383_v33, %v5976_v34  ;;  %8707 = vrot.lane.b32.xlu0 %v8676_v31, %s9356_s0 }
 0x75f   :  { %v8385_v0 = vpop.f32.mrf.mxu0 }
 0x760   :  { %8709 = vrot.lane.b32.xlu1 %v8677_v63, %s9356_s0  ;;  %v6260_v0 = vadd.f32 %v15401_v24, %v15864_v7 }
 0x765   :  { %v8421_v1 = vpop.f32.mrf.mxu1 }
 0x766   :  { %v8422_v52 = vadd.f32 %v8421_v1, %v15866_v47 }
 0x767   :  { %v8423_v28 = vpop.f32.mrf.mxu1 }
 0x768   :  { %v8678_v21 = vadd.f32 %v8422_v52, %v6015_v48  ;;  %v8424_v14 = vadd.f32 %v8423_v28, %v15866_v47 }
 0x769   :  { %v8425_v36 = vpop.f32.mrf.mxu1 }
 0x76a   :  { %v8679_v18 = vadd.f32 %v8424_v14, %v6017_v27  ;;  %8711 = vrot.lane.b32.xlu0 %v8678_v21, %s9356_s0 }
 0x76b   :  { %v8426_v59 = vpop.f32.mrf.mxu1 }
 0x76c   :  { %8713 = vrot.lane.b32.xlu1 %v8679_v18, %s9356_s0 }
 0x771   :  { %v8462_v25 = vpop.f32.mrf.mxu0 }
 0x772   :  { %v8463_v13 = vadd.f32 %v8462_v25, %v15866_v47 }
 0x773   :  { %v8464_v39 = vpop.f32.mrf.mxu0 }
 0x774   :  { %v8680_v32 = vadd.f32 %v8463_v13, %v6056_v56 }
 0x775   :  { %v8465_v45 = vpop.f32.mrf.mxu0 }
 0x776   :  { %8715 = vrot.lane.b32.xlu0 %v8680_v32, %s9356_s0 }
 0x777   :  { %v8466_v38 = vpop.f32.mrf.mxu0 }
 0x77d   :  { %v8502_v58 = vpop.f32.mrf.mxu1 }
 0x77e   :  { %v8503_v54 = vadd.f32 %v8502_v58, %v15866_v47 }
 0x77f   :  { %v8504_v16 = vpop.f32.mrf.mxu1 }
 0x780   :  { %v8681_v23 = vadd.f32 %v8503_v54, %v6096_v29  ;;  %v8505_v15 = vadd.f32 %v8504_v16, %v15866_v47 }
 0x781   :  { %v8506_v51 = vpop.f32.mrf.mxu1 }
 0x782   :  { %v8682_v57 = vadd.f32 %v8505_v15, %v6098_v62  ;;  %8750 = vrot.lane.b32.xlu1 %v8681_v23, %s9356_s0 }
 0x783   :  { %v8507_v40 = vpop.f32.mrf.mxu1 }
 0x784   :  { %8752 = vrot.lane.b32.xlu0 %v8682_v57, %s9356_s0 }
 0x789   :  { %v8543_v37 = vpop.f32.mrf.mxu0 }
 0x78a   :  { %v8544_v30 = vadd.f32 %v8543_v37, %v15866_v47 }
 0x78b   :  { %v8545_v55 = vpop.f32.mrf.mxu0 }
 0x78c   :  { %v8683_v10 = vadd.f32 %v8544_v30, %v6137_v3  ;;  %v8546_v17 = vadd.f32 %v8545_v55, %v15866_v47 }
 0x78d   :  { %v8547_v19 = vpop.f32.mrf.mxu0 }
 0x78e   :  { %v8684_v11 = vadd.f32 %v8546_v17, %v6139_v8  ;;  %8754 = vrot.lane.b32.xlu1 %v8683_v10, %s9356_s0 }
 0x78f   :  { %v8548_v5 = vpop.f32.mrf.mxu0 }
 0x790   :  { %8756 = vrot.lane.b32.xlu0 %v8684_v11, %s9356_s0 }
 0x795   :  { %v8584_v6 = vpop.f32.mrf.mxu1 }
 0x796   :  { %v8585_v2 = vadd.f32 %v8584_v6, %v15866_v47 }
 0x797   :  { %v8586_v53 = vpop.f32.mrf.mxu1 }
 0x798   :  { %v8685_v44 = vadd.f32 %v8585_v2, %v6178_v35  ;;  %v8587_v50 = vadd.f32 %v8586_v53, %v15866_v47 }
 0x799   :  { %v8588_v22 = vpop.f32.mrf.mxu1 }
 0x79a   :  { %v8686_v20 = vadd.f32 %v8587_v50, %v6180_v46  ;;  %8758 = vrot.lane.b32.xlu1 %v8685_v44, %s9356_s0 }
 0x79b   :  { %v8589_v9 = vpop.f32.mrf.mxu1 }
 0x79c   :  { %8760 = vrot.lane.b32.xlu0 %v8686_v20, %s9356_s0 }
 0x7a1   :  { %v8625_v43 = vpop.f32.mrf.mxu0 }
 0x7a2   :  { %v8626_v41 = vadd.f32 %v8625_v43, %v15866_v47 }
 0x7a3   :  { %v8627_v49 = vpop.f32.mrf.mxu0 }
 0x7a4   :  { %v8687_v4 = vadd.f32 %v8626_v41, %v6219_v26  ;;  %v8628_v31 = vadd.f32 %v8627_v49, %v15866_v47 }
 0x7a5   :  { %v8629_v34 = vpop.f32.mrf.mxu0 }
 0x7a6   :  { %v8688_v33 = vadd.f32 %v8628_v31, %v6221_v61  ;;  %8762 = vrot.lane.b32.xlu1 %v8687_v4, %s9356_s0 }
 0x7a7   :  { %v8630_v42 = vpop.f32.mrf.mxu0  ;;  %v8666_v63 = vpop.f32.mrf.mxu1 }
 0x7a8   :  { %v8667_v60 = vadd.f32 %v8666_v63, %v15866_v47  ;;  %8764 = vrot.lane.b32.xlu0 %v8688_v33, %s9356_s0 }
 0x7a9   :  { %v8668_v1 = vpop.f32.mrf.mxu1 }
 0x7aa   :  { %v8689_v48 = vadd.f32 %v8667_v60, %v6260_v0 }
 0x7ab   :  { %v8669_v52 = vpop.f32.mrf.mxu1 }
 0x7ac   :  { %8766 = vrot.lane.b32.xlu1 %v8689_v48, %s9356_s0 }
 0x7ad   :  { %v8670_v12 = vpop.f32.mrf.mxu1 }
 0x7b8   :  { %v8700_v28 = vpop.permute.xlu0 %8699 }
 0x7ba   :  { %v8702_v21 = vpop.permute.xlu1 %8701 }
 0x7bb   :  { %v8717_v27 = vsel %vm17537_vm6, %v8700_v28, %v8702_v21 }
 0x7bc   :  { %8733 = vst [vmem:[%s16027_s20] sm:$0xff] %v8717_v27 }
 0x7c4   :  { %v8704_v14 = vpop.permute.xlu0 %8703 }
 0x7c5   :  { %v8718_v24 = vsel %vm17538_vm5, %v8702_v21, %v8704_v14 }
 0x7c6   :  { %8734 = vst [vmem:[%s16027_s20 + $0x8] sm:$0xff] %v8718_v24  ;;  %v8706_v7 = vpop.permute.xlu1 %8705 }
 0x7c7   :  { %v8719_v47 = vsel %vm17539_vm8, %v8704_v14, %v8706_v7 }
 0x7c8   :  { %8735 = vst [vmem:[%s16027_s20 + $0x10] sm:$0xff] %v8719_v47 }
 0x7d0   :  { %v8708_v36 = vpop.permute.xlu0 %8707 }
 0x7d1   :  { %v8720_v18 = vsel %vm17540_vm10, %v8706_v7, %v8708_v36 }
 0x7d2   :  { %8736 = vst [vmem:[%s16027_s20 + $0x18] sm:$0xff] %v8720_v18  ;;  %v8710_v59 = vpop.permute.xlu1 %8709 }
 0x7d3   :  { %v8721_v25 = vsel %vm17541_vm12, %v8708_v36, %v8710_v59 }
 0x7d4   :  { %8737 = vst [vmem:[%s16027_s20 + $0x20] sm:$0xff] %v8721_v25 }
 0x7dc   :  { %v8712_v56 = vpop.permute.xlu0 %8711 }
 0x7dd   :  { %v8722_v13 = vsel %vm17542_vm13, %v8710_v59, %v8712_v56 }
 0x7de   :  { %8738 = vst [vmem:[%s16027_s20 + $0x28] sm:$0xff] %v8722_v13  ;;  %v8714_v39 = vpop.permute.xlu1 %8713 }
 0x7df   :  { %v8723_v32 = vsel %vm17527_vm3, %v8712_v56, %v8714_v39 }
 0x7e0   :  { %8739 = vst [vmem:[%s16027_s20 + $0x30] sm:$0xff] %v8723_v32 }
 0x7e8   :  { %v8716_v45 = vpop.permute.xlu0 %8715 }
 0x7e9   :  { %v8724_v38 = vsel %vm17543_vm9, %v8714_v39, %v8716_v45 }
 0x7ea   :  { %8740 = vst [vmem:[%s16027_s20 + $0x38] sm:$0xff] %v8724_v38 }
 0x7f4   :  { %v8751_v58 = vpop.permute.xlu1 %8750 }
 0x7f6   :  { %v8753_v29 = vpop.permute.xlu0 %8752 }
 0x7f7   :  { %v8768_v54 = vsel %vm17544_vm11, %v8751_v58, %v8753_v29 }
 0x7f8   :  { %9206 = vst [vmem:[%s16027_s20 + $0x40] sm:$0xff] %v8768_v54 }
 0x800   :  { %v8755_v16 = vpop.permute.xlu1 %8754 }
 0x801   :  { %v8769_v23 = vsel %vm17545_vm15, %v8753_v29, %v8755_v16 }
 0x802   :  { %9207 = vst [vmem:[%s16027_s20 + $0x48] sm:$0xff] %v8769_v23  ;;  %v8757_v62 = vpop.permute.xlu0 %8756 }
 0x803   :  { %v8770_v15 = vsel %vm17546_vm4, %v8755_v16, %v8757_v62 }
 0x804   :  { %9208 = vst [vmem:[%s16027_s20 + $0x50] sm:$0xff] %v8770_v15 }
 0x80c   :  { %v8759_v51 = vpop.permute.xlu1 %8758 }
 0x80d   :  { %v8771_v57 = vsel %vm17547_vm14, %v8757_v62, %v8759_v51 }
 0x80e   :  { %9209 = vst [vmem:[%s16027_s20 + $0x58] sm:$0xff] %v8771_v57  ;;  %v8761_v40 = vpop.permute.xlu0 %8760 }
 0x80f   :  { %v8772_v37 = vsel %vm17548_vm0, %v8759_v51, %v8761_v40 }
 0x810   :  { %9210 = vst [vmem:[%s16027_s20 + $0x60] sm:$0xff] %v8772_v37 }
 0x818   :  { %v8763_v3 = vpop.permute.xlu1 %8762 }
 0x819   :  { %v8773_v30 = vsel %vm17549_vm7, %v8761_v40, %v8763_v3 }
 0x81a   :  { %9211 = vst [vmem:[%s16027_s20 + $0x68] sm:$0xff] %v8773_v30  ;;  %v8765_v55 = vpop.permute.xlu0 %8764 }
 0x81b   :  { %v8774_v10 = vsel %vm17550_vm2, %v8763_v3, %v8765_v55 }
 0x81c   :  { %9212 = vst [vmem:[%s16027_s20 + $0x70] sm:$0xff] %v8774_v10 }
 0x81e   :  { %v8767_v8 = vpop.permute.xlu1 %8766 }
 0x81f   :  { %v8775_v17 = vsel %vm17551_vm1, %v8765_v55, %v8767_v8 }
 0x820   :  { %9213 = vst [vmem:[%s16027_s20 + $0x78] sm:$0xff] %v8775_v17 }

</bundles_post_ra>
